<compile_context>
chip_gen: v7x
topology: tpu7x:2x2x1
jax: 0.10.0
libtpu: 0.0.40
codegen_flags: <defaults>
</compile_context>

<pallas_src>
import functools

import jax
import jax.numpy as jnp
import numpy as np
from jax.experimental import pallas as pl
from jax.experimental.pallas import tpu as pltpu

EPS = 1e-5


# ----------------------------- fused Pallas kernel ---------------------------

def make_fused_kernel(B, L1):
    """Whole forward pass in one kernel body. Activations live in (B*L, C) layout:
    channels on the 128-lane axis, batch*length stacked on sublanes."""
    L2, L3, L4 = L1 // 2, L1 // 4, L1 // 8            # 84, 42, 21 for L1=168
    BL2, BL3 = B * L2, B * L3

    def shifted(h, L):
        """h[r-1] and h[r+1] along the row axis, zeroed at each batch row's l==0 /
        l==L-1 boundary (implements Conv1d padding=1 without jnp.pad, and kills
        cross-batch bleed)."""
        n, c = h.shape
        z = jnp.zeros((1, c), h.dtype)
        prev = jnp.concatenate([z, h[: n - 1, :]], axis=0)
        nxt = jnp.concatenate([h[1:, :], z], axis=0)
        lidx = jax.lax.broadcasted_iota(jnp.int32, (n, 1), 0) % L
        prev = jnp.where(lidx == 0, 0.0, prev)
        nxt = jnp.where(lidx == L - 1, 0.0, nxt)
        return prev, nxt

    def kernel(x_ref, w1_ref, s1_ref, c1_ref,
               w2_ref, s2_ref, c2_ref,
               w3_ref, s3_ref, c3_ref,
               wf1_ref, sf1_ref, cf1_ref,
               wf2_ref, sf2_ref, cf2_ref,
               wf3_ref, cf3_ref,
               out_ref, a1_ref, a2_ref, a3_ref):
        # ---- conv1 (Cin=1): 3 VPU broadcast-FMAs, no MXU --------------------
        x = x_ref[...]                                        # (B*168, 1) f32
        xp, xn = shifted(x, L1)
        w1 = w1_ref[...]                                      # (3, 32) f32
        y = xp * w1[0:1, :] + x * w1[1:2, :] + xn * w1[2:3, :]
        y = jnp.maximum(y * s1_ref[...] + c1_ref[...], 0.0)
        a1_ref[...] = y                                       # (B*168, 32)
        # MaxPool1d(2,2): two strided VMEM reads, no reshape.
        h = jnp.maximum(a1_ref[pl.ds(0, BL2, stride=2), :],
                        a1_ref[pl.ds(1, BL2, stride=2), :])   # (B*84, 32)

        # ---- conv2: im2col -> single K=96 MXU matmul ------------------------
        hp, hn = shifted(h, L2)
        win = jnp.concatenate([hp, h, hn], axis=-1).astype(jnp.bfloat16)   # (B*84, 96)
        y = jnp.dot(win, w2_ref[...], preferred_element_type=jnp.float32)
        y = jnp.maximum(y * s2_ref[...] + c2_ref[...], 0.0)
        a2_ref[...] = y                                       # (B*84, 64)
        h = jnp.maximum(a2_ref[pl.ds(0, BL3, stride=2), :],
                        a2_ref[pl.ds(1, BL3, stride=2), :])   # (B*42, 64)

        # ---- conv3: im2col -> single K=192 MXU matmul -----------------------
        hp, hn = shifted(h, L3)
        win = jnp.concatenate([hp, h, hn], axis=-1).astype(jnp.bfloat16)   # (B*42, 192)
        y = jnp.dot(win, w3_ref[...], preferred_element_type=jnp.float32)
        y = jnp.maximum(y * s3_ref[...] + c3_ref[...], 0.0)
        a3_ref[...] = y                                       # (B*42, 128), pre-pool

        # ---- pool3 + flatten + fc1, fused: for each spatial position l, pool
        # the (B, 128) rows and accumulate against the matching (128, 256) slab
        # of the position-major fc1 weight. Avoids any in-kernel flatten reshape.
        acc = jnp.zeros((B, 256), jnp.float32)
        for l in range(L4):                                   # 21 unrolled steps
            r0 = a3_ref[pl.ds(2 * l, B, stride=L3), :]        # rows b*L3 + 2l
            r1 = a3_ref[pl.ds(2 * l + 1, B, stride=L3), :]    # rows b*L3 + 2l + 1
            hb = jnp.maximum(r0, r1).astype(jnp.bfloat16)     # pooled (B, 128)
            acc = acc + jnp.dot(hb, wf1_ref[l],
                                preferred_element_type=jnp.float32)
        h1 = jnp.maximum(acc * sf1_ref[...] + cf1_ref[...], 0.0)          # (B, 256)

        # ---- fc2 + BN + ReLU, fc3 (lane-dense 128-wide output) --------------
        h2 = jnp.dot(h1.astype(jnp.bfloat16), wf2_ref[...],
                     preferred_element_type=jnp.float32)
        h2 = jnp.maximum(h2 * sf2_ref[...] + cf2_ref[...], 0.0)           # (B, 128)
        out_ref[...] = (jnp.dot(h2.astype(jnp.bfloat16), wf3_ref[...],
                                preferred_element_type=jnp.float32)
                        + cf3_ref[...])                                   # (B, 128)

    return kernel


# ------------------------------ wrappers ------------------------------------

def _full_spec(shape):
    nd = len(shape)
    return pl.BlockSpec(shape, lambda *_, _nd=nd: (0,) * _nd)


def fused_cnn_call(x2, q, B, L1):
    kernel = make_fused_kernel(B, L1)
    args = (x2, q["w1"], q["s1"], q["c1"], q["w2"], q["s2"], q["c2"],
            q["w3"], q["s3"], q["c3"], q["wf1"], q["sf1"], q["cf1"],
            q["wf2"], q["sf2"], q["cf2"], q["wf3"], q["cf3"])
    out_shape = (B, 128)                                  # lane-dense, sliced to 10 outside
    return pl.pallas_call(
        kernel,
        out_shape=jax.ShapeDtypeStruct(out_shape, jnp.float32),
        in_specs=[_full_spec(a.shape) for a in args],
        out_specs=_full_spec(out_shape),
        scratch_shapes=[pltpu.VMEM((B * L1, 32), jnp.float32),        # conv1 pre-pool
                        pltpu.VMEM((B * (L1 // 2), 64), jnp.float32),  # conv2 pre-pool
                        pltpu.VMEM((B * (L1 // 4), 128), jnp.float32)],  # conv3 pre-pool
    )(*args)


@functools.partial(jax.jit, static_argnames=("output_dim",))
def cnn_forward(x, q, output_dim=10):
    """x: (B, 168) -> (B, output_dim). The hot path is a single fused Pallas kernel."""
    B, L = x.shape
    x2 = x.astype(jnp.float32).reshape(B * L, 1)
    out = fused_cnn_call(x2, q, B, L)
    return out[:, :output_dim]


# --------------------- one-time parameter preprocessing ----------------------

def _fold_bn(p, prefix, lin_bias):
    s = p[f"{prefix}_g"] / jnp.sqrt(p[f"{prefix}_v"] + EPS)
    c = (lin_bias - p[f"{prefix}_m"]) * s + p[f"{prefix}_b"]
    return (s.reshape(1, -1).astype(jnp.float32),
            c.reshape(1, -1).astype(jnp.float32))


def _conv_w_im2col(w):
    # (Cout, Cin, K) -> (K*Cin, Cout), tap-major rows matching [x_{l-1} | x_l | x_{l+1}].
    cout, cin, k = w.shape
    return jnp.transpose(w, (2, 1, 0)).reshape(k * cin, cout)


def prep_params(p, output_dim=10):
    """One-time weight reorder / BN fold / bf16 cast, hoisted out of the hot path."""
    q = {}
    q["w1"] = jnp.transpose(p["conv1_w"][:, 0, :]).astype(jnp.float32)      # (3, 32), VPU path
    q["s1"], q["c1"] = _fold_bn(p, "bn1", p["conv1_b"])
    q["w2"] = _conv_w_im2col(p["conv2_w"]).astype(jnp.bfloat16)             # (96, 64)
    q["s2"], q["c2"] = _fold_bn(p, "bn2", p["conv2_b"])
    q["w3"] = _conv_w_im2col(p["conv3_w"]).astype(jnp.bfloat16)             # (192, 128)
    q["s3"], q["c3"] = _fold_bn(p, "bn3", p["conv3_b"])
    # fc1: PyTorch flattens the (C=128, L=21) activation channel-major (col = c*21 + l);
    # reorder once into position-major slabs wf1[l, c, out].
    q["wf1"] = jnp.transpose(p["fc1_w"].reshape(256, 128, 21),
                             (2, 1, 0)).astype(jnp.bfloat16)                # (21, 128, 256)
    q["sf1"], q["cf1"] = _fold_bn(p, "bnf1", p["fc1_b"])
    q["wf2"] = jnp.transpose(p["fc2_w"]).astype(jnp.bfloat16)               # (256, 128)
    q["sf2"], q["cf2"] = _fold_bn(p, "bnf2", p["fc2_b"])
    w3t = jnp.transpose(p["fc3_w"])                                         # (128, out)
    q["wf3"] = jnp.pad(w3t, ((0, 0), (0, 128 - output_dim))).astype(jnp.bfloat16)
    q["cf3"] = jnp.pad(p["fc3_b"], (0, 128 - output_dim)).reshape(1, -1).astype(jnp.float32)
    return q


# --------------------------- parameters / reference --------------------------

def init_params(key, output_dim=10):
    ks = iter(jax.random.split(key, 48))

    def rnd(shape, scale=0.1):
        return scale * jax.random.normal(next(ks), shape, jnp.float32)

    p = {}
    p["conv1_w"] = rnd((32, 1, 3));    p["conv1_b"] = rnd((32,))
    p["conv2_w"] = rnd((64, 32, 3), 0.05);  p["conv2_b"] = rnd((64,))
    p["conv3_w"] = rnd((128, 64, 3), 0.05); p["conv3_b"] = rnd((128,))
    for i, c in ((1, 32), (2, 64), (3, 128)):
        p[f"bn{i}_g"] = 1.0 + rnd((c,))
        p[f"bn{i}_b"] = rnd((c,))
        p[f"bn{i}_m"] = rnd((c,))
        p[f"bn{i}_v"] = 1.0 + 0.1 * jnp.abs(jax.random.normal(next(ks), (c,)))
    p["fc1_w"] = rnd((256, 128 * 21), 0.02); p["fc1_b"] = rnd((256,))
    p["fc2_w"] = rnd((128, 256), 0.05);      p["fc2_b"] = rnd((128,))
    p["fc3_w"] = rnd((output_dim, 128), 0.05); p["fc3_b"] = rnd((output_dim,))
    for name, c in (("bnf1", 256), ("bnf2", 128)):
        p[f"{name}_g"] = 1.0 + rnd((c,))
        p[f"{name}_b"] = rnd((c,))
        p[f"{name}_m"] = rnd((c,))
        p[f"{name}_v"] = 1.0 + 0.1 * jnp.abs(jax.random.normal(next(ks), (c,)))
    return p


def reference_forward(x, p):
    """Pure-JAX f32 reference in PyTorch's NCW layout."""
    def bn(h, g, b, m, v):
        shape = [1] * h.ndim
        shape[1] = -1
        return ((h - m.reshape(shape)) / jnp.sqrt(v.reshape(shape) + EPS)
                * g.reshape(shape) + b.reshape(shape))

    h = x[:, None, :]  # (B, 1, L)
    for i in (1, 2, 3):
        h = jax.lax.conv_general_dilated(
            h, p[f"conv{i}_w"], window_strides=(1,), padding=[(1, 1)],
            dimension_numbers=("NCH", "OIH", "NCH"))
        h = h + p[f"conv{i}_b"][None, :, None]
        h = jnp.maximum(bn(h, p[f"bn{i}_g"], p[f"bn{i}_b"],
                           p[f"bn{i}_m"], p[f"bn{i}_v"]), 0.0)
        B, C, L = h.shape
        h = h.reshape(B, C, L // 2, 2).max(axis=3)

    h = h.reshape(h.shape[0], -1)
    h = h @ p["fc1_w"].T + p["fc1_b"]
    h = jnp.maximum(bn(h, p["bnf1_g"], p["bnf1_b"], p["bnf1_m"], p["bnf1_v"]), 0.0)
    h = h @ p["fc2_w"].T + p["fc2_b"]
    h = jnp.maximum(bn(h, p["bnf2_g"], p["bnf2_b"], p["bnf2_m"], p["bnf2_v"]), 0.0)
    return h @ p["fc3_w"].T + p["fc3_b"]


# ---------------------------------- main --------------------------------------

if __name__ == "__main__":
    key = jax.random.PRNGKey(0)
    k_param, k_x = jax.random.split(key)
    params = init_params(k_param, output_dim=10)
    prepped = prep_params(params, output_dim=10)   # one-time, outside the hot path

    B, L = 2, 168  # 168 -> 84 -> 42 -> 21, matching flatten_dim = 128*21
    x = jax.random.normal(k_x, (B, L), jnp.float32)

    out = jax.block_until_ready(cnn_forward(x, prepped, output_dim=10))
    ref = jax.block_until_ready(reference_forward(x, params))

    assert out.shape == (B, 10), out.shape
    # bf16 weights/activations on the MXU (f32 accumulation) -> looser tolerance than f32.
    np.testing.assert_allclose(np.asarray(out), np.asarray(ref),
                               rtol=2e-2, atol=2e-2)
    print("KERNEL_OK")
</pallas_src>

<mosaic_0001>
module attributes {stable_mosaic.version = 11 : i64} {
  func.func @kernel(%arg0: memref<336x1xf32, #tpu.memory_space<vmem>>, %arg1: memref<3x32xf32, #tpu.memory_space<vmem>>, %arg2: memref<1x32xf32, #tpu.memory_space<vmem>>, %arg3: memref<1x32xf32, #tpu.memory_space<vmem>>, %arg4: memref<96x64xbf16, #tpu.memory_space<vmem>>, %arg5: memref<1x64xf32, #tpu.memory_space<vmem>>, %arg6: memref<1x64xf32, #tpu.memory_space<vmem>>, %arg7: memref<192x128xbf16, #tpu.memory_space<vmem>>, %arg8: memref<1x128xf32, #tpu.memory_space<vmem>>, %arg9: memref<1x128xf32, #tpu.memory_space<vmem>>, %arg10: memref<21x128x256xbf16, #tpu.memory_space<vmem>>, %arg11: memref<1x256xf32, #tpu.memory_space<vmem>>, %arg12: memref<1x256xf32, #tpu.memory_space<vmem>>, %arg13: memref<256x128xbf16, #tpu.memory_space<vmem>>, %arg14: memref<1x128xf32, #tpu.memory_space<vmem>>, %arg15: memref<1x128xf32, #tpu.memory_space<vmem>>, %arg16: memref<128x128xbf16, #tpu.memory_space<vmem>>, %arg17: memref<1x128xf32, #tpu.memory_space<vmem>>, %arg18: memref<2x128xf32, #tpu.memory_space<vmem>>, %arg19: memref<336x32xf32, #tpu.memory_space<vmem>>, %arg20: memref<168x64xf32, #tpu.memory_space<vmem>>, %arg21: memref<84x128xf32, #tpu.memory_space<vmem>>) attributes {dimension_semantics = [], scalar_prefetch = 0 : i64, scratch_operands = 3 : i64, tpu.core_type = #tpu.core_type<tc>} {
    %c0 = arith.constant 0 : index
    %c0_0 = arith.constant 0 : index
    %0 = vector.load %arg0[%c0, %c0_0] : memref<336x1xf32, #tpu.memory_space<vmem>>, vector<336x1xf32>
    %cst = arith.constant 0.000000e+00 : f32
    %1 = vector.broadcast %cst : f32 to vector<1x1xf32>
    %2 = vector.extract_strided_slice %0 {offsets = [0, 0], sizes = [335, 1], strides = [1, 1]} : vector<336x1xf32> to vector<335x1xf32>
    %3 = tpu.concatenate %1, %2 in 0 : vector<1x1xf32>, vector<335x1xf32> -> vector<336x1xf32>
    %4 = vector.extract_strided_slice %0 {offsets = [1, 0], sizes = [335, 1], strides = [1, 1]} : vector<336x1xf32> to vector<335x1xf32>
    %5 = tpu.concatenate %4, %1 in 0 : vector<335x1xf32>, vector<1x1xf32> -> vector<336x1xf32>
    %6 = tpu.iota {dimensions = array<i32: 0>} : vector<336x1xi32>
    %c168_i32 = arith.constant 168 : i32
    %c0_i32 = arith.constant 0 : i32
    %7 = arith.cmpi eq, %c168_i32, %c0_i32 : i32
    %c1_i32 = arith.constant 1 : i32
    %8 = arith.select %7, %c1_i32, %c168_i32 : i32
    %9 = vector.broadcast %8 : i32 to vector<336x1xi32>
    %10 = arith.remsi %6, %9 : vector<336x1xi32>
    %c0_i32_1 = arith.constant 0 : i32
    %11 = vector.broadcast %c0_i32_1 : i32 to vector<336x1xi32>
    %12 = arith.cmpi ne, %10, %11 : vector<336x1xi32>
    %c0_i32_2 = arith.constant 0 : i32
    %13 = vector.broadcast %c0_i32_2 : i32 to vector<336x1xi32>
    %14 = arith.cmpi slt, %10, %13 : vector<336x1xi32>
    %c0_i32_3 = arith.constant 0 : i32
    %15 = arith.cmpi slt, %8, %c0_i32_3 : i32
    %16 = vector.broadcast %15 : i1 to vector<336x1xi1>
    %17 = vector.broadcast %16 : vector<336x1xi1> to vector<336x1xi1>
    %18 = arith.xori %14, %17 : vector<336x1xi1>
    %19 = arith.andi %18, %12 : vector<336x1xi1>
    %20 = vector.broadcast %8 : i32 to vector<336x1xi32>
    %21 = arith.addi %10, %20 : vector<336x1xi32>
    %22 = arith.select %19, %21, %10 : vector<336x1xi1>, vector<336x1xi32>
    %c0_i32_4 = arith.constant 0 : i32
    %23 = vector.broadcast %c0_i32_4 : i32 to vector<336x1xi32>
    %24 = arith.cmpi eq, %22, %23 : vector<336x1xi32>
    %cst_5 = arith.constant 0.000000e+00 : f32
    %25 = vector.broadcast %cst_5 : f32 to vector<336x1xf32>
    %26 = arith.select %24, %25, %3 : vector<336x1xi1>, vector<336x1xf32>
    %c167_i32 = arith.constant 167 : i32
    %27 = vector.broadcast %c167_i32 : i32 to vector<336x1xi32>
    %28 = arith.cmpi eq, %22, %27 : vector<336x1xi32>
    %cst_6 = arith.constant 0.000000e+00 : f32
    %29 = vector.broadcast %cst_6 : f32 to vector<336x1xf32>
    %30 = arith.select %28, %29, %5 : vector<336x1xi1>, vector<336x1xf32>
    %c0_7 = arith.constant 0 : index
    %c0_8 = arith.constant 0 : index
    %31 = vector.load %arg1[%c0_7, %c0_8] : memref<3x32xf32, #tpu.memory_space<vmem>>, vector<3x32xf32>
    %32 = vector.extract_strided_slice %31 {offsets = [0, 0], sizes = [1, 32], strides = [1, 1]} : vector<3x32xf32> to vector<1x32xf32>
    %33 = vector.broadcast %26 : vector<336x1xf32> to vector<336x32xf32>
    %34 = vector.broadcast %32 : vector<1x32xf32> to vector<336x32xf32>
    %35 = arith.mulf %33, %34 : vector<336x32xf32>
    %36 = vector.extract_strided_slice %31 {offsets = [1, 0], sizes = [1, 32], strides = [1, 1]} : vector<3x32xf32> to vector<1x32xf32>
    %37 = vector.broadcast %0 : vector<336x1xf32> to vector<336x32xf32>
    %38 = vector.broadcast %36 : vector<1x32xf32> to vector<336x32xf32>
    %39 = arith.mulf %37, %38 : vector<336x32xf32>
    %40 = arith.addf %35, %39 : vector<336x32xf32>
    %41 = vector.extract_strided_slice %31 {offsets = [2, 0], sizes = [1, 32], strides = [1, 1]} : vector<3x32xf32> to vector<1x32xf32>
    %42 = vector.broadcast %30 : vector<336x1xf32> to vector<336x32xf32>
    %43 = vector.broadcast %41 : vector<1x32xf32> to vector<336x32xf32>
    %44 = arith.mulf %42, %43 : vector<336x32xf32>
    %45 = arith.addf %40, %44 : vector<336x32xf32>
    %c0_9 = arith.constant 0 : index
    %c0_10 = arith.constant 0 : index
    %46 = vector.load %arg2[%c0_9, %c0_10] : memref<1x32xf32, #tpu.memory_space<vmem>>, vector<1x32xf32>
    %47 = vector.broadcast %46 : vector<1x32xf32> to vector<336x32xf32>
    %48 = arith.mulf %45, %47 : vector<336x32xf32>
    %c0_11 = arith.constant 0 : index
    %c0_12 = arith.constant 0 : index
    %49 = vector.load %arg3[%c0_11, %c0_12] : memref<1x32xf32, #tpu.memory_space<vmem>>, vector<1x32xf32>
    %50 = vector.broadcast %49 : vector<1x32xf32> to vector<336x32xf32>
    %51 = arith.addf %48, %50 : vector<336x32xf32>
    %cst_13 = arith.constant 0.000000e+00 : f32
    %52 = vector.broadcast %cst_13 : f32 to vector<336x32xf32>
    %53 = arith.maximumf %51, %52 : vector<336x32xf32>
    %c0_14 = arith.constant 0 : index
    %c0_15 = arith.constant 0 : index
    %54 = vector.load %arg19[%c0_14, %c0_15] : memref<336x32xf32, #tpu.memory_space<vmem>>, vector<336x32xf32>
    tpu.vector_store %arg19[%c0_14, %c0_15], %53 {strides = array<i32>} : memref<336x32xf32, #tpu.memory_space<vmem>>, vector<336x32xf32>,
    %c0_16 = arith.constant 0 : index
    %c0_17 = arith.constant 0 : index
    %55 = tpu.strided_load %arg19[%c0_16, %c0_17] {strides = array<i32: 2, 1>} : memref<336x32xf32, #tpu.memory_space<vmem>>, vector<168x32xf32>
    %c1 = arith.constant 1 : index
    %c0_18 = arith.constant 0 : index
    %56 = tpu.strided_load %arg19[%c1, %c0_18] {strides = array<i32: 2, 1>} : memref<336x32xf32, #tpu.memory_space<vmem>>, vector<168x32xf32>
    %57 = arith.maximumf %55, %56 : vector<168x32xf32>
    %cst_19 = arith.constant 0.000000e+00 : f32
    %58 = vector.broadcast %cst_19 : f32 to vector<1x32xf32>
    %59 = vector.extract_strided_slice %57 {offsets = [0, 0], sizes = [167, 32], strides = [1, 1]} : vector<168x32xf32> to vector<167x32xf32>
    %60 = tpu.concatenate %58, %59 in 0 : vector<1x32xf32>, vector<167x32xf32> -> vector<168x32xf32>
    %61 = vector.extract_strided_slice %57 {offsets = [1, 0], sizes = [167, 32], strides = [1, 1]} : vector<168x32xf32> to vector<167x32xf32>
    %62 = tpu.concatenate %61, %58 in 0 : vector<167x32xf32>, vector<1x32xf32> -> vector<168x32xf32>
    %63 = tpu.iota {dimensions = array<i32: 0>} : vector<168x1xi32>
    %c84_i32 = arith.constant 84 : i32
    %c0_i32_20 = arith.constant 0 : i32
    %64 = arith.cmpi eq, %c84_i32, %c0_i32_20 : i32
    %c1_i32_21 = arith.constant 1 : i32
    %65 = arith.select %64, %c1_i32_21, %c84_i32 : i32
    %66 = vector.broadcast %65 : i32 to vector<168x1xi32>
    %67 = arith.remsi %63, %66 : vector<168x1xi32>
    %c0_i32_22 = arith.constant 0 : i32
    %68 = vector.broadcast %c0_i32_22 : i32 to vector<168x1xi32>
    %69 = arith.cmpi ne, %67, %68 : vector<168x1xi32>
    %c0_i32_23 = arith.constant 0 : i32
    %70 = vector.broadcast %c0_i32_23 : i32 to vector<168x1xi32>
    %71 = arith.cmpi slt, %67, %70 : vector<168x1xi32>
    %c0_i32_24 = arith.constant 0 : i32
    %72 = arith.cmpi slt, %65, %c0_i32_24 : i32
    %73 = vector.broadcast %72 : i1 to vector<168x1xi1>
    %74 = vector.broadcast %73 : vector<168x1xi1> to vector<168x1xi1>
    %75 = arith.xori %71, %74 : vector<168x1xi1>
    %76 = arith.andi %75, %69 : vector<168x1xi1>
    %77 = vector.broadcast %65 : i32 to vector<168x1xi32>
    %78 = arith.addi %67, %77 : vector<168x1xi32>
    %79 = arith.select %76, %78, %67 : vector<168x1xi1>, vector<168x1xi32>
    %c0_i32_25 = arith.constant 0 : i32
    %80 = vector.broadcast %c0_i32_25 : i32 to vector<168x1xi32>
    %81 = arith.cmpi eq, %79, %80 : vector<168x1xi32>
    %cst_26 = arith.constant 0.000000e+00 : f32
    %82 = vector.shape_cast %81 : vector<168x1xi1> to vector<168x1xi1>
    %83 = vector.broadcast %82 : vector<168x1xi1> to vector<168x32xi1>
    %84 = vector.broadcast %cst_26 : f32 to vector<168x32xf32>
    %85 = arith.select %83, %84, %60 : vector<168x32xi1>, vector<168x32xf32>
    %c83_i32 = arith.constant 83 : i32
    %86 = vector.broadcast %c83_i32 : i32 to vector<168x1xi32>
    %87 = arith.cmpi eq, %79, %86 : vector<168x1xi32>
    %cst_27 = arith.constant 0.000000e+00 : f32
    %88 = vector.shape_cast %87 : vector<168x1xi1> to vector<168x1xi1>
    %89 = vector.broadcast %88 : vector<168x1xi1> to vector<168x32xi1>
    %90 = vector.broadcast %cst_27 : f32 to vector<168x32xf32>
    %91 = arith.select %89, %90, %62 : vector<168x32xi1>, vector<168x32xf32>
    %92 = tpu.concatenate %85, %57, %91 in 1 : vector<168x32xf32>, vector<168x32xf32>, vector<168x32xf32> -> vector<168x96xf32>
    %93 = arith.truncf %92 : vector<168x96xf32> to vector<168x96xbf16>
    %c0_28 = arith.constant 0 : index
    %c0_29 = arith.constant 0 : index
    %94 = vector.load %arg4[%c0_28, %c0_29] : memref<96x64xbf16, #tpu.memory_space<vmem>>, vector<96x64xbf16>
    %cst_30 = arith.constant dense<0.000000e+00> : vector<168x64xf32>
    %95 = tpu.matmul %93, %94, %cst_30 {dimension_numbers = #tpu.dot_dimension_numbers<[1], [0], [0], [1], [0, 0, 1, 1], [], []>} : vector<168x96xbf16>, vector<96x64xbf16>, vector<168x64xf32> -> vector<168x64xf32>
    %c0_31 = arith.constant 0 : index
    %c0_32 = arith.constant 0 : index
    %96 = vector.load %arg5[%c0_31, %c0_32] : memref<1x64xf32, #tpu.memory_space<vmem>>, vector<1x64xf32>
    %97 = vector.broadcast %96 : vector<1x64xf32> to vector<168x64xf32>
    %98 = arith.mulf %95, %97 : vector<168x64xf32>
    %c0_33 = arith.constant 0 : index
    %c0_34 = arith.constant 0 : index
    %99 = vector.load %arg6[%c0_33, %c0_34] : memref<1x64xf32, #tpu.memory_space<vmem>>, vector<1x64xf32>
    %100 = vector.broadcast %99 : vector<1x64xf32> to vector<168x64xf32>
    %101 = arith.addf %98, %100 : vector<168x64xf32>
    %cst_35 = arith.constant 0.000000e+00 : f32
    %102 = vector.broadcast %cst_35 : f32 to vector<168x64xf32>
    %103 = arith.maximumf %101, %102 : vector<168x64xf32>
    %c0_36 = arith.constant 0 : index
    %c0_37 = arith.constant 0 : index
    %104 = vector.load %arg20[%c0_36, %c0_37] : memref<168x64xf32, #tpu.memory_space<vmem>>, vector<168x64xf32>
    tpu.vector_store %arg20[%c0_36, %c0_37], %103 {strides = array<i32>} : memref<168x64xf32, #tpu.memory_space<vmem>>, vector<168x64xf32>,
    %c0_38 = arith.constant 0 : index
    %c0_39 = arith.constant 0 : index
    %105 = tpu.strided_load %arg20[%c0_38, %c0_39] {strides = array<i32: 2, 1>} : memref<168x64xf32, #tpu.memory_space<vmem>>, vector<84x64xf32>
    %c1_40 = arith.constant 1 : index
    %c0_41 = arith.constant 0 : index
    %106 = tpu.strided_load %arg20[%c1_40, %c0_41] {strides = array<i32: 2, 1>} : memref<168x64xf32, #tpu.memory_space<vmem>>, vector<84x64xf32>
    %107 = arith.maximumf %105, %106 : vector<84x64xf32>
    %cst_42 = arith.constant 0.000000e+00 : f32
    %108 = vector.broadcast %cst_42 : f32 to vector<1x64xf32>
    %109 = vector.extract_strided_slice %107 {offsets = [0, 0], sizes = [83, 64], strides = [1, 1]} : vector<84x64xf32> to vector<83x64xf32>
    %110 = tpu.concatenate %108, %109 in 0 : vector<1x64xf32>, vector<83x64xf32> -> vector<84x64xf32>
    %111 = vector.extract_strided_slice %107 {offsets = [1, 0], sizes = [83, 64], strides = [1, 1]} : vector<84x64xf32> to vector<83x64xf32>
    %112 = tpu.concatenate %111, %108 in 0 : vector<83x64xf32>, vector<1x64xf32> -> vector<84x64xf32>
    %113 = tpu.iota {dimensions = array<i32: 0>} : vector<84x1xi32>
    %c42_i32 = arith.constant 42 : i32
    %c0_i32_43 = arith.constant 0 : i32
    %114 = arith.cmpi eq, %c42_i32, %c0_i32_43 : i32
    %c1_i32_44 = arith.constant 1 : i32
    %115 = arith.select %114, %c1_i32_44, %c42_i32 : i32
    %116 = vector.broadcast %115 : i32 to vector<84x1xi32>
    %117 = arith.remsi %113, %116 : vector<84x1xi32>
    %c0_i32_45 = arith.constant 0 : i32
    %118 = vector.broadcast %c0_i32_45 : i32 to vector<84x1xi32>
    %119 = arith.cmpi ne, %117, %118 : vector<84x1xi32>
    %c0_i32_46 = arith.constant 0 : i32
    %120 = vector.broadcast %c0_i32_46 : i32 to vector<84x1xi32>
    %121 = arith.cmpi slt, %117, %120 : vector<84x1xi32>
    %c0_i32_47 = arith.constant 0 : i32
    %122 = arith.cmpi slt, %115, %c0_i32_47 : i32
    %123 = vector.broadcast %122 : i1 to vector<84x1xi1>
    %124 = vector.broadcast %123 : vector<84x1xi1> to vector<84x1xi1>
    %125 = arith.xori %121, %124 : vector<84x1xi1>
    %126 = arith.andi %125, %119 : vector<84x1xi1>
    %127 = vector.broadcast %115 : i32 to vector<84x1xi32>
    %128 = arith.addi %117, %127 : vector<84x1xi32>
    %129 = arith.select %126, %128, %117 : vector<84x1xi1>, vector<84x1xi32>
    %c0_i32_48 = arith.constant 0 : i32
    %130 = vector.broadcast %c0_i32_48 : i32 to vector<84x1xi32>
    %131 = arith.cmpi eq, %129, %130 : vector<84x1xi32>
    %cst_49 = arith.constant 0.000000e+00 : f32
    %132 = vector.shape_cast %131 : vector<84x1xi1> to vector<84x1xi1>
    %133 = vector.broadcast %132 : vector<84x1xi1> to vector<84x64xi1>
    %134 = vector.broadcast %cst_49 : f32 to vector<84x64xf32>
    %135 = arith.select %133, %134, %110 : vector<84x64xi1>, vector<84x64xf32>
    %c41_i32 = arith.constant 41 : i32
    %136 = vector.broadcast %c41_i32 : i32 to vector<84x1xi32>
    %137 = arith.cmpi eq, %129, %136 : vector<84x1xi32>
    %cst_50 = arith.constant 0.000000e+00 : f32
    %138 = vector.shape_cast %137 : vector<84x1xi1> to vector<84x1xi1>
    %139 = vector.broadcast %138 : vector<84x1xi1> to vector<84x64xi1>
    %140 = vector.broadcast %cst_50 : f32 to vector<84x64xf32>
    %141 = arith.select %139, %140, %112 : vector<84x64xi1>, vector<84x64xf32>
    %142 = tpu.concatenate %135, %107, %141 in 1 : vector<84x64xf32>, vector<84x64xf32>, vector<84x64xf32> -> vector<84x192xf32>
    %143 = arith.truncf %142 : vector<84x192xf32> to vector<84x192xbf16>
    %c0_51 = arith.constant 0 : index
    %c0_52 = arith.constant 0 : index
    %144 = vector.load %arg7[%c0_51, %c0_52] : memref<192x128xbf16, #tpu.memory_space<vmem>>, vector<192x128xbf16>
    %cst_53 = arith.constant dense<0.000000e+00> : vector<84x128xf32>
    %145 = tpu.matmul %143, %144, %cst_53 {dimension_numbers = #tpu.dot_dimension_numbers<[1], [0], [0], [1], [0, 0, 1, 1], [], []>} : vector<84x192xbf16>, vector<192x128xbf16>, vector<84x128xf32> -> vector<84x128xf32>
    %c0_54 = arith.constant 0 : index
    %c0_55 = arith.constant 0 : index
    %146 = vector.load %arg8[%c0_54, %c0_55] : memref<1x128xf32, #tpu.memory_space<vmem>>, vector<1x128xf32>
    %147 = vector.broadcast %146 : vector<1x128xf32> to vector<84x128xf32>
    %148 = arith.mulf %145, %147 : vector<84x128xf32>
    %c0_56 = arith.constant 0 : index
    %c0_57 = arith.constant 0 : index
    %149 = vector.load %arg9[%c0_56, %c0_57] : memref<1x128xf32, #tpu.memory_space<vmem>>, vector<1x128xf32>
    %150 = vector.broadcast %149 : vector<1x128xf32> to vector<84x128xf32>
    %151 = arith.addf %148, %150 : vector<84x128xf32>
    %cst_58 = arith.constant 0.000000e+00 : f32
    %152 = vector.broadcast %cst_58 : f32 to vector<84x128xf32>
    %153 = arith.maximumf %151, %152 : vector<84x128xf32>
    %c0_59 = arith.constant 0 : index
    %c0_60 = arith.constant 0 : index
    %154 = vector.load %arg21[%c0_59, %c0_60] : memref<84x128xf32, #tpu.memory_space<vmem>>, vector<84x128xf32>
    tpu.vector_store %arg21[%c0_59, %c0_60], %153 {strides = array<i32>} : memref<84x128xf32, #tpu.memory_space<vmem>>, vector<84x128xf32>,
    %cst_61 = arith.constant 0.000000e+00 : f32
    %155 = vector.broadcast %cst_61 : f32 to vector<2x256xf32>
    %c0_62 = arith.constant 0 : index
    %c0_63 = arith.constant 0 : index
    %156 = tpu.strided_load %arg21[%c0_62, %c0_63] {strides = array<i32: 42, 1>} : memref<84x128xf32, #tpu.memory_space<vmem>>, vector<2x128xf32>
    %c1_64 = arith.constant 1 : index
    %c0_65 = arith.constant 0 : index
    %157 = tpu.strided_load %arg21[%c1_64, %c0_65] {strides = array<i32: 42, 1>} : memref<84x128xf32, #tpu.memory_space<vmem>>, vector<2x128xf32>
    %158 = arith.maximumf %156, %157 : vector<2x128xf32>
    %159 = arith.truncf %158 : vector<2x128xf32> to vector<2x128xbf16>
    %c0_66 = arith.constant 0 : index
    %c0_67 = arith.constant 0 : index
    %c0_68 = arith.constant 0 : index
    %160 = vector.load %arg10[%c0_66, %c0_67, %c0_68] : memref<21x128x256xbf16, #tpu.memory_space<vmem>>, vector<1x128x256xbf16>
    %161 = vector.shape_cast %160 : vector<1x128x256xbf16> to vector<128x256xbf16>
    %cst_69 = arith.constant dense<0.000000e+00> : vector<2x256xf32>
    %162 = tpu.matmul %159, %161, %cst_69 {dimension_numbers = #tpu.dot_dimension_numbers<[1], [0], [0], [1], [0, 0, 1, 1], [], []>} : vector<2x128xbf16>, vector<128x256xbf16>, vector<2x256xf32> -> vector<2x256xf32>
    %163 = arith.addf %155, %162 : vector<2x256xf32>
    %c2 = arith.constant 2 : index
    %c0_70 = arith.constant 0 : index
    %164 = tpu.strided_load %arg21[%c2, %c0_70] {strides = array<i32: 42, 1>} : memref<84x128xf32, #tpu.memory_space<vmem>>, vector<2x128xf32>
    %c3 = arith.constant 3 : index
    %c0_71 = arith.constant 0 : index
    %165 = tpu.strided_load %arg21[%c3, %c0_71] {strides = array<i32: 42, 1>} : memref<84x128xf32, #tpu.memory_space<vmem>>, vector<2x128xf32>
    %166 = arith.maximumf %164, %165 : vector<2x128xf32>
    %167 = arith.truncf %166 : vector<2x128xf32> to vector<2x128xbf16>
    %c1_72 = arith.constant 1 : index
    %c0_73 = arith.constant 0 : index
    %c0_74 = arith.constant 0 : index
    %168 = vector.load %arg10[%c1_72, %c0_73, %c0_74] : memref<21x128x256xbf16, #tpu.memory_space<vmem>>, vector<1x128x256xbf16>
    %169 = vector.shape_cast %168 : vector<1x128x256xbf16> to vector<128x256xbf16>
    %cst_75 = arith.constant dense<0.000000e+00> : vector<2x256xf32>
    %170 = tpu.matmul %167, %169, %cst_75 {dimension_numbers = #tpu.dot_dimension_numbers<[1], [0], [0], [1], [0, 0, 1, 1], [], []>} : vector<2x128xbf16>, vector<128x256xbf16>, vector<2x256xf32> -> vector<2x256xf32>
    %171 = arith.addf %163, %170 : vector<2x256xf32>
    %c4 = arith.constant 4 : index
    %c0_76 = arith.constant 0 : index
    %172 = tpu.strided_load %arg21[%c4, %c0_76] {strides = array<i32: 42, 1>} : memref<84x128xf32, #tpu.memory_space<vmem>>, vector<2x128xf32>
    %c5 = arith.constant 5 : index
    %c0_77 = arith.constant 0 : index
    %173 = tpu.strided_load %arg21[%c5, %c0_77] {strides = array<i32: 42, 1>} : memref<84x128xf32, #tpu.memory_space<vmem>>, vector<2x128xf32>
    %174 = arith.maximumf %172, %173 : vector<2x128xf32>
    %175 = arith.truncf %174 : vector<2x128xf32> to vector<2x128xbf16>
    %c2_78 = arith.constant 2 : index
    %c0_79 = arith.constant 0 : index
    %c0_80 = arith.constant 0 : index
    %176 = vector.load %arg10[%c2_78, %c0_79, %c0_80] : memref<21x128x256xbf16, #tpu.memory_space<vmem>>, vector<1x128x256xbf16>
    %177 = vector.shape_cast %176 : vector<1x128x256xbf16> to vector<128x256xbf16>
    %cst_81 = arith.constant dense<0.000000e+00> : vector<2x256xf32>
    %178 = tpu.matmul %175, %177, %cst_81 {dimension_numbers = #tpu.dot_dimension_numbers<[1], [0], [0], [1], [0, 0, 1, 1], [], []>} : vector<2x128xbf16>, vector<128x256xbf16>, vector<2x256xf32> -> vector<2x256xf32>
    %179 = arith.addf %171, %178 : vector<2x256xf32>
    %c6 = arith.constant 6 : index
    %c0_82 = arith.constant 0 : index
    %180 = tpu.strided_load %arg21[%c6, %c0_82] {strides = array<i32: 42, 1>} : memref<84x128xf32, #tpu.memory_space<vmem>>, vector<2x128xf32>
    %c7 = arith.constant 7 : index
    %c0_83 = arith.constant 0 : index
    %181 = tpu.strided_load %arg21[%c7, %c0_83] {strides = array<i32: 42, 1>} : memref<84x128xf32, #tpu.memory_space<vmem>>, vector<2x128xf32>
    %182 = arith.maximumf %180, %181 : vector<2x128xf32>
    %183 = arith.truncf %182 : vector<2x128xf32> to vector<2x128xbf16>
    %c3_84 = arith.constant 3 : index
    %c0_85 = arith.constant 0 : index
    %c0_86 = arith.constant 0 : index
    %184 = vector.load %arg10[%c3_84, %c0_85, %c0_86] : memref<21x128x256xbf16, #tpu.memory_space<vmem>>, vector<1x128x256xbf16>
    %185 = vector.shape_cast %184 : vector<1x128x256xbf16> to vector<128x256xbf16>
    %cst_87 = arith.constant dense<0.000000e+00> : vector<2x256xf32>
    %186 = tpu.matmul %183, %185, %cst_87 {dimension_numbers = #tpu.dot_dimension_numbers<[1], [0], [0], [1], [0, 0, 1, 1], [], []>} : vector<2x128xbf16>, vector<128x256xbf16>, vector<2x256xf32> -> vector<2x256xf32>
    %187 = arith.addf %179, %186 : vector<2x256xf32>
    %c8 = arith.constant 8 : index
    %c0_88 = arith.constant 0 : index
    %188 = tpu.strided_load %arg21[%c8, %c0_88] {strides = array<i32: 42, 1>} : memref<84x128xf32, #tpu.memory_space<vmem>>, vector<2x128xf32>
    %c9 = arith.constant 9 : index
    %c0_89 = arith.constant 0 : index
    %189 = tpu.strided_load %arg21[%c9, %c0_89] {strides = array<i32: 42, 1>} : memref<84x128xf32, #tpu.memory_space<vmem>>, vector<2x128xf32>
    %190 = arith.maximumf %188, %189 : vector<2x128xf32>
    %191 = arith.truncf %190 : vector<2x128xf32> to vector<2x128xbf16>
    %c4_90 = arith.constant 4 : index
    %c0_91 = arith.constant 0 : index
    %c0_92 = arith.constant 0 : index
    %192 = vector.load %arg10[%c4_90, %c0_91, %c0_92] : memref<21x128x256xbf16, #tpu.memory_space<vmem>>, vector<1x128x256xbf16>
    %193 = vector.shape_cast %192 : vector<1x128x256xbf16> to vector<128x256xbf16>
    %cst_93 = arith.constant dense<0.000000e+00> : vector<2x256xf32>
    %194 = tpu.matmul %191, %193, %cst_93 {dimension_numbers = #tpu.dot_dimension_numbers<[1], [0], [0], [1], [0, 0, 1, 1], [], []>} : vector<2x128xbf16>, vector<128x256xbf16>, vector<2x256xf32> -> vector<2x256xf32>
    %195 = arith.addf %187, %194 : vector<2x256xf32>
    %c10 = arith.constant 10 : index
    %c0_94 = arith.constant 0 : index
    %196 = tpu.strided_load %arg21[%c10, %c0_94] {strides = array<i32: 42, 1>} : memref<84x128xf32, #tpu.memory_space<vmem>>, vector<2x128xf32>
    %c11 = arith.constant 11 : index
    %c0_95 = arith.constant 0 : index
    %197 = tpu.strided_load %arg21[%c11, %c0_95] {strides = array<i32: 42, 1>} : memref<84x128xf32, #tpu.memory_space<vmem>>, vector<2x128xf32>
    %198 = arith.maximumf %196, %197 : vector<2x128xf32>
    %199 = arith.truncf %198 : vector<2x128xf32> to vector<2x128xbf16>
    %c5_96 = arith.constant 5 : index
    %c0_97 = arith.constant 0 : index
    %c0_98 = arith.constant 0 : index
    %200 = vector.load %arg10[%c5_96, %c0_97, %c0_98] : memref<21x128x256xbf16, #tpu.memory_space<vmem>>, vector<1x128x256xbf16>
    %201 = vector.shape_cast %200 : vector<1x128x256xbf16> to vector<128x256xbf16>
    %cst_99 = arith.constant dense<0.000000e+00> : vector<2x256xf32>
    %202 = tpu.matmul %199, %201, %cst_99 {dimension_numbers = #tpu.dot_dimension_numbers<[1], [0], [0], [1], [0, 0, 1, 1], [], []>} : vector<2x128xbf16>, vector<128x256xbf16>, vector<2x256xf32> -> vector<2x256xf32>
    %203 = arith.addf %195, %202 : vector<2x256xf32>
    %c12 = arith.constant 12 : index
    %c0_100 = arith.constant 0 : index
    %204 = tpu.strided_load %arg21[%c12, %c0_100] {strides = array<i32: 42, 1>} : memref<84x128xf32, #tpu.memory_space<vmem>>, vector<2x128xf32>
    %c13 = arith.constant 13 : index
    %c0_101 = arith.constant 0 : index
    %205 = tpu.strided_load %arg21[%c13, %c0_101] {strides = array<i32: 42, 1>} : memref<84x128xf32, #tpu.memory_space<vmem>>, vector<2x128xf32>
    %206 = arith.maximumf %204, %205 : vector<2x128xf32>
    %207 = arith.truncf %206 : vector<2x128xf32> to vector<2x128xbf16>
    %c6_102 = arith.constant 6 : index
    %c0_103 = arith.constant 0 : index
    %c0_104 = arith.constant 0 : index
    %208 = vector.load %arg10[%c6_102, %c0_103, %c0_104] : memref<21x128x256xbf16, #tpu.memory_space<vmem>>, vector<1x128x256xbf16>
    %209 = vector.shape_cast %208 : vector<1x128x256xbf16> to vector<128x256xbf16>
    %cst_105 = arith.constant dense<0.000000e+00> : vector<2x256xf32>
    %210 = tpu.matmul %207, %209, %cst_105 {dimension_numbers = #tpu.dot_dimension_numbers<[1], [0], [0], [1], [0, 0, 1, 1], [], []>} : vector<2x128xbf16>, vector<128x256xbf16>, vector<2x256xf32> -> vector<2x256xf32>
    %211 = arith.addf %203, %210 : vector<2x256xf32>
    %c14 = arith.constant 14 : index
    %c0_106 = arith.constant 0 : index
    %212 = tpu.strided_load %arg21[%c14, %c0_106] {strides = array<i32: 42, 1>} : memref<84x128xf32, #tpu.memory_space<vmem>>, vector<2x128xf32>
    %c15 = arith.constant 15 : index
    %c0_107 = arith.constant 0 : index
    %213 = tpu.strided_load %arg21[%c15, %c0_107] {strides = array<i32: 42, 1>} : memref<84x128xf32, #tpu.memory_space<vmem>>, vector<2x128xf32>
    %214 = arith.maximumf %212, %213 : vector<2x128xf32>
    %215 = arith.truncf %214 : vector<2x128xf32> to vector<2x128xbf16>
    %c7_108 = arith.constant 7 : index
    %c0_109 = arith.constant 0 : index
    %c0_110 = arith.constant 0 : index
    %216 = vector.load %arg10[%c7_108, %c0_109, %c0_110] : memref<21x128x256xbf16, #tpu.memory_space<vmem>>, vector<1x128x256xbf16>
    %217 = vector.shape_cast %216 : vector<1x128x256xbf16> to vector<128x256xbf16>
    %cst_111 = arith.constant dense<0.000000e+00> : vector<2x256xf32>
    %218 = tpu.matmul %215, %217, %cst_111 {dimension_numbers = #tpu.dot_dimension_numbers<[1], [0], [0], [1], [0, 0, 1, 1], [], []>} : vector<2x128xbf16>, vector<128x256xbf16>, vector<2x256xf32> -> vector<2x256xf32>
    %219 = arith.addf %211, %218 : vector<2x256xf32>
    %c16 = arith.constant 16 : index
    %c0_112 = arith.constant 0 : index
    %220 = tpu.strided_load %arg21[%c16, %c0_112] {strides = array<i32: 42, 1>} : memref<84x128xf32, #tpu.memory_space<vmem>>, vector<2x128xf32>
    %c17 = arith.constant 17 : index
    %c0_113 = arith.constant 0 : index
    %221 = tpu.strided_load %arg21[%c17, %c0_113] {strides = array<i32: 42, 1>} : memref<84x128xf32, #tpu.memory_space<vmem>>, vector<2x128xf32>
    %222 = arith.maximumf %220, %221 : vector<2x128xf32>
    %223 = arith.truncf %222 : vector<2x128xf32> to vector<2x128xbf16>
    %c8_114 = arith.constant 8 : index
    %c0_115 = arith.constant 0 : index
    %c0_116 = arith.constant 0 : index
    %224 = vector.load %arg10[%c8_114, %c0_115, %c0_116] : memref<21x128x256xbf16, #tpu.memory_space<vmem>>, vector<1x128x256xbf16>
    %225 = vector.shape_cast %224 : vector<1x128x256xbf16> to vector<128x256xbf16>
    %cst_117 = arith.constant dense<0.000000e+00> : vector<2x256xf32>
    %226 = tpu.matmul %223, %225, %cst_117 {dimension_numbers = #tpu.dot_dimension_numbers<[1], [0], [0], [1], [0, 0, 1, 1], [], []>} : vector<2x128xbf16>, vector<128x256xbf16>, vector<2x256xf32> -> vector<2x256xf32>
    %227 = arith.addf %219, %226 : vector<2x256xf32>
    %c18 = arith.constant 18 : index
    %c0_118 = arith.constant 0 : index
    %228 = tpu.strided_load %arg21[%c18, %c0_118] {strides = array<i32: 42, 1>} : memref<84x128xf32, #tpu.memory_space<vmem>>, vector<2x128xf32>
    %c19 = arith.constant 19 : index
    %c0_119 = arith.constant 0 : index
    %229 = tpu.strided_load %arg21[%c19, %c0_119] {strides = array<i32: 42, 1>} : memref<84x128xf32, #tpu.memory_space<vmem>>, vector<2x128xf32>
    %230 = arith.maximumf %228, %229 : vector<2x128xf32>
    %231 = arith.truncf %230 : vector<2x128xf32> to vector<2x128xbf16>
    %c9_120 = arith.constant 9 : index
    %c0_121 = arith.constant 0 : index
    %c0_122 = arith.constant 0 : index
    %232 = vector.load %arg10[%c9_120, %c0_121, %c0_122] : memref<21x128x256xbf16, #tpu.memory_space<vmem>>, vector<1x128x256xbf16>
    %233 = vector.shape_cast %232 : vector<1x128x256xbf16> to vector<128x256xbf16>
    %cst_123 = arith.constant dense<0.000000e+00> : vector<2x256xf32>
    %234 = tpu.matmul %231, %233, %cst_123 {dimension_numbers = #tpu.dot_dimension_numbers<[1], [0], [0], [1], [0, 0, 1, 1], [], []>} : vector<2x128xbf16>, vector<128x256xbf16>, vector<2x256xf32> -> vector<2x256xf32>
    %235 = arith.addf %227, %234 : vector<2x256xf32>
    %c20 = arith.constant 20 : index
    %c0_124 = arith.constant 0 : index
    %236 = tpu.strided_load %arg21[%c20, %c0_124] {strides = array<i32: 42, 1>} : memref<84x128xf32, #tpu.memory_space<vmem>>, vector<2x128xf32>
    %c21 = arith.constant 21 : index
    %c0_125 = arith.constant 0 : index
    %237 = tpu.strided_load %arg21[%c21, %c0_125] {strides = array<i32: 42, 1>} : memref<84x128xf32, #tpu.memory_space<vmem>>, vector<2x128xf32>
    %238 = arith.maximumf %236, %237 : vector<2x128xf32>
    %239 = arith.truncf %238 : vector<2x128xf32> to vector<2x128xbf16>
    %c10_126 = arith.constant 10 : index
    %c0_127 = arith.constant 0 : index
    %c0_128 = arith.constant 0 : index
    %240 = vector.load %arg10[%c10_126, %c0_127, %c0_128] : memref<21x128x256xbf16, #tpu.memory_space<vmem>>, vector<1x128x256xbf16>
    %241 = vector.shape_cast %240 : vector<1x128x256xbf16> to vector<128x256xbf16>
    %cst_129 = arith.constant dense<0.000000e+00> : vector<2x256xf32>
    %242 = tpu.matmul %239, %241, %cst_129 {dimension_numbers = #tpu.dot_dimension_numbers<[1], [0], [0], [1], [0, 0, 1, 1], [], []>} : vector<2x128xbf16>, vector<128x256xbf16>, vector<2x256xf32> -> vector<2x256xf32>
    %243 = arith.addf %235, %242 : vector<2x256xf32>
    %c22 = arith.constant 22 : index
    %c0_130 = arith.constant 0 : index
    %244 = tpu.strided_load %arg21[%c22, %c0_130] {strides = array<i32: 42, 1>} : memref<84x128xf32, #tpu.memory_space<vmem>>, vector<2x128xf32>
    %c23 = arith.constant 23 : index
    %c0_131 = arith.constant 0 : index
    %245 = tpu.strided_load %arg21[%c23, %c0_131] {strides = array<i32: 42, 1>} : memref<84x128xf32, #tpu.memory_space<vmem>>, vector<2x128xf32>
    %246 = arith.maximumf %244, %245 : vector<2x128xf32>
    %247 = arith.truncf %246 : vector<2x128xf32> to vector<2x128xbf16>
    %c11_132 = arith.constant 11 : index
    %c0_133 = arith.constant 0 : index
    %c0_134 = arith.constant 0 : index
    %248 = vector.load %arg10[%c11_132, %c0_133, %c0_134] : memref<21x128x256xbf16, #tpu.memory_space<vmem>>, vector<1x128x256xbf16>
    %249 = vector.shape_cast %248 : vector<1x128x256xbf16> to vector<128x256xbf16>
    %cst_135 = arith.constant dense<0.000000e+00> : vector<2x256xf32>
    %250 = tpu.matmul %247, %249, %cst_135 {dimension_numbers = #tpu.dot_dimension_numbers<[1], [0], [0], [1], [0, 0, 1, 1], [], []>} : vector<2x128xbf16>, vector<128x256xbf16>, vector<2x256xf32> -> vector<2x256xf32>
    %251 = arith.addf %243, %250 : vector<2x256xf32>
    %c24 = arith.constant 24 : index
    %c0_136 = arith.constant 0 : index
    %252 = tpu.strided_load %arg21[%c24, %c0_136] {strides = array<i32: 42, 1>} : memref<84x128xf32, #tpu.memory_space<vmem>>, vector<2x128xf32>
    %c25 = arith.constant 25 : index
    %c0_137 = arith.constant 0 : index
    %253 = tpu.strided_load %arg21[%c25, %c0_137] {strides = array<i32: 42, 1>} : memref<84x128xf32, #tpu.memory_space<vmem>>, vector<2x128xf32>
    %254 = arith.maximumf %252, %253 : vector<2x128xf32>
    %255 = arith.truncf %254 : vector<2x128xf32> to vector<2x128xbf16>
    %c12_138 = arith.constant 12 : index
    %c0_139 = arith.constant 0 : index
    %c0_140 = arith.constant 0 : index
    %256 = vector.load %arg10[%c12_138, %c0_139, %c0_140] : memref<21x128x256xbf16, #tpu.memory_space<vmem>>, vector<1x128x256xbf16>
    %257 = vector.shape_cast %256 : vector<1x128x256xbf16> to vector<128x256xbf16>
    %cst_141 = arith.constant dense<0.000000e+00> : vector<2x256xf32>
    %258 = tpu.matmul %255, %257, %cst_141 {dimension_numbers = #tpu.dot_dimension_numbers<[1], [0], [0], [1], [0, 0, 1, 1], [], []>} : vector<2x128xbf16>, vector<128x256xbf16>, vector<2x256xf32> -> vector<2x256xf32>
    %259 = arith.addf %251, %258 : vector<2x256xf32>
    %c26 = arith.constant 26 : index
    %c0_142 = arith.constant 0 : index
    %260 = tpu.strided_load %arg21[%c26, %c0_142] {strides = array<i32: 42, 1>} : memref<84x128xf32, #tpu.memory_space<vmem>>, vector<2x128xf32>
    %c27 = arith.constant 27 : index
    %c0_143 = arith.constant 0 : index
    %261 = tpu.strided_load %arg21[%c27, %c0_143] {strides = array<i32: 42, 1>} : memref<84x128xf32, #tpu.memory_space<vmem>>, vector<2x128xf32>
    %262 = arith.maximumf %260, %261 : vector<2x128xf32>
    %263 = arith.truncf %262 : vector<2x128xf32> to vector<2x128xbf16>
    %c13_144 = arith.constant 13 : index
    %c0_145 = arith.constant 0 : index
    %c0_146 = arith.constant 0 : index
    %264 = vector.load %arg10[%c13_144, %c0_145, %c0_146] : memref<21x128x256xbf16, #tpu.memory_space<vmem>>, vector<1x128x256xbf16>
    %265 = vector.shape_cast %264 : vector<1x128x256xbf16> to vector<128x256xbf16>
    %cst_147 = arith.constant dense<0.000000e+00> : vector<2x256xf32>
    %266 = tpu.matmul %263, %265, %cst_147 {dimension_numbers = #tpu.dot_dimension_numbers<[1], [0], [0], [1], [0, 0, 1, 1], [], []>} : vector<2x128xbf16>, vector<128x256xbf16>, vector<2x256xf32> -> vector<2x256xf32>
    %267 = arith.addf %259, %266 : vector<2x256xf32>
    %c28 = arith.constant 28 : index
    %c0_148 = arith.constant 0 : index
    %268 = tpu.strided_load %arg21[%c28, %c0_148] {strides = array<i32: 42, 1>} : memref<84x128xf32, #tpu.memory_space<vmem>>, vector<2x128xf32>
    %c29 = arith.constant 29 : index
    %c0_149 = arith.constant 0 : index
    %269 = tpu.strided_load %arg21[%c29, %c0_149] {strides = array<i32: 42, 1>} : memref<84x128xf32, #tpu.memory_space<vmem>>, vector<2x128xf32>
    %270 = arith.maximumf %268, %269 : vector<2x128xf32>
    %271 = arith.truncf %270 : vector<2x128xf32> to vector<2x128xbf16>
    %c14_150 = arith.constant 14 : index
    %c0_151 = arith.constant 0 : index
    %c0_152 = arith.constant 0 : index
    %272 = vector.load %arg10[%c14_150, %c0_151, %c0_152] : memref<21x128x256xbf16, #tpu.memory_space<vmem>>, vector<1x128x256xbf16>
    %273 = vector.shape_cast %272 : vector<1x128x256xbf16> to vector<128x256xbf16>
    %cst_153 = arith.constant dense<0.000000e+00> : vector<2x256xf32>
    %274 = tpu.matmul %271, %273, %cst_153 {dimension_numbers = #tpu.dot_dimension_numbers<[1], [0], [0], [1], [0, 0, 1, 1], [], []>} : vector<2x128xbf16>, vector<128x256xbf16>, vector<2x256xf32> -> vector<2x256xf32>
    %275 = arith.addf %267, %274 : vector<2x256xf32>
    %c30 = arith.constant 30 : index
    %c0_154 = arith.constant 0 : index
    %276 = tpu.strided_load %arg21[%c30, %c0_154] {strides = array<i32: 42, 1>} : memref<84x128xf32, #tpu.memory_space<vmem>>, vector<2x128xf32>
    %c31 = arith.constant 31 : index
    %c0_155 = arith.constant 0 : index
    %277 = tpu.strided_load %arg21[%c31, %c0_155] {strides = array<i32: 42, 1>} : memref<84x128xf32, #tpu.memory_space<vmem>>, vector<2x128xf32>
    %278 = arith.maximumf %276, %277 : vector<2x128xf32>
    %279 = arith.truncf %278 : vector<2x128xf32> to vector<2x128xbf16>
    %c15_156 = arith.constant 15 : index
    %c0_157 = arith.constant 0 : index
    %c0_158 = arith.constant 0 : index
    %280 = vector.load %arg10[%c15_156, %c0_157, %c0_158] : memref<21x128x256xbf16, #tpu.memory_space<vmem>>, vector<1x128x256xbf16>
    %281 = vector.shape_cast %280 : vector<1x128x256xbf16> to vector<128x256xbf16>
    %cst_159 = arith.constant dense<0.000000e+00> : vector<2x256xf32>
    %282 = tpu.matmul %279, %281, %cst_159 {dimension_numbers = #tpu.dot_dimension_numbers<[1], [0], [0], [1], [0, 0, 1, 1], [], []>} : vector<2x128xbf16>, vector<128x256xbf16>, vector<2x256xf32> -> vector<2x256xf32>
    %283 = arith.addf %275, %282 : vector<2x256xf32>
    %c32 = arith.constant 32 : index
    %c0_160 = arith.constant 0 : index
    %284 = tpu.strided_load %arg21[%c32, %c0_160] {strides = array<i32: 42, 1>} : memref<84x128xf32, #tpu.memory_space<vmem>>, vector<2x128xf32>
    %c33 = arith.constant 33 : index
    %c0_161 = arith.constant 0 : index
    %285 = tpu.strided_load %arg21[%c33, %c0_161] {strides = array<i32: 42, 1>} : memref<84x128xf32, #tpu.memory_space<vmem>>, vector<2x128xf32>
    %286 = arith.maximumf %284, %285 : vector<2x128xf32>
    %287 = arith.truncf %286 : vector<2x128xf32> to vector<2x128xbf16>
    %c16_162 = arith.constant 16 : index
    %c0_163 = arith.constant 0 : index
    %c0_164 = arith.constant 0 : index
    %288 = vector.load %arg10[%c16_162, %c0_163, %c0_164] : memref<21x128x256xbf16, #tpu.memory_space<vmem>>, vector<1x128x256xbf16>
    %289 = vector.shape_cast %288 : vector<1x128x256xbf16> to vector<128x256xbf16>
    %cst_165 = arith.constant dense<0.000000e+00> : vector<2x256xf32>
    %290 = tpu.matmul %287, %289, %cst_165 {dimension_numbers = #tpu.dot_dimension_numbers<[1], [0], [0], [1], [0, 0, 1, 1], [], []>} : vector<2x128xbf16>, vector<128x256xbf16>, vector<2x256xf32> -> vector<2x256xf32>
    %291 = arith.addf %283, %290 : vector<2x256xf32>
    %c34 = arith.constant 34 : index
    %c0_166 = arith.constant 0 : index
    %292 = tpu.strided_load %arg21[%c34, %c0_166] {strides = array<i32: 42, 1>} : memref<84x128xf32, #tpu.memory_space<vmem>>, vector<2x128xf32>
    %c35 = arith.constant 35 : index
    %c0_167 = arith.constant 0 : index
    %293 = tpu.strided_load %arg21[%c35, %c0_167] {strides = array<i32: 42, 1>} : memref<84x128xf32, #tpu.memory_space<vmem>>, vector<2x128xf32>
    %294 = arith.maximumf %292, %293 : vector<2x128xf32>
    %295 = arith.truncf %294 : vector<2x128xf32> to vector<2x128xbf16>
    %c17_168 = arith.constant 17 : index
    %c0_169 = arith.constant 0 : index
    %c0_170 = arith.constant 0 : index
    %296 = vector.load %arg10[%c17_168, %c0_169, %c0_170] : memref<21x128x256xbf16, #tpu.memory_space<vmem>>, vector<1x128x256xbf16>
    %297 = vector.shape_cast %296 : vector<1x128x256xbf16> to vector<128x256xbf16>
    %cst_171 = arith.constant dense<0.000000e+00> : vector<2x256xf32>
    %298 = tpu.matmul %295, %297, %cst_171 {dimension_numbers = #tpu.dot_dimension_numbers<[1], [0], [0], [1], [0, 0, 1, 1], [], []>} : vector<2x128xbf16>, vector<128x256xbf16>, vector<2x256xf32> -> vector<2x256xf32>
    %299 = arith.addf %291, %298 : vector<2x256xf32>
    %c36 = arith.constant 36 : index
    %c0_172 = arith.constant 0 : index
    %300 = tpu.strided_load %arg21[%c36, %c0_172] {strides = array<i32: 42, 1>} : memref<84x128xf32, #tpu.memory_space<vmem>>, vector<2x128xf32>
    %c37 = arith.constant 37 : index
    %c0_173 = arith.constant 0 : index
    %301 = tpu.strided_load %arg21[%c37, %c0_173] {strides = array<i32: 42, 1>} : memref<84x128xf32, #tpu.memory_space<vmem>>, vector<2x128xf32>
    %302 = arith.maximumf %300, %301 : vector<2x128xf32>
    %303 = arith.truncf %302 : vector<2x128xf32> to vector<2x128xbf16>
    %c18_174 = arith.constant 18 : index
    %c0_175 = arith.constant 0 : index
    %c0_176 = arith.constant 0 : index
    %304 = vector.load %arg10[%c18_174, %c0_175, %c0_176] : memref<21x128x256xbf16, #tpu.memory_space<vmem>>, vector<1x128x256xbf16>
    %305 = vector.shape_cast %304 : vector<1x128x256xbf16> to vector<128x256xbf16>
    %cst_177 = arith.constant dense<0.000000e+00> : vector<2x256xf32>
    %306 = tpu.matmul %303, %305, %cst_177 {dimension_numbers = #tpu.dot_dimension_numbers<[1], [0], [0], [1], [0, 0, 1, 1], [], []>} : vector<2x128xbf16>, vector<128x256xbf16>, vector<2x256xf32> -> vector<2x256xf32>
    %307 = arith.addf %299, %306 : vector<2x256xf32>
    %c38 = arith.constant 38 : index
    %c0_178 = arith.constant 0 : index
    %308 = tpu.strided_load %arg21[%c38, %c0_178] {strides = array<i32: 42, 1>} : memref<84x128xf32, #tpu.memory_space<vmem>>, vector<2x128xf32>
    %c39 = arith.constant 39 : index
    %c0_179 = arith.constant 0 : index
    %309 = tpu.strided_load %arg21[%c39, %c0_179] {strides = array<i32: 42, 1>} : memref<84x128xf32, #tpu.memory_space<vmem>>, vector<2x128xf32>
    %310 = arith.maximumf %308, %309 : vector<2x128xf32>
    %311 = arith.truncf %310 : vector<2x128xf32> to vector<2x128xbf16>
    %c19_180 = arith.constant 19 : index
    %c0_181 = arith.constant 0 : index
    %c0_182 = arith.constant 0 : index
    %312 = vector.load %arg10[%c19_180, %c0_181, %c0_182] : memref<21x128x256xbf16, #tpu.memory_space<vmem>>, vector<1x128x256xbf16>
    %313 = vector.shape_cast %312 : vector<1x128x256xbf16> to vector<128x256xbf16>
    %cst_183 = arith.constant dense<0.000000e+00> : vector<2x256xf32>
    %314 = tpu.matmul %311, %313, %cst_183 {dimension_numbers = #tpu.dot_dimension_numbers<[1], [0], [0], [1], [0, 0, 1, 1], [], []>} : vector<2x128xbf16>, vector<128x256xbf16>, vector<2x256xf32> -> vector<2x256xf32>
    %315 = arith.addf %307, %314 : vector<2x256xf32>
    %c40 = arith.constant 40 : index
    %c0_184 = arith.constant 0 : index
    %316 = tpu.strided_load %arg21[%c40, %c0_184] {strides = array<i32: 42, 1>} : memref<84x128xf32, #tpu.memory_space<vmem>>, vector<2x128xf32>
    %c41 = arith.constant 41 : index
    %c0_185 = arith.constant 0 : index
    %317 = tpu.strided_load %arg21[%c41, %c0_185] {strides = array<i32: 42, 1>} : memref<84x128xf32, #tpu.memory_space<vmem>>, vector<2x128xf32>
    %318 = arith.maximumf %316, %317 : vector<2x128xf32>
    %319 = arith.truncf %318 : vector<2x128xf32> to vector<2x128xbf16>
    %c20_186 = arith.constant 20 : index
    %c0_187 = arith.constant 0 : index
    %c0_188 = arith.constant 0 : index
    %320 = vector.load %arg10[%c20_186, %c0_187, %c0_188] : memref<21x128x256xbf16, #tpu.memory_space<vmem>>, vector<1x128x256xbf16>
    %321 = vector.shape_cast %320 : vector<1x128x256xbf16> to vector<128x256xbf16>
    %cst_189 = arith.constant dense<0.000000e+00> : vector<2x256xf32>
    %322 = tpu.matmul %319, %321, %cst_189 {dimension_numbers = #tpu.dot_dimension_numbers<[1], [0], [0], [1], [0, 0, 1, 1], [], []>} : vector<2x128xbf16>, vector<128x256xbf16>, vector<2x256xf32> -> vector<2x256xf32>
    %323 = arith.addf %315, %322 : vector<2x256xf32>
    %c0_190 = arith.constant 0 : index
    %c0_191 = arith.constant 0 : index
    %324 = vector.load %arg11[%c0_190, %c0_191] : memref<1x256xf32, #tpu.memory_space<vmem>>, vector<1x256xf32>
    %325 = vector.broadcast %324 : vector<1x256xf32> to vector<2x256xf32>
    %326 = arith.mulf %323, %325 : vector<2x256xf32>
    %c0_192 = arith.constant 0 : index
    %c0_193 = arith.constant 0 : index
    %327 = vector.load %arg12[%c0_192, %c0_193] : memref<1x256xf32, #tpu.memory_space<vmem>>, vector<1x256xf32>
    %328 = vector.broadcast %327 : vector<1x256xf32> to vector<2x256xf32>
    %329 = arith.addf %326, %328 : vector<2x256xf32>
    %cst_194 = arith.constant 0.000000e+00 : f32
    %330 = vector.broadcast %cst_194 : f32 to vector<2x256xf32>
    %331 = arith.maximumf %329, %330 : vector<2x256xf32>
    %332 = arith.truncf %331 : vector<2x256xf32> to vector<2x256xbf16>
    %c0_195 = arith.constant 0 : index
    %c0_196 = arith.constant 0 : index
    %333 = vector.load %arg13[%c0_195, %c0_196] : memref<256x128xbf16, #tpu.memory_space<vmem>>, vector<256x128xbf16>
    %cst_197 = arith.constant dense<0.000000e+00> : vector<2x128xf32>
    %334 = tpu.matmul %332, %333, %cst_197 {dimension_numbers = #tpu.dot_dimension_numbers<[1], [0], [0], [1], [0, 0, 1, 1], [], []>} : vector<2x256xbf16>, vector<256x128xbf16>, vector<2x128xf32> -> vector<2x128xf32>
    %c0_198 = arith.constant 0 : index
    %c0_199 = arith.constant 0 : index
    %335 = vector.load %arg14[%c0_198, %c0_199] : memref<1x128xf32, #tpu.memory_space<vmem>>, vector<1x128xf32>
    %336 = vector.broadcast %335 : vector<1x128xf32> to vector<2x128xf32>
    %337 = arith.mulf %334, %336 : vector<2x128xf32>
    %c0_200 = arith.constant 0 : index
    %c0_201 = arith.constant 0 : index
    %338 = vector.load %arg15[%c0_200, %c0_201] : memref<1x128xf32, #tpu.memory_space<vmem>>, vector<1x128xf32>
    %339 = vector.broadcast %338 : vector<1x128xf32> to vector<2x128xf32>
    %340 = arith.addf %337, %339 : vector<2x128xf32>
    %cst_202 = arith.constant 0.000000e+00 : f32
    %341 = vector.broadcast %cst_202 : f32 to vector<2x128xf32>
    %342 = arith.maximumf %340, %341 : vector<2x128xf32>
    %343 = arith.truncf %342 : vector<2x128xf32> to vector<2x128xbf16>
    %c0_203 = arith.constant 0 : index
    %c0_204 = arith.constant 0 : index
    %344 = vector.load %arg16[%c0_203, %c0_204] : memref<128x128xbf16, #tpu.memory_space<vmem>>, vector<128x128xbf16>
    %cst_205 = arith.constant dense<0.000000e+00> : vector<2x128xf32>
    %345 = tpu.matmul %343, %344, %cst_205 {dimension_numbers = #tpu.dot_dimension_numbers<[1], [0], [0], [1], [0, 0, 1, 1], [], []>} : vector<2x128xbf16>, vector<128x128xbf16>, vector<2x128xf32> -> vector<2x128xf32>
    %c0_206 = arith.constant 0 : index
    %c0_207 = arith.constant 0 : index
    %346 = vector.load %arg17[%c0_206, %c0_207] : memref<1x128xf32, #tpu.memory_space<vmem>>, vector<1x128xf32>
    %347 = vector.broadcast %346 : vector<1x128xf32> to vector<2x128xf32>
    %348 = arith.addf %345, %347 : vector<2x128xf32>
    %c0_208 = arith.constant 0 : index
    %c0_209 = arith.constant 0 : index
    %349 = vector.load %arg18[%c0_208, %c0_209] : memref<2x128xf32, #tpu.memory_space<vmem>>, vector<2x128xf32>
    tpu.vector_store %arg18[%c0_208, %c0_209], %348 {strides = array<i32>} : memref<2x128xf32, #tpu.memory_space<vmem>>, vector<2x128xf32>,
    return
  }
}

</mosaic_0001>

<bundles_post_ra>
// kernel: cnn_forward.1
= control target key start
LH: loop header
LB: loop body
LE: loop exit
PB: predicated region body
PF: predicated region fallthrough
CT: control target
= control target key end

     0   :  { %s12792_s0 = inlined_call_operand.vmem [shape: f32[336,1], index: 0, kind: input, shape index: {}]   ;;  %s12793_s1 = inlined_call_operand.hbm [shape: f32[3,32], index: 1, kind: input, shape index: {}]   ;;  %s12794_s2 = inlined_call_operand.hbm [shape: f32[1,32], index: 2, kind: input, shape index: {}]   ;;  %s12795_s3 = inlined_call_operand.hbm [shape: f32[1,32], index: 3, kind: input, shape index: {}]   ;;  %s12796_s4 = inlined_call_operand.vmem [shape: bf16[96,64], index: 4, kind: input, shape index: {}]   ;;  %s12797_s5 = inlined_call_operand.hbm [shape: f32[1,64], index: 5, kind: input, shape index: {}]   ;;  %s12798_s6 = inlined_call_operand.hbm [shape: f32[1,64], index: 6, kind: input, shape index: {}]   ;;  %s12799_s7 = inlined_call_operand.hbm [shape: bf16[192,128], index: 7, kind: input, shape index: {}]   ;;  %s12800_s8 = inlined_call_operand.hbm [shape: f32[1,128], index: 8, kind: input, shape index: {}]   ;;  %s12801_s9 = inlined_call_operand.hbm [shape: f32[1,128], index: 9, kind: input, shape index: {}]   ;;  %s12802_s10 = inlined_call_operand.hbm [shape: bf16[21,128,256], index: 10, kind: input, shape index: {}]   ;;  %s12803_s11 = inlined_call_operand.hbm [shape: f32[1,256], index: 11, kind: input, shape index: {}]   ;;  %s12804_s12 = inlined_call_operand.hbm [shape: f32[1,256], index: 12, kind: input, shape index: {}]   ;;  %s12805_s13 = inlined_call_operand.hbm [shape: bf16[256,128], index: 13, kind: input, shape index: {}]   ;;  %s12806_s14 = inlined_call_operand.hbm [shape: f32[1,128], index: 14, kind: input, shape index: {}]   ;;  %s12807_s15 = inlined_call_operand.hbm [shape: f32[1,128], index: 15, kind: input, shape index: {}]   ;;  %s12808_s16 = inlined_call_operand.hbm [shape: bf16[128,128], index: 16, kind: input, shape index: {}]   ;;  %s12809_s17 = inlined_call_operand.hbm [shape: f32[1,128], index: 17, kind: input, shape index: {}]   ;;  %s12810_s18 = inlined_call_operand.hbm [shape: f32[2,128], index: 18, kind: output, shape index: {}]  }
   0x1   :  { %12898 = sst [smem:[#allocation90_spill]] %s12792_s0 }
   0x2   :  { %12899 = sst [smem:[#allocation91_spill]] %s12793_s1 }
   0x3   :  { %12900 = sst [smem:[#allocation92_spill]] %s12794_s2 }
   0x4   :  { %23 = vsyncpa [#allocation6], 0 }
   0x5   :  { %24 = vsyncpa [#allocation9], 0 }
   0x6   :  { %25 = vsyncpa [#allocation12], 0 }
   0x7   :  { %26 = vsyncpa [#allocation15], 0 }
   0x8   :  { %27 = vsyncpa [#allocation18], 0 }
   0x9   :  { %28 = vsyncpa [#allocation21], 0 }
   0xa   :  { %29 = vsyncpa [#allocation24], 0 }
   0xb   :  { %30 = vsyncpa [#allocation27], 0 }
   0xc   :  { %31 = vsyncpa [#allocation30], 0 }
   0xd   :  { %32 = vsyncpa [#allocation7], 0  ;;  %s9851_s27 = smov [#allocation8]   ;;  %s9852_s29 = smov [#allocation11]  }
   0xe   :  { %s51_s28 = sshll.u32 %s9851_s27, 4  ;;  %s73_s30 = sshll.u32 %s9852_s29, 4  ;;  %s52_s28 = int_to_ptr.vmem [resolvable:$true] %s51_s28  ;;  %s74_s30 = int_to_ptr.vmem [resolvable:$true] %s73_s30 }
   0xf   :  { %s12901_s1 = sld [smem:[#allocation92_spill]] }
  0x15   :  { %s9457_s20 = scalar_lea.hbm %s12901_s1, 16 }
  0x16   :  { %p9458_p0 = scmp.ne.s32.totalorder %s12901_s1, %s9457_s20  ;;  %p9461_p1 = scmp.lt.u32.totalorder %s9457_s20, %s12901_s1 }
  0x18   :  { %p9463_p2 = pnand %p9461_p1, %p9458_p0 }
  0x1a   :  { %9466 = shalt.err (!%p9463_p2)
}
  0x1b   :  { %s9467_s24 = scalar_lea.vmem %s52_s28, 16  ;;  %s9471_s25 = scalar_lea.vmem %s52_s28, 32 }
  0x1c   :  { %p9468_p3 = scmp.ne.s32.totalorder %s52_s28, %s9467_s24  ;;  %p9472_p4 = scmp.lt.s32.totalorder %s52_s28, %s52_s28 }
  0x1d   :  { %p9473_p5 = scmp.lt.s32.totalorder %s9471_s25, %s9467_s24 }
  0x1f   :  { %p9474_p6 = por %p9473_p5, %p9472_p4 }
  0x21   :  { %p9475_p7 = pnand %p9474_p6, %p9468_p3 }
  0x23   :  { %9478 = shalt.err (!%p9475_p7)
}
  0x24   :  { %54 = dma.hbm_to_vmem [thread:$0]  %s12901_s1, 16, %s52_s28, [#allocation9]  }
  0x25   :  { %s9479_s19 = scalar_lea.hbm %s12797_s5, 16 }
  0x26   :  { %p9480_p8 = scmp.ne.s32.totalorder %s12797_s5, %s9479_s19  ;;  %p9483_p9 = scmp.lt.u32.totalorder %s9479_s19, %s12797_s5 }
  0x28   :  { %p9485_p10 = pnand %p9483_p9, %p9480_p8 }
  0x2a   :  { %9488 = shalt.err (!%p9485_p10)
}
  0x2b   :  { %s9489_s23 = scalar_lea.vmem %s74_s30, 16  ;;  %s9493_s24 = scalar_lea.vmem %s74_s30, 32 }
  0x2c   :  { %p9490_p11 = scmp.ne.s32.totalorder %s74_s30, %s9489_s23  ;;  %p9494_p12 = scmp.lt.s32.totalorder %s74_s30, %s74_s30 }
  0x2d   :  { %p9495_p13 = scmp.lt.s32.totalorder %s9493_s24, %s9489_s23 }
  0x2f   :  { %p9496_p0 = por %p9495_p13, %p9494_p12 }
  0x31   :  { %p9497_p1 = pnand %p9496_p0, %p9490_p11 }
  0x33   :  { %9500 = shalt.err (!%p9497_p1)
}
  0x34   :  { %76 = dma.hbm_to_vmem [thread:$0]  %s12797_s5, 16, %s74_s30, [#allocation12]  }
  0x35   :  { %s9853_s25 = smov [#allocation14]   ;;  %s9501_s0 = scalar_lea.hbm %s12799_s7, 1536 }
  0x36   :  { %s92_s26 = sshll.u32 %s9853_s25, 4  ;;  %p9502_p2 = scmp.ne.s32.totalorder %s12799_s7, %s9501_s0  ;;  %s93_s26 = int_to_ptr.vmem [resolvable:$true] %s92_s26 }
  0x37   :  { %p9505_p3 = scmp.lt.u32.totalorder %s9501_s0, %s12799_s7 }
  0x39   :  { %p9507_p4 = pnand %p9505_p3, %p9502_p2 }
  0x3b   :  { %9510 = shalt.err (!%p9507_p4)
}
  0x3c   :  { %s9511_s2 = scalar_lea.vmem %s93_s26, 1536  ;;  %p9516_p6 = scmp.lt.s32.totalorder %s93_s26, %s93_s26 }
  0x3d   :  { %p9512_p5 = scmp.ne.s32.totalorder %s93_s26, %s9511_s2  ;;  %p9517_p7 = scmp.lt.s32.totalorder %s9511_s2, %s9511_s2 }
  0x3f   :  { %p9518_p8 = por %p9517_p7, %p9516_p6 }
  0x41   :  { %p9519_p9 = pnand %p9518_p8, %p9512_p5 }
  0x43   :  { %9522 = shalt.err (!%p9519_p9)
}
  0x44   :  { %s9854_s5 = smov 64   ;;  %s9855_s30 = smov 4  }
  0x45   :  { %98 = dma.hbm_to_vmem [thread:$0]  %s12799_s7, 1536, %s93_s26, [#allocation15], %s9854_s5, %s9854_s5, %s9855_s30  }
  0x46   :  { %s9856_s28 = smov [#allocation17]   ;;  %s9857_s25 = smov [#allocation20]  }
  0x47   :  { %s115_s1 = sshll.u32 %s9856_s28, 4  ;;  %s137_s27 = sshll.u32 %s9857_s25, 4  ;;  %s116_s1 = int_to_ptr.vmem [resolvable:$true] %s115_s1  ;;  %s138_s27 = int_to_ptr.vmem [resolvable:$true] %s137_s27 }
  0x48   :  { %s9523_s19 = scalar_lea.hbm %s12801_s9, 16 }
  0x49   :  { %p9524_p10 = scmp.ne.s32.totalorder %s12801_s9, %s9523_s19  ;;  %p9527_p11 = scmp.lt.u32.totalorder %s9523_s19, %s12801_s9 }
  0x4b   :  { %p9529_p12 = pnand %p9527_p11, %p9524_p10 }
  0x4d   :  { %9532 = shalt.err (!%p9529_p12)
}
  0x4e   :  { %s9533_s7 = scalar_lea.vmem %s116_s1, 16  ;;  %s9537_s26 = scalar_lea.vmem %s116_s1, 32 }
  0x4f   :  { %p9534_p13 = scmp.ne.s32.totalorder %s116_s1, %s9533_s7  ;;  %p9538_p0 = scmp.lt.s32.totalorder %s116_s1, %s116_s1 }
  0x50   :  { %p9539_p1 = scmp.lt.s32.totalorder %s9537_s26, %s9533_s7 }
  0x52   :  { %p9540_p2 = por %p9539_p1, %p9538_p0 }
  0x54   :  { %p9541_p3 = pnand %p9540_p2, %p9534_p13 }
  0x56   :  { %9544 = shalt.err (!%p9541_p3)
}
  0x57   :  { %118 = dma.hbm_to_vmem [thread:$0]  %s12801_s9, 16, %s116_s1, [#allocation18]  }
  0x58   :  { %s9545_s29 = scalar_lea.hbm %s12803_s11, 32 }
  0x59   :  { %p9546_p4 = scmp.ne.s32.totalorder %s12803_s11, %s9545_s29  ;;  %p9549_p5 = scmp.lt.u32.totalorder %s9545_s29, %s12803_s11 }
  0x5b   :  { %p9551_p6 = pnand %p9549_p5, %p9546_p4 }
  0x5d   :  { %9554 = shalt.err (!%p9551_p6)
}
  0x5e   :  { %s9555_s22 = scalar_lea.vmem %s138_s27, 32  ;;  %p9560_p8 = scmp.lt.s32.totalorder %s138_s27, %s138_s27 }
  0x5f   :  { %p9556_p7 = scmp.ne.s32.totalorder %s138_s27, %s9555_s22  ;;  %p9561_p9 = scmp.lt.s32.totalorder %s9555_s22, %s9555_s22 }
  0x61   :  { %p9562_p10 = por %p9561_p9, %p9560_p8 }
  0x63   :  { %p9563_p11 = pnand %p9562_p10, %p9556_p7 }
  0x65   :  { %9566 = shalt.err (!%p9563_p11)
}
  0x66   :  { %140 = dma.hbm_to_vmem [thread:$0]  %s12803_s11, 32, %s138_s27, [#allocation21]  }
  0x67   :  { %s9858_s2 = smov [#allocation23]   ;;  %s9859_s26 = smov [#allocation26]  }
  0x68   :  { %s156_s7 = sshll.u32 %s9858_s2, 4  ;;  %s179_s23 = sshll.u32 %s9859_s26, 4  ;;  %s157_s7 = int_to_ptr.vmem [resolvable:$true] %s156_s7  ;;  %s180_s23 = int_to_ptr.vmem [resolvable:$true] %s179_s23 }
  0x69   :  { %s9567_s25 = scalar_lea.hbm %s12805_s13, 2048 }
  0x6a   :  { %p9568_p12 = scmp.ne.s32.totalorder %s12805_s13, %s9567_s25  ;;  %p9571_p13 = scmp.lt.u32.totalorder %s9567_s25, %s12805_s13 }
  0x6c   :  { %p9573_p0 = pnand %p9571_p13, %p9568_p12 }
  0x6e   :  { %9576 = shalt.err (!%p9573_p0)
}
  0x6f   :  { %s9577_s11 = scalar_lea.vmem %s157_s7, 2048  ;;  %p9582_p2 = scmp.lt.s32.totalorder %s157_s7, %s157_s7 }
  0x70   :  { %p9578_p1 = scmp.ne.s32.totalorder %s157_s7, %s9577_s11  ;;  %p9583_p3 = scmp.lt.s32.totalorder %s9577_s11, %s9577_s11 }
  0x72   :  { %p9584_p4 = por %p9583_p3, %p9582_p2 }
  0x74   :  { %p9585_p5 = pnand %p9584_p4, %p9578_p1 }
  0x76   :  { %9588 = shalt.err (!%p9585_p5)
}
  0x77   :  { %162 = dma.hbm_to_vmem [thread:$0]  %s12805_s13, 2048, %s157_s7, [#allocation24], %s9854_s5, %s9854_s5, %s9855_s30  }
  0x78   :  { %s9589_s1 = scalar_lea.hbm %s12807_s15, 16 }
  0x79   :  { %p9590_p6 = scmp.ne.s32.totalorder %s12807_s15, %s9589_s1  ;;  %p9593_p7 = scmp.lt.u32.totalorder %s9589_s1, %s12807_s15 }
  0x7b   :  { %p9595_p8 = pnand %p9593_p7, %p9590_p6 }
  0x7d   :  { %9598 = shalt.err (!%p9595_p8)
}
  0x7e   :  { %s9599_s25 = scalar_lea.vmem %s180_s23, 16  ;;  %s9603_s29 = scalar_lea.vmem %s180_s23, 32 }
  0x7f   :  { %p9600_p9 = scmp.ne.s32.totalorder %s180_s23, %s9599_s25  ;;  %p9604_p10 = scmp.lt.s32.totalorder %s180_s23, %s180_s23 }
  0x80   :  { %p9605_p11 = scmp.lt.s32.totalorder %s9603_s29, %s9599_s25 }
  0x82   :  { %p9606_p12 = por %p9605_p11, %p9604_p10 }
  0x84   :  { %p9607_p13 = pnand %p9606_p12, %p9600_p9 }
  0x86   :  { %9610 = shalt.err (!%p9607_p13)
}
  0x87   :  { %182 = dma.hbm_to_vmem [thread:$0]  %s12807_s15, 16, %s180_s23, [#allocation27]  }
  0x88   :  { %s9860_s0 = smov [#allocation5]   ;;  %s9861_s21 = smov [#allocation10]  }
  0x89   :  { %s41_s19 = sshll.u32 %s9860_s0, 4  ;;  %s61_s11 = sshll.u32 %s9861_s21, 4  ;;  %s42_s19 = int_to_ptr.vmem [resolvable:$true] %s41_s19  ;;  %s62_s11 = int_to_ptr.vmem [resolvable:$true] %s61_s11 }
  0x8a   :  { %s12902_s22 = sld [smem:[#allocation91_spill]] }
  0x90   :  { %s9611_s9 = scalar_lea.hbm %s12902_s22, 64 }
  0x91   :  { %p9612_p0 = scmp.ne.s32.totalorder %s12902_s22, %s9611_s9  ;;  %p9615_p1 = scmp.lt.u32.totalorder %s9611_s9, %s12902_s22 }
  0x93   :  { %p9617_p2 = pnand %p9615_p1, %p9612_p0 }
  0x95   :  { %9620 = shalt.err (!%p9617_p2)
}
  0x96   :  { %s9621_s15 = scalar_lea.vmem %s42_s19, 64  ;;  %p9626_p4 = scmp.lt.s32.totalorder %s42_s19, %s42_s19 }
  0x97   :  { %p9622_p3 = scmp.ne.s32.totalorder %s42_s19, %s9621_s15  ;;  %p9627_p5 = scmp.lt.s32.totalorder %s9621_s15, %s9621_s15 }
  0x99   :  { %p9628_p6 = por %p9627_p5, %p9626_p4 }
  0x9b   :  { %p9629_p7 = pnand %p9628_p6, %p9622_p3 }
  0x9d   :  { %9632 = shalt.err (!%p9629_p7)
}
  0x9e   :  { %44 = dma.hbm_to_vmem [thread:$0]  %s12902_s22, 64, %s42_s19, [#allocation6]  }
  0x9f   :  { %s9633_s13 = scalar_lea.hbm %s12795_s3, 16 }
  0xa0   :  { %p9634_p8 = scmp.ne.s32.totalorder %s12795_s3, %s9633_s13  ;;  %p9637_p9 = scmp.lt.u32.totalorder %s9633_s13, %s12795_s3 }
  0xa2   :  { %p9639_p10 = pnand %p9637_p9, %p9634_p8 }
  0xa4   :  { %9642 = shalt.err (!%p9639_p10)
}
  0xa5   :  { %s9643_s20 = scalar_lea.vmem %s62_s11, 16  ;;  %s9647_s9 = scalar_lea.vmem %s62_s11, 32 }
  0xa6   :  { %p9644_p11 = scmp.ne.s32.totalorder %s62_s11, %s9643_s20  ;;  %p9648_p12 = scmp.lt.s32.totalorder %s62_s11, %s62_s11 }
  0xa7   :  { %p9649_p13 = scmp.lt.s32.totalorder %s9647_s9, %s9643_s20 }
  0xa9   :  { %p9650_p0 = por %p9649_p13, %p9648_p12 }
  0xab   :  { %p9651_p1 = pnand %p9650_p0, %p9644_p11 }
  0xad   :  { %9654 = shalt.err (!%p9651_p1)
}
  0xae   :  { %64 = dma.hbm_to_vmem [thread:$0]  %s12795_s3, 16, %s62_s11, [#allocation9]  }
  0xaf   :  { %s9862_s1 = smov [#allocation13]   ;;  %s9863_s26 = smov [#allocation16]  }
  0xb0   :  { %s83_s2 = sshll.u32 %s9862_s1, 4  ;;  %s105_s24 = sshll.u32 %s9863_s26, 4  ;;  %s84_s2 = int_to_ptr.vmem [resolvable:$true] %s83_s2  ;;  %s106_s24 = int_to_ptr.vmem [resolvable:$true] %s105_s24 }
  0xb1   :  { %s9655_s28 = scalar_lea.hbm %s12798_s6, 16 }
  0xb2   :  { %p9656_p2 = scmp.ne.s32.totalorder %s12798_s6, %s9655_s28  ;;  %p9659_p3 = scmp.lt.u32.totalorder %s9655_s28, %s12798_s6 }
  0xb4   :  { %p9661_p4 = pnand %p9659_p3, %p9656_p2 }
  0xb6   :  { %9664 = shalt.err (!%p9661_p4)
}
  0xb7   :  { %s9665_s3 = scalar_lea.vmem %s84_s2, 16  ;;  %s9669_s11 = scalar_lea.vmem %s84_s2, 32 }
  0xb8   :  { %p9666_p5 = scmp.ne.s32.totalorder %s84_s2, %s9665_s3  ;;  %p9670_p6 = scmp.lt.s32.totalorder %s84_s2, %s84_s2 }
  0xb9   :  { %p9671_p7 = scmp.lt.s32.totalorder %s9669_s11, %s9665_s3 }
  0xbb   :  { %p9672_p8 = por %p9671_p7, %p9670_p6 }
  0xbd   :  { %p9673_p9 = pnand %p9672_p8, %p9666_p5 }
  0xbf   :  { %9676 = shalt.err (!%p9673_p9)
}
  0xc0   :  { %86 = dma.hbm_to_vmem [thread:$0]  %s12798_s6, 16, %s84_s2, [#allocation12]  }
  0xc1   :  { %s9677_s9 = scalar_lea.hbm %s12800_s8, 16 }
  0xc2   :  { %p9678_p10 = scmp.ne.s32.totalorder %s12800_s8, %s9677_s9  ;;  %p9681_p11 = scmp.lt.u32.totalorder %s9677_s9, %s12800_s8 }
  0xc4   :  { %p9683_p12 = pnand %p9681_p11, %p9678_p10 }
  0xc6   :  { %9686 = shalt.err (!%p9683_p12)
}
  0xc7   :  { %s9687_s15 = scalar_lea.vmem %s106_s24, 16  ;;  %s9691_s23 = scalar_lea.vmem %s106_s24, 32 }
  0xc8   :  { %p9688_p13 = scmp.ne.s32.totalorder %s106_s24, %s9687_s15  ;;  %p9692_p0 = scmp.lt.s32.totalorder %s106_s24, %s106_s24 }
  0xc9   :  { %p9693_p1 = scmp.lt.s32.totalorder %s9691_s23, %s9687_s15 }
  0xcb   :  { %p9694_p2 = por %p9693_p1, %p9692_p0 }
  0xcd   :  { %p9695_p3 = pnand %p9694_p2, %p9688_p13 }
  0xcf   :  { %9698 = shalt.err (!%p9695_p3)
}
  0xd0   :  { %108 = dma.hbm_to_vmem [thread:$0]  %s12800_s8, 16, %s106_s24, [#allocation15]  }
  0xd1   :  { %s9864_s28 = smov [#allocation19]   ;;  %s9699_s7 = scalar_lea.hbm %s12802_s10, 43008 }
  0xd2   :  { %s124_s25 = sshll.u32 %s9864_s28, 4  ;;  %p9700_p4 = scmp.ne.s32.totalorder %s12802_s10, %s9699_s7  ;;  %s125_s25 = int_to_ptr.vmem [resolvable:$true] %s124_s25 }
  0xd3   :  { %p9703_p5 = scmp.lt.u32.totalorder %s9699_s7, %s12802_s10 }
  0xd5   :  { %p9705_p6 = pnand %p9703_p5, %p9700_p4 }
  0xd7   :  { %9708 = shalt.err (!%p9705_p6)
}
  0xd8   :  { %s9709_s27 = scalar_lea.vmem %s125_s25, 43008  ;;  %p9714_p8 = scmp.lt.s32.totalorder %s125_s25, %s125_s25 }
  0xd9   :  { %p9710_p7 = scmp.ne.s32.totalorder %s125_s25, %s9709_s27  ;;  %p9715_p9 = scmp.lt.s32.totalorder %s9709_s27, %s9709_s27 }
  0xdb   :  { %p9716_p10 = por %p9715_p9, %p9714_p8 }
  0xdd   :  { %p9717_p11 = pnand %p9716_p10, %p9710_p7 }
  0xdf   :  { %9720 = shalt.err (!%p9717_p11)
}
  0xe0   :  { %s9865_s8 = smov 128   ;;  %s9866_s24 = smov 8  }
  0xe1   :  { %130 = dma.hbm_to_vmem [thread:$0]  %s12802_s10, 43008, %s125_s25, [#allocation18], %s9865_s8, %s9865_s8, %s9866_s24  }
  0xe2   :  { %s9867_s19 = smov [#allocation22]   ;;  %s9868_s1 = smov [#allocation25]  }
  0xe3   :  { %s147_s22 = sshll.u32 %s9867_s19, 4  ;;  %s169_s26 = sshll.u32 %s9868_s1, 4  ;;  %s148_s22 = int_to_ptr.vmem [resolvable:$true] %s147_s22  ;;  %s170_s26 = int_to_ptr.vmem [resolvable:$true] %s169_s26 }
  0xe4   :  { %s9721_s6 = scalar_lea.hbm %s12804_s12, 32 }
  0xe5   :  { %p9722_p12 = scmp.ne.s32.totalorder %s12804_s12, %s9721_s6  ;;  %p9725_p13 = scmp.lt.u32.totalorder %s9721_s6, %s12804_s12 }
  0xe7   :  { %p9727_p0 = pnand %p9725_p13, %p9722_p12 }
  0xe9   :  { %9730 = shalt.err (!%p9727_p0)
}
  0xea   :  { %s9731_s10 = scalar_lea.vmem %s148_s22, 32  ;;  %p9736_p2 = scmp.lt.s32.totalorder %s148_s22, %s148_s22 }
  0xeb   :  { %p9732_p1 = scmp.ne.s32.totalorder %s148_s22, %s9731_s10  ;;  %p9737_p3 = scmp.lt.s32.totalorder %s9731_s10, %s9731_s10 }
  0xed   :  { %p9738_p4 = por %p9737_p3, %p9736_p2 }
  0xef   :  { %p9739_p5 = pnand %p9738_p4, %p9732_p1 }
  0xf1   :  { %9742 = shalt.err (!%p9739_p5)
}
  0xf2   :  { %150 = dma.hbm_to_vmem [thread:$0]  %s12804_s12, 32, %s148_s22, [#allocation21]  }
  0xf3   :  { %s9743_s0 = scalar_lea.hbm %s12806_s14, 16 }
  0xf4   :  { %p9744_p6 = scmp.ne.s32.totalorder %s12806_s14, %s9743_s0  ;;  %p9747_p7 = scmp.lt.u32.totalorder %s9743_s0, %s12806_s14 }
  0xf6   :  { %p9749_p8 = pnand %p9747_p7, %p9744_p6 }
  0xf8   :  { %9752 = shalt.err (!%p9749_p8)
}
  0xf9   :  { %s9753_s20 = scalar_lea.vmem %s170_s26, 16  ;;  %s9757_s9 = scalar_lea.vmem %s170_s26, 32 }
  0xfa   :  { %p9754_p9 = scmp.ne.s32.totalorder %s170_s26, %s9753_s20  ;;  %p9758_p10 = scmp.lt.s32.totalorder %s170_s26, %s170_s26 }
  0xfb   :  { %p9759_p11 = scmp.lt.s32.totalorder %s9757_s9, %s9753_s20 }
  0xfd   :  { %p9760_p12 = por %p9759_p11, %p9758_p10 }
  0xff   :  { %p9761_p13 = pnand %p9760_p12, %p9754_p9 }
 0x101   :  { %9764 = shalt.err (!%p9761_p13)
}
 0x102   :  { %172 = dma.hbm_to_vmem [thread:$0]  %s12806_s14, 16, %s170_s26, [#allocation24]  }
 0x103   :  { %s9869_s22 = smov [#allocation28]   ;;  %s9870_s15 = smov [#allocation29]  }
 0x104   :  { %s188_s1 = sshll.u32 %s9869_s22, 4  ;;  %s201_s23 = sshll.u32 %s9870_s15, 4  ;;  %s189_s1 = int_to_ptr.vmem [resolvable:$true] %s188_s1  ;;  %s202_s23 = int_to_ptr.vmem [resolvable:$true] %s201_s23 }
 0x105   :  { %s9765_s28 = scalar_lea.hbm %s12808_s16, 1024 }
 0x106   :  { %p9766_p0 = scmp.ne.s32.totalorder %s12808_s16, %s9765_s28  ;;  %p9769_p1 = scmp.lt.u32.totalorder %s9765_s28, %s12808_s16 }
 0x108   :  { %p9771_p2 = pnand %p9769_p1, %p9766_p0 }
 0x10a   :  { %9774 = shalt.err (!%p9771_p2)
}
 0x10b   :  { %s9775_s14 = scalar_lea.vmem %s189_s1, 1024  ;;  %p9780_p4 = scmp.lt.s32.totalorder %s189_s1, %s189_s1 }
 0x10c   :  { %p9776_p3 = scmp.ne.s32.totalorder %s189_s1, %s9775_s14  ;;  %p9781_p5 = scmp.lt.s32.totalorder %s9775_s14, %s9775_s14 }
 0x10e   :  { %p9782_p6 = por %p9781_p5, %p9780_p4 }
 0x110   :  { %p9783_p7 = pnand %p9782_p6, %p9776_p3 }
 0x112   :  { %9786 = shalt.err (!%p9783_p7)
}
 0x113   :  { %194 = dma.hbm_to_vmem [thread:$0]  %s12808_s16, 1024, %s189_s1, [#allocation27], %s9854_s5, %s9854_s5, %s9855_s30  }
 0x114   :  { %s9787_s0 = scalar_lea.hbm %s12809_s17, 16 }
 0x115   :  { %p9788_p8 = scmp.ne.s32.totalorder %s12809_s17, %s9787_s0  ;;  %p9791_p9 = scmp.lt.u32.totalorder %s9787_s0, %s12809_s17 }
 0x117   :  { %p9793_p10 = pnand %p9791_p9, %p9788_p8 }
 0x119   :  { %9796 = shalt.err (!%p9793_p10)
}
 0x11a   :  { %s9797_s20 = scalar_lea.vmem %s202_s23, 16  ;;  %s9801_s9 = scalar_lea.vmem %s202_s23, 32 }
 0x11b   :  { %p9798_p11 = scmp.ne.s32.totalorder %s202_s23, %s9797_s20  ;;  %p9802_p12 = scmp.lt.s32.totalorder %s202_s23, %s202_s23 }
 0x11c   :  { %p9803_p13 = scmp.lt.s32.totalorder %s9801_s9, %s9797_s20 }
 0x11e   :  { %p9804_p0 = por %p9803_p13, %p9802_p12 }
 0x120   :  { %p9805_p1 = pnand %p9804_p0, %p9798_p11 }
 0x122   :  { %9808 = shalt.err (!%p9805_p1)
}
 0x123   :  { %204 = dma.hbm_to_vmem [thread:$0]  %s12809_s17, 16, %s202_s23, [#allocation30]  }
 0x124   :  { %9831 = dma.done.wait [#allocation6], 64  }
 0x125   :  { %9832 = vsyncadd [#allocation6], 4294967232 }
 0x126   :  { %9833 = dma.done.wait [#allocation9], 32  }
 0x127   :  { %9834 = vsyncadd [#allocation9], 4294967264 }
 0x128   :  { %9835 = dma.done.wait [#allocation12], 32  }
 0x129   :  { %9836 = vsyncadd [#allocation12], 4294967264 }
 0x12a   :  { %9837 = dma.done.wait [#allocation15], 1552  }
 0x12b   :  { %9838 = vsyncadd [#allocation15], 4294965744 }
 0x12c   :  { %9839 = dma.done.wait [#allocation18], 43024  }
 0x12d   :  { %9840 = vsyncadd [#allocation18], 4294924272 }
 0x12e   :  { %9841 = dma.done.wait [#allocation21], 64  }
 0x12f   :  { %9842 = vsyncadd [#allocation21], 4294967232 }
 0x130   :  { %9843 = dma.done.wait [#allocation24], 2064  }
 0x131   :  { %9844 = vsyncadd [#allocation24], 4294965232 }
 0x132   :  { %9845 = dma.done.wait [#allocation27], 1040  }
 0x133   :  { %9846 = vsyncadd [#allocation27], 4294966256 }
 0x134   :  { %9847 = dma.done.wait [#allocation30], 16  }
 0x135   :  { %9848 = vsyncadd [#allocation30], 4294967280  ;;  %v592_v0 = vlaneseq  ;;  %v12818_v1 = vmov 0   ;;  %vm338_vm0 = vcmask 1040384   ;;  %s12907_s19 = sld [smem:[#allocation90_spill]]  ;;  %vm12896_vm6 = vcmask 1046528  }
 0x136   :  { %8780 = vset.pattern.permute.xlu1 %v12818_v1  ;;  %8779 = vset.pattern.permute.xlu0 %v12818_v1  ;;  %s9872_s3 = smov 32  }
 0x137   :  { %v10174_v2 = vshrl.u32 %v592_v0, 7  ;;  %5802 = vmatprep.mubr.bf16.mxu1 %v12818_v1 }
 0x139   :  { %12903 = vst [vmem:[#allocation42_spill] sm:$0xff] %v10174_v2  ;;  %v10178_v3 = vmul.u32.u64.low 3272356035, %v10174_v2  ;;  %v10179_v4 = vmul.u32.u64.high 3272356035, %v10174_v2, %v10178_v3  ;;  %v10182_v5 = vadd.s32 16, %v10174_v2  ;;  %v10185_v6 = vadd.s32 8, %v10174_v2 }
 0x13a   :  { %v10192_v9 = vadd.s32 24, %v10174_v2  ;;  %v10209_v14 = vadd.s32 32, %v10174_v2  ;;  %v10212_v15 = vadd.s32 40, %v10174_v2  ;;  %v10224_v19 = vadd.s32 48, %v10174_v2 }
 0x13b   :  { %12904 = vst [vmem:[#allocation43_spill] sm:$0xff] %v10182_v5  ;;  %12905 = vst [vmem:[#allocation44_spill] sm:$0xff] %v10185_v6  ;;  %vm641_vm1 = vc.u32 %v10178_v3, 3272356035  ;;  %v10188_v7 = vmul.u32.u64.low 3272356035, %v10182_v5  ;;  %v10189_v8 = vmul.u32.u64.high 3272356035, %v10182_v5, %v10188_v7 }
 0x13c   :  { %12906 = vst [vmem:[#allocation45_spill] sm:$0xff] %v10192_v9  ;;  %v10197_v10 = vld [vmem:[%s12907_s19 + $0x8] sm:$0xff]  ;;  %v10202_v11 = vld [vmem:[%s12907_s19] sm:$0xff]  ;;  %v10205_v12 = vmul.u32.u64.low 3272356035, %v10185_v6  ;;  %v10206_v13 = vmul.u32.u64.high 3272356035, %v10185_v6, %v10205_v12  ;;  %12908 = vst [vmem:[#allocation46_spill] sm:$0xff] %v10209_v14 }
 0x13d   :  { %12909 = vst [vmem:[#allocation47_spill] sm:$0xff] %v10212_v15  ;;  %1863 = vperm.xlu1 %8780, %v10197_v10   ;;  %1859 = vperm.xlu0 %8779, %v10202_v11   ;;  %v339_v16 = vrot.slane %v10202_v11, 7  ;;  %v10220_v17 = vld [vmem:[%s12907_s19 + $0x10] sm:$0xff]  ;;  %v642_v18 = vsel %vm641_vm1, 1, %v12818_v1  ;;  %12910 = vst [vmem:[#allocation48_spill] sm:$0xff] %v10224_v19  ;;  %v10227_v20 = vadd.s32 56, %v10174_v2 }
 0x13e   :  { %v340_v21 = vrot.slane %v10197_v10, 7  ;;  %v467_v22 = vrot.slane %v10197_v10, 1  ;;  %v466_v23 = vrot.slane %v10202_v11, 1  ;;  %v10235_v24 = vld [vmem:[%s12907_s19 + $0x18] sm:$0xff]  ;;  %v342_v25 = vrot.slane %v10220_v17, 7  ;;  %v10241_v26 = vld [vmem:[%s12907_s19 + $0x28] sm:$0xff] }
 0x13f   :  { %12911 = vst [vmem:[#allocation49_spill] sm:$0xff] %v10227_v20  ;;  %v344_v27 = vrot.slane %v10235_v24, 7  ;;  %v471_v28 = vrot.slane %v10235_v24, 1  ;;  %v469_v29 = vrot.slane %v10220_v17, 1  ;;  %v348_v30 = vrot.slane %v10241_v26, 7  ;;  %v10250_v31 = vld [vmem:[%s12907_s19 + $0x20] sm:$0xff] }
 0x140   :  { %v475_v32 = vrot.slane %v10241_v26, 1  ;;  %v346_v33 = vrot.slane %v10250_v31, 7  ;;  %v10255_v34 = vadd.s32 %v10179_v4, %v642_v18  ;;  %vm669_vm2 = vc.u32 %v10188_v7, 3272356035  ;;  %v10348_v10 = vld [vmem:[%s12907_s19 + $0x30] sm:$0xff] }
 0x141   :  { %1871 = vperm.xlu1 %8780, %v10235_v24   ;;  %1867 = vperm.xlu0 %8779, %v10220_v17   ;;  %v473_v35 = vrot.slane %v10250_v31, 1  ;;  %v464_v36 = vsel %vm338_vm0, 0.0, %v339_v16  ;;  %v670_v37 = vsel %vm669_vm2, 1, %v12818_v1  ;;  %vm655_vm3 = vc.u32 %v10205_v12, 3272356035 }
 0x142   :  { %12912 = vst [vmem:[#allocation50_spill] sm:$0xff] %v10255_v34  ;;  %v644_v38 = vshrl.u32 %v10255_v34, 7  ;;  %v343_v39 = vsel %vm338_vm0, %v340_v21, %v342_v25  ;;  %v10267_v40 = vadd.s32 %v10189_v8, %v670_v37  ;;  %v656_v41 = vsel %vm655_vm3, 1, %v12818_v1 }
 0x143   :  { %v341_v42 = vsel %vm338_vm0, %v339_v16, %v340_v21  ;;  %v10272_v43 = vadd.s32 %v10206_v13, %v656_v41  ;;  %v10275_v44 = vmul.u32.u64.low 3272356035, %v10192_v9  ;;  %v10276_v45 = vmul.u32.u64.high 3272356035, %v10192_v9, %v10275_v44 }
 0x144   :  { %12913 = vst [vmem:[#allocation51_spill] sm:$0xff] %v10267_v40  ;;  %v645_v46 = vmul.u32 168, %v644_v38  ;;  %v672_v47 = vshrl.u32 %v10267_v40, 7  ;;  %v10280_v48 = vmul.u32.u64.low 3272356035, %v10209_v14  ;;  %v10281_v49 = vmul.u32.u64.high 3272356035, %v10209_v14, %v10280_v48 }
 0x145   :  { %12914 = vst [vmem:[#allocation52_spill] sm:$0xff] %v10272_v43  ;;  %1879 = vperm.xlu1 %8780, %v10241_v26   ;;  %1875 = vperm.xlu0 %8779, %v10250_v31   ;;  %v658_v50 = vshrl.u32 %v10272_v43, 7  ;;  %vm683_vm4 = vc.u32 %v10275_v44, 3272356035  ;;  %v10287_v51 = vmul.u32.u64.low 3272356035, %v10212_v15  ;;  %v10288_v52 = vmul.u32.u64.high 3272356035, %v10212_v15, %v10287_v51 }
 0x146   :  { %v646_v53 = vsub.s32 %v10174_v2, %v645_v46  ;;  %v673_v54 = vmul.u32 168, %v672_v47  ;;  %v684_v55 = vsel %vm683_vm4, 1, %v12818_v1  ;;  %vm697_vm5 = vc.u32 %v10280_v48, 3272356035 }
 0x147   :  { %v659_v56 = vmul.u32 168, %v658_v50  ;;  %v10293_v57 = vadd.s32 %v10276_v45, %v684_v55  ;;  %v698_v58 = vsel %vm697_vm5, 1, %v12818_v1  ;;  %vm711_vm7 = vc.u32 %v10287_v51, 3272356035  ;;  %v10367_v55 = vld [vmem:[%s12907_s19 + $0x38] sm:$0xff] }
 0x148   :  { %vm1223_vm8 = vcmp.ne.s32.totalorder %v646_v53, 0  ;;  %vm1265_vm9 = vcmp.lt.s32.totalorder %v646_v53, 0  ;;  %v1349_v59 = vadd.s32 168, %v646_v53  ;;  %v674_v60 = vsub.s32 %v10182_v5, %v673_v54 }
 0x149   :  { %12915 = vst [vmem:[#allocation53_spill] sm:$0xff] %v10293_v57  ;;  %vm1307_vm10 = vmand %vm1265_vm9, %vm1223_vm8  ;;  %v660_v61 = vsub.s32 %v10185_v6, %v659_v56  ;;  %v686_v62 = vshrl.u32 %v10293_v57, 7  ;;  %v10300_v63 = vadd.s32 %v10281_v49, %v698_v58  ;;  %v712_v0 = vsel %vm711_vm7, 1, %v12818_v1 }
 0x14a   :  { %v10303_v3 = vsel %vm1307_vm10, %v1349_v59, %v646_v53  ;;  %vm1225_vm11 = vcmp.ne.s32.totalorder %v674_v60, 0  ;;  %vm1267_vm12 = vcmp.lt.s32.totalorder %v674_v60, 0  ;;  %v1351_v4 = vadd.s32 168, %v674_v60 }
 0x14b   :  { %12916 = vst [vmem:[#allocation54_spill] sm:$0xff] %v10300_v63  ;;  %vm1433_vm13 = vcmp.eq.s32.totalorder %v10303_v3, 0  ;;  %vm1309_vm14 = vmand %vm1267_vm12, %vm1225_vm11  ;;  %vm1224_vm15 = vcmp.ne.s32.totalorder %v660_v61, 0  ;;  %vm1266_vm1 = vcmp.lt.s32.totalorder %v660_v61, 0  ;;  %v1350_v7 = vadd.s32 168, %v660_v61 }
 0x14c   :  { %v1475_v8 = vsel %vm1433_vm13, 0.0, %v464_v36  ;;  %v1393_v12 = vsel %vm1309_vm14, %v1351_v4, %v674_v60  ;;  %vm1308_vm2 = vmand %vm1266_vm1, %vm1224_vm15  ;;  %v687_v13 = vmul.u32 168, %v686_v62  ;;  %v700_v16 = vshrl.u32 %v10300_v63, 7 }
 0x14d   :  { %1604 = vperm.xlu0 %8779, %v1475_v8   ;;  %vm1435_vm3 = vcmp.eq.s32.totalorder %v1393_v12, 0  ;;  %v1392_v18 = vsel %vm1308_vm2, %v1350_v7, %v660_v61  ;;  %v345_v21 = vsel %vm338_vm0, %v342_v25, %v344_v27  ;;  %v10313_v37 = vadd.s32 %v10288_v52, %v712_v0 }
 0x14e   :  { %v1477_v38 = vsel %vm1435_vm3, 0.0, %v343_v39  ;;  %vm1434_vm4 = vcmp.eq.s32.totalorder %v1392_v18, 0  ;;  %v688_v36 = vsub.s32 %v10192_v9, %v687_v13  ;;  %v701_v41 = vmul.u32 168, %v700_v16  ;;  %v10398_v16 = vld [vmem:[%s12907_s19 + $0x40] sm:$0xff] }
 0x14f   :  { %12917 = vst [vmem:[#allocation55_spill] sm:$0xff] %v10313_v37  ;;  %1614 = vperm.xlu1 %8780, %v1477_v38   ;;  %v1476_v44 = vsel %vm1434_vm4, 0.0, %v341_v42  ;;  %v347_v45 = vsel %vm338_vm0, %v344_v27, %v346_v33  ;;  %v349_v25 = vsel %vm338_vm0, %v346_v33, %v348_v30  ;;  %v714_v39 = vshrl.u32 %v10313_v37, 7 }
 0x150   :  { %vm1226_vm5 = vcmp.ne.s32.totalorder %v688_v36, 0  ;;  %vm1268_vm7 = vcmp.lt.s32.totalorder %v688_v36, 0  ;;  %v1352_v46 = vadd.s32 168, %v688_v36  ;;  %v702_v47 = vsub.s32 %v10209_v14, %v701_v41 }
 0x151   :  { %1609 = vperm.xlu0 %8779, %v1476_v44   ;;  %vm1310_vm8 = vmand %vm1268_vm7, %vm1226_vm5  ;;  %v715_v42 = vmul.u32 168, %v714_v39  ;;  %v468_v27 = vsel %vm12896_vm6, %v466_v23, %v467_v22  ;;  %vm1517_vm9 = vcmp.eq.s32.totalorder %v10303_v3, 167  ;;  %v470_v33 = vsel %vm12896_vm6, %v467_v22, %v469_v29 }
 0x152   :  { %v1394_v48 = vsel %vm1310_vm8, %v1352_v46, %v688_v36  ;;  %vm1227_vm10 = vcmp.ne.s32.totalorder %v702_v47, 0  ;;  %vm1269_vm11 = vcmp.lt.s32.totalorder %v702_v47, 0  ;;  %v1353_v49 = vadd.s32 168, %v702_v47 }
 0x153   :  { %vm1436_vm12 = vcmp.eq.s32.totalorder %v1394_v48, 0  ;;  %vm1311_vm13 = vmand %vm1269_vm11, %vm1227_vm10  ;;  %v716_v50 = vsub.s32 %v10212_v15, %v715_v42  ;;  %vm1518_vm14 = vcmp.eq.s32.totalorder %v1392_v18, 167  ;;  %v472_v11 = vsel %vm12896_vm6, %v469_v29, %v471_v28 }
 0x154   :  { %v1478_v22 = vsel %vm1436_vm12, 0.0, %v345_v21  ;;  %v1395_v23 = vsel %vm1311_vm13, %v1353_v49, %v702_v47  ;;  %vm1519_vm15 = vcmp.eq.s32.totalorder %v1393_v12, 167  ;;  %v474_v51 = vsel %vm12896_vm6, %v471_v28, %v473_v35 }
 0x155   :  { %1619 = vperm.xlu1 %8780, %v1478_v22   ;;  %vm1437_vm1 = vcmp.eq.s32.totalorder %v1395_v23, 0  ;;  %vm1228_vm2 = vcmp.ne.s32.totalorder %v716_v50, 0  ;;  %vm1270_vm3 = vcmp.lt.s32.totalorder %v716_v50, 0  ;;  %v1354_v17 = vadd.s32 168, %v716_v50 }
 0x156   :  { %v1479_v29 = vsel %vm1437_vm1, 0.0, %v347_v45  ;;  %vm1312_vm4 = vmand %vm1270_vm3, %vm1228_vm2  ;;  %vm1520_vm5 = vcmp.eq.s32.totalorder %v1394_v48, 167  ;;  %v476_v52 = vsel %vm12896_vm6, %v473_v35, %v475_v32  ;;  %vm1521_vm7 = vcmp.eq.s32.totalorder %v1395_v23, 167 }
 0x157   :  { %1624 = vperm.xlu0 %8779, %v1479_v29   ;;  %v1396_v53 = vsel %vm1312_vm4, %v1354_v17, %v716_v50  ;;  %v1559_v24 = vsel %vm1517_vm9, 0.0, %v468_v27  ;;  %v1560_v28 = vsel %vm1518_vm14, 0.0, %v470_v33  ;;  %v1561_v54 = vsel %vm1519_vm15, 0.0, %v472_v11 }
 0x158   :  { %vm1438_vm8 = vcmp.eq.s32.totalorder %v1396_v53, 0  ;;  %v1562_v56 = vsel %vm1520_vm5, 0.0, %v474_v51  ;;  %v1563_v31 = vsel %vm1521_vm7, 0.0, %v476_v52  ;;  %v477_v35 = vrot.slane %v10348_v10, 1 }
 0x159   :  { %v1480_v58 = vsel %vm1438_vm8, 0.0, %v349_v25  ;;  %v10371_v59 = vmul.u32.u64.low 3272356035, %v10224_v19  ;;  %v10372_v60 = vmul.u32.u64.high 3272356035, %v10224_v19, %v10371_v59  ;;  %vm1522_vm9 = vcmp.eq.s32.totalorder %v1396_v53, 167 }
 0x15a   :  { %1629 = vperm.xlu1 %8780, %v1480_v58   ;;  %v350_v61 = vrot.slane %v10348_v10, 7  ;;  %v10376_v62 = vmul.u32.u64.low 3272356035, %v10227_v20  ;;  %v10377_v0 = vmul.u32.u64.high 3272356035, %v10227_v20, %v10376_v62  ;;  %v10380_v3 = vadd.s32 64, %v10174_v2 }
 0x15b   :  { %2116 = vperm.xlu0 %8779, %v1559_v24   ;;  %vm725_vm10 = vc.u32 %v10371_v59, 3272356035  ;;  %v478_v4 = vsel %vm12896_vm6, %v475_v32, %v477_v35  ;;  %v352_v8 = vrot.slane %v10367_v55, 7  ;;  %v10390_v12 = vadd.s32 72, %v10174_v2  ;;  %v10407_v32 = vld [vmem:[%s12907_s19 + $0x48] sm:$0xff]  ;;  %v10447_v24 = vld [vmem:[%s12907_s19 + $0x50] sm:$0xff] }
 0x15c   :  { %12918 = vst [vmem:[#allocation56_spill] sm:$0xff] %v10380_v3  ;;  %v726_v7 = vsel %vm725_vm10, 1, %v12818_v1  ;;  %vm739_vm11 = vc.u32 %v10376_v62, 3272356035  ;;  %v10401_v18 = vmul.u32.u64.low 3272356035, %v10380_v3  ;;  %v10402_v21 = vmul.u32.u64.high 3272356035, %v10380_v3, %v10401_v18 }
 0x15d   :  { %12919 = vst [vmem:[#allocation57_spill] sm:$0xff] %v10390_v12  ;;  %v10393_v13 = vadd.s32 %v10372_v60, %v726_v7  ;;  %v740_v38 = vsel %vm739_vm11, 1, %v12818_v1  ;;  %v10411_v36 = vmul.u32.u64.low 3272356035, %v10390_v12  ;;  %v10412_v41 = vmul.u32.u64.high 3272356035, %v10390_v12, %v10411_v36 }
 0x15e   :  { %2121 = vperm.xlu1 %8780, %v1560_v28   ;;  %v1564_v44 = vsel %vm1522_vm9, 0.0, %v478_v4  ;;  %v10417_v25 = vadd.s32 %v10377_v0, %v740_v38  ;;  %vm753_vm12 = vc.u32 %v10401_v18, 3272356035  ;;  %v354_v39 = vrot.slane %v10398_v16, 7 }
 0x15f   :  { %12920 = vst [vmem:[#allocation58_spill] sm:$0xff] %v10393_v13  ;;  %2126 = vperm.xlu0 %8779, %v1561_v54   ;;  %v728_v45 = vshrl.u32 %v10393_v13, 7  ;;  %v754_v46 = vsel %vm753_vm12, 1, %v12818_v1  ;;  %v356_v47 = vrot.slane %v10407_v32, 7  ;;  %vm767_vm13 = vc.u32 %v10411_v36, 3272356035 }
 0x160   :  { %12921 = vst [vmem:[#allocation59_spill] sm:$0xff] %v10417_v25  ;;  %v742_v27 = vshrl.u32 %v10417_v25, 7  ;;  %v10424_v33 = vadd.s32 %v10402_v21, %v754_v46  ;;  %v768_v48 = vsel %vm767_vm13, 1, %v12818_v1  ;;  %v351_v49 = vsel %vm338_vm0, %v348_v30, %v350_v61  ;;  %v10464_v21 = vld [vmem:[%s12907_s19 + $0x58] sm:$0xff] }
 0x161   :  { %v729_v42 = vmul.u32 168, %v728_v45  ;;  %v10431_v50 = vadd.s32 %v10412_v41, %v768_v48  ;;  %v479_v11 = vrot.slane %v10367_v55, 1  ;;  %v481_v22 = vrot.slane %v10398_v16, 1 }
 0x162   :  { %12922 = vst [vmem:[#allocation60_spill] sm:$0xff] %v10424_v33  ;;  %2131 = vperm.xlu1 %8780, %v1562_v56   ;;  %v353_v51 = vsel %vm338_vm0, %v350_v61, %v352_v8  ;;  %v743_v17 = vmul.u32 168, %v742_v27  ;;  %v756_v29 = vshrl.u32 %v10424_v33, 7  ;;  %v355_v52 = vsel %vm338_vm0, %v352_v8, %v354_v39 }
 0x163   :  { %12923 = vst [vmem:[#allocation61_spill] sm:$0xff] %v10431_v50  ;;  %2136 = vperm.xlu0 %8779, %v1563_v31   ;;  %v730_v23 = vsub.s32 %v10224_v19, %v729_v42  ;;  %v357_v26 = vsel %vm338_vm0, %v354_v39, %v356_v47  ;;  %v770_v30 = vshrl.u32 %v10431_v50, 7  ;;  %v483_v53 = vrot.slane %v10407_v32, 1 }
 0x164   :  { %v744_v54 = vsub.s32 %v10227_v20, %v743_v17  ;;  %v757_v56 = vmul.u32 168, %v756_v29  ;;  %v480_v58 = vsel %vm12896_vm6, %v477_v35, %v479_v11  ;;  %v482_v59 = vsel %vm12896_vm6, %v479_v11, %v481_v22 }
 0x165   :  { %vm1229_vm14 = vcmp.ne.s32.totalorder %v730_v23, 0  ;;  %vm1271_vm15 = vcmp.lt.s32.totalorder %v730_v23, 0  ;;  %v1355_v28 = vadd.s32 168, %v730_v23  ;;  %v771_v31 = vmul.u32 168, %v770_v30 }
 0x166   :  { %2141 = vperm.xlu1 %8780, %v1564_v44   ;;  %vm1313_vm1 = vmand %vm1271_vm15, %vm1229_vm14  ;;  %vm1230_vm2 = vcmp.ne.s32.totalorder %v744_v54, 0  ;;  %vm1272_vm3 = vcmp.lt.s32.totalorder %v744_v54, 0  ;;  %v1356_v61 = vadd.s32 168, %v744_v54  ;;  %v758_v62 = vsub.s32 %v10380_v3, %v757_v56 }
 0x167   :  { %v1397_v60 = vsel %vm1313_vm1, %v1355_v28, %v730_v23  ;;  %vm1314_vm5 = vmand %vm1272_vm3, %vm1230_vm2  ;;  %v772_v0 = vsub.s32 %v10390_v12, %v771_v31  ;;  %v10457_v4 = vadd.s32 80, %v10174_v2  ;;  %v485_v18 = vrot.slane %v10447_v24, 1  ;;  %v10502_v28 = vld [vmem:[%s12907_s19 + $0x68] sm:$0xff] }
 0x168   :  { %vm1439_vm4 = vcmp.eq.s32.totalorder %v1397_v60, 0  ;;  %v1398_v8 = vsel %vm1314_vm5, %v1356_v61, %v744_v54  ;;  %v358_v35 = vrot.slane %v10447_v24, 7  ;;  %vm1231_vm8 = vcmp.ne.s32.totalorder %v758_v62, 0 }
 0x169   :  { %12924 = vst [vmem:[#allocation62_spill] sm:$0xff] %v10457_v4  ;;  %v1481_v7 = vsel %vm1439_vm4, 0.0, %v351_v49  ;;  %vm1440_vm7 = vcmp.eq.s32.totalorder %v1398_v8, 0  ;;  %vm1273_vm9 = vcmp.lt.s32.totalorder %v758_v62, 0  ;;  %v1357_v38 = vadd.s32 168, %v758_v62 }
 0x16a   :  { %1634 = vperm.xlu0 %8779, %v1481_v7   ;;  %v1482_v36 = vsel %vm1440_vm7, 0.0, %v353_v51  ;;  %vm1315_vm10 = vmand %vm1273_vm9, %vm1231_vm8  ;;  %vm1232_vm11 = vcmp.ne.s32.totalorder %v772_v0, 0  ;;  %vm1274_vm12 = vcmp.lt.s32.totalorder %v772_v0, 0  ;;  %v1358_v41 = vadd.s32 168, %v772_v0  ;;  %v10486_v51 = vld [vmem:[%s12907_s19 + $0x60] sm:$0xff] }
 0x16b   :  { %1639 = vperm.xlu1 %8780, %v1482_v36   ;;  %v1399_v44 = vsel %vm1315_vm10, %v1357_v38, %v758_v62  ;;  %vm1316_vm13 = vmand %vm1274_vm12, %vm1232_vm11  ;;  %v484_v45 = vsel %vm12896_vm6, %v481_v22, %v483_v53  ;;  %v10468_v39 = vmul.u32.u64.low 3272356035, %v10457_v4  ;;  %v10469_v46 = vmul.u32.u64.high 3272356035, %v10457_v4, %v10468_v39 }
 0x16c   :  { %vm1441_vm14 = vcmp.eq.s32.totalorder %v1399_v44, 0  ;;  %v1400_v42 = vsel %vm1316_vm13, %v1358_v41, %v772_v0  ;;  %vm1523_vm15 = vcmp.eq.s32.totalorder %v1397_v60, 167  ;;  %vm1524_vm1 = vcmp.eq.s32.totalorder %v1398_v8, 167 }
 0x16d   :  { %v1483_v27 = vsel %vm1441_vm14, 0.0, %v355_v52  ;;  %vm1442_vm2 = vcmp.eq.s32.totalorder %v1400_v42, 0  ;;  %v486_v48 = vsel %vm12896_vm6, %v483_v53, %v485_v18  ;;  %v360_v49 = vrot.slane %v10464_v21, 7 }
 0x16e   :  { %1644 = vperm.xlu0 %8779, %v1483_v27   ;;  %v1484_v11 = vsel %vm1442_vm2, 0.0, %v357_v26  ;;  %v10478_v22 = vsel %vm338_vm0, %v356_v47, %v358_v35  ;;  %vm781_vm3 = vc.u32 %v10468_v39, 3272356035  ;;  %v10481_v23 = vadd.s32 88, %v10174_v2 }
 0x16f   :  { %1649 = vperm.xlu1 %8780, %v1484_v11   ;;  %v1565_v17 = vsel %vm1523_vm15, 0.0, %v480_v58  ;;  %v1566_v29 = vsel %vm1524_vm1, 0.0, %v482_v59  ;;  %v782_v52 = vsel %vm781_vm3, 1, %v12818_v1  ;;  %v10490_v26 = vadd.s32 96, %v10174_v2 }
 0x170   :  { %12925 = vst [vmem:[#allocation63_spill] sm:$0xff] %v10481_v23  ;;  %v10493_v47 = vadd.s32 %v10469_v46, %v782_v52  ;;  %v10496_v30 = vmul.u32.u64.low 3272356035, %v10481_v23  ;;  %v10497_v53 = vmul.u32.u64.high 3272356035, %v10481_v23, %v10496_v30  ;;  %v10505_v54 = vadd.s32 104, %v10174_v2 }
 0x171   :  { %12926 = vst [vmem:[#allocation64_spill] sm:$0xff] %v10490_v26  ;;  %vm1525_vm4 = vcmp.eq.s32.totalorder %v1399_v44, 167  ;;  %v10508_v56 = vsel %vm338_vm0, %v358_v35, %v360_v49  ;;  %v10511_v31 = vmul.u32.u64.low 3272356035, %v10490_v26  ;;  %v10512_v58 = vmul.u32.u64.high 3272356035, %v10490_v26, %v10511_v31 }
 0x172   :  { %12927 = vst [vmem:[#allocation65_spill] sm:$0xff] %v10493_v47  ;;  %12928 = vst [vmem:[#allocation66_spill] sm:$0xff] %v10505_v54  ;;  %1883 = vperm.xlu0 %8779, %v10348_v10   ;;  %v784_v59 = vshrl.u32 %v10493_v47, 7  ;;  %vm795_vm5 = vc.u32 %v10496_v30, 3272356035  ;;  %vm1526_vm7 = vcmp.eq.s32.totalorder %v1400_v42, 167 }
 0x173   :  { %v10517_v60 = vmul.u32.u64.low 3272356035, %v10505_v54  ;;  %v10518_v61 = vmul.u32.u64.high 3272356035, %v10505_v54, %v10517_v60  ;;  %1887 = vperm.xlu1 %8780, %v10367_v55   ;;  %v796_v62 = vsel %vm795_vm5, 1, %v12818_v1  ;;  %v362_v0 = vrot.slane %v10486_v51, 7 }
 0x174   :  { %vm809_vm8 = vc.u32 %v10511_v31, 3272356035  ;;  %v785_v7 = vmul.u32 168, %v784_v59  ;;  %v10524_v8 = vadd.s32 %v10497_v53, %v796_v62  ;;  %v364_v38 = vrot.slane %v10502_v28, 7 }
 0x175   :  { %v810_v10 = vsel %vm809_vm8, 1, %v12818_v1  ;;  %vm823_vm9 = vc.u32 %v10517_v60, 3272356035  ;;  %v487_v36 = vrot.slane %v10464_v21, 1  ;;  %v489_v27 = vrot.slane %v10486_v51, 1 }
 0x176   :  { %12929 = vst [vmem:[#allocation67_spill] sm:$0xff] %v10524_v8  ;;  %v10528_v35 = vadd.s32 %v10512_v58, %v810_v10  ;;  %v824_v55 = vsel %vm823_vm9, 1, %v12818_v1  ;;  %1891 = vperm.xlu0 %8779, %v10398_v16   ;;  %v786_v41 = vsub.s32 %v10457_v4, %v785_v7  ;;  %v798_v39 = vshrl.u32 %v10524_v8, 7 }
 0x177   :  { %v10537_v46 = vadd.s32 %v10518_v61, %v824_v55  ;;  %1895 = vperm.xlu1 %8780, %v10407_v32   ;;  %v1567_v11 = vsel %vm1525_vm4, 0.0, %v484_v45  ;;  %v1568_v52 = vsel %vm1526_vm7, 0.0, %v486_v48  ;;  %v363_v30 = vsel %vm338_vm0, %v360_v49, %v362_v0  ;;  %v10555_v45 = vld [vmem:[%s12907_s19 + $0x70] sm:$0xff] }
 0x178   :  { %12930 = vst [vmem:[#allocation68_spill] sm:$0xff] %v10528_v35  ;;  %v812_v53 = vshrl.u32 %v10528_v35, 7  ;;  %vm1233_vm10 = vcmp.ne.s32.totalorder %v786_v41, 0  ;;  %vm1275_vm11 = vcmp.lt.s32.totalorder %v786_v41, 0  ;;  %v1359_v16 = vadd.s32 168, %v786_v41 }
 0x179   :  { %12931 = vst [vmem:[#allocation69_spill] sm:$0xff] %v10537_v46  ;;  %v799_v31 = vmul.u32 168, %v798_v39  ;;  %vm1317_vm12 = vmand %vm1275_vm11, %vm1233_vm10  ;;  %v365_v59 = vsel %vm338_vm0, %v362_v0, %v364_v38  ;;  %v826_v32 = vshrl.u32 %v10537_v46, 7  ;;  %v488_v44 = vsel %vm12896_vm6, %v485_v18, %v487_v36 }
 0x17a   :  { %v813_v58 = vmul.u32 168, %v812_v53  ;;  %2146 = vperm.xlu0 %8779, %v1565_v17   ;;  %v1401_v42 = vsel %vm1317_vm12, %v1359_v16, %v786_v41  ;;  %v490_v49 = vsel %vm12896_vm6, %v487_v36, %v489_v27  ;;  %v10560_v60 = vadd.s32 112, %v10174_v2 }
 0x17b   :  { %v800_v48 = vsub.s32 %v10481_v23, %v799_v31  ;;  %2151 = vperm.xlu1 %8780, %v1566_v29   ;;  %vm1443_vm13 = vcmp.eq.s32.totalorder %v1401_v42, 0  ;;  %v827_v62 = vmul.u32 168, %v826_v32  ;;  %v491_v18 = vrot.slane %v10502_v28, 1  ;;  %v10569_v29 = vld [vmem:[%s12907_s19 + $0x78] sm:$0xff] }
 0x17c   :  { %12932 = vst [vmem:[#allocation70_spill] sm:$0xff] %v10560_v60  ;;  %v814_v61 = vsub.s32 %v10490_v26, %v813_v58  ;;  %v12814_v17 = vrot.slane %v10555_v45, 1  ;;  %v1485_v55 = vsel %vm1443_vm13, 0.0, %v10478_v22  ;;  %vm1527_vm11 = vcmp.eq.s32.totalorder %v1401_v42, 167 }
 0x17d   :  { %vm1234_vm14 = vcmp.ne.s32.totalorder %v800_v48, 0  ;;  %vm1276_vm15 = vcmp.lt.s32.totalorder %v800_v48, 0  ;;  %v1360_v0 = vadd.s32 168, %v800_v48  ;;  %v828_v10 = vsub.s32 %v10505_v54, %v827_v62 }
 0x17e   :  { %vm1318_vm1 = vmand %vm1276_vm15, %vm1234_vm14  ;;  %vm1235_vm2 = vcmp.ne.s32.totalorder %v814_v61, 0  ;;  %vm1277_vm3 = vcmp.lt.s32.totalorder %v814_v61, 0  ;;  %v1361_v7 = vadd.s32 168, %v814_v61  ;;  %2156 = vperm.xlu0 %8779, %v1567_v11   ;;  %v366_v11 = vrot.slane %v10555_v45, 7 }
 0x17f   :  { %v1402_v36 = vsel %vm1318_vm1, %v1360_v0, %v800_v48  ;;  %vm1319_vm4 = vmand %vm1277_vm3, %vm1235_vm2  ;;  %v10573_v41 = vmul.u32.u64.low 3272356035, %v10560_v60  ;;  %v10574_v39 = vmul.u32.u64.high 3272356035, %v10560_v60, %v10573_v41  ;;  %2161 = vperm.xlu1 %8780, %v1568_v52   ;;  %vm1236_vm7 = vcmp.ne.s32.totalorder %v828_v10, 0  ;;  %v10594_v0 = vld [vmem:[%s12907_s19 + $0x80] sm:$0xff] }
 0x180   :  { %vm1444_vm5 = vcmp.eq.s32.totalorder %v1402_v36, 0  ;;  %v1403_v53 = vsel %vm1319_vm4, %v1361_v7, %v814_v61  ;;  %vm1278_vm8 = vcmp.lt.s32.totalorder %v828_v10, 0  ;;  %v1362_v31 = vadd.s32 168, %v828_v10 }
 0x181   :  { %v1486_v16 = vsel %vm1444_vm5, 0.0, %v10508_v56  ;;  %vm1445_vm9 = vcmp.eq.s32.totalorder %v1403_v53, 0  ;;  %vm1320_vm10 = vmand %vm1278_vm8, %vm1236_vm7  ;;  %vm1528_vm12 = vcmp.eq.s32.totalorder %v1402_v36, 167  ;;  %v492_v22 = vsel %vm12896_vm6, %v489_v27, %v491_v18 }
 0x182   :  { %vm837_vm13 = vc.u32 %v10573_v41, 3272356035  ;;  %1654 = vperm.xlu0 %8779, %v1485_v55   ;;  %v1404_v58 = vsel %vm1320_vm10, %v1362_v31, %v828_v10  ;;  %vm1529_vm14 = vcmp.eq.s32.totalorder %v1403_v53, 167  ;;  %v368_v32 = vrot.slane %v10569_v29, 7 }
 0x183   :  { %v838_v52 = vsel %vm837_vm13, 1, %v12818_v1  ;;  %1659 = vperm.xlu1 %8780, %v1486_v16   ;;  %v1487_v48 = vsel %vm1445_vm9, 0.0, %v363_v30  ;;  %vm1446_vm15 = vcmp.eq.s32.totalorder %v1404_v58, 0  ;;  %v10585_v61 = vadd.s32 120, %v10174_v2 }
 0x184   :  { %v10582_v56 = vadd.s32 %v10574_v39, %v838_v52  ;;  %v1488_v42 = vsel %vm1446_vm15, 0.0, %v365_v59  ;;  %v10587_v62 = vsel %vm1527_vm11, 0.0, %v488_v44  ;;  %v10589_v27 = vsel %vm1528_vm12, 0.0, %v490_v49  ;;  %v10609_v59 = vld [vmem:[%s12907_s19 + $0x88] sm:$0xff] }
 0x185   :  { %12934 = vst [vmem:[#allocation72_spill] sm:$0xff] %v10585_v61  ;;  %v10597_v7 = vadd.s32 128, %v10174_v2  ;;  %v10599_v30 = vsel %vm1529_vm14, 0.0, %v492_v22  ;;  %v10603_v55 = vmul.u32.u64.low 3272356035, %v10585_v61  ;;  %v10604_v36 = vmul.u32.u64.high 3272356035, %v10585_v61, %v10603_v55 }
 0x186   :  { %12933 = vst [vmem:[#allocation71_spill] sm:$0xff] %v10582_v56  ;;  %v840_v10 = vshrl.u32 %v10582_v56, 7  ;;  %1664 = vperm.xlu0 %8779, %v1487_v48   ;;  %v494_v44 = vsel %vm12896_vm6, %v491_v18, %v12814_v17  ;;  %v10619_v39 = vadd.s32 136, %v10174_v2  ;;  %vm1530_vm1 = vcmp.eq.s32.totalorder %v1404_v58, 167 }
 0x187   :  { %12935 = vst [vmem:[#allocation73_spill] sm:$0xff] %v10597_v7  ;;  %v10615_v49 = vmul.u32.u64.low 3272356035, %v10597_v7  ;;  %v10616_v41 = vmul.u32.u64.high 3272356035, %v10597_v7, %v10615_v49  ;;  %1669 = vperm.xlu1 %8780, %v1488_v42   ;;  %v10624_v53 = vsel %vm338_vm0, %v364_v38, %v366_v11  ;;  %vm851_vm2 = vc.u32 %v10603_v55, 3272356035 }
 0x188   :  { %12936 = vst [vmem:[#allocation74_spill] sm:$0xff] %v10619_v39  ;;  %v841_v16 = vmul.u32 168, %v840_v10  ;;  %v852_v31 = vsel %vm851_vm2, 1, %v12818_v1  ;;  %v10628_v18 = vmul.u32.u64.low 3272356035, %v10619_v39  ;;  %v10629_v22 = vmul.u32.u64.high 3272356035, %v10619_v39, %v10628_v18 }
 0x189   :  { %vm865_vm3 = vc.u32 %v10615_v49, 3272356035  ;;  %v10633_v48 = vadd.s32 %v10604_v36, %v852_v31  ;;  %v370_v42 = vrot.slane %v10594_v0, 7  ;;  %v495_v55 = vrot.slane %v10569_v29, 1 }
 0x18a   :  { %v842_v52 = vsub.s32 %v10560_v60, %v841_v16  ;;  %v866_v17 = vsel %vm865_vm3, 1, %v12818_v1  ;;  %1899 = vperm.xlu0 %8779, %v10447_v24   ;;  %vm879_vm4 = vc.u32 %v10628_v18, 3272356035  ;;  %v10648_v16 = vld [vmem:[%s12907_s19 + $0x90] sm:$0xff]  ;;  %v1572_v24 = vsel %vm1530_vm1, 0.0, %v494_v44 }
 0x18b   :  { %12937 = vst [vmem:[#allocation75_spill] sm:$0xff] %v10633_v48  ;;  %v10639_v38 = vadd.s32 %v10616_v41, %v866_v17  ;;  %1903 = vperm.xlu1 %8780, %v10464_v21   ;;  %v854_v49 = vshrl.u32 %v10633_v48, 7  ;;  %v369_v17 = vsel %vm338_vm0, %v366_v11, %v368_v32  ;;  %v880_v31 = vsel %vm879_vm4, 1, %v12818_v1 }
 0x18c   :  { %vm1237_vm5 = vcmp.ne.s32.totalorder %v842_v52, 0  ;;  %vm1279_vm7 = vcmp.lt.s32.totalorder %v842_v52, 0  ;;  %v1363_v36 = vadd.s32 168, %v842_v52  ;;  %v371_v10 = vsel %vm338_vm0, %v368_v32, %v370_v42 }
 0x18d   :  { %12938 = vst [vmem:[#allocation76_spill] sm:$0xff] %v10639_v38  ;;  %vm1321_vm8 = vmand %vm1279_vm7, %vm1237_vm5  ;;  %v868_v41 = vshrl.u32 %v10639_v38, 7  ;;  %v855_v18 = vmul.u32 168, %v854_v49  ;;  %v10656_v60 = vadd.s32 %v10629_v22, %v880_v31  ;;  %v12940_v58 = vrot.slane %v10609_v59, 7 }
 0x18e   :  { %v1405_v21 = vsel %vm1321_vm8, %v1363_v36, %v842_v52  ;;  %1907 = vperm.xlu0 %8779, %v10486_v51   ;;  %v12941_v11 = vrot.slane %v10555_v45, 1  ;;  %v497_v52 = vrot.slane %v10594_v0, 1  ;;  %v499_v51 = vrot.slane %v10609_v59, 1 }
 0x18f   :  { %12939 = vst [vmem:[#allocation77_spill] sm:$0xff] %v10656_v60  ;;  %v869_v48 = vmul.u32 168, %v868_v41  ;;  %v10662_v44 = vsel %vm338_vm0, %v370_v42, %v12940_v58  ;;  %1911 = vperm.xlu1 %8780, %v10502_v28   ;;  %v856_v32 = vsub.s32 %v10585_v61, %v855_v18  ;;  %v882_v22 = vshrl.u32 %v10656_v60, 7 }
 0x190   :  { %v496_v38 = vsel %vm12896_vm6, %v12941_v11, %v495_v55  ;;  %vm1447_vm9 = vcmp.eq.s32.totalorder %v1405_v21, 0  ;;  %vm1531_vm10 = vcmp.eq.s32.totalorder %v1405_v21, 167  ;;  %v10675_v49 = vadd.s32 144, %v10174_v2 }
 0x191   :  { %v870_v42 = vsub.s32 %v10597_v7, %v869_v48  ;;  %vm1238_vm11 = vcmp.ne.s32.totalorder %v856_v32, 0  ;;  %vm1280_vm12 = vcmp.lt.s32.totalorder %v856_v32, 0  ;;  %v1364_v41 = vadd.s32 168, %v856_v32  ;;  %v10682_v48 = vld [vmem:[%s12907_s19 + $0x98] sm:$0xff] }
 0x192   :  { %12942 = vst [vmem:[#allocation78_spill] sm:$0xff] %v10675_v49  ;;  %v883_v31 = vmul.u32 168, %v882_v22  ;;  %2166 = vperm.xlu0 %8779, %v10587_v62   ;;  %vm1322_vm13 = vmand %vm1280_vm12, %vm1238_vm11  ;;  %v374_v18 = vrot.slane %v10648_v16, 7  ;;  %v10687_v22 = vmul.u32.u64.low 3272356035, %v10675_v49  ;;  %v10688_v62 = vmul.u32.u64.high 3272356035, %v10675_v49, %v10687_v22 }
 0x193   :  { %vm1239_vm14 = vcmp.ne.s32.totalorder %v870_v42, 0  ;;  %vm1281_vm15 = vcmp.lt.s32.totalorder %v870_v42, 0  ;;  %v1365_v28 = vadd.s32 168, %v870_v42  ;;  %2171 = vperm.xlu1 %8780, %v10589_v27   ;;  %v1406_v58 = vsel %vm1322_vm13, %v1364_v41, %v856_v32 }
 0x194   :  { %vm1323_vm1 = vmand %vm1281_vm15, %vm1239_vm14  ;;  %v884_v11 = vsub.s32 %v10619_v39, %v883_v31  ;;  %v1489_v1 = vsel %vm1447_vm9, 0.0, %v10624_v53  ;;  %v498_v60 = vsel %vm12896_vm6, %v495_v55, %v497_v52  ;;  %v500_v7 = vsel %vm12896_vm6, %v497_v52, %v499_v51 }
 0x195   :  { %v1407_v36 = vsel %vm1323_vm1, %v1365_v28, %v870_v42  ;;  %vm1448_vm2 = vcmp.eq.s32.totalorder %v1406_v58, 0  ;;  %v10695_v27 = vsel %vm1531_vm10, 0.0, %v496_v38  ;;  %vm1532_vm8 = vcmp.eq.s32.totalorder %v1406_v58, 167 }
 0x196   :  { %vm1240_vm3 = vcmp.ne.s32.totalorder %v884_v11, 0  ;;  %vm1282_vm4 = vcmp.lt.s32.totalorder %v884_v11, 0  ;;  %2176 = vperm.xlu0 %8779, %v10599_v30   ;;  %vm1449_vm5 = vcmp.eq.s32.totalorder %v1407_v36, 0  ;;  %v1366_v32 = vadd.s32 168, %v884_v11  ;;  %v10713_v30 = vld [vmem:[%s12907_s19 + $0xa0] sm:$0xff] }
 0x197   :  { %vm1324_vm7 = vmand %vm1282_vm4, %vm1240_vm3  ;;  %v12943_v41 = vrot.slane %v10648_v16, 1  ;;  %2181 = vperm.xlu1 %8780, %v1572_v24   ;;  %v12944_v55 = vrot.slane %v10609_v59, 7  ;;  %vm893_vm9 = vc.u32 %v10687_v22, 3272356035  ;;  %v376_v38 = vrot.slane %v10682_v48, 7  ;;  %v10723_v22 = vld [vmem:[%s12907_s19 + $0xa8] sm:$0xff] }
 0x198   :  { %v10708_v21 = vadd.s32 152, %v10174_v2  ;;  %v1490_v42 = vsel %vm1448_vm2, 0.0, %v369_v17  ;;  %v12946_v24 = vmov 0   ;;  %v10718_v28 = vadd.s32 160, %v10174_v2 }
 0x199   :  { %v502_v53 = vsel %vm12896_vm6, %v499_v51, %v12943_v41  ;;  %v10704_v52 = vsel %vm338_vm0, %v12944_v55, %v374_v18  ;;  %v1408_v51 = vsel %vm1324_vm7, %v1366_v32, %v884_v11  ;;  %v894_v31 = vsel %vm893_vm9, 1, %v12946_v24 }
 0x19a   :  { %12945 = vst [vmem:[#allocation79_spill] sm:$0xff] %v10708_v21  ;;  %12947 = vst [vmem:[#allocation80_spill] sm:$0xff] %v10718_v28  ;;  %v1491_v41 = vsel %vm1449_vm5, 0.0, %v371_v10  ;;  %vm1450_vm10 = vcmp.eq.s32.totalorder %v1408_v51, 0  ;;  %v10726_v55 = vsel %vm1532_vm8, 0.0, %v498_v60  ;;  %v10729_v39 = vadd.s32 %v10688_v62, %v894_v31  ;;  %1674 = vperm.xlu0 %8779, %v1489_v1  }
 0x19b   :  { %vm1533_vm11 = vcmp.eq.s32.totalorder %v1407_v36, 167  ;;  %v10732_v17 = vmul.u32.u64.low 3272356035, %v10708_v21  ;;  %v10733_v58 = vmul.u32.u64.high 3272356035, %v10708_v21, %v10732_v17  ;;  %v378_v11 = vrot.slane %v10713_v30, 7  ;;  %1679 = vperm.xlu1 %8780, %v1490_v42  }
 0x19c   :  { %12948 = vst [vmem:[#allocation81_spill] sm:$0xff] %v10729_v39  ;;  %v896_v32 = vshrl.u32 %v10729_v39, 7  ;;  %v10738_v61 = vsel %vm338_vm0, %v374_v18, %v376_v38  ;;  %v10741_v60 = vmul.u32.u64.low 3272356035, %v10718_v28  ;;  %v10742_v10 = vmul.u32.u64.high 3272356035, %v10718_v28, %v10741_v60 }
 0x19d   :  { %v1492_v62 = vsel %vm1450_vm10, 0.0, %v10662_v44  ;;  %vm1534_vm12 = vcmp.eq.s32.totalorder %v1408_v51, 167  ;;  %vm907_vm13 = vc.u32 %v10732_v17, 3272356035  ;;  %v10746_v1 = vadd.s32 168, %v10174_v2 }
 0x19e   :  { %v897_v31 = vmul.u32 168, %v896_v32  ;;  %v908_v56 = vsel %vm907_vm13, 1, %v12946_v24  ;;  %vm921_vm14 = vc.u32 %v10741_v60, 3272356035  ;;  %v12830_v42 = vrot.slane %v10723_v22, 7  ;;  %1684 = vperm.xlu0 %8779, %v1491_v41  }
 0x19f   :  { %v10751_v18 = vadd.s32 %v10733_v58, %v908_v56  ;;  %v922_v39 = vsel %vm921_vm14, 1, %v12946_v24  ;;  %v10755_v54 = vmul.u32.u64.low 3272356035, %v10746_v1  ;;  %v10756_v44 = vmul.u32.u64.high 3272356035, %v10746_v1, %v10755_v54  ;;  %1689 = vperm.xlu1 %8780, %v1492_v62   ;;  %v10770_v56 = vld [vmem:[%s12907_s19 + $0xb0] sm:$0xff] }
 0x1a0   :  { %v10759_v51 = vsel %vm1533_vm11, 0.0, %v500_v7  ;;  %v10761_v17 = vsel %vm1534_vm12, 0.0, %v502_v53  ;;  %v898_v32 = vsub.s32 %v10675_v49, %v897_v31  ;;  %v10765_v60 = vadd.s32 %v10742_v10, %v922_v39  ;;  %v10778_v39 = vld [vmem:[#allocation5] sm:$0x7] }
 0x1a1   :  { %12949 = vst [vmem:[#allocation82_spill] sm:$0xff] %v10751_v18  ;;  %v910_v41 = vshrl.u32 %v10751_v18, 7  ;;  %v10774_v58 = vsel %vm338_vm0, %v376_v38, %v378_v11  ;;  %vm935_vm15 = vc.u32 %v10755_v54, 3272356035  ;;  %v503_v7 = vrot.slane %v10682_v48, 1 }
 0x1a2   :  { %12950 = vst [vmem:[#allocation83_spill] sm:$0xff] %v10765_v60  ;;  %vm1241_vm1 = vcmp.ne.s32.totalorder %v898_v32, 0  ;;  %vm1283_vm2 = vcmp.lt.s32.totalorder %v898_v32, 0  ;;  %v1367_v36 = vadd.s32 168, %v898_v32  ;;  %v924_v53 = vshrl.u32 %v10765_v60, 7  ;;  %1915 = vperm.xlu0 %8779, %v10555_v45  }
 0x1a3   :  { %vm1325_vm3 = vmand %vm1283_vm2, %vm1241_vm1  ;;  %v911_v10 = vmul.u32 168, %v910_v41  ;;  %v10784_v62 = vsel %vm338_vm0, %v378_v11, %v12830_v42  ;;  %v936_v54 = vsel %vm935_vm15, 1, %v12946_v24  ;;  %v10788_v38 = vsub.s32 1, %v10174_v2  ;;  %1919 = vperm.xlu1 %8780, %v10569_v29  }
 0x1a4   :  { %v1409_v31 = vsel %vm1325_vm3, %v1367_v36, %v898_v32  ;;  %v925_v60 = vmul.u32 168, %v924_v53  ;;  %v937_v18 = vadd.s32 %v10756_v44, %v936_v54  ;;  %v505_v45 = vrot.slane %v10713_v30, 1 }
 0x1a5   :  { %12951 = vst [vmem:[#allocation84_spill] sm:$0xff] %v10788_v38  ;;  %v912_v41 = vsub.s32 %v10708_v21, %v911_v10  ;;  %v12952_v49 = vrot.slane %v10648_v16, 1  ;;  %v507_v42 = vrot.slane %v10723_v22, 1  ;;  %vm1451_vm4 = vcmp.eq.s32.totalorder %v1409_v31, 0 }
 0x1a6   :  { %v926_v46 = vsub.s32 %v10718_v28, %v925_v60  ;;  %v938_v29 = vshrl.u32 %v937_v18, 7  ;;  %vm1535_vm5 = vcmp.eq.s32.totalorder %v1409_v31, 167  ;;  %1923 = vperm.xlu0 %8779, %v10594_v0   ;;  %v10803_v32 = vrot.slane %v10778_v39, %v10788_v38  ;;  %v10809_v18 = vld [vmem:[%s12907_s19 + $0xb8] sm:$0xff] }
 0x1a7   :  { %v504_v11 = vsel %vm12896_vm6, %v12952_v49, %v503_v7  ;;  %vm1242_vm7 = vcmp.ne.s32.totalorder %v912_v41, 0  ;;  %vm1284_vm8 = vcmp.lt.s32.totalorder %v912_v41, 0  ;;  %v1368_v44 = vadd.s32 168, %v912_v41  ;;  %1927 = vperm.xlu1 %8780, %v10609_v59  }
 0x1a8   :  { %vm1326_vm9 = vmand %vm1284_vm8, %vm1242_vm7  ;;  %vm1243_vm10 = vcmp.ne.s32.totalorder %v926_v46, 0  ;;  %vm1285_vm11 = vcmp.lt.s32.totalorder %v926_v46, 0  ;;  %v1369_v49 = vadd.s32 168, %v926_v46  ;;  %v939_v36 = vmul.u32 168, %v938_v29 }
 0x1a9   :  { %v1410_v0 = vsel %vm1326_vm9, %v1368_v44, %v912_v41  ;;  %vm1327_vm12 = vmand %vm1285_vm11, %vm1243_vm10  ;;  %v506_v60 = vsel %vm12896_vm6, %v503_v7, %v505_v45  ;;  %v508_v53 = vsel %vm12896_vm6, %v505_v45, %v507_v42  ;;  %v10814_v10 = vadd.s32 176, %v10174_v2 }
 0x1aa   :  { %v1411_v59 = vsel %vm1327_vm12, %v1369_v49, %v926_v46  ;;  %v940_v54 = vsub.s32 %v10746_v1, %v939_v36  ;;  %v382_v26 = vrot.slane %v10770_v56, 7  ;;  %v10819_v29 = vadd.s32 184, %v10174_v2  ;;  %2186 = vperm.xlu0 %8779, %v10695_v27  }
 0x1ab   :  { %v1493_v41 = vsel %vm1451_vm4, 0.0, %v10704_v52  ;;  %vm1452_vm13 = vcmp.eq.s32.totalorder %v1410_v0, 0  ;;  %v10825_v7 = vsel %vm1535_vm5, 0.0, %v504_v11  ;;  %v12953_v45 = vrot.slane %v10770_v56, 1  ;;  %2191 = vperm.xlu1 %8780, %v10726_v55   ;;  %v10843_v55 = vld [vmem:[%s12907_s19 + $0xc0] sm:$0xff] }
 0x1ac   :  { %vm1244_vm14 = vcmp.ne.s32.totalorder %v940_v54, 0  ;;  %vm1286_vm15 = vcmp.lt.s32.totalorder %v940_v54, 0  ;;  %v1370_v1 = vadd.s32 168, %v940_v54  ;;  %vm1536_vm1 = vcmp.eq.s32.totalorder %v1410_v0, 167  ;;  %v10863_v0 = vld [vmem:[%s12907_s19 + $0xc8] sm:$0xff] }
 0x1ad   :  { %v510_v46 = vsel %vm12896_vm6, %v507_v42, %v12953_v45  ;;  %vm1453_vm2 = vcmp.eq.s32.totalorder %v1411_v59, 0  ;;  %vm1328_vm3 = vmand %vm1286_vm15, %vm1244_vm14  ;;  %v10832_v27 = vmul.u32.u64.low 3272356035, %v10814_v10  ;;  %v10833_v44 = vmul.u32.u64.high 3272356035, %v10814_v10, %v10832_v27 }
 0x1ae   :  { %v384_v52 = vrot.slane %v10809_v18, 7  ;;  %v1412_v31 = vsel %vm1328_vm3, %v1370_v1, %v940_v54  ;;  %vm1537_vm4 = vcmp.eq.s32.totalorder %v1411_v59, 167  ;;  %2196 = vperm.xlu0 %8779, %v10759_v51   ;;  %v1494_v42 = vsel %vm1452_vm13, 0.0, %v10738_v61 }
 0x1af   :  { %v10837_v11 = vmul.u32.u64.low 3272356035, %v10819_v29  ;;  %v10838_v49 = vmul.u32.u64.high 3272356035, %v10819_v29, %v10837_v11  ;;  %v10848_v36 = vsel %vm1536_vm1, 0.0, %v506_v60  ;;  %vm949_vm5 = vc.u32 %v10832_v27, 3272356035  ;;  %2201 = vperm.xlu1 %8780, %v10761_v17  }
 0x1b0   :  { %v10851_v54 = vadd.s32 192, %v10174_v2  ;;  %v1495_v59 = vsel %vm1453_vm2, 0.0, %v10774_v58  ;;  %vm1454_vm7 = vcmp.eq.s32.totalorder %v1412_v31, 0  ;;  %v950_v45 = vsel %vm949_vm5, 1, %v12946_v24 }
 0x1b1   :  { %vm963_vm8 = vc.u32 %v10837_v11, 3272356035  ;;  %v10856_v1 = vsel %vm1537_vm4, 0.0, %v508_v53  ;;  %vm1538_vm9 = vcmp.eq.s32.totalorder %v1412_v31, 167  ;;  %v951_v51 = vadd.s32 %v10833_v44, %v950_v45 }
 0x1b2   :  { %v964_v61 = vsel %vm963_vm8, 1, %v12946_v24  ;;  %v10867_v58 = vmul.u32.u64.low 3272356035, %v10851_v54  ;;  %v10868_v60 = vmul.u32.u64.high 3272356035, %v10851_v54, %v10867_v58  ;;  %v10871_v27 = vadd.s32 200, %v10174_v2  ;;  %1694 = vperm.xlu0 %8779, %v1493_v41  }
 0x1b3   :  { %v965_v17 = vadd.s32 %v10838_v49, %v964_v61  ;;  %v1496_v53 = vsel %vm1454_vm7, 0.0, %v10784_v62  ;;  %v12954_v44 = vrot.slane %v10723_v22, 7  ;;  %v952_v45 = vshrl.u32 %v951_v51, 7  ;;  %1699 = vperm.xlu1 %8780, %v1494_v42  }
 0x1b4   :  { %v386_v38 = vrot.slane %v10843_v55, 7  ;;  %vm977_vm10 = vc.u32 %v10867_v58, 3272356035  ;;  %v10881_v61 = vmul.u32.u64.low 3272356035, %v10871_v27  ;;  %v10882_v28 = vmul.u32.u64.high 3272356035, %v10871_v27, %v10881_v61 }
 0x1b5   :  { %v10877_v11 = vsel %vm338_vm0, %v12954_v44, %v382_v26  ;;  %v966_v49 = vshrl.u32 %v965_v17, 7  ;;  %v10885_v21 = vsel %vm1538_vm9, 0.0, %v510_v46  ;;  %v953_v41 = vmul.u32 168, %v952_v45 }
 0x1b6   :  { %v385_v62 = vsel %vm338_vm0, %v382_v26, %v384_v52  ;;  %v978_v35 = vsel %vm977_vm10, 1, %v12946_v24  ;;  %v12839_v23 = vrot.slane %v10863_v0, 7  ;;  %vm991_vm11 = vc.u32 %v10881_v61, 3272356035  ;;  %1704 = vperm.xlu0 %8779, %v1495_v59  }
 0x1b7   :  { %v967_v44 = vmul.u32 168, %v966_v49  ;;  %v979_v51 = vadd.s32 %v10868_v60, %v978_v35  ;;  %v954_v42 = vsub.s32 %v10814_v10, %v953_v41  ;;  %v992_v17 = vsel %vm991_vm11, 1, %v12946_v24  ;;  %1709 = vperm.xlu1 %8780, %v1496_v53  }
 0x1b8   :  { %v10894_v31 = vsub.s32 0, %v10174_v2  ;;  %v511_v46 = vrot.slane %v10809_v18, 1  ;;  %v993_v45 = vadd.s32 %v10882_v28, %v992_v17  ;;  %v513_v35 = vrot.slane %v10843_v55, 1 }
 0x1b9   :  { %v968_v26 = vsub.s32 %v10819_v29, %v967_v44  ;;  %v980_v58 = vshrl.u32 %v979_v51, 7  ;;  %vm1245_vm12 = vcmp.ne.s32.totalorder %v954_v42, 0  ;;  %vm1287_vm13 = vcmp.lt.s32.totalorder %v954_v42, 0  ;;  %v10906_v29 = vld [vmem:[%s12907_s19 + $0xd0] sm:$0xff] }
 0x1ba   :  { %12955 = vst [vmem:[#allocation85_spill] sm:$0xff] %v10894_v31  ;;  %v1371_v59 = vadd.s32 168, %v954_v42  ;;  %v10901_v10 = vsel %vm338_vm0, %v384_v52, %v386_v38  ;;  %vm1329_vm14 = vmand %vm1287_vm13, %vm1245_vm12  ;;  %1931 = vperm.xlu0 %8779, %v10648_v16   ;;  %v10912_v53 = vsel %vm338_vm0, %v386_v38, %v12839_v23  ;;  %v994_v52 = vshrl.u32 %v993_v45, 7 }
 0x1bb   :  { %vm1246_vm15 = vcmp.ne.s32.totalorder %v968_v26, 0  ;;  %vm1288_vm1 = vcmp.lt.s32.totalorder %v968_v26, 0  ;;  %v1372_v60 = vadd.s32 168, %v968_v26  ;;  %v981_v49 = vmul.u32 168, %v980_v58  ;;  %1935 = vperm.xlu1 %8780, %v10682_v48  }
 0x1bc   :  { %v1413_v28 = vsel %vm1329_vm14, %v1371_v59, %v954_v42  ;;  %vm1330_vm2 = vmand %vm1288_vm1, %vm1246_vm15  ;;  %v2326_v61 = vsub.s32 2, %v10174_v2  ;;  %v1864_v41 = vpop.permute.xlu1 %1863  ;;  %v1860_v44 = vpop.permute.xlu0 %1859  ;;  %v10919_v16 = vrot.slane %v10778_v39, %v10894_v31  ;;  %v12956_v42 = vrot.slane %v10770_v56, 1 }
 0x1bd   :  { %v1414_v51 = vsel %vm1330_vm2, %v1372_v60, %v968_v26  ;;  %v982_v17 = vsub.s32 %v10851_v54, %v981_v49  ;;  %vm1455_vm3 = vcmp.eq.s32.totalorder %v1413_v28, 0  ;;  %vm1539_vm4 = vcmp.eq.s32.totalorder %v1413_v28, 167 }
 0x1be   :  { %v512_v58 = vsel %vm12896_vm6, %v12956_v42, %v511_v46  ;;  %v514_v38 = vsel %vm12896_vm6, %v511_v46, %v513_v35  ;;  %v515_v45 = vrot.slane %v10863_v0, 1  ;;  %vm1456_vm5 = vcmp.eq.s32.totalorder %v1414_v51, 0  ;;  %1939 = vperm.xlu0 %8779, %v10713_v30  }
 0x1bf   :  { %vm1247_vm7 = vcmp.ne.s32.totalorder %v982_v17, 0  ;;  %vm1289_vm8 = vcmp.lt.s32.totalorder %v982_v17, 0  ;;  %v1373_v48 = vadd.s32 168, %v982_v17  ;;  %v995_v54 = vmul.u32 168, %v994_v52  ;;  %1943 = vperm.xlu1 %8780, %v10723_v22  }
 0x1c0   :  { %vm1331_vm9 = vmand %vm1289_vm8, %vm1247_vm7  ;;  %vm1540_vm10 = vcmp.eq.s32.totalorder %v1414_v51, 167  ;;  %v10928_v26 = vrot.slane %v10778_v39, %v2326_v61  ;;  %v12840_v59 = vrot.slane %v10906_v29, 1  ;;  %v10933_v46 = vmul.f32 %v10803_v32, %v1864_v41  ;;  %v1868_v49 = vpop.permute.xlu0 %1867  ;;  %v1872_v22 = vpop.permute.xlu1 %1871 }
 0x1c1   :  { %v10936_v60 = vmul.f32 %v10803_v32, %v1860_v44  ;;  %v1497_v30 = vsel %vm1455_vm3, 0.0, %v10877_v11  ;;  %v1415_v42 = vsel %vm1331_vm9, %v1373_v48, %v982_v17  ;;  %v1498_v52 = vsel %vm1456_vm5, 0.0, %v385_v62  ;;  %v10952_v11 = vld [vmem:[%s12907_s19 + $0xd8] sm:$0xff] }
 0x1c2   :  { %v996_v39 = vsub.s32 %v10871_v27, %v995_v54  ;;  %v10943_v61 = vsel %vm1539_vm4, 0.0, %v512_v58  ;;  %v10945_v23 = vsel %vm1540_vm10, 0.0, %v514_v38  ;;  %vm1457_vm11 = vcmp.eq.s32.totalorder %v1415_v42, 0  ;;  %v10957_v27 = vld [vmem:[%s12907_s19 + $0xe0] sm:$0xff]  ;;  %2206 = vperm.xlu0 %8779, %v10825_v7   ;;  %v10974_v7 = vld [vmem:[%s12907_s19 + $0xe8] sm:$0xff] }
 0x1c3   :  { %v516_v41 = vsel %vm12896_vm6, %v513_v35, %v515_v45  ;;  %vm1541_vm12 = vcmp.eq.s32.totalorder %v1415_v42, 167  ;;  %v619_v44 = vadd.s32 208, %v10174_v2  ;;  %v390_v35 = vrot.slane %v10906_v29, 7  ;;  %2211 = vperm.xlu1 %8780, %v10848_v36  }
 0x1c4   :  { %vm1248_vm13 = vcmp.ne.s32.totalorder %v996_v39, 0  ;;  %vm1290_vm14 = vcmp.lt.s32.totalorder %v996_v39, 0  ;;  %v1374_v62 = vadd.s32 168, %v996_v39  ;;  %v518_v28 = vsel %vm12896_vm6, %v515_v45, %v12840_v59  ;;  %v1876_v59 = vpop.permute.xlu0 %1875 }
 0x1c5   :  { %vm1332_vm15 = vmand %vm1290_vm14, %vm1248_vm13  ;;  %v10965_v51 = vmul.u32.u64.low 3272356035, %v619_v44  ;;  %v10966_v17 = vmul.u32.u64.high 3272356035, %v619_v44, %v10965_v51  ;;  %v10969_v58 = vadd.s32 216, %v10174_v2  ;;  %v10977_v38 = vmul.f32 %v10803_v32, %v1872_v22 }
 0x1c6   :  { %v1499_v36 = vsel %vm1457_vm11, 0.0, %v10901_v10  ;;  %v1416_v48 = vsel %vm1332_vm15, %v1374_v62, %v996_v39  ;;  %v10982_v45 = vsel %vm1541_vm12, 0.0, %v516_v41  ;;  %v10985_v54 = vmul.f32 %v10803_v32, %v1868_v49  ;;  %2216 = vperm.xlu0 %8779, %v10856_v1   ;;  %v1880_v49 = vpop.permute.xlu1 %1879 }
 0x1c7   :  { %vm1458_vm1 = vcmp.eq.s32.totalorder %v1416_v48, 0  ;;  %vm1542_vm2 = vcmp.eq.s32.totalorder %v1416_v48, 167  ;;  %vm1005_vm3 = vc.u32 %v10965_v51, 3272356035  ;;  %v12957_v31 = vrot.slane %v10863_v0, 7  ;;  %2221 = vperm.xlu1 %8780, %v10885_v21  }
 0x1c8   :  { %v1006_v10 = vsel %vm1005_vm3, 1, %v12946_v24  ;;  %v392_v42 = vrot.slane %v10952_v11, 7  ;;  %v394_v39 = vrot.slane %v10957_v27, 7  ;;  %v11003_v1 = vadd.s32 224, %v10174_v2 }
 0x1c9   :  { %v10991_v22 = vsel %vm338_vm0, %v12957_v31, %v390_v35  ;;  %v1007_v41 = vadd.s32 %v10966_v17, %v1006_v10  ;;  %v10999_v62 = vmul.u32.u64.low 3272356035, %v10969_v58  ;;  %v11000_v51 = vmul.u32.u64.high 3272356035, %v10969_v58, %v10999_v62 }
 0x1ca   :  { %v1500_v31 = vsel %vm1458_vm1, 0.0, %v10912_v53  ;;  %v11006_v48 = vsel %vm1542_vm2, 0.0, %v518_v28  ;;  %v622_v8 = vadd.s32 232, %v10174_v2  ;;  %1714 = vperm.xlu0 %8779, %v1497_v30   ;;  %v11015_v10 = vmul.f32 %v10803_v32, %v1880_v49 }
 0x1cb   :  { %v1008_v47 = vshrl.u32 %v1007_v41, 7  ;;  %vm1019_vm4 = vc.u32 %v10999_v62, 3272356035  ;;  %v11011_v21 = vmul.u32.u64.low 3272356035, %v11003_v1  ;;  %v11012_v17 = vmul.u32.u64.high 3272356035, %v11003_v1, %v11011_v21  ;;  %1719 = vperm.xlu1 %8780, %v1498_v52  }
 0x1cc   :  { %v1020_v12 = vsel %vm1019_vm4, 1, %v12946_v24  ;;  %v11018_v3 = vmul.u32.u64.low 3272356035, %v622_v8  ;;  %v11019_v53 = vmul.u32.u64.high 3272356035, %v622_v8, %v11018_v3  ;;  %v11022_v28 = vmul.f32 %v10803_v32, %v1876_v59  ;;  %v1605_v4 = vpop.permute.xlu0 %1604 }
 0x1cd   :  { %v1009_v41 = vmul.u32 168, %v1008_v47  ;;  %v1021_v62 = vadd.s32 %v11000_v51, %v1020_v12  ;;  %vm1033_vm5 = vc.u32 %v11011_v21, 3272356035  ;;  %v11026_v50 = vsel %vm338_vm0, %v390_v35, %v392_v42 }
 0x1ce   :  { %v11029_v30 = vsel %vm338_vm0, %v392_v42, %v394_v39  ;;  %v1034_v49 = vsel %vm1033_vm5, 1, %v12946_v24  ;;  %vm1047_vm7 = vc.u32 %v11018_v3, 3272356035  ;;  %v1615_v33 = vpop.permute.xlu1 %1614  ;;  %1724 = vperm.xlu0 %8779, %v1499_v36   ;;  %v12958_v12 = vrot.slane %v10974_v7, 7 }
 0x1cf   :  { %v1010_v20 = vsub.s32 %v619_v44, %v1009_v41  ;;  %v1022_v52 = vshrl.u32 %v1021_v62, 7  ;;  %v1035_v59 = vadd.s32 %v11012_v17, %v1034_v49  ;;  %v1048_v19 = vsel %vm1047_vm7, 1, %v12946_v24  ;;  %1729 = vperm.xlu1 %8780, %v1500_v31   ;;  %v11050_v31 = vld [vmem:[%s12907_s19 + $0xf0] sm:$0xff] }
 0x1d0   :  { %v11037_v47 = vsel %vm338_vm0, %v394_v39, %v12958_v12  ;;  %v1049_v35 = vadd.s32 %v11019_v53, %v1048_v19  ;;  %v519_v42 = vrot.slane %v10952_v11, 1  ;;  %v521_v51 = vrot.slane %v10957_v27, 1  ;;  %v1610_v3 = vpop.permute.xlu0 %1609 }
 0x1d1   :  { %vm1249_vm8 = vcmp.ne.s32.totalorder %v1010_v20, 0  ;;  %vm1291_vm9 = vcmp.lt.s32.totalorder %v1010_v20, 0  ;;  %v1375_v44 = vadd.s32 168, %v1010_v20  ;;  %v1023_v21 = vmul.u32 168, %v1022_v52 }
 0x1d2   :  { %v1816_v17 = vmul.f32 %v10919_v16, %v1605_v4  ;;  %v1818_v36 = vmul.f32 %v10919_v16, %v1615_v33  ;;  %vm1333_vm10 = vmand %vm1291_vm9, %vm1249_vm8  ;;  %v1036_v41 = vshrl.u32 %v1035_v59, 7  ;;  %v1050_v39 = vshrl.u32 %v1049_v35, 7  ;;  %1947 = vperm.xlu0 %8779, %v10770_v56  }
 0x1d3   :  { %v1817_v62 = vmul.f32 %v10919_v16, %v1610_v3  ;;  %v1417_v19 = vsel %vm1333_vm10, %v1375_v44, %v1010_v20  ;;  %v1024_v53 = vsub.s32 %v10969_v58, %v1023_v21  ;;  %v523_v49 = vrot.slane %v10974_v7, 1  ;;  %1951 = vperm.xlu1 %8780, %v10809_v18  }
 0x1d4   :  { %v1037_v4 = vmul.u32 168, %v1036_v41  ;;  %v1051_v52 = vmul.u32 168, %v1050_v39  ;;  %v12959_v33 = vrot.slane %v10906_v29, 1  ;;  %v522_v12 = vsel %vm12896_vm6, %v519_v42, %v521_v51  ;;  %v1620_v20 = vpop.permute.xlu1 %1619 }
 0x1d5   :  { %vm1459_vm11 = vcmp.eq.s32.totalorder %v1417_v19, 0  ;;  %vm1250_vm12 = vcmp.ne.s32.totalorder %v1024_v53, 0  ;;  %vm1292_vm13 = vcmp.lt.s32.totalorder %v1024_v53, 0  ;;  %v1376_v58 = vadd.s32 168, %v1024_v53 }
 0x1d6   :  { %v520_v59 = vsel %vm12896_vm6, %v12959_v33, %v519_v42  ;;  %v2072_v35 = vadd.f32 %v10936_v60, %v1816_v17  ;;  %v11060_v3 = vadd.f32 %v10985_v54, %v1818_v36  ;;  %vm1334_vm14 = vmand %vm1292_vm13, %vm1250_vm12  ;;  %v1038_v56 = vsub.s32 %v11003_v1, %v1037_v4  ;;  %v1625_v41 = vpop.permute.xlu0 %1624  ;;  %1955 = vperm.xlu0 %8779, %v10843_v55  }
 0x1d7   :  { %v1052_v44 = vsub.s32 %v622_v8, %v1051_v52  ;;  %v2073_v21 = vadd.f32 %v10933_v46, %v1817_v62  ;;  %v1418_v42 = vsel %vm1334_vm14, %v1376_v58, %v1024_v53  ;;  %v524_v18 = vsel %vm12896_vm6, %v521_v51, %v523_v49  ;;  %1959 = vperm.xlu1 %8780, %v10863_v0   ;;  %v11075_v51 = vld [vmem:[#allocation8] ss:$0 sm:$0xff] }
 0x1d8   :  { %v525_v39 = vrot.slane %v11050_v31, 1  ;;  %v1819_v33 = vmul.f32 %v10919_v16, %v1620_v20  ;;  %v11070_v60 = vsel %vm1459_vm11, 0.0, %v10991_v22  ;;  %vm1251_vm15 = vcmp.ne.s32.totalorder %v1038_v56, 0 }
 0x1d9   :  { %vm1543_vm1 = vcmp.eq.s32.totalorder %v1417_v19, 167  ;;  %v1820_v8 = vmul.f32 %v10919_v16, %v1625_v41  ;;  %vm1293_vm2 = vcmp.lt.s32.totalorder %v1038_v56, 0  ;;  %v1377_v46 = vadd.s32 168, %v1038_v56  ;;  %v1630_v54 = vpop.permute.xlu1 %1629 }
 0x1da   :  { %vm1252_vm3 = vcmp.ne.s32.totalorder %v1052_v44, 0  ;;  %vm1460_vm4 = vcmp.eq.s32.totalorder %v1418_v42, 0  ;;  %vm1335_vm5 = vmand %vm1293_vm2, %vm1251_vm15  ;;  %vm1294_vm7 = vcmp.lt.s32.totalorder %v1052_v44, 0  ;;  %v1378_v55 = vadd.s32 168, %v1052_v44  ;;  %v2117_v22 = vpop.permute.xlu0 %2116  ;;  %2226 = vperm.xlu0 %8779, %v10943_v61  }
 0x1db   :  { %vm1544_vm8 = vcmp.eq.s32.totalorder %v1418_v42, 167  ;;  %v1821_v1 = vmul.f32 %v10919_v16, %v1630_v54  ;;  %vm12897_vm9 = vcmask 261120   ;;  %v1419_v17 = vsel %vm1335_vm5, %v1377_v46, %v1038_v56  ;;  %vm1336_vm10 = vmand %vm1294_vm7, %vm1252_vm3  ;;  %2231 = vperm.xlu1 %8780, %v10945_v23  }
 0x1dc   :  { %v11078_v0 = vsel %vm1543_vm1, 0.0, %v520_v59  ;;  %v11083_v36 = vsel %vm12896_vm6, %v523_v49, %v525_v39  ;;  %v2328_v62 = vmul.f32 %v10928_v26, %v2117_v22  ;;  %vm1461_vm11 = vcmp.eq.s32.totalorder %v1419_v17, 0  ;;  %v11093_v59 = vld [vmem:[#allocation10] ss:$0 sm:$0xff] }
 0x1dd   :  { %v11087_v53 = vsel %vm1336_vm10, %v1378_v55, %v1052_v44  ;;  %v398_v4 = vrot.slane %v11050_v31, 7  ;;  %v2075_v52 = vadd.f32 %v10977_v38, %v1819_v33  ;;  %v2076_v19 = vadd.f32 %v11022_v28, %v1820_v8  ;;  %v2122_v56 = vpop.permute.xlu1 %2121 }
 0x1de   :  { %v1502_v49 = vsel %vm1460_vm4, 0.0, %v11026_v50  ;;  %v11098_v61 = vsel %vm1544_vm8, 0.0, %v522_v12  ;;  %v2077_v20 = vadd.f32 %v11015_v10, %v1821_v1  ;;  %v2370_v58 = vadd.f32 %v2328_v62, %v2072_v35  ;;  %v2127_v28 = vpop.permute.xlu0 %2126  ;;  %2236 = vperm.xlu0 %8779, %v10982_v45  }
 0x1df   :  { %vm1545_vm12 = vcmp.eq.s32.totalorder %v1419_v17, 167  ;;  %v623_v44 = vadd.s32 240, %v10174_v2  ;;  %v2329_v38 = vmul.f32 %v10928_v26, %v2122_v56  ;;  %v1503_v23 = vsel %vm1461_vm11, 0.0, %v11029_v30  ;;  %2241 = vperm.xlu1 %8780, %v11006_v48   ;;  %v11137_v56 = vld [vmem:[%s12907_s19 + $0xf8] sm:$0xff] }
 0x1e0   :  { %vm1462_vm13 = vcmp.eq.s32.totalorder %v11087_v53, 0  ;;  %v11107_v50 = vadd.s32 248, %v10174_v2  ;;  %v2419_v12 = vmul.f32 %v11075_v51, %v2370_v58  ;;  %v2330_v10 = vmul.f32 %v10928_v26, %v2127_v28 }
 0x1e1   :  { %v11112_v35 = vmul.u32.u64.low 3272356035, %v623_v44  ;;  %v11113_v41 = vmul.u32.u64.high 3272356035, %v623_v44, %v11112_v35  ;;  %v2371_v42 = vadd.f32 %v2329_v38, %v2073_v21  ;;  %v11116_v33 = vsel %vm1545_vm12, 0.0, %v524_v18  ;;  %v2132_v55 = vpop.permute.xlu1 %2131 }
 0x1e2   :  { %v11119_v30 = vmul.u32.u64.low 3272356035, %v11107_v50  ;;  %v11120_v8 = vmul.u32.u64.high 3272356035, %v11107_v50, %v11119_v30  ;;  %v2468_v46 = vadd.f32 %v11093_v59, %v2419_v12  ;;  %v2372_v54 = vadd.f32 %v2330_v10, %v11060_v3  ;;  %v2137_v22 = vpop.permute.xlu0 %2136  ;;  %1734 = vperm.xlu0 %8779, %v11070_v60  }
 0x1e3   :  { %v1504_v45 = vsel %vm1462_vm13, 0.0, %v11037_v47  ;;  %vm1061_vm14 = vc.u32 %v11112_v35, 3272356035  ;;  %v2420_v1 = vmul.f32 %v11075_v51, %v2371_v42  ;;  %v2331_v21 = vmul.f32 %v10928_v26, %v2132_v55  ;;  %1739 = vperm.xlu1 %8780, %v1502_v49  }
 0x1e4   :  { %v1062_v48 = vsel %vm1061_vm14, 1, %v12946_v24  ;;  %vm1075_vm15 = vc.u32 %v11119_v30, 3272356035  ;;  %v2510_v18 = vmax.f32 %v2468_v46, 0.0  ;;  %v2421_v17 = vmul.f32 %v11075_v51, %v2372_v54 }
 0x1e5   :  { %v2332_v62 = vmul.f32 %v10928_v26, %v2137_v22  ;;  %v1063_v3 = vadd.s32 %v11113_v41, %v1062_v48  ;;  %v2469_v47 = vadd.f32 %v11093_v59, %v2420_v1  ;;  %v2373_v58 = vadd.f32 %v2331_v21, %v2075_v52  ;;  %v2142_v12 = vpop.permute.xlu1 %2141 }
 0x1e6   :  { %vm1546_vm1 = vcmp.eq.s32.totalorder %v11087_v53, 167  ;;  %v1076_v38 = vsel %vm1075_vm15, 1, %v12946_v24  ;;  %2553 = vst.msk [vmem:[#allocation2] sm:$0xff] %vm12897_vm9, %v2510_v18  ;;  %v2470_v60 = vadd.f32 %v11093_v59, %v2421_v17  ;;  %v2333_v41 = vmul.f32 %v10928_v26, %v2142_v12  ;;  %1744 = vperm.xlu0 %8779, %v1503_v23  }
 0x1e7   :  { %v2374_v28 = vadd.f32 %v2332_v62, %v2076_v19  ;;  %v1064_v10 = vshrl.u32 %v1063_v3, 7  ;;  %v1077_v35 = vadd.s32 %v11120_v8, %v1076_v38  ;;  %v2511_v52 = vmax.f32 %v2469_v47, 0.0  ;;  %v11152_v19 = vld [vmem:[%s12907_s19 + $0x100] sm:$0xff]  ;;  %1749 = vperm.xlu1 %8780, %v1504_v45   ;;  %v11166_v3 = vld [vmem:[%s12907_s19 + $0x108] sm:$0xff] }
 0x1e8   :  { %v2422_v49 = vmul.f32 %v11075_v51, %v2373_v58  ;;  %v11146_v42 = vadd.s32 256, %v10174_v2  ;;  %v2512_v30 = vmax.f32 %v2470_v60, 0.0  ;;  %v2375_v1 = vadd.f32 %v2333_v41, %v2077_v20 }
 0x1e9   :  { %v2423_v46 = vmul.f32 %v11075_v51, %v2374_v28  ;;  %v1065_v54 = vmul.u32 168, %v1064_v10  ;;  %v1078_v55 = vshrl.u32 %v1077_v35, 7  ;;  %2554 = vst.msk [vmem:[#allocation2 + $0x8] sm:$0xff] %vm12897_vm9, %v2511_v52  ;;  %v1635_v48 = vpop.permute.xlu0 %1634  ;;  %v400_v17 = vrot.slane %v11137_v56, 7 }
 0x1ea   :  { %v2471_v8 = vadd.f32 %v11093_v59, %v2422_v49  ;;  %v11157_v21 = vmul.u32.u64.low 3272356035, %v11146_v42  ;;  %v11158_v22 = vmul.u32.u64.high 3272356035, %v11146_v42, %v11157_v21  ;;  %2555 = vst.msk [vmem:[#allocation2 + $0x10] sm:$0xff] %vm12897_vm9, %v2512_v30  ;;  %v2424_v45 = vmul.f32 %v11075_v51, %v2375_v1  ;;  %1963 = vperm.xlu0 %8779, %v10906_v29  }
 0x1eb   :  { %v2472_v23 = vadd.f32 %v11093_v59, %v2423_v46  ;;  %v1066_v18 = vsub.s32 %v623_v44, %v1065_v54  ;;  %v1079_v62 = vmul.u32 168, %v1078_v55  ;;  %v12960_v47 = vrot.slane %v10974_v7, 7  ;;  %v1640_v44 = vpop.permute.xlu1 %1639  ;;  %1967 = vperm.xlu1 %8780, %v10952_v11  }
 0x1ec   :  { %v2513_v20 = vmax.f32 %v2471_v8, 0.0  ;;  %vm1089_vm2 = vc.u32 %v11157_v21, 3272356035  ;;  %v2473_v28 = vadd.f32 %v11093_v59, %v2424_v45  ;;  %v402_v10 = vrot.slane %v11152_v19, 7 }
 0x1ed   :  { %v399_v58 = vsel %vm338_vm0, %v12960_v47, %v398_v4  ;;  %v2514_v38 = vmax.f32 %v2472_v23, 0.0  ;;  %vm1253_vm3 = vcmp.ne.s32.totalorder %v1066_v18, 0  ;;  %vm1295_vm4 = vcmp.lt.s32.totalorder %v1066_v18, 0  ;;  %v1645_v30 = vpop.permute.xlu0 %1644 }
 0x1ee   :  { %v1379_v60 = vadd.s32 168, %v1066_v18  ;;  %2556 = vst.msk [vmem:[#allocation2 + $0x18] sm:$0xff] %vm12897_vm9, %v2513_v20  ;;  %vm1337_vm5 = vmand %vm1295_vm4, %vm1253_vm3  ;;  %v1080_v12 = vsub.s32 %v11107_v50, %v1079_v62  ;;  %v1090_v35 = vsel %vm1089_vm2, 1, %v12946_v24  ;;  %v11185_v29 = vsel %vm1546_vm1, 0.0, %v11083_v36  ;;  %1971 = vperm.xlu0 %8779, %v10957_v27  }
 0x1ef   :  { %2557 = vst.msk [vmem:[#allocation2 + $0x20] sm:$0xff] %vm12897_vm9, %v2514_v38  ;;  %v1091_v49 = vadd.s32 %v11158_v22, %v1090_v35  ;;  %v11189_v41 = vadd.s32 264, %v10174_v2  ;;  %v2515_v11 = vmax.f32 %v2473_v28, 0.0  ;;  %v404_v50 = vrot.slane %v11166_v3, 7  ;;  %v1650_v46 = vpop.permute.xlu1 %1649  ;;  %1975 = vperm.xlu1 %8780, %v10974_v7  }
 0x1f0   :  { %v1421_v52 = vsel %vm1337_vm5, %v1379_v60, %v1066_v18  ;;  %vm1254_vm7 = vcmp.ne.s32.totalorder %v1080_v12, 0  ;;  %vm1296_vm8 = vcmp.lt.s32.totalorder %v1080_v12, 0  ;;  %v401_v36 = vsel %vm338_vm0, %v398_v4, %v400_v17 }
 0x1f1   :  { %vm1463_vm10 = vcmp.eq.s32.totalorder %v1421_v52, 0  ;;  %vm1338_vm11 = vmand %vm1296_vm8, %vm1254_vm7  ;;  %v1380_v53 = vadd.s32 168, %v1080_v12  ;;  %v1092_v54 = vshrl.u32 %v1091_v49, 7  ;;  %2558 = vst.msk [vmem:[#allocation2 + $0x28] sm:$0xff] %vm12897_vm9, %v2515_v11  ;;  %v403_v55 = vsel %vm338_vm0, %v400_v17, %v402_v10  ;;  %v1884_v18 = vpop.permute.xlu0 %1883 }
 0x1f2   :  { %v11200_v8 = vmul.u32.u64.low 3272356035, %v11189_v41  ;;  %v11201_v1 = vmul.u32.u64.high 3272356035, %v11189_v41, %v11200_v8  ;;  %v527_v27 = vrot.slane %v11137_v56, 1  ;;  %v1822_v21 = vmul.f32 %v10919_v16, %v1635_v48  ;;  %2246 = vperm.xlu0 %8779, %v11078_v0   ;;  %v11225_v0 = vld [vmem:[%s12907_s19 + $0x110] sm:$0xff] }
 0x1f3   :  { %v1823_v22 = vmul.f32 %v10919_v16, %v1640_v44  ;;  %v1422_v4 = vsel %vm1338_vm11, %v1380_v53, %v1080_v12  ;;  %v1093_v23 = vmul.u32 168, %v1092_v54  ;;  %v1505_v62 = vsel %vm1463_vm10, 0.0, %v399_v58  ;;  %v1888_v20 = vpop.permute.xlu1 %1887  ;;  %2251 = vperm.xlu1 %8780, %v11098_v61  }
 0x1f4   :  { %v11209_v7 = vsel %vm338_vm0, %v402_v10, %v404_v50  ;;  %vm1103_vm12 = vc.u32 %v11200_v8, 3272356035  ;;  %v529_v17 = vrot.slane %v11152_v19, 1  ;;  %vm1464_vm13 = vcmp.eq.s32.totalorder %v1422_v4, 0 }
 0x1f5   :  { %v1094_v48 = vsub.s32 %v11146_v42, %v1093_v23  ;;  %v1104_v45 = vsel %vm1103_vm12, 1, %v12946_v24  ;;  %vm1547_vm14 = vcmp.eq.s32.totalorder %v1421_v52, 167  ;;  %v2036_v47 = vmul.f32 %v10803_v32, %v1884_v18  ;;  %v1892_v28 = vpop.permute.xlu0 %1891  ;;  %v2597_v35 = vld [vmem:[#allocation2 + $0x10] ss:$2 sm:$0xff] }
 0x1f6   :  { %v2037_v58 = vmul.f32 %v10803_v32, %v1888_v20  ;;  %v1105_v38 = vadd.s32 %v11201_v1, %v1104_v45  ;;  %v528_v44 = vsel %vm12896_vm6, %v525_v39, %v527_v27  ;;  %vm1548_vm2 = vcmp.eq.s32.totalorder %v1422_v4, 167  ;;  %v2639_v39 = vld [vmem:[#allocation2 + $0x11] ss:$2 sm:$0xff]  ;;  %2256 = vperm.xlu0 %8779, %v11116_v33  }
 0x1f7   :  { %vm1255_vm15 = vcmp.ne.s32.totalorder %v1094_v48, 0  ;;  %vm1297_vm1 = vcmp.lt.s32.totalorder %v1094_v48, 0  ;;  %v1381_v42 = vadd.s32 168, %v1094_v48  ;;  %v1824_v60 = vmul.f32 %v10919_v16, %v1645_v30  ;;  %v1896_v11 = vpop.permute.xlu1 %1895  ;;  %2261 = vperm.xlu1 %8780, %v11185_v29  }
 0x1f8   :  { %vm1339_vm3 = vmand %vm1297_vm1, %vm1255_vm15  ;;  %v1106_v61 = vshrl.u32 %v1105_v38, 7  ;;  %v530_v12 = vsel %vm12896_vm6, %v527_v27, %v529_v17  ;;  %v531_v10 = vrot.slane %v11166_v3, 1  ;;  %v1825_v49 = vmul.f32 %v10919_v16, %v1650_v46  ;;  %v2599_v30 = vld [vmem:[#allocation2 + $0x20] ss:$2 sm:$0xff]  ;;  %v2641_v1 = vld [vmem:[#allocation2 + $0x21] ss:$2 sm:$0xff] }
 0x1f9   :  { %v1506_v53 = vsel %vm1464_vm13, 0.0, %v401_v36  ;;  %v1423_v54 = vsel %vm1339_vm3, %v1381_v42, %v1094_v48  ;;  %v11234_v8 = vsel %vm1547_vm14, 0.0, %v528_v44  ;;  %v2078_v23 = vadd.f32 %v2036_v47, %v1822_v21  ;;  %v2147_v52 = vpop.permute.xlu0 %2146  ;;  %v2637_v44 = vld [vmem:[#allocation2 + $0x1] ss:$2 sm:$0xff] }
 0x1fa   :  { %v2079_v18 = vadd.f32 %v2037_v58, %v1823_v22  ;;  %vm1465_vm4 = vcmp.eq.s32.totalorder %v1423_v54, 0  ;;  %v1107_v27 = vmul.u32 168, %v1106_v61  ;;  %v2038_v20 = vmul.f32 %v10803_v32, %v1892_v28  ;;  %1754 = vperm.xlu0 %8779, %v1505_v62  }
 0x1fb   :  { %v2039_v46 = vmul.f32 %v10803_v32, %v1896_v11  ;;  %v11240_v33 = vsel %vm1548_vm2, 0.0, %v530_v12  ;;  %v533_v36 = vrot.slane %v11225_v0, 1  ;;  %v1507_v48 = vsel %vm1465_vm4, 0.0, %v403_v55  ;;  %v2152_v22 = vpop.permute.xlu1 %2151  ;;  %1759 = vperm.xlu1 %8780, %v1506_v53   ;;  %v2595_v55 = vld [vmem:[#allocation2] ss:$2 sm:$0xff] }
 0x1fc   :  { %v1108_v45 = vsub.s32 %v11189_v41, %v1107_v27  ;;  %v532_v21 = vsel %vm12896_vm6, %v529_v17, %v531_v10  ;;  %vm1549_vm5 = vcmp.eq.s32.totalorder %v1423_v54, 167  ;;  %v2334_v29 = vmul.f32 %v10928_v26, %v2147_v52 }
 0x1fd   :  { %v11248_v47 = vmax.f32 %v2597_v35, %v2639_v39  ;;  %v11250_v4 = vmax.f32 %v2599_v30, %v2641_v1  ;;  %v2855_v58 = vshrl.u32 %v10255_v34, 6  ;;  %v2335_v38 = vmul.f32 %v10928_v26, %v2152_v22  ;;  %v2157_v12 = vpop.permute.xlu0 %2156 }
 0x1fe   :  { %vm1256_vm7 = vcmp.ne.s32.totalorder %v1108_v45, 0  ;;  %vm1298_vm8 = vcmp.lt.s32.totalorder %v1108_v45, 0  ;;  %v1382_v41 = vadd.s32 168, %v1108_v45  ;;  %v2080_v17 = vadd.f32 %v2038_v20, %v1824_v60  ;;  %1764 = vperm.xlu0 %8779, %v1507_v48  }
 0x1ff   :  { %v2081_v42 = vadd.f32 %v2039_v46, %v1825_v49  ;;  %v2376_v28 = vadd.f32 %v2334_v29, %v2078_v23  ;;  %vm1340_vm10 = vmand %vm1298_vm8, %vm1256_vm7  ;;  %v11255_v62 = vsel %vm1549_vm5, 0.0, %v532_v21  ;;  %v2377_v61 = vadd.f32 %v2335_v38, %v2079_v18  ;;  %v2162_v1 = vpop.permute.xlu1 %2161 }
 0x200   :  { %v1424_v35 = vsel %vm1340_vm10, %v1382_v41, %v1108_v45  ;;  %v2856_v39 = vmul.u32 84, %v2855_v58  ;;  %v2869_v11 = vshrl.u32 %v10272_v43, 6  ;;  %v2336_v30 = vmul.f32 %v10928_v26, %v2157_v12 }
 0x201   :  { %v2425_v53 = vmul.f32 %v11075_v51, %v2376_v28  ;;  %vm1466_vm11 = vcmp.eq.s32.totalorder %v1424_v35, 0  ;;  %v2784_v60 = vrot.slane %v11248_v47, 1  ;;  %v2426_v49 = vmul.f32 %v11075_v51, %v2377_v61  ;;  %v1655_v45 = vpop.permute.xlu0 %1654 }
 0x202   :  { %v2337_v54 = vmul.f32 %v10928_v26, %v2162_v1  ;;  %v1508_v23 = vsel %vm1466_vm11, 0.0, %v11209_v7  ;;  %v2786_v18 = vrot.slane %v11250_v4, 1  ;;  %v2378_v20 = vadd.f32 %v2336_v30, %v2080_v17  ;;  %1979 = vperm.xlu0 %8779, %v11050_v31  }
 0x203   :  { %v2474_v27 = vadd.f32 %v11093_v59, %v2425_v53  ;;  %1769 = vperm.xlu1 %8780, %v1508_v23   ;;  %v11266_v46 = vmax.f32 %v2595_v55, %v2637_v44  ;;  %v2475_v52 = vadd.f32 %v11093_v59, %v2426_v49  ;;  %v2857_v21 = vsub.s32 %v10174_v2, %v2856_v39  ;;  %v1660_v7 = vpop.permute.xlu1 %1659 }
 0x204   :  { %v2379_v48 = vadd.f32 %v2337_v54, %v2081_v42  ;;  %v2870_v29 = vmul.u32 84, %v2869_v11  ;;  %v2427_v58 = vmul.f32 %v11075_v51, %v2378_v20  ;;  %v534_v38 = vsel %vm12896_vm6, %v531_v10, %v533_v36 }
 0x205   :  { %v2516_v22 = vmax.f32 %v2474_v27, 0.0  ;;  %v2883_v41 = vshrl.u32 %v10267_v40, 6  ;;  %v2517_v55 = vmax.f32 %v2475_v52, 0.0  ;;  %vm1550_vm12 = vcmp.eq.s32.totalorder %v1424_v35, 167  ;;  %v1665_v28 = vpop.permute.xlu0 %1664 }
 0x206   :  { %v2428_v44 = vmul.f32 %v11075_v51, %v2379_v48  ;;  %v2871_v17 = vsub.s32 %v10185_v6, %v2870_v29  ;;  %v2476_v42 = vadd.f32 %v11093_v59, %v2427_v58  ;;  %vm3140_vm13 = vcmp.ne.s32.totalorder %v2857_v21, 0  ;;  %1987 = vperm.xlu0 %8779, %v11152_v19  }
 0x207   :  { %2559 = vst.msk [vmem:[#allocation2 + $0x30] sm:$0xff] %vm12897_vm9, %v2516_v22  ;;  %1983 = vperm.xlu1 %8780, %v11137_v56   ;;  %vm3161_vm14 = vcmp.lt.s32.totalorder %v2857_v21, 0  ;;  %v3203_v31 = vadd.s32 84, %v2857_v21  ;;  %2560 = vst.msk [vmem:[#allocation2 + $0x38] sm:$0xff] %vm12897_vm9, %v2517_v55  ;;  %v1670_v39 = vpop.permute.xlu1 %1669  ;;  %v2787_v56 = vsel %vm12896_vm6, %v2784_v60, %v2786_v18  ;;  %v2884_v11 = vmul.u32 84, %v2883_v41 }
 0x208   :  { %v2477_v10 = vadd.f32 %v11093_v59, %v2428_v44  ;;  %vm3141_vm15 = vcmp.ne.s32.totalorder %v2871_v17, 0  ;;  %vm3162_vm1 = vcmp.lt.s32.totalorder %v2871_v17, 0  ;;  %vm3182_vm2 = vmand %vm3161_vm14, %vm3140_vm13  ;;  %v3204_v61 = vadd.s32 84, %v2871_v17 }
 0x209   :  { %v2518_v12 = vmax.f32 %v2476_v42, 0.0  ;;  %vm3183_vm3 = vmand %vm3162_vm1, %vm3141_vm15  ;;  %v2783_v30 = vrot.slane %v11266_v46, 1  ;;  %v1592_v49 = vsel %vm1550_vm12, 0.0, %v534_v38  ;;  %v11295_v54 = vsel %vm3182_vm2, %v3203_v31, %v2857_v21  ;;  %v1900_v23 = vpop.permute.xlu0 %1899 }
 0x20a   :  { %v2519_v53 = vmax.f32 %v2477_v10, 0.0  ;;  %v11290_v1 = vsel %vm3183_vm3, %v3204_v61, %v2871_v17  ;;  %v2885_v19 = vsub.s32 %v10182_v5, %v2884_v11  ;;  %vm3329_vm5 = vcmp.eq.s32.totalorder %v11295_v54, 83  ;;  %2266 = vperm.xlu0 %8779, %v11234_v8  }
 0x20b   :  { %2561 = vst.msk [vmem:[#allocation2 + $0x40] sm:$0xff] %vm12897_vm9, %v2518_v12  ;;  %1991 = vperm.xlu1 %8780, %v11166_v3   ;;  %vm3330_vm4 = vcmp.eq.s32.totalorder %v11290_v1, 83  ;;  %v2785_v27 = vsel %vm12896_vm6, %v2783_v30, %v2784_v60  ;;  %v2897_v52 = vshrl.u32 %v10293_v57, 6  ;;  %v2040_v48 = vmul.f32 %v10803_v32, %v1900_v23  ;;  %v1904_v35 = vpop.permute.xlu1 %1903 }
 0x20c   :  { %2562 = vst.msk [vmem:[#allocation2 + $0x48] sm:$0xff] %vm12897_vm9, %v2519_v53  ;;  %v3393_v20 = vsel %vm3330_vm4, 0.0, %v2787_v56  ;;  %vm3142_vm7 = vcmp.ne.s32.totalorder %v2885_v19, 0  ;;  %vm3163_vm8 = vcmp.lt.s32.totalorder %v2885_v19, 0  ;;  %v1826_v21 = vmul.f32 %v10919_v16, %v1655_v45 }
 0x20d   :  { %v8781_v29 = vpack.i.bf16 %v11248_v47, %v11266_v46  ;;  %v2898_v22 = vmul.u32 84, %v2897_v52  ;;  %vm11308_vm10 = vmand %vm3163_vm8, %vm3142_vm7  ;;  %v3205_v58 = vadd.s32 84, %v2885_v19  ;;  %v1827_v38 = vmul.f32 %v10919_v16, %v1660_v7  ;;  %v1908_v42 = vpop.permute.xlu0 %1907 }
 0x20e   :  { %v1828_v41 = vmul.f32 %v10919_v16, %v1665_v28  ;;  %v2041_v8 = vmul.f32 %v10803_v32, %v1904_v35  ;;  %v3392_v45 = vsel %vm3329_vm5, 0.0, %v2785_v27  ;;  %v2601_v55 = vld [vmem:[#allocation2 + $0x30] ss:$2 sm:$0xff]  ;;  %v2643_v44 = vld [vmem:[#allocation2 + $0x31] ss:$2 sm:$0xff]  ;;  %v1829_v17 = vmul.f32 %v10919_v16, %v1670_v39  ;;  %2276 = vperm.xlu0 %8779, %v11255_v62  }
 0x20f   :  { %2271 = vperm.xlu1 %8780, %v11240_v33   ;;  %v8786_v31 = vpack.i.bf16 %v3393_v20, %v3392_v45  ;;  %v11319_v10 = vmax.f32 %v2601_v55, %v2643_v44  ;;  %v2899_v61 = vsub.s32 %v10192_v9, %v2898_v22  ;;  %v2082_v7 = vadd.f32 %v2040_v48, %v1826_v21  ;;  %v1912_v12 = vpop.permute.xlu1 %1911 }
 0x210   :  { %v2042_v28 = vmul.f32 %v10803_v32, %v1908_v42  ;;  %v11326_v33 = vsel %vm11308_vm10, %v3205_v58, %v2885_v19  ;;  %v11329_v56 = vadd.s32 272, %v10174_v2  ;;  %v2043_v39 = vmul.f32 %v10803_v32, %v1912_v12 }
 0x211   :  { %v2788_v11 = vrot.slane %v11319_v10, 1  ;;  %vm3143_vm11 = vcmp.ne.s32.totalorder %v2899_v61, 0  ;;  %vm3331_vm12 = vcmp.eq.s32.totalorder %v11326_v33, 83  ;;  %v2083_v53 = vadd.f32 %v2041_v8, %v1827_v38  ;;  %v2167_v20 = vpop.permute.xlu0 %2166 }
 0x212   :  { %v8791_v62 = vpack.i.bf16 %v11319_v10, %v11250_v4  ;;  %vm3164_vm13 = vcmp.lt.s32.totalorder %v2899_v61, 0  ;;  %v3206_v19 = vadd.s32 84, %v2899_v61  ;;  %v2084_v27 = vadd.f32 %v2042_v28, %v1828_v41  ;;  %8782 = vrot.lane.b32.xlu0 %v8781_v29, %s9872_s3 }
 0x213   :  { %2281 = vperm.xlu1 %8780, %v1592_v49   ;;  %v2603_v30 = vld [vmem:[#allocation2 + $0x40] ss:$2 sm:$0xff]  ;;  %v2645_v23 = vld [vmem:[#allocation2 + $0x41] ss:$2 sm:$0xff]  ;;  %v2789_v48 = vsel %vm12896_vm6, %v2786_v18, %v2788_v11  ;;  %vm3185_vm14 = vmand %vm3164_vm13, %vm3143_vm11  ;;  %v11342_v35 = vadd.s32 288, %v10174_v2  ;;  %v2085_v49 = vadd.f32 %v2043_v39, %v1829_v17  ;;  %v2338_v21 = vmul.f32 %v10928_v26, %v2167_v20  ;;  %v2172_v22 = vpop.permute.xlu1 %2171 }
 0x214   :  { %v11336_v52 = vmax.f32 %v2603_v30, %v2645_v23  ;;  %v11346_v60 = vsel %vm3185_vm14, %v3206_v19, %v2899_v61  ;;  %v2911_v58 = vshrl.u32 %v10300_v63, 6  ;;  %v2339_v38 = vmul.f32 %v10928_v26, %v2172_v22 }
 0x215   :  { %vm3332_vm15 = vcmp.eq.s32.totalorder %v11346_v60, 83  ;;  %v3394_v18 = vsel %vm3331_vm12, 0.0, %v2789_v48  ;;  %v2380_v8 = vadd.f32 %v2338_v21, %v2082_v7  ;;  %v2177_v17 = vpop.permute.xlu0 %2176 }
 0x216   :  { %v2790_v41 = vrot.slane %v11336_v52, 1  ;;  %v11356_v45 = vmul.u32.u64.low 3272356035, %v11329_v56  ;;  %v11357_v29 = vmul.u32.u64.high 3272356035, %v11329_v56, %v11356_v45  ;;  %v2912_v55 = vmul.u32 84, %v2911_v58  ;;  %8792 = vrot.lane.b32.xlu0 %v8791_v62, %s9872_s3  ;;  %v11379_v58 = vld [vmem:[%s12907_s19 + $0x118] sm:$0xff] }
 0x217   :  { %8787 = vrot.lane.b32.xlu1 %v8786_v31, %s9854_s5  ;;  %v2381_v44 = vadd.f32 %v2339_v38, %v2083_v53  ;;  %v11363_v61 = vmul.u32.u64.low 3272356035, %v11342_v35  ;;  %v11364_v28 = vmul.u32.u64.high 3272356035, %v11342_v35, %v11363_v61  ;;  %v2429_v12 = vmul.f32 %v11075_v51, %v2380_v8  ;;  %v2182_v31 = vpop.permute.xlu1 %2181 }
 0x218   :  { %v2791_v42 = vsel %vm12896_vm6, %v2788_v11, %v2790_v41  ;;  %v2340_v7 = vmul.f32 %v10928_v26, %v2177_v17  ;;  %vm1117_vm1 = vc.u32 %v11356_v45, 3272356035  ;;  %v2341_v30 = vmul.f32 %v10928_v26, %v2182_v31 }
 0x219   :  { %v3395_v39 = vsel %vm3332_vm15, 0.0, %v2791_v42  ;;  %v2430_v53 = vmul.f32 %v11075_v51, %v2381_v44  ;;  %v1118_v11 = vsel %vm1117_vm1, 1, %v12946_v24  ;;  %v2478_v19 = vadd.f32 %v11093_v59, %v2429_v12  ;;  %v1675_v62 = vpop.permute.xlu0 %1674  ;;  %v11389_v42 = vld [vmem:[%s12907_s19 + $0x120] sm:$0xff] }
 0x21a   :  { %v8796_v23 = vpack.i.bf16 %v3395_v39, %v3394_v18  ;;  %v2382_v20 = vadd.f32 %v2340_v7, %v2084_v27  ;;  %v1119_v48 = vadd.s32 %v11357_v29, %v1118_v11  ;;  %vm1145_vm2 = vc.u32 %v11363_v61, 3272356035 }
 0x21b   :  { %v2479_v21 = vadd.f32 %v11093_v59, %v2430_v53  ;;  %v2383_v22 = vadd.f32 %v2341_v30, %v2085_v49  ;;  %v1146_v38 = vsel %vm1145_vm2, 1, %v12946_v24  ;;  %v2913_v18 = vsub.s32 %v10209_v14, %v2912_v55  ;;  %v1680_v45 = vpop.permute.xlu1 %1679 }
 0x21c   :  { %8797 = vrot.lane.b32.xlu1 %v8796_v23, %s9854_s5  ;;  %v2520_v8 = vmax.f32 %v2478_v19, 0.0  ;;  %v2431_v27 = vmul.f32 %v11075_v51, %v2382_v20  ;;  %v1120_v29 = vshrl.u32 %v1119_v48, 7  ;;  %v12861_v17 = vrot.slane %v11225_v0, 7 }
 0x21d   :  { %v2521_v44 = vmax.f32 %v2479_v21, 0.0  ;;  %v2432_v49 = vmul.f32 %v11075_v51, %v2383_v22  ;;  %v1147_v61 = vadd.s32 %v11364_v28, %v1146_v38  ;;  %v12863_v7 = vrot.slane %v11379_v58, 7  ;;  %v1685_v39 = vpop.permute.xlu0 %1684 }
 0x21e   :  { %2563 = vst.msk [vmem:[#allocation2 + $0x50] sm:$0xff] %vm12897_vm9, %v2520_v8  ;;  %v2480_v55 = vadd.f32 %v11093_v59, %v2431_v27  ;;  %v1121_v12 = vmul.u32 168, %v1120_v29  ;;  %v2925_v31 = vshrl.u32 %v10313_v37, 6  ;;  %vm3144_vm3 = vcmp.ne.s32.totalorder %v2913_v18, 0 }
 0x21f   :  { %2564 = vst.msk [vmem:[#allocation2 + $0x58] sm:$0xff] %vm12897_vm9, %v2521_v44  ;;  %v2481_v51 = vadd.f32 %v11093_v59, %v2432_v49  ;;  %v1148_v53 = vshrl.u32 %v1147_v61, 7  ;;  %vm3165_vm4 = vcmp.lt.s32.totalorder %v2913_v18, 0  ;;  %v1690_v23 = vpop.permute.xlu1 %1689  ;;  %v12860_v11 = vrot.slane %v11389_v42, 7 }
 0x220   :  { %v2522_v30 = vmax.f32 %v2480_v55, 0.0  ;;  %v1122_v28 = vsub.s32 %v11329_v56, %v1121_v12  ;;  %v2926_v19 = vmul.u32 84, %v2925_v31  ;;  %v3207_v21 = vadd.s32 84, %v2913_v18  ;;  %vm11403_vm8 = vmand %vm3165_vm4, %vm3144_vm3 }
 0x221   :  { %v2523_v20 = vmax.f32 %v2481_v51, 0.0  ;;  %v1149_v48 = vmul.u32 168, %v1148_v53  ;;  %v1916_v56 = vpop.permute.xlu0 %1915  ;;  %v407_v8 = vsel %vm338_vm0, %v404_v50, %v12861_v17  ;;  %v1830_v29 = vmul.f32 %v10919_v16, %v1675_v62 }
 0x222   :  { %2565 = vst.msk [vmem:[#allocation2 + $0x60] sm:$0xff] %vm12897_vm9, %v2522_v30  ;;  %vm1257_vm5 = vcmp.ne.s32.totalorder %v1122_v28, 0  ;;  %vm1299_vm7 = vcmp.lt.s32.totalorder %v1122_v28, 0  ;;  %v1383_v22 = vadd.s32 168, %v1122_v28  ;;  %v2927_v59 = vsub.s32 %v10212_v15, %v2926_v19 }
 0x223   :  { %2566 = vst.msk [vmem:[#allocation2 + $0x68] sm:$0xff] %vm12897_vm9, %v2523_v20  ;;  %vm1341_vm10 = vmand %vm1299_vm7, %vm1257_vm5  ;;  %v1150_v27 = vsub.s32 %v11342_v35, %v1149_v48  ;;  %v1831_v44 = vmul.f32 %v10919_v16, %v1680_v45  ;;  %v1920_v49 = vpop.permute.xlu1 %1919  ;;  %v411_v55 = vsel %vm338_vm0, %v12863_v7, %v12860_v11  ;;  %v1832_v3 = vmul.f32 %v10919_v16, %v1685_v39 }
 0x224   :  { %v11416_v61 = vsel %vm1341_vm10, %v1383_v22, %v1122_v28  ;;  %vm3145_vm13 = vcmp.ne.s32.totalorder %v2927_v59, 0  ;;  %vm3166_vm14 = vcmp.lt.s32.totalorder %v2927_v59, 0  ;;  %v2044_v50 = vmul.f32 %v10803_v32, %v1916_v56 }
 0x225   :  { %vm1259_vm11 = vcmp.ne.s32.totalorder %v1150_v27, 0  ;;  %vm1301_vm12 = vcmp.lt.s32.totalorder %v1150_v27, 0  ;;  %v1385_v45 = vadd.s32 168, %v1150_v27  ;;  %v11427_v12 = vsel %vm11403_vm8, %v3207_v21, %v2913_v18  ;;  %v1924_v51 = vpop.permute.xlu0 %1923  ;;  %vm11439_vm2 = vmand %vm3166_vm14, %vm3145_vm13 }
 0x226   :  { %v2605_v35 = vld [vmem:[#allocation2 + $0x50] ss:$2 sm:$0xff]  ;;  %v2647_v62 = vld [vmem:[#allocation2 + $0x51] ss:$2 sm:$0xff]  ;;  %vm1343_vm15 = vmand %vm1301_vm12, %vm1259_vm11  ;;  %v2045_v31 = vmul.f32 %v10803_v32, %v1920_v49  ;;  %vm1467_vm1 = vcmp.eq.s32.totalorder %v11416_v61, 0  ;;  %v3208_v30 = vadd.s32 84, %v2927_v59  ;;  %v1833_v39 = vmul.f32 %v10919_v16, %v1690_v23 }
 0x227   :  { %v11430_v53 = vmax.f32 %v2605_v35, %v2647_v62  ;;  %v2046_v28 = vmul.f32 %v10803_v32, %v1924_v51  ;;  %v1928_v19 = vpop.permute.xlu1 %1927  ;;  %v11435_v20 = vsel %vm1343_vm15, %v1385_v45, %v1150_v27  ;;  %vm3333_vm3 = vcmp.eq.s32.totalorder %v11427_v12, 83 }
 0x228   :  { %vm1469_vm4 = vcmp.eq.s32.totalorder %v11435_v20, 0  ;;  %v11449_v21 = vadd.s32 280, %v10174_v2  ;;  %v2086_v22 = vadd.f32 %v2044_v50, %v1830_v29  ;;  %v2047_v38 = vmul.f32 %v10803_v32, %v1928_v19 }
 0x229   :  { %12965 = vst [vmem:[#allocation86_spill] sm:$0xff] %v11430_v53  ;;  %v8801_v48 = vpack.i.bf16 %v11430_v53, %v11336_v52  ;;  %v2792_v23 = vrot.slane %v11430_v53, 1  ;;  %v1509_v56 = vsel %vm1467_vm1, 0.0, %v407_v8  ;;  %v11453_v35 = vadd.s32 296, %v10174_v2  ;;  %v2187_v51 = vpop.permute.xlu0 %2186 }
 0x22a   :  { %v2607_v27 = vld [vmem:[#allocation2 + $0x60] ss:$2 sm:$0xff]  ;;  %v2649_v49 = vld [vmem:[#allocation2 + $0x61] ss:$2 sm:$0xff]  ;;  %v2087_v62 = vadd.f32 %v2045_v31, %v1831_v44  ;;  %v2088_v45 = vadd.f32 %v2046_v28, %v1832_v3  ;;  %v11460_v17 = vsel %vm11439_vm2, %v3208_v30, %v2927_v59  ;;  %v2342_v29 = vmul.f32 %v10928_v26, %v2187_v51  ;;  %v11484_v51 = vld [vmem:[#allocation8] ss:$0 sm:$0xff] }
 0x22b   :  { %8802 = vrot.lane.b32.xlu0 %v8801_v48, %s9872_s3  ;;  %v11456_v11 = vmax.f32 %v2607_v27, %v2649_v49  ;;  %v2192_v50 = vpop.permute.xlu1 %2191  ;;  %v1511_v8 = vsel %vm1469_vm4, 0.0, %v411_v55  ;;  %v2793_v44 = vsel %vm12896_vm6, %v2790_v41, %v2792_v23  ;;  %vm3334_vm5 = vcmp.eq.s32.totalorder %v11460_v17, 83 }
 0x22c   :  { %v2343_v3 = vmul.f32 %v10928_v26, %v2192_v50  ;;  %v11472_v28 = vmul.u32.u64.low 3272356035, %v11449_v21  ;;  %v11473_v59 = vmul.u32.u64.high 3272356035, %v11449_v21, %v11472_v28  ;;  %v2089_v30 = vadd.f32 %v2047_v38, %v1833_v39 }
 0x22d   :  { %v12862_v31 = vrot.slane %v11456_v11, 1  ;;  %v2384_v19 = vadd.f32 %v2342_v29, %v2086_v22  ;;  %v11476_v18 = vmul.u32.u64.low 3272356035, %v11453_v35  ;;  %v11477_v48 = vmul.u32.u64.high 3272356035, %v11453_v35, %v11476_v18  ;;  %v2197_v27 = vpop.permute.xlu0 %2196 }
 0x22e   :  { %v2385_v55 = vadd.f32 %v2343_v3, %v2087_v62  ;;  %v3396_v49 = vsel %vm3333_vm3, 0.0, %v2793_v44  ;;  %vm1131_vm7 = vc.u32 %v11472_v28, 3272356035  ;;  %v2344_v22 = vmul.f32 %v10928_v26, %v2197_v27  ;;  %v11494_v3 = vld [vmem:[#allocation10] ss:$0 sm:$0xff] }
 0x22f   :  { %1774 = vperm.xlu0 %8779, %v1509_v56   ;;  %v2795_v41 = vsel %vm12896_vm6, %v2792_v23, %v12862_v31  ;;  %v2433_v39 = vmul.f32 %v11484_v51, %v2384_v19  ;;  %v2202_v38 = vpop.permute.xlu1 %2201  ;;  %v1132_v56 = vsel %vm1131_vm7, 1, %v12946_v24  ;;  %vm1159_vm8 = vc.u32 %v11476_v18, 3272356035 }
 0x230   :  { %v3397_v62 = vsel %vm3334_vm5, 0.0, %v2795_v41  ;;  %v2434_v29 = vmul.f32 %v11484_v51, %v2385_v55  ;;  %v2345_v23 = vmul.f32 %v10928_v26, %v2202_v38  ;;  %v1133_v44 = vadd.s32 %v11473_v59, %v1132_v56 }
 0x231   :  { %v8806_v50 = vpack.i.bf16 %v3397_v62, %v3396_v49  ;;  %v2482_v28 = vadd.f32 %v11494_v3, %v2433_v39  ;;  %v2386_v19 = vadd.f32 %v2344_v22, %v2088_v45  ;;  %v12866_v27 = vrot.slane %v11379_v58, 1  ;;  %v11499_v7 = vpop.permute.xlu0 %1694 }
 0x232   :  { %v2483_v31 = vadd.f32 %v11494_v3, %v2434_v29  ;;  %v2387_v41 = vadd.f32 %v2345_v23, %v2089_v30  ;;  %v1134_v55 = vshrl.u32 %v1133_v44, 7  ;;  %v1160_v49 = vsel %vm1159_vm8, 1, %v12946_v24 }
 0x233   :  { %1784 = vperm.xlu0 %8779, %v1511_v8   ;;  %8807 = vrot.lane.b32.xlu1 %v8806_v50, %s9854_s5  ;;  %v2524_v59 = vmax.f32 %v2482_v28, 0.0  ;;  %v2435_v38 = vmul.f32 %v11484_v51, %v2386_v19  ;;  %v11504_v62 = vpop.permute.xlu1 %1699  ;;  %v1161_v45 = vadd.s32 %v11477_v48, %v1160_v49  ;;  %v536_v48 = vsel %vm12896_vm6, %v533_v36, %v12866_v27 }
 0x234   :  { %v2525_v18 = vmax.f32 %v2483_v31, 0.0  ;;  %v2436_v39 = vmul.f32 %v11484_v51, %v2387_v41  ;;  %v1135_v22 = vmul.u32 168, %v1134_v55  ;;  %v11517_v31 = vld [vmem:[%s12907_s19 + $0x128] sm:$0xff]  ;;  %vm1551_vm10 = vcmp.eq.s32.totalorder %v11416_v61, 167  ;;  %v11553_v61 = vld [vmem:[%s12907_s19 + $0x130] sm:$0xff] }
 0x235   :  { %2567 = vst.msk [vmem:[#allocation2 + $0x70] sm:$0xff] %vm12897_vm9, %v2524_v59  ;;  %v2484_v8 = vadd.f32 %v11494_v3, %v2435_v38  ;;  %v1162_v30 = vshrl.u32 %v1161_v45, 7  ;;  %v1705_v29 = vpop.permute.xlu0 %1704  ;;  %v537_v19 = vrot.slane %v11389_v42, 1  ;;  %v12968_v49 = vrot.slane %v11379_v58, 7 }
 0x236   :  { %2568 = vst.msk [vmem:[#allocation2 + $0x78] sm:$0xff] %vm12897_vm9, %v2525_v18  ;;  %v2485_v56 = vadd.f32 %v11494_v3, %v2436_v39  ;;  %v1136_v23 = vsub.s32 %v11449_v21, %v1135_v22  ;;  %v12865_v21 = vrot.slane %v11517_v31, 1  ;;  %v12969_v59 = vrot.slane %v11225_v0, 7 }
 0x237   :  { %1995 = vperm.xlu0 %8779, %v11225_v0   ;;  %v2526_v50 = vmax.f32 %v2484_v8, 0.0  ;;  %v1710_v44 = vpop.permute.xlu1 %1709  ;;  %v1163_v28 = vmul.u32 168, %v1162_v30  ;;  %v12864_v38 = vrot.slane %v11517_v31, 7  ;;  %v2939_v22 = vshrl.u32 %v10393_v13, 6 }
 0x238   :  { %v2527_v41 = vmax.f32 %v2485_v56, 0.0  ;;  %vm1258_vm11 = vcmp.ne.s32.totalorder %v1136_v23, 0  ;;  %vm1300_vm12 = vcmp.lt.s32.totalorder %v1136_v23, 0  ;;  %v1384_v55 = vadd.s32 168, %v1136_v23 }
 0x239   :  { %2569 = vst.msk [vmem:[#allocation2 + $0x80] sm:$0xff] %vm12897_vm9, %v2526_v50  ;;  %v409_v36 = vsel %vm338_vm0, %v12969_v59, %v12968_v49  ;;  %vm1342_vm13 = vmand %vm1300_vm12, %vm1258_vm11  ;;  %v1164_v45 = vsub.s32 %v11453_v35, %v1163_v28  ;;  %v1932_v39 = vpop.permute.xlu0 %1931  ;;  %v2953_v8 = vshrl.u32 %v10417_v25, 6  ;;  %v1593_v30 = vsel %vm1551_vm10, 0.0, %v536_v48 }
 0x23a   :  { %2570 = vst.msk [vmem:[#allocation2 + $0x88] sm:$0xff] %vm12897_vm9, %v2527_v41  ;;  %v1426_v18 = vsel %vm1342_vm13, %v1384_v55, %v1136_v23  ;;  %v540_v23 = vsel %vm12896_vm6, %v537_v19, %v12865_v21  ;;  %vm1553_vm3 = vcmp.eq.s32.totalorder %v11435_v20, 167  ;;  %v12970_v50 = vrot.slane %v11389_v42, 7 }
 0x23b   :  { %2003 = vperm.xlu0 %8779, %v11389_v42   ;;  %vm1468_vm14 = vcmp.eq.s32.totalorder %v1426_v18, 0  ;;  %vm1260_vm15 = vcmp.ne.s32.totalorder %v1164_v45, 0  ;;  %vm1302_vm1 = vcmp.lt.s32.totalorder %v1164_v45, 0  ;;  %v1936_v0 = vpop.permute.xlu1 %1935  ;;  %v1386_v35 = vadd.s32 168, %v1164_v45 }
 0x23c   :  { %v1510_v56 = vsel %vm1468_vm14, 0.0, %v409_v36  ;;  %vm1344_vm2 = vmand %vm1302_vm1, %vm1260_vm15  ;;  %v413_v28 = vsel %vm338_vm0, %v12970_v50, %v12864_v38  ;;  %v2940_v59 = vmul.u32 84, %v2939_v22  ;;  %v2954_v20 = vmul.u32 84, %v2953_v8 }
 0x23d   :  { %1779 = vperm.xlu1 %8780, %v1510_v56   ;;  %v2609_v41 = vld [vmem:[#allocation2 + $0x70] ss:$2 sm:$0xff]  ;;  %v2651_v55 = vld [vmem:[#allocation2 + $0x71] ss:$2 sm:$0xff]  ;;  %v11555_v48 = vsel %vm1344_vm2, %v1386_v35, %v1164_v45  ;;  %v1940_v49 = vpop.permute.xlu0 %1939  ;;  %v2048_v36 = vmul.f32 %v10803_v32, %v1932_v39  ;;  %v1595_v56 = vsel %vm1553_vm3, 0.0, %v540_v23  ;;  %v2049_v38 = vmul.f32 %v10803_v32, %v1936_v0 }
 0x23e   :  { %vm1470_vm4 = vcmp.eq.s32.totalorder %v11555_v48, 0  ;;  %v11560_v21 = vmax.f32 %v2609_v41, %v2651_v55  ;;  %v1834_v45 = vmul.f32 %v10919_v16, %v11499_v7  ;;  %v1835_v22 = vmul.f32 %v10919_v16, %v11504_v62  ;;  %v12972_v41 = vld [vmem:[#allocation48_spill] sm:$0xff]  ;;  %v12973_v7 = vld [vmem:[#allocation49_spill] sm:$0xff] }
 0x23f   :  { %2286 = vperm.xlu0 %8779, %v1593_v30   ;;  %v1944_v42 = vpop.permute.xlu1 %1943  ;;  %v1512_v50 = vsel %vm1470_vm4, 0.0, %v413_v28  ;;  %v1836_v8 = vmul.f32 %v10919_v16, %v1705_v29  ;;  %v2050_v39 = vmul.f32 %v10803_v32, %v1940_v49  ;;  %v12971_v35 = vrot.slane %v11379_v58, 1 }
 0x240   :  { %vm1552_vm5 = vcmp.eq.s32.totalorder %v1426_v18, 167  ;;  %v11573_v55 = vsub.s32 %v12972_v41, %v2940_v59  ;;  %v2955_v27 = vsub.s32 %v12973_v7, %v2954_v20  ;;  %v1837_v62 = vmul.f32 %v10919_v16, %v1710_v44  ;;  %v12991_v7 = vld [vmem:[#allocation67_spill] sm:$0xff] }
 0x241   :  { %1789 = vperm.xlu1 %8780, %v1512_v50   ;;  %v2207_v30 = vpop.permute.xlu0 %2206  ;;  %v538_v0 = vsel %vm12896_vm6, %v12971_v35, %v537_v19  ;;  %v2611_v23 = vld [vmem:[#allocation2 + $0x80] ss:$2 sm:$0xff]  ;;  %v2653_v28 = vld [vmem:[#allocation2 + $0x81] ss:$2 sm:$0xff]  ;;  %v2090_v29 = vadd.f32 %v2048_v36, %v1834_v45  ;;  %v2051_v50 = vmul.f32 %v10803_v32, %v1944_v42  ;;  %v2091_v13 = vadd.f32 %v2049_v38, %v1835_v22 }
 0x242   :  { %v2346_v49 = vmul.f32 %v10928_v26, %v2207_v30  ;;  %v8811_v19 = vpack.i.bf16 %v11560_v21, %v11456_v11  ;;  %v12974_v35 = vrot.slane %v11553_v61, 1  ;;  %v12975_v59 = vrot.slane %v11517_v31, 1 }
 0x243   :  { %2296 = vperm.xlu0 %8779, %v1595_v56   ;;  %v2212_v56 = vpop.permute.xlu1 %2211  ;;  %v2092_v41 = vadd.f32 %v2050_v39, %v1836_v8  ;;  %v1594_v36 = vsel %vm1552_vm5, 0.0, %v538_v0  ;;  %v11589_v42 = vmax.f32 %v2611_v23, %v2653_v28  ;;  %vm3146_vm7 = vcmp.ne.s32.totalorder %v11573_v55, 0 }
 0x244   :  { %v2347_v25 = vmul.f32 %v10928_v26, %v2212_v56  ;;  %v542_v20 = vsel %vm12896_vm6, %v12975_v59, %v12974_v35  ;;  %v2388_v44 = vadd.f32 %v2346_v49, %v2090_v29  ;;  %vm3147_vm8 = vcmp.ne.s32.totalorder %v2955_v27, 0 }
 0x245   :  { %1999 = vperm.xlu1 %8780, %v11379_v58   ;;  %12976 = vst [vmem:[#allocation87_spill] sm:$0xff] %v11589_v42  ;;  %v2217_v45 = vpop.permute.xlu0 %2216  ;;  %vm3168_vm10 = vcmp.lt.s32.totalorder %v2955_v27, 0  ;;  %v2093_v22 = vadd.f32 %v2051_v50, %v1837_v62  ;;  %v12977_v58 = vld [vmem:[#allocation60_spill] sm:$0xff]  ;;  %vm3167_vm11 = vcmp.lt.s32.totalorder %v11573_v55, 0  ;;  %v12869_v28 = vrot.slane %v11589_v42, 1  ;;  %v12978_v62 = vld [vmem:[#allocation61_spill] sm:$0xff] }
 0x246   :  { %v2389_v38 = vadd.f32 %v2347_v25, %v2091_v13  ;;  %v2437_v30 = vmul.f32 %v11484_v51, %v2388_v44  ;;  %v2348_v8 = vmul.f32 %v10928_v26, %v2217_v45  ;;  %v2967_v29 = vshrl.u32 %v12977_v58, 6  ;;  %vm3189_vm12 = vmand %vm3168_vm10, %vm3147_vm8 }
 0x247   :  { %8812 = vrot.lane.b32.xlu0 %v8811_v19, %s9872_s3  ;;  %v2222_v39 = vpop.permute.xlu1 %2221  ;;  %v3210_v13 = vadd.s32 84, %v2955_v27  ;;  %v2981_v50 = vshrl.u32 %v12978_v62, 6  ;;  %vm1554_vm13 = vcmp.eq.s32.totalorder %v11555_v48, 167  ;;  %v3209_v35 = vadd.s32 84, %v11573_v55  ;;  %vm11617_vm14 = vmand %vm3167_vm11, %vm3146_vm7 }
 0x248   :  { %v2438_v18 = vmul.f32 %v11484_v51, %v2389_v38  ;;  %v2349_v0 = vmul.f32 %v10928_v26, %v2222_v39  ;;  %v2486_v25 = vadd.f32 %v11494_v3, %v2437_v30  ;;  %v2390_v23 = vadd.f32 %v2348_v8, %v2092_v41 }
 0x249   :  { %2007 = vperm.xlu1 %8780, %v11517_v31   ;;  %v11605_v19 = vpop.permute.xlu0 %1714  ;;  %v2796_v41 = vrot.slane %v11560_v21, 1  ;;  %v11622_v39 = vsel %vm3189_vm12, %v3210_v13, %v2955_v27  ;;  %v3009_v14 = vshrl.u32 %v12991_v7, 6  ;;  %v12992_v15 = vmov 0.0  }
 0x24a   :  { %v2487_v49 = vadd.f32 %v11494_v3, %v2438_v18  ;;  %v2391_v56 = vadd.f32 %v2349_v0, %v2093_v22  ;;  %v2528_v59 = vmax.f32 %v2486_v25, 0.0  ;;  %v2439_v44 = vmul.f32 %v11484_v51, %v2390_v23  ;;  %v8906_v0 = vld [vmem:[%s12796_s4] sm:$0xff]  }
 0x24b   :  { %v11610_v38 = vpop.permute.xlu1 %1719  ;;  %v2968_v22 = vmul.u32 84, %v2967_v29  ;;  %v2982_v18 = vmul.u32 84, %v2981_v50  ;;  %v2799_v23 = vsel %vm12896_vm6, %v2796_v41, %v12869_v28  ;;  %vm3336_vm15 = vcmp.eq.s32.totalorder %v11622_v39, 83  ;;  %v12983_v28 = vld [vmem:[#allocation57_spill] sm:$0xff] }
 0x24c   :  { %v2529_v30 = vmax.f32 %v2487_v49, 0.0  ;;  %v2440_v8 = vmul.f32 %v11484_v51, %v2391_v56  ;;  %2571 = vst.msk [vmem:[#allocation2 + $0x90] sm:$0xff] %vm12897_vm9, %v2528_v59  ;;  %v2488_v25 = vadd.f32 %v11494_v3, %v2439_v44  ;;  %v1596_v29 = vsel %vm1554_vm13, 0.0, %v542_v20  ;;  %v12982_v44 = vld [vmem:[#allocation56_spill] sm:$0xff] }
 0x24d   :  { %2291 = vperm.xlu1 %8780, %v1594_v36   ;;  %v1725_v13 = vpop.permute.xlu0 %1724  ;;  %v11640_v50 = vsel %vm11617_vm14, %v3209_v35, %v11573_v55  ;;  %v12981_v49 = vrot.slane %v11456_v11, 1  ;;  %v3399_v20 = vsel %vm3336_vm15, 0.0, %v2799_v23  ;;  %v2983_v45 = vsub.s32 %v12983_v28, %v2982_v18  ;;  %v8907_v55 = vld [vmem:[%s12796_s4 + $0x8] sm:$0xff]   ;;  %v8908_v18 = vld [vmem:[%s12796_s4 + $0x10] sm:$0xff]  }
 0x24e   :  { %2572 = vst.msk [vmem:[#allocation2 + $0x98] sm:$0xff] %vm12897_vm9, %v2529_v30  ;;  %v2489_v27 = vadd.f32 %v11494_v3, %v2440_v8  ;;  %v2530_v36 = vmax.f32 %v2488_v25, 0.0  ;;  %vm3335_vm1 = vcmp.eq.s32.totalorder %v11640_v50, 83  ;;  %v2969_v30 = vsub.s32 %v12982_v44, %v2968_v22 }
 0x24f   :  { %v2797_v56 = vsel %vm12896_vm6, %v12981_v49, %v2796_v41  ;;  %v11646_v59 = vpop.permute.xlu1 %1729  ;;  %v12870_v8 = vmov 0.0   ;;  %vm3149_vm4 = vcmp.ne.s32.totalorder %v2983_v45, 0  ;;  %vm3170_vm5 = vcmp.lt.s32.totalorder %v2983_v45, 0 }
 0x250   :  { %8516 = vmatprep.subr.bf16.mxu0 %v12870_v8  ;;  %v2531_v48 = vmax.f32 %v2489_v27, 0.0  ;;  %2573 = vst.msk [vmem:[#allocation2 + $0xa0] sm:$0xff] %vm12897_vm9, %v2530_v36  ;;  %v3398_v35 = vsel %vm3335_vm1, 0.0, %v2797_v56  ;;  %vm3148_vm2 = vcmp.ne.s32.totalorder %v2969_v30, 0  ;;  %vm3169_vm3 = vcmp.lt.s32.totalorder %v2969_v30, 0  ;;  %vm11672_vm8 = vmand %vm3170_vm5, %vm3149_vm4 }
 0x251   :  { %8517 = vmatpush3.bf16.msra.mxu0 %v8906_v0  ;;  %2301 = vperm.xlu1 %8780, %v1596_v29   ;;  %v1948_v41 = vpop.permute.xlu0 %1947  ;;  %v8816_v22 = vpack.i.bf16 %v3399_v20, %v3398_v35  ;;  %v3211_v27 = vadd.s32 84, %v2969_v30  ;;  %vm11664_vm7 = vmand %vm3169_vm3, %vm3148_vm2  ;;  %v3212_v56 = vadd.s32 84, %v2983_v45  ;;  %v1840_v44 = vmul.f32 %v10919_v16, %v1725_v13 }
 0x252   :  { %8518 = vmatprep.subr.bf16.mxu0 %v12870_v8  ;;  %2574 = vst.msk [vmem:[#allocation2 + $0xa8] sm:$0xff] %vm12897_vm9, %v2531_v48  ;;  %v2052_v48 = vmul.f32 %v10803_v32, %v1948_v41  ;;  %v8909_v41 = vld [vmem:[%s12796_s4 + $0x18] sm:$0xff]   ;;  %v3010_v35 = vmul.u32 84, %v3009_v14  ;;  %vm9874_vm12 = vmmov 0  }
 0x253   :  { %v1952_v25 = vpop.permute.xlu1 %1951  ;;  %8528 = vmatprep.mubr.msk.bf16.mxu0 %vm9874_vm12, %v12992_v15 }
 0x254   :  { %v2053_v20 = vmul.f32 %v10803_v32, %v1952_v25  ;;  %v1839_v25 = vmul.f32 %v10919_v16, %v11610_v38  ;;  %v11700_v38 = vsel %vm11672_vm8, %v3212_v56, %v2983_v45  ;;  %v8910_v56 = vld [vmem:[%s12796_s4 + $0x20] sm:$0xff]   ;;  %vm3245_vm8 = vcmp.eq.s32.totalorder %v11295_v54, 0 }
 0x255   :  { %8519 = vmatpush3.bf16.msra.mxu0 %v8907_v55  ;;  %8817 = vrot.lane.b32.xlu1 %v8816_v22, %s9854_s5  ;;  %v2613_v0 = vld [vmem:[#allocation2 + $0x90] ss:$2 sm:$0xff]  ;;  %v2655_v23 = vld [vmem:[#allocation2 + $0x91] ss:$2 sm:$0xff]  ;;  %v1956_v29 = vpop.permute.xlu0 %1955  ;;  %v1838_v22 = vmul.f32 %v10919_v16, %v11605_v19  ;;  %v11690_v19 = vsel %vm11664_vm7, %v3211_v27, %v2969_v30  ;;  %12993 = vst [vmem:[#allocation67_spill] sm:$0xff] %v11700_v38  ;;  %vm3338_vm11 = vcmp.eq.s32.totalorder %v11700_v38, 83 }
 0x256   :  { %8520 = vmatprep.subr.bf16.mxu0 %v12870_v8  ;;  %v11662_v36 = vmax.f32 %v2613_v0, %v2655_v23  ;;  %v12989_v8 = vld [vmem:[#allocation65_spill] sm:$0xff]  ;;  %12990 = vst [vmem:[#allocation89_spill] sm:$0xff] %v11690_v19  ;;  %vm3337_vm10 = vcmp.eq.s32.totalorder %v11690_v19, 83  ;;  %v2095_v30 = vadd.f32 %v2053_v20, %v1839_v25 }
 0x257   :  { %v1960_v55 = vpop.permute.xlu1 %1959  ;;  %v2995_v28 = vshrl.u32 %v12989_v8, 6  ;;  %v2094_v13 = vadd.f32 %v2052_v48, %v1838_v22 }
 0x258   :  { %12984 = vst [vmem:[#allocation88_spill] sm:$0xff] %v11662_v36  ;;  %v8821_v0 = vpack.i.bf16 %v11662_v36, %v11589_v42  ;;  %v2800_v23 = vrot.slane %v11662_v36, 1 }
 0x259   :  { %8521 = vmatpush3.bf16.msra.mxu0 %v8908_v18  ;;  %v2615_v62 = vld [vmem:[#allocation2 + $0xa0] ss:$2 sm:$0xff]  ;;  %v2657_v58 = vld [vmem:[#allocation2 + $0xa1] ss:$2 sm:$0xff]  ;;  %v2054_v18 = vmul.f32 %v10803_v32, %v1956_v29  ;;  %v2227_v8 = vpop.permute.xlu0 %2226  ;;  %v2055_v29 = vmul.f32 %v10803_v32, %v1960_v55  ;;  %v2996_v20 = vmul.u32 84, %v2995_v28 }
 0x25a   :  { %8522 = vmatprep.subr.bf16.mxu0 %v12992_v15  ;;  %8822 = vrot.lane.b32.xlu0 %v8821_v0, %s9872_s3  ;;  %v11696_v63 = vmax.f32 %v2615_v62, %v2657_v58  ;;  %v2350_v27 = vmul.f32 %v10928_v26, %v2227_v8  ;;  %v12994_v58 = vrot.slane %v11589_v42, 1  ;;  %v1841_v8 = vmul.f32 %v10919_v16, %v11646_v59 }
 0x25b   :  { %v2232_v7 = vpop.permute.xlu1 %2231  ;;  %v2096_v55 = vadd.f32 %v2054_v18, %v1840_v44 }
 0x25c   :  { %v2351_v49 = vmul.f32 %v10928_v26, %v2232_v7  ;;  %v2801_v62 = vsel %vm12896_vm6, %v12994_v58, %v2800_v23  ;;  %v12875_v45 = vrot.slane %v11696_v63, 1  ;;  %v2392_v48 = vadd.f32 %v2350_v27, %v2094_v13  ;;  %v8911_v13 = vld [vmem:[%s12796_s4 + $0x28] sm:$0xff]  }
 0x25d   :  { %8523 = vmatpush3.bf16.msra.mxu0 %v8909_v41  ;;  %v2237_v0 = vpop.permute.xlu0 %2236  ;;  %v3400_v59 = vsel %vm3337_vm10, 0.0, %v2801_v62  ;;  %v2097_v28 = vadd.f32 %v2055_v29, %v1841_v8  ;;  %vm3246_vm10 = vcmp.eq.s32.totalorder %v11290_v1, 0 }
 0x25e   :  { %8524 = vmatprep.subr.bf16.mxu0 %v12992_v15  ;;  %v2393_v22 = vadd.f32 %v2351_v49, %v2095_v30  ;;  %v2803_v25 = vsel %vm12896_vm6, %v2800_v23, %v12875_v45  ;;  %v2441_v41 = vmul.f32 %v11484_v51, %v2392_v48  ;;  %v2352_v7 = vmul.f32 %v10928_v26, %v2237_v0 }
 0x25f   :  { %v2242_v58 = vpop.permute.xlu1 %2241  ;;  %v3401_v14 = vsel %vm3338_vm11, 0.0, %v2803_v25 }
 0x260   :  { %v2442_v44 = vmul.f32 %v11484_v51, %v2393_v22  ;;  %v2353_v23 = vmul.f32 %v10928_v26, %v2242_v58  ;;  %v8826_v18 = vpack.i.bf16 %v3401_v14, %v3400_v59  ;;  %v2490_v30 = vadd.f32 %v11494_v3, %v2441_v41  ;;  %v12996_v59 = vld [vmem:[#allocation63_spill] sm:$0xff] }
 0x261   :  { %8525 = vmatpush3.bf16.msra.mxu0 %v8910_v56  ;;  %v2394_v27 = vadd.f32 %v2352_v7, %v2096_v55  ;;  %v1735_v48 = vpop.permute.xlu0 %1734  ;;  %v12995_v56 = vld [vmem:[#allocation62_spill] sm:$0xff]  ;;  %v3011_v41 = vsub.s32 %v12996_v59, %v3010_v35  ;;  %v12997_v35 = vld [vmem:[#allocation68_spill] sm:$0xff] }
 0x262   :  { %8526 = vmatprep.subr.bf16.mxu0 %v12992_v15  ;;  %v2491_v49 = vadd.f32 %v11494_v3, %v2442_v44  ;;  %v2395_v62 = vadd.f32 %v2353_v23, %v2097_v28  ;;  %8827 = vrot.lane.b32.xlu1 %v8826_v18, %s9854_s5  ;;  %v2532_v29 = vmax.f32 %v2490_v30, 0.0  ;;  %v2997_v0 = vsub.s32 %v12995_v56, %v2996_v20 }
 0x263   :  { %v2443_v8 = vmul.f32 %v11484_v51, %v2394_v27  ;;  %v1740_v22 = vpop.permute.xlu1 %1739  ;;  %vm3151_vm15 = vcmp.ne.s32.totalorder %v3011_v41, 0  ;;  %vm3172_vm1 = vcmp.lt.s32.totalorder %v3011_v41, 0  ;;  %v3023_v23 = vshrl.u32 %v12997_v35, 6 }
 0x264   :  { %v2533_v25 = vmax.f32 %v2491_v49, 0.0  ;;  %v2444_v58 = vmul.f32 %v11484_v51, %v2395_v62  ;;  %2575 = vst.msk [vmem:[#allocation2 + $0xb0] sm:$0xff] %vm12897_vm9, %v2532_v29  ;;  %vm3150_vm13 = vcmp.ne.s32.totalorder %v2997_v0, 0  ;;  %vm3171_vm14 = vcmp.lt.s32.totalorder %v2997_v0, 0  ;;  %vm3193_vm3 = vmand %vm3172_vm1, %vm3151_vm15 }
 0x265   :  { %8527 = vmatpush3.bf16.msra.mxu0 %v8911_v13  ;;  %v2492_v55 = vadd.f32 %v11494_v3, %v2443_v8  ;;  %v1745_v14 = vpop.permute.xlu0 %1744  ;;  %v11749_v18 = vadd.s32 304, %v10174_v2  ;;  %vm3192_vm2 = vmand %vm3171_vm14, %vm3150_vm13  ;;  %v3213_v30 = vadd.s32 84, %v2997_v0  ;;  %v3214_v27 = vadd.s32 84, %v3011_v41 }
 0x266   :  { %4513 = vmatprep.subr.bf16.mxu0 %v12946_v24  ;;  %2576 = vst.msk [vmem:[#allocation2 + $0xb8] sm:$0xff] %vm12897_vm9, %v2533_v25  ;;  %v2493_v7 = vadd.f32 %v11494_v3, %v2444_v58  ;;  %v3024_v8 = vmul.u32 84, %v3023_v23  ;;  %v12998_v25 = vld [vmem:[#allocation69_spill] sm:$0xff]  ;;  %v11766_v62 = vadd.s32 320, %v10174_v2  ;;  %v1844_v9 = vmul.f32 %v10919_v16, %v1745_v14 }
 0x267   :  { %v2534_v28 = vmax.f32 %v2492_v55, 0.0  ;;  %v1750_v44 = vpop.permute.xlu1 %1749  ;;  %v3037_v58 = vshrl.u32 %v12998_v25, 6  ;;  %v11761_v45 = vsel %vm3192_vm2, %v3213_v30, %v2997_v0  ;;  %v11763_v56 = vsel %vm3193_vm3, %v3214_v27, %v3011_v41  ;;  %v13000_v30 = vld [vmem:[#allocation64_spill] sm:$0xff] }
 0x268   :  { %v2535_v20 = vmax.f32 %v2493_v7, 0.0  ;;  %12999 = vst [vmem:[#allocation63_spill] sm:$0xff] %v11761_v45  ;;  %vm3339_vm4 = vcmp.eq.s32.totalorder %v11761_v45, 83  ;;  %vm3340_vm5 = vcmp.eq.s32.totalorder %v11763_v56, 83  ;;  %v11776_v41 = vsub.s32 %v13000_v30, %v3024_v8 }
 0x269   :  { %2577 = vst.msk [vmem:[#allocation2 + $0xc0] sm:$0xff] %vm12897_vm9, %v2534_v28  ;;  %v1964_v13 = vpop.permute.xlu0 %1963  ;;  %v11756_v7 = vmul.u32.u64.low 3272356035, %v11749_v18  ;;  %v11757_v28 = vmul.u32.u64.high 3272356035, %v11749_v18, %v11756_v7  ;;  %v1842_v27 = vmul.f32 %v10919_v16, %v1735_v48  ;;  %v3038_v5 = vmul.u32 84, %v3037_v58 }
 0x26a   :  { %2578 = vst.msk [vmem:[#allocation2 + $0xc8] sm:$0xff] %vm12897_vm9, %v2535_v20  ;;  %v2056_v23 = vmul.f32 %v10803_v32, %v1964_v13  ;;  %v1843_v13 = vmul.f32 %v10919_v16, %v1740_v22  ;;  %v11786_v8 = vmul.u32.u64.low 3272356035, %v11766_v62  ;;  %v11787_v30 = vmul.u32.u64.high 3272356035, %v11766_v62, %v11786_v8 }
 0x26b   :  { %v1968_v49 = vpop.permute.xlu1 %1967  ;;  %vm1173_vm7 = vc.u32 %v11756_v7, 3272356035  ;;  %v13002_v7 = vld [vmem:[#allocation66_spill] sm:$0xff]  ;;  %vm3247_vm13 = vcmp.eq.s32.totalorder %v11326_v33, 0  ;;  %vm3152_vm14 = vcmp.ne.s32.totalorder %v11776_v41, 0  ;;  %vm3173_vm15 = vcmp.lt.s32.totalorder %v11776_v41, 0 }
 0x26c   :  { %v2057_v25 = vmul.f32 %v10803_v32, %v1968_v49  ;;  %v2098_v6 = vadd.f32 %v2056_v23, %v1842_v27  ;;  %v11802_v27 = vsub.s32 %v13002_v7, %v3038_v5  ;;  %vm1201_vm11 = vc.u32 %v11786_v8, 3272356035  ;;  %vm11853_vm3 = vmand %vm3173_vm15, %vm3152_vm14 }
 0x26d   :  { %v2617_v59 = vld [vmem:[#allocation2 + $0xb0] ss:$2 sm:$0xff]  ;;  %v2659_v55 = vld [vmem:[#allocation2 + $0xb1] ss:$2 sm:$0xff]  ;;  %v1972_v20 = vpop.permute.xlu0 %1971  ;;  %v2725_v8 = vrot.slane %v11319_v10, 7  ;;  %vm3581_vm15 = vcmask 523264  }
 0x26e   :  { %v11759_v35 = vmax.f32 %v2617_v59, %v2659_v55  ;;  %v2058_v49 = vmul.f32 %v10803_v32, %v1972_v20  ;;  %v2099_v48 = vadd.f32 %v2057_v25, %v1843_v13  ;;  %v1174_v20 = vsel %vm1173_vm7, 1, %v12946_v24 }
 0x26f   :  { %v1976_v29 = vpop.permute.xlu1 %1975  ;;  %vm3153_vm1 = vcmp.ne.s32.totalorder %v11802_v27, 0  ;;  %vm3174_vm2 = vcmp.lt.s32.totalorder %v11802_v27, 0 }
 0x270   :  { %v8831_v59 = vpack.i.bf16 %v11759_v35, %v11696_v63  ;;  %v2804_v0 = vrot.slane %v11759_v35, 1  ;;  %v2059_v14 = vmul.f32 %v10803_v32, %v1976_v29  ;;  %v2100_v23 = vadd.f32 %v2058_v49, %v1844_v9 }
 0x271   :  { %v2619_v55 = vld [vmem:[#allocation2 + $0xc0] ss:$2 sm:$0xff]  ;;  %v2661_v37 = vld [vmem:[#allocation2 + $0xc1] ss:$2 sm:$0xff]  ;;  %v2247_v40 = vpop.permute.xlu0 %2246  ;;  %v1175_v29 = vadd.s32 %v11757_v28, %v1174_v20  ;;  %v2723_v20 = vrot.slane %v11250_v4, 7  ;;  %v1202_v4 = vsel %vm1201_vm11, 1, %v12946_v24 }
 0x272   :  { %8832 = vrot.lane.b32.xlu0 %v8831_v59, %s9872_s3  ;;  %v11783_v57 = vmax.f32 %v2619_v55, %v2661_v37  ;;  %v2354_v22 = vmul.f32 %v10928_v26, %v2247_v40  ;;  %v13001_v37 = vrot.slane %v11696_v63, 1  ;;  %v1845_v40 = vmul.f32 %v10919_v16, %v1750_v44 }
 0x273   :  { %v2252_v43 = vpop.permute.xlu1 %2251  ;;  %v1176_v7 = vshrl.u32 %v1175_v29, 7 }
 0x274   :  { %v2355_v58 = vmul.f32 %v10928_v26, %v2252_v43  ;;  %v2805_v59 = vsel %vm12896_vm6, %v13001_v37, %v2804_v0  ;;  %v12889_v55 = vrot.slane %v11783_v57, 1  ;;  %v2396_v25 = vadd.f32 %v2354_v22, %v2098_v6 }
 0x275   :  { %v2257_v34 = vpop.permute.xlu0 %2256  ;;  %v3402_v6 = vsel %vm3339_vm4, 0.0, %v2805_v59  ;;  %v2101_v9 = vadd.f32 %v2059_v14, %v1845_v40  ;;  %vm3248_vm4 = vcmp.eq.s32.totalorder %v11346_v60, 0  ;;  %v13013_v36 = vrot.slane %v11783_v57, 1 }
 0x276   :  { %v2397_v13 = vadd.f32 %v2355_v58, %v2099_v48  ;;  %v2807_v43 = vsel %vm12896_vm6, %v2804_v0, %v12889_v55  ;;  %v2445_v37 = vmul.f32 %v11484_v51, %v2396_v25  ;;  %v2356_v38 = vmul.f32 %v10928_v26, %v2257_v34 }
 0x277   :  { %v2262_v19 = vpop.permute.xlu1 %2261  ;;  %v3403_v5 = vsel %vm3340_vm5, 0.0, %v2807_v43  ;;  %v13003_v34 = vrot.slane %v11266_v46, 7  ;;  %v13004_v43 = vrot.slane %v11248_v47, 7  ;;  %v3216_v46 = vadd.s32 84, %v11802_v27  ;;  %vm3195_vm5 = vmand %vm3174_vm2, %vm3153_vm1 }
 0x278   :  { %v2446_v44 = vmul.f32 %v11484_v51, %v2397_v13  ;;  %v2357_v49 = vmul.f32 %v10928_v26, %v2262_v19  ;;  %v8836_v0 = vpack.i.bf16 %v3403_v5, %v3402_v6  ;;  %v2494_v28 = vadd.f32 %v11494_v3, %v2445_v37 }
 0x279   :  { %v2398_v48 = vadd.f32 %v2356_v38, %v2100_v23  ;;  %v2782_v22 = vsel %vm338_vm0, 0.0, %v13003_v34  ;;  %v11823_v14 = vpop.permute.xlu0 %1754  ;;  %v13005_v37 = vmov %v13003_v34  ;;  %v3215_v5 = vadd.s32 84, %v11776_v41  ;;  %v13009_v34 = vld [vmem:[#allocation75_spill] sm:$0xff] }
 0x27a   :  { %v2495_v58 = vadd.f32 %v11494_v3, %v2446_v44  ;;  %v2399_v59 = vadd.f32 %v2357_v49, %v2101_v9  ;;  %8837 = vrot.lane.b32.xlu1 %v8836_v0, %s9854_s5  ;;  %v2536_v19 = vmax.f32 %v2494_v28, 0.0  ;;  %v2722_v6 = vsel %vm338_vm0, %v13005_v37, %v13004_v43  ;;  %v13008_v0 = vld [vmem:[#allocation71_spill] sm:$0xff] }
 0x27b   :  { %v2447_v38 = vmul.f32 %v11484_v51, %v2398_v48  ;;  %v11829_v40 = vpop.permute.xlu1 %1759  ;;  %v1203_v49 = vadd.s32 %v11787_v30, %v1202_v4  ;;  %v3051_v10 = vshrl.u32 %v13008_v0, 6  ;;  %v11863_v48 = vsel %vm3245_vm8, 0.0, %v2782_v22 }
 0x27c   :  { %v2537_v23 = vmax.f32 %v2495_v58, 0.0  ;;  %v2448_v25 = vmul.f32 %v11484_v51, %v2399_v59  ;;  %2579 = vst.msk [vmem:[#allocation2 + $0xd0] sm:$0xff] %vm12897_vm9, %v2536_v19  ;;  %v3065_v58 = vshrl.u32 %v13009_v34, 6  ;;  %v11874_v30 = vsel %vm3246_vm10, 0.0, %v2722_v6 }
 0x27d   :  { %v2496_v13 = vadd.f32 %v11494_v3, %v2447_v38  ;;  %v11847_v44 = vpop.permute.xlu0 %1764  ;;  %v13010_v38 = vmov %v13004_v43  ;;  %v1177_v22 = vmul.u32 168, %v1176_v7  ;;  %v2726_v4 = vsel %vm338_vm0, %v2723_v20, %v2725_v8 }
 0x27e   :  { %2580 = vst.msk [vmem:[#allocation2 + $0xd8] sm:$0xff] %vm12897_vm9, %v2537_v23  ;;  %v2497_v9 = vadd.f32 %v11494_v3, %v2448_v25  ;;  %v2724_v54 = vsel %vm338_vm0, %v13010_v38, %v2723_v20  ;;  %v2727_v23 = vrot.slane %v11336_v52, 7  ;;  %v12888_v25 = vrot.slane %v11430_v53, 7  ;;  %v11898_v52 = vld [vmem:[%s12907_s19 + $0x138] sm:$0xff]  ;;  %v11903_v20 = vld [vmem:[%s12907_s19 + $0x140] sm:$0xff] }
 0x27f   :  { %v2538_v28 = vmax.f32 %v2496_v13, 0.0  ;;  %v11884_v13 = vadd.s32 312, %v10174_v2  ;;  %v11890_v47 = vsel %vm11853_vm3, %v3215_v5, %v11776_v41  ;;  %v11893_v7 = vsel %vm3195_vm5, %v3216_v46, %v11802_v27 }
 0x280   :  { %v2539_v59 = vmax.f32 %v2497_v9, 0.0  ;;  %v1204_v43 = vshrl.u32 %v1203_v49, 7  ;;  %v3052_v37 = vmul.u32 84, %v3051_v10  ;;  %vm3341_vm7 = vcmp.eq.s32.totalorder %v11890_v47, 83 }
 0x281   :  { %2581 = vst.msk [vmem:[#allocation2 + $0xe0] sm:$0xff] %vm12897_vm9, %v2538_v28  ;;  %v1980_v1 = vpop.permute.xlu0 %1979  ;;  %v3066_v6 = vmul.u32 84, %v3065_v58  ;;  %v11907_v41 = vmul.u32.u64.low 3272356035, %v11884_v13  ;;  %v11908_v5 = vmul.u32.u64.high 3272356035, %v11884_v13, %v11907_v41  ;;  %v11911_v27 = vadd.s32 328, %v10174_v2 }
 0x282   :  { %v11870_v19 = vpop.permute.xlu1 %1769  ;;  %2582 = vst.msk [vmem:[#allocation2 + $0xe8] sm:$0xff] %vm12897_vm9, %v2539_v59  ;;  %vm3342_vm8 = vcmp.eq.s32.totalorder %v11893_v7, 83  ;;  %v11916_v29 = vsel %vm3247_vm13, 0.0, %v2724_v54  ;;  %v11920_v46 = vsel %vm3248_vm4, 0.0, %v2726_v4  ;;  %v11924_v0 = vsub.s32 %v11749_v18, %v1177_v22  ;;  %v13011_v18 = vld [vmem:[#allocation70_spill] sm:$0xff]  ;;  %v13012_v4 = vld [vmem:[#allocation72_spill] sm:$0xff] }
 0x283   :  { %v11927_v34 = vsel %vm338_vm0, %v2725_v8, %v2727_v23  ;;  %v11932_v33 = vsel %vm338_vm0, %v2727_v23, %v12888_v25  ;;  %v1205_v54 = vmul.u32 168, %v1204_v43  ;;  %v11939_v22 = vsub.s32 %v13011_v18, %v3052_v37 }
 0x284   :  { %vm1187_vm10 = vc.u32 %v11907_v41, 3272356035  ;;  %v2060_v8 = vmul.f32 %v10803_v32, %v1980_v1  ;;  %v11943_v49 = vsub.s32 %v13012_v4, %v3066_v6  ;;  %vm1261_vm11 = vcmp.ne.s32.totalorder %v11924_v0, 0 }
 0x285   :  { %v2621_v10 = vld [vmem:[#allocation2 + $0xd0] ss:$2 sm:$0xff]  ;;  %v2663_v28 = vld [vmem:[#allocation2 + $0xd1] ss:$2 sm:$0xff]  ;;  %v1988_v59 = vpop.permute.xlu0 %1987  ;;  %v11946_v23 = vmul.u32.u64.low 3272356035, %v11911_v27  ;;  %v11947_v25 = vmul.u32.u64.high 3272356035, %v11911_v27, %v11946_v23  ;;  %v1846_v1 = vmul.f32 %v10919_v16, %v11823_v14  ;;  %v1847_v18 = vmul.f32 %v10919_v16, %v11829_v40 }
 0x286   :  { %v1984_v9 = vpop.permute.xlu1 %1983  ;;  %v11936_v38 = vmax.f32 %v2621_v10, %v2663_v28  ;;  %vm1303_vm13 = vcmp.lt.s32.totalorder %v11924_v0, 0  ;;  %v1387_v41 = vadd.s32 168, %v11924_v0  ;;  %v1188_v28 = vsel %vm1187_vm10, 1, %v12946_v24 }
 0x287   :  { %v2061_v43 = vmul.f32 %v10803_v32, %v1984_v9  ;;  %v2062_v4 = vmul.f32 %v10803_v32, %v1988_v59  ;;  %v11966_v14 = vsub.s32 %v11766_v62, %v1205_v54  ;;  %v2102_v9 = vadd.f32 %v2060_v8, %v1846_v1  ;;  %vm11995_vm1 = vmand %vm1303_vm13, %vm1261_vm11 }
 0x288   :  { %v8841_v60 = vpack.i.bf16 %v11936_v38, %v11783_v57  ;;  %v2808_v10 = vrot.slane %v11936_v38, 1  ;;  %vm1215_vm14 = vc.u32 %v11946_v23, 3272356035  ;;  %v1848_v40 = vmul.f32 %v10919_v16, %v11847_v44 }
 0x289   :  { %v2623_v37 = vld [vmem:[#allocation2 + $0xe0] ss:$2 sm:$0xff]  ;;  %v2665_v6 = vld [vmem:[#allocation2 + $0xe1] ss:$2 sm:$0xff]  ;;  %v2267_v55 = vpop.permute.xlu0 %2266  ;;  %v1189_v62 = vadd.s32 %v11908_v5, %v1188_v28  ;;  %v1849_v54 = vmul.f32 %v10919_v16, %v11870_v19  ;;  %vm3154_vm2 = vcmp.ne.s32.totalorder %v11939_v22, 0  ;;  %vm3175_vm3 = vcmp.lt.s32.totalorder %v11939_v22, 0 }
 0x28a   :  { %v1992_v58 = vpop.permute.xlu1 %1991  ;;  %8842 = vrot.lane.b32.xlu0 %v8841_v60, %s9872_s3  ;;  %v11963_v2 = vmax.f32 %v2623_v37, %v2665_v6  ;;  %v2358_v45 = vmul.f32 %v10928_v26, %v2267_v55  ;;  %v2809_v42 = vsel %vm12896_vm6, %v13013_v36, %v2808_v10  ;;  %v2103_v55 = vadd.f32 %v2061_v43, %v1847_v18 }
 0x28b   :  { %v2063_v59 = vmul.f32 %v10803_v32, %v1992_v58  ;;  %v2104_v36 = vadd.f32 %v2062_v4, %v1848_v40  ;;  %v3404_v58 = vsel %vm3341_vm7, 0.0, %v2809_v42  ;;  %v1216_v6 = vsel %vm1215_vm14, 1, %v12946_v24 }
 0x28c   :  { %v2810_v60 = vrot.slane %v11963_v2, 1  ;;  %v2400_v8 = vadd.f32 %v2358_v45, %v2102_v9  ;;  %vm3249_vm4 = vcmp.eq.s32.totalorder %v11427_v12, 0  ;;  %vm3662_vm5 = vcmask 785408  }
 0x28d   :  { %v2277_v37 = vpop.permute.xlu0 %2276  ;;  %v2105_v42 = vadd.f32 %v2063_v59, %v1849_v54  ;;  %v12003_v43 = vadd.s32 84, %v11939_v22  ;;  %v1190_v18 = vshrl.u32 %v1189_v62, 7  ;;  %vm3155_vm7 = vcmp.ne.s32.totalorder %v11943_v49, 0 }
 0x28e   :  { %v2272_v53 = vpop.permute.xlu1 %2271  ;;  %v2811_v44 = vsel %vm12896_vm6, %v2808_v10, %v2810_v60  ;;  %v2449_v5 = vmul.f32 %v11484_v51, %v2400_v8  ;;  %v2360_v19 = vmul.f32 %v10928_v26, %v2277_v37  ;;  %v12014_v59 = vsel %vm11995_vm1, %v1387_v41, %v11924_v0  ;;  %vm12054_vm6 = vmand %vm3175_vm3, %vm3154_vm2 }
 0x28f   :  { %v2359_v1 = vmul.f32 %v10928_v26, %v2272_v53  ;;  %v3405_v53 = vsel %vm3342_vm8, 0.0, %v2811_v44  ;;  %vm3250_vm8 = vcmp.eq.s32.totalorder %v11460_v17, 0  ;;  %vm1263_vm10 = vcmp.ne.s32.totalorder %v11966_v14, 0 }
 0x290   :  { %v8846_v10 = vpack.i.bf16 %v3405_v53, %v3404_v58  ;;  %v2498_v4 = vadd.f32 %v11494_v3, %v2449_v5  ;;  %v2402_v40 = vadd.f32 %v2360_v19, %v2104_v36  ;;  %vm1305_vm11 = vcmp.lt.s32.totalorder %v11966_v14, 0 }
 0x291   :  { %v2401_v28 = vadd.f32 %v2359_v1, %v2103_v55  ;;  %v8783_v8 = vpop.permute.xlu0 %8782  ;;  %v1217_v62 = vadd.s32 %v11947_v25, %v1216_v6  ;;  %v1191_v19 = vmul.u32 168, %v1190_v18  ;;  %vm3176_vm13 = vcmp.lt.s32.totalorder %v11943_v49, 0  ;;  %vm1347_vm14 = vmand %vm1305_vm11, %vm1263_vm10 }
 0x292   :  { %v2282_v23 = vpop.permute.xlu1 %2281  ;;  %8847 = vrot.lane.b32.xlu1 %v8846_v10, %s9854_s5  ;;  %v2540_v54 = vmax.f32 %v2498_v4, 0.0  ;;  %v2451_v36 = vmul.f32 %v11484_v51, %v2402_v40  ;;  %v8785_v44 = vunpack.i.h.bf16 %v8783_v8  ;;  %v8784_v58 = vunpack.i.l.bf16 %v8783_v8  ;;  %vm12076_vm2 = vmand %vm3176_vm13, %vm3155_vm7 }
 0x293   :  { %v2450_v9 = vmul.f32 %v11484_v51, %v2401_v28  ;;  %v2361_v55 = vmul.f32 %v10928_v26, %v2282_v23  ;;  %v1389_v28 = vadd.s32 168, %v11966_v14  ;;  %v1218_v10 = vshrl.u32 %v1217_v62, 7 }
 0x294   :  { %2583 = vst.msk [vmem:[#allocation2 + $0xf0] sm:$0xff] %vm12897_vm9, %v2540_v54  ;;  %v2500_v41 = vadd.f32 %v11494_v3, %v2451_v36  ;;  %v3561_v6 = vsel %vm12897_vm9, %v11874_v30, %v8785_v44  ;;  %v3560_v45 = vsel %vm12897_vm9, %v11863_v48, %v8784_v58  ;;  %v1192_v30 = vsub.s32 %v11884_v13, %v1191_v19 }
 0x295   :  { %v2499_v1 = vadd.f32 %v11494_v3, %v2450_v9  ;;  %v2403_v37 = vadd.f32 %v2361_v55, %v2105_v42  ;;  %v8793_v23 = vpop.permute.xlu0 %8792  ;;  %v13017_v13 = vrot.slane %v11517_v31, 7  ;;  %vm1471_vm1 = vcmp.eq.s32.totalorder %v12014_v59, 0 }
 0x296   :  { %v8788_v5 = vpop.permute.xlu1 %8787  ;;  %v2542_v18 = vmax.f32 %v2500_v41, 0.0  ;;  %v8795_v40 = vunpack.i.h.bf16 %v8793_v23  ;;  %v8794_v55 = vunpack.i.l.bf16 %v8793_v23  ;;  %vm3256_vm10 = vcmp.eq.s32.totalorder %v11763_v56, 0 }
 0x297   :  { %v2541_v0 = vmax.f32 %v2499_v1, 0.0  ;;  %v2452_v53 = vmul.f32 %v11484_v51, %v2403_v37  ;;  %v8790_v25 = vunpack.i.h.bf16 %v8788_v5  ;;  %v8789_v42 = vunpack.i.l.bf16 %v8788_v5 }
 0x298   :  { %2585 = vst.msk [vmem:[#allocation2 + $0x100] sm:$0xff] %vm12897_vm9, %v2542_v18  ;;  %v3563_v54 = vsel %vm12897_vm9, %v11920_v46, %v8795_v40  ;;  %v13016_v37 = vrot.slane %v11553_v61, 7  ;;  %v3312_v31 = vsel %vm3249_vm4, 0.0, %v11927_v34  ;;  %v3218_v58 = vadd.s32 84, %v11943_v49  ;;  %v13026_v40 = vld [vmem:[#allocation76_spill] sm:$0xff] }
 0x299   :  { %2584 = vst.msk [vmem:[#allocation2 + $0xf8] sm:$0xff] %vm12897_vm9, %v2541_v0  ;;  %v2501_v4 = vadd.f32 %v11494_v3, %v2452_v53  ;;  %v3583_v9 = vsel %vm3581_vm15, %v3561_v6, %v8790_v25  ;;  %v3582_v51 = vsel %vm3581_vm15, %v3560_v45, %v8789_v42  ;;  %v3562_v3 = vsel %vm12897_vm9, %v11916_v29, %v8794_v55  ;;  %v12094_v25 = vld [vmem:[%s12907_s19 + $0x148] sm:$0xff] }
 0x29a   :  { %v8798_v8 = vpop.permute.xlu1 %8797  ;;  %v3603_v62 = vpack.c.bf16 %v3583_v9, %v3582_v51  ;;  %v415_v44 = vsel %vm338_vm0, %v13017_v13, %v13016_v37  ;;  %v1219_v5 = vmul.u32 168, %v1218_v10  ;;  %v12070_v0 = vsel %vm1347_vm14, %v1389_v28, %v11966_v14 }
 0x29b   :  { %v2543_v48 = vmax.f32 %v2501_v4, 0.0  ;;  %v8800_v1 = vunpack.i.h.bf16 %v8798_v8  ;;  %v8799_v36 = vunpack.i.l.bf16 %v8798_v8  ;;  %vm1262_vm3 = vcmp.ne.s32.totalorder %v1192_v30, 0 }
 0x29c   :  { %8529 = vmatmul.mubr.msk.bf16.vlgmr.msra.gmra.mrb[0].mxu0 %vm3662_vm5, %v3603_v62  ;;  %vm1304_vm4 = vcmp.lt.s32.totalorder %v1192_v30, 0  ;;  %v3313_v34 = vsel %vm3250_vm8, 0.0, %v11932_v33  ;;  %v1513_v14 = vsel %vm1471_vm1, 0.0, %v415_v44  ;;  %v12089_v28 = vsel %vm12054_vm6, %v12003_v43, %v11939_v22 }
 0x29d   :  { %2586 = vst.msk [vmem:[#allocation2 + $0x108] sm:$0xff] %vm12897_vm9, %v2543_v48  ;;  %v3585_v29 = vsel %vm3581_vm15, %v3563_v54, %v8800_v1  ;;  %v3584_v19 = vsel %vm3581_vm15, %v3562_v3, %v8799_v36  ;;  %8532 = vmatprep.mubr.msk.bf16.mxu0 %vm9874_vm12, %v12992_v15  ;;  %v8803_v53 = vpop.permute.xlu0 %8802  ;;  %v13022_v17 = vrot.slane %v11903_v20, 7  ;;  %v13023_v33 = vrot.slane %v11898_v52, 7  ;;  %vm12112_vm8 = vmand %vm1304_vm4, %vm1262_vm3 }
 0x29e   :  { %v3604_v12 = vpack.c.bf16 %v3585_v29, %v3584_v19  ;;  %vm3343_vm7 = vcmp.eq.s32.totalorder %v12089_v28, 83  ;;  %v1388_v23 = vadd.s32 168, %v1192_v30  ;;  %vm1473_vm6 = vcmp.eq.s32.totalorder %v12070_v0, 0 }
 0x29f   :  { %v419_v42 = vsel %vm338_vm0, %v13023_v33, %v13022_v17  ;;  %v12108_v22 = vsel %vm12076_vm2, %v3218_v58, %v11943_v49  ;;  %v1220_v18 = vsub.s32 %v11911_v27, %v1219_v5  ;;  %v8805_v4 = vunpack.i.h.bf16 %v8803_v53 }
 0x2a0   :  { %v2625_v6 = vld [vmem:[#allocation2 + $0xf0] ss:$2 sm:$0xff]  ;;  %v2667_v45 = vld [vmem:[#allocation2 + $0xf1] ss:$2 sm:$0xff]  ;;  %v8804_v9 = vunpack.i.l.bf16 %v8803_v53  ;;  %vm3344_vm11 = vcmp.eq.s32.totalorder %v12108_v22, 83  ;;  %v3079_v51 = vshrl.u32 %v13026_v40, 6  ;;  %v13027_v54 = vmov %v13023_v33 }
 0x2a1   :  { %v12102_v10 = vmax.f32 %v2625_v6, %v2667_v45  ;;  %vm3257_vm13 = vcmp.eq.s32.totalorder %v11890_v47, 0  ;;  %vm3258_vm14 = vcmp.eq.s32.totalorder %v11893_v7, 0  ;;  %v420_v8 = vrot.slane %v12094_v25, 7 }
 0x2a2   :  { %v2741_v48 = vrot.slane %v11759_v35, 7  ;;  %v13028_v1 = vmov %v13016_v37  ;;  %v12134_v36 = vsel %vm12112_vm8, %v1388_v23, %v1192_v30  ;;  %v3080_v37 = vmul.u32 84, %v3079_v51  ;;  %v13029_v30 = vld [vmem:[#allocation73_spill] sm:$0xff] }
 0x2a3   :  { %v8851_v49 = vpack.i.bf16 %v12102_v10, %v11963_v2  ;;  %v2812_v55 = vrot.slane %v12102_v10, 1  ;;  %v417_v3 = vsel %vm338_vm0, %v13028_v1, %v13027_v54  ;;  %v2739_v13 = vrot.slane %v11696_v63, 7 }
 0x2a4   :  { %v2627_v27 = vld [vmem:[#allocation2 + $0x100] ss:$2 sm:$0xff]  ;;  %v2669_v62 = vld [vmem:[#allocation2 + $0x101] ss:$2 sm:$0xff]  ;;  %8533 = vmatmul.mubr.msk.bf16.gmra.mrb[4].mxu0 %vm3662_vm5, %v3604_v12  ;;  %vm1264_vm2 = vcmp.ne.s32.totalorder %v1220_v18, 0  ;;  %vm1306_vm3 = vcmp.lt.s32.totalorder %v1220_v18, 0  ;;  %v3565_v46 = vsel %vm12897_vm9, %v3313_v34, %v8805_v4  ;;  %v3564_v29 = vsel %vm12897_vm9, %v3312_v31, %v8804_v9 }
 0x2a5   :  { %8852 = vrot.lane.b32.xlu0 %v8851_v49, %s9872_s3  ;;  %v12139_v35 = vmax.f32 %v2627_v27, %v2669_v62  ;;  %v1390_v44 = vadd.s32 168, %v1220_v18  ;;  %v8808_v58 = vpop.permute.xlu1 %8807  ;;  %8536 = vmatprep.mubr.msk.bf16.mxu0 %vm9874_vm12, %v12992_v15  ;;  %v3081_v5 = vsub.s32 %v13029_v30, %v3080_v37  ;;  %v2742_v19 = vsel %vm338_vm0, %v2739_v13, %v2741_v48  ;;  %vm12153_vm8 = vmand %vm1306_vm3, %vm1264_vm2  ;;  %v9454_v37 = vld [vmem:[%s12907_s19 + $0x130] sm:$0xff] }
 0x2a6   :  { %v8810_v41 = vunpack.i.h.bf16 %v8808_v58  ;;  %v8809_v12 = vunpack.i.l.bf16 %v8808_v58  ;;  %vm13030_vm4 = vcmask 1046528   ;;  %v12159_v45 = vsel %vm3256_vm10, 0.0, %v2742_v19 }
 0x2a7   :  { %v2813_v53 = vsel %vm13030_vm4, %v2810_v60, %v2812_v55  ;;  %v2814_v34 = vrot.slane %v12139_v35, 1  ;;  %vm3156_vm9 = vcmp.ne.s32.totalorder %v3081_v5, 0  ;;  %vm3177_vm1 = vcmp.lt.s32.totalorder %v3081_v5, 0  ;;  %vm13033_vm2 = vmmov %vm13030_vm4 }
 0x2a8   :  { %v3219_v6 = vadd.s32 84, %v3081_v5  ;;  %v3586_v17 = vsel %vm3581_vm15, %v3564_v29, %v8809_v12  ;;  %v3587_v33 = vsel %vm3581_vm15, %v3565_v46, %v8810_v41  ;;  %v1515_v60 = vsel %vm1473_vm6, 0.0, %v419_v42  ;;  %vm3198_vm3 = vmand %vm3177_vm1, %vm3156_vm9 }
 0x2a9   :  { %1794 = vperm.xlu0 %8779, %v1513_v14   ;;  %v2815_v23 = vsel %vm13033_vm2, %v2812_v55, %v2814_v34  ;;  %v3605_v43 = vpack.c.bf16 %v3587_v33, %v3586_v17  ;;  %v3406_v4 = vsel %vm3343_vm7, 0.0, %v2813_v53  ;;  %vm1472_vm10 = vcmp.eq.s32.totalorder %v12134_v36, 0 }
 0x2aa   :  { %v3407_v56 = vsel %vm3344_vm11, 0.0, %v2815_v23  ;;  %vm3260_vm4 = vcmp.eq.s32.totalorder %v12108_v22, 0  ;;  %v2743_v9 = vrot.slane %v11783_v57, 7  ;;  %v2745_v42 = vrot.slane %v11936_v38, 7  ;;  %vm13037_vm11 = vmmov %vm13033_vm2 }
 0x2ab   :  { %v8856_v14 = vpack.i.bf16 %v3407_v56, %v3406_v4  ;;  %v13034_v40 = vrot.slane %v11903_v20, 7  ;;  %v1432_v49 = vsel %vm12153_vm8, %v1390_v44, %v1220_v18  ;;  %v12181_v55 = vsel %vm3198_vm3, %v3219_v6, %v3081_v5  ;;  %vm13039_vm8 = vmmov %vm13033_vm2 }
 0x2ac   :  { %v2747_v27 = vrot.slane %v11963_v2, 7  ;;  %v1514_v62 = vsel %vm1472_vm10, 0.0, %v417_v3  ;;  %v543_v54 = vrot.slane %v11898_v52, 1  ;;  %v2744_v57 = vsel %vm338_vm0, %v2741_v48, %v2743_v9  ;;  %8537 = vmatmul.mubr.msk.bf16.gmra.mrb[8].mxu0 %vm3662_vm5, %v3605_v43  ;;  %vm13040_vm3 = vmmov %vm13039_vm8 }
 0x2ad   :  { %v421_v51 = vsel %vm338_vm0, %v13034_v40, %v420_v8  ;;  %1804 = vperm.xlu0 %8779, %v1515_v60   ;;  %8857 = vrot.lane.b32.xlu1 %v8856_v14, %s9854_s5  ;;  %v2746_v38 = vsel %vm338_vm0, %v2743_v9, %v2745_v42  ;;  %v12191_v8 = vsel %vm3257_vm13, 0.0, %v2744_v57  ;;  %v2749_v1 = vrot.slane %v12102_v10, 7  ;;  %v12239_v9 = vld [vmem:[#allocation8] ss:$0 sm:$0xff] }
 0x2ae   :  { %v12195_v18 = vsel %vm3258_vm14, 0.0, %v2746_v38  ;;  %v2748_v2 = vsel %vm338_vm0, %v2745_v42, %v2747_v27  ;;  %v1775_v3 = vpop.permute.xlu0 %1774  ;;  %vm1474_vm9 = vcmp.eq.s32.totalorder %v1432_v49, 0  ;;  %8540 = vmatprep.mubr.msk.bf16.mxu0 %vm9874_vm12, %v12992_v15  ;;  %vm3261_vm7 = vcmp.eq.s32.totalorder %v12181_v55, 0  ;;  %vm13038_vm14 = vmmov %vm13033_vm2 }
 0x2af   :  { %vm13035_vm6 = vcmp.eq.s32.totalorder %v12089_v28, 0  ;;  %v2751_v48 = vrot.slane %v12139_v35, 7  ;;  %v2750_v7 = vsel %vm338_vm0, %v2747_v27, %v2749_v1  ;;  %v1516_v44 = vsel %vm1474_vm9, 0.0, %v421_v51 }
 0x2b0   :  { %v12204_v47 = vsel %vm13035_vm6, 0.0, %v2748_v2  ;;  %v12213_v10 = vsel %vm3260_vm4, 0.0, %v2750_v7  ;;  %v13036_v58 = vrot.slane %v11553_v61, 1  ;;  %vm1555_vm13 = vcmp.eq.s32.totalorder %v12014_v59, 167 }
 0x2b1   :  { %2011 = vperm.xlu0 %8779, %v9454_v37   ;;  %1799 = vperm.xlu1 %8780, %v1514_v62   ;;  %v2752_v28 = vsel %vm338_vm0, %v2749_v1, %v2751_v48  ;;  %v545_v5 = vrot.slane %v11903_v20, 1  ;;  %v547_v22 = vrot.slane %v12094_v25, 1  ;;  %vm1557_vm1 = vcmp.eq.s32.totalorder %v12070_v0, 167  ;;  %v13042_v1 = vld [vmem:[#allocation77_spill] sm:$0xff] }
 0x2b2   :  { %v12218_v46 = vsel %vm3261_vm7, 0.0, %v2752_v28  ;;  %v1785_v29 = vpop.permute.xlu0 %1784  ;;  %v544_v30 = vsel %vm13037_vm11, %v13036_v58, %v543_v54  ;;  %vm1556_vm2 = vcmp.eq.s32.totalorder %v12134_v36, 167  ;;  %vm1558_vm10 = vcmp.eq.s32.totalorder %v1432_v49, 167  ;;  %v12243_v49 = vld [vmem:[#allocation10] ss:$0 sm:$0xff] }
 0x2b3   :  { %v1597_v19 = vsel %vm1555_vm13, 0.0, %v544_v30  ;;  %v548_v12 = vsel %vm13038_vm14, %v545_v5, %v547_v22  ;;  %v546_v59 = vsel %vm13039_vm8, %v543_v54, %v545_v5  ;;  %v591_v0 = vsel %vm13040_vm3, %v547_v22, 0.0 }
 0x2b4   :  { %v1599_v61 = vsel %vm1557_vm1, 0.0, %v548_v12  ;;  %v1598_v17 = vsel %vm1556_vm2, 0.0, %v546_v59  ;;  %v1852_v36 = vmul.f32 %v10919_v16, %v1785_v29  ;;  %v1600_v56 = vsel %vm1558_vm10, 0.0, %v591_v0  ;;  %v13048_v0 = vld [vmem:[#allocation74_spill] sm:$0xff] }
 0x2b5   :  { %2019 = vperm.xlu0 %8779, %v11903_v20   ;;  %1809 = vperm.xlu1 %8780, %v1516_v44   ;;  %v1850_v20 = vmul.f32 %v10919_v16, %v1775_v3  ;;  %vm13041_vm4 = vcmask 261120   ;;  %v3093_v3 = vshrl.u32 %v13042_v1, 6  ;;  %v2731_v44 = vrot.slane %v11456_v11, 7 }
 0x2b6   :  { %v1996_v41 = vpop.permute.xlu0 %1995  ;;  %vm13043_vm9 = vmmov %vm13041_vm4  ;;  %v2733_v58 = vrot.slane %v11560_v21, 7  ;;  %vm3251_vm7 = vcmp.eq.s32.totalorder %v11640_v50, 0  ;;  %vm3252_vm6 = vcmp.eq.s32.totalorder %v11622_v39, 0 }
 0x2b7   :  { %v2064_v31 = vmul.f32 %v10803_v32, %v1996_v41  ;;  %v3094_v30 = vmul.u32 84, %v3093_v3  ;;  %vm13052_vm8 = vmmov %vm13041_vm4 }
 0x2b8   :  { %v2734_v21 = vsel %vm338_vm0, %v2731_v44, %v2733_v58  ;;  %vm13053_vm2 = vmmov %vm13041_vm4 }
 0x2b9   :  { %2306 = vperm.xlu0 %8779, %v1597_v19   ;;  %2015 = vperm.xlu1 %8780, %v11898_v52   ;;  %v2106_v52 = vadd.f32 %v2064_v31, %v1850_v20  ;;  %v13046_v20 = vld [vmem:[#allocation87_spill] sm:$0xff]  ;;  %vm13054_vm3 = vmmov %vm13053_vm2 }
 0x2ba   :  { %v2004_v53 = vpop.permute.xlu0 %2003  ;;  %vm13055_vm10 = vmmov %vm13053_vm2 }
 0x2bb   :  { %v2066_v60 = vmul.f32 %v10803_v32, %v2004_v53 }
 0x2bc   :  { %v1780_v6 = vpop.permute.xlu1 %1779 }
 0x2bd   :  { %2316 = vperm.xlu0 %8779, %v1599_v61   ;;  %2023 = vperm.xlu1 %8780, %v12094_v25   ;;  %v2108_v14 = vadd.f32 %v2066_v60, %v1852_v36  ;;  %v1851_v28 = vmul.f32 %v10919_v16, %v1780_v6  ;;  %v13044_v61 = vld [vmem:[#allocation86_spill] sm:$0xff]  ;;  %v2735_v6 = vrot.slane %v13046_v20, 7  ;;  %v13049_v60 = vld [vmem:[#allocation89_spill] sm:$0xff] }
 0x2be   :  { %v2287_v33 = vpop.permute.xlu0 %2286  ;;  %v13045_v11 = vrot.slane %v13044_v61, 7  ;;  %vm3253_vm11 = vcmp.eq.s32.totalorder %v13049_v60, 0 }
 0x2bf   :  { %v2362_v23 = vmul.f32 %v10928_v26, %v2287_v33 }
 0x2c0   :  { %v1790_v43 = vpop.permute.xlu1 %1789  ;;  %v2732_v53 = vsel %vm338_vm0, %v13045_v11, %v2731_v44 }
 0x2c1   :  { %2311 = vperm.xlu1 %8780, %v1598_v17   ;;  %v2404_v4 = vadd.f32 %v2362_v23, %v2106_v52  ;;  %v1853_v41 = vmul.f32 %v10919_v16, %v1790_v43  ;;  %v13047_v17 = vld [vmem:[#allocation88_spill] sm:$0xff]  ;;  %v3095_v52 = vsub.s32 %v13048_v0, %v3094_v30  ;;  %v13058_v0 = vld [vmem:[#allocation78_spill] sm:$0xff] }
 0x2c2   :  { %v2297_v25 = vpop.permute.xlu0 %2296  ;;  %v2737_v33 = vrot.slane %v13047_v17, 7 }
 0x2c3   :  { %v2453_v42 = vmul.f32 %v12239_v9, %v2404_v4  ;;  %v2364_v40 = vmul.f32 %v10928_v26, %v2297_v25  ;;  %v13050_v4 = vld [vmem:[#allocation67_spill] sm:$0xff]  ;;  %vm3157_vm14 = vcmp.ne.s32.totalorder %v3095_v52, 0  ;;  %vm3178_vm1 = vcmp.lt.s32.totalorder %v3095_v52, 0 }
 0x2c4   :  { %v2000_v51 = vpop.permute.xlu1 %1999  ;;  %vm3254_vm13 = vcmp.eq.s32.totalorder %v13050_v4, 0 }
 0x2c5   :  { %2321 = vperm.xlu1 %8780, %v1600_v56   ;;  %v2502_v27 = vadd.f32 %v12243_v49, %v2453_v42  ;;  %v2406_v62 = vadd.f32 %v2364_v40, %v2108_v14  ;;  %v2065_v7 = vmul.f32 %v10803_v32, %v2000_v51  ;;  %v3314_v56 = vsel %vm3251_vm7, 0.0, %v2732_v53  ;;  %vm13057_vm7 = vmmov %vm13053_vm2 }
 0x2c6   :  { %v8813_v59 = vpop.permute.xlu0 %8812  ;;  %v3315_v40 = vsel %vm3252_vm6, 0.0, %v2734_v21 }
 0x2c7   :  { %v2544_v54 = vmax.f32 %v2502_v27, 0.0  ;;  %v2455_v57 = vmul.f32 %v12239_v9, %v2406_v62  ;;  %v2107_v5 = vadd.f32 %v2065_v7, %v1851_v28  ;;  %v8815_v25 = vunpack.i.h.bf16 %v8813_v59  ;;  %v13051_v62 = vld [vmem:[#allocation81_spill] sm:$0xff] }
 0x2c8   :  { %v2008_v38 = vpop.permute.xlu1 %2007  ;;  %v8814_v14 = vunpack.i.l.bf16 %v8813_v59  ;;  %v3220_v59 = vadd.s32 84, %v3095_v52 }
 0x2c9   :  { %2587 = vst.msk [vmem:[#allocation2 + $0x110] sm:$0xff] %vm13041_vm4, %v2544_v54  ;;  %v2504_v2 = vadd.f32 %v12243_v49, %v2455_v57  ;;  %v2067_v22 = vmul.f32 %v10803_v32, %v2008_v38  ;;  %v3107_v54 = vshrl.u32 %v13051_v62, 6  ;;  %v2736_v57 = vsel %vm338_vm0, %v2733_v58, %v2735_v6  ;;  %vm13056_vm4 = vmmov %vm13053_vm2 }
 0x2ca   :  { %v2738_v38 = vsel %vm338_vm0, %v2735_v6, %v2737_v33  ;;  %v3567_v39 = vsel %vm13052_vm8, %v3315_v40, %v8815_v25  ;;  %vm13059_vm8 = vcmask 1046528  }
 0x2cb   :  { %v2546_v37 = vmax.f32 %v2504_v2, 0.0  ;;  %v2109_v23 = vadd.f32 %v2067_v22, %v1853_v41  ;;  %v3316_v22 = vsel %vm3253_vm11, 0.0, %v2736_v57 }
 0x2cc   :  { %v2292_v29 = vpop.permute.xlu1 %2291  ;;  %v8823_v27 = vpop.permute.xlu0 %8822 }
 0x2cd   :  { %2589 = vst.msk [vmem:[#allocation2 + $0x120] sm:$0xff] %vm13043_vm9, %v2546_v37  ;;  %v2363_v19 = vmul.f32 %v10928_v26, %v2292_v29  ;;  %v3566_v37 = vsel %vm13053_vm2, %v3314_v56, %v8814_v14  ;;  %v8825_v28 = vunpack.i.h.bf16 %v8823_v27  ;;  %v8824_v44 = vunpack.i.l.bf16 %v8823_v27  ;;  %vm3199_vm9 = vmand %vm3178_vm1, %vm3157_vm14 }
 0x2ce   :  { %vm3345_vm1 = vcmp.eq.s32.totalorder %v12181_v55, 83 }
 0x2cf   :  { %v2405_v12 = vadd.f32 %v2363_v19, %v2107_v5  ;;  %v3108_v5 = vmul.u32 84, %v3107_v54  ;;  %v3317_v19 = vsel %vm3254_vm13, 0.0, %v2738_v38 }
 0x2d0   :  { %v2302_v31 = vpop.permute.xlu1 %2301  ;;  %v3569_v21 = vsel %vm13055_vm10, %v3317_v19, %v8825_v28 }
 0x2d1   :  { %v2454_v36 = vmul.f32 %v12239_v9, %v2405_v12  ;;  %v2365_v43 = vmul.f32 %v10928_v26, %v2302_v31  ;;  %v3568_v31 = vsel %vm13056_vm4, %v3316_v22, %v8824_v44  ;;  %v3109_v60 = vsub.s32 %v13058_v0, %v3108_v5 }
 0x2d3   :  { %v2503_v42 = vadd.f32 %v12243_v49, %v2454_v36  ;;  %v2407_v51 = vadd.f32 %v2365_v43, %v2109_v23  ;;  %v3241_v36 = vsel %vm3199_vm9, %v3220_v59, %v3095_v52  ;;  %vm3158_vm6 = vcmp.ne.s32.totalorder %v3109_v60, 0  ;;  %vm13062_vm9 = vmmov %vm13057_vm7 }
 0x2d4   :  { %v8818_v2 = vpop.permute.xlu1 %8817  ;;  %vm3179_vm11 = vcmp.lt.s32.totalorder %v3109_v60, 0  ;;  %vm3262_vm13 = vcmp.eq.s32.totalorder %v3241_v36, 0  ;;  %v3221_v40 = vadd.s32 84, %v3109_v60  ;;  %vm3346_vm2 = vcmp.eq.s32.totalorder %v3241_v36, 83 }
 0x2d5   :  { %v2545_v50 = vmax.f32 %v2503_v42, 0.0  ;;  %v2456_v1 = vmul.f32 %v12239_v9, %v2407_v51  ;;  %v8820_v3 = vunpack.i.h.bf16 %v8818_v2  ;;  %v8819_v7 = vunpack.i.l.bf16 %v8818_v2  ;;  %vm3200_vm14 = vmand %vm3179_vm11, %vm3158_vm6 }
 0x2d6   :  { %v12320_v2 = vsel %vm3200_vm14, %v3221_v40, %v3109_v60  ;;  %vm13063_vm6 = vmmov %vm13057_vm7 }
 0x2d7   :  { %2588 = vst.msk [vmem:[#allocation2 + $0x118] sm:$0xff] %vm13054_vm3, %v2545_v50  ;;  %v2505_v29 = vadd.f32 %v12243_v49, %v2456_v1  ;;  %v3588_v58 = vsel %vm3581_vm15, %v3566_v37, %v8819_v7  ;;  %v3589_v30 = vsel %vm3581_vm15, %v3567_v39, %v8820_v3  ;;  %vm13060_vm3 = vmmov %vm13059_vm8  ;;  %vm3263_vm10 = vcmp.eq.s32.totalorder %v12320_v2, 0 }
 0x2d8   :  { %v3606_v41 = vpack.c.bf16 %v3589_v30, %v3588_v58  ;;  %v8828_v12 = vpop.permute.xlu1 %8827  ;;  %v2740_v39 = vsel %vm338_vm0, %v2737_v33, %v2739_v13  ;;  %vm13064_vm11 = vmmov %vm13063_vm6 }
 0x2d9   :  { %v2547_v61 = vmax.f32 %v2505_v29, 0.0  ;;  %v8830_v11 = vunpack.i.h.bf16 %v8828_v12  ;;  %v8829_v53 = vunpack.i.l.bf16 %v8828_v12  ;;  %vm13066_vm14 = vmmov %vm13063_vm6 }
 0x2da   :  { %8541 = vmatmul.mubr.msk.bf16.gmra.mrb[12].mxu0 %vm3662_vm5, %v3606_v41 }
 0x2db   :  { %2590 = vst.msk [vmem:[#allocation2 + $0x128] sm:$0xff] %vm13057_vm7, %v2547_v61  ;;  %v3590_v20 = vsel %vm3581_vm15, %v3568_v31, %v8829_v53  ;;  %v3591_v6 = vsel %vm3581_vm15, %v3569_v21, %v8830_v11  ;;  %8544 = vmatprep.mubr.msk.bf16.mxu0 %vm9874_vm12, %v12992_v15 }
 0x2dc   :  { %v3607_v23 = vpack.c.bf16 %v3591_v6, %v3590_v20 }
 0x2de   :  { %v2629_v43 = vld [vmem:[#allocation2 + $0x110] ss:$2 sm:$0xff]  ;;  %v2671_v4 = vld [vmem:[#allocation2 + $0x111] ss:$2 sm:$0xff] }
 0x2df   :  { %v2695_v56 = vmax.f32 %v2629_v43, %v2671_v4 }
 0x2e1   :  { %v8861_v25 = vpack.i.bf16 %v2695_v56, %v12139_v35  ;;  %v2816_v14 = vrot.slane %v2695_v56, 1  ;;  %v2753_v42 = vrot.slane %v2695_v56, 7 }
 0x2e2   :  { %8545 = vmatmul.mubr.msk.bf16.gmra.mrb[16].mxu0 %vm3662_vm5, %v3607_v23  ;;  %v2631_v51 = vld [vmem:[#allocation2 + $0x120] ss:$2 sm:$0xff]  ;;  %v2673_v27 = vld [vmem:[#allocation2 + $0x121] ss:$2 sm:$0xff] }
 0x2e3   :  { %8862 = vrot.lane.b32.xlu0 %v8861_v25, %s9872_s3  ;;  %v12306_v62 = vmax.f32 %v2631_v51, %v2673_v27  ;;  %8548 = vmatprep.mubr.msk.bf16.mxu0 %vm9874_vm12, %v12992_v15  ;;  %v2754_v52 = vsel %vm338_vm0, %v2751_v48, %v2753_v42  ;;  %v2817_v57 = vsel %vm13059_vm8, %v2814_v34, %v2816_v14  ;;  %v13061_v34 = vld [vmem:[#allocation63_spill] sm:$0xff] }
 0x2e4   :  { %v12314_v54 = vsel %vm3262_vm13, 0.0, %v2754_v52  ;;  %v8833_v48 = vpop.permute.xlu0 %8832  ;;  %v3408_v3 = vsel %vm3345_vm1, 0.0, %v2817_v57  ;;  %vm3255_vm4 = vcmp.eq.s32.totalorder %v13061_v34, 0  ;;  %vm13065_vm13 = vmmov %vm13063_vm6 }
 0x2e5   :  { %v2818_v38 = vrot.slane %v12306_v62, 1  ;;  %v2755_v50 = vrot.slane %v12306_v62, 7  ;;  %v8835_v37 = vunpack.i.h.bf16 %v8833_v48  ;;  %v8834_v28 = vunpack.i.l.bf16 %v8833_v48  ;;  %vm13068_vm1 = vmmov %vm13063_vm6 }
 0x2e6   :  { %v3318_v58 = vsel %vm3255_vm4, 0.0, %v2740_v39  ;;  %vm13070_vm8 = vmmov %vm13068_vm1 }
 0x2e7   :  { %v2819_v1 = vsel %vm13060_vm3, %v2816_v14, %v2818_v38  ;;  %v2756_v35 = vsel %vm338_vm0, %v2753_v42, %v2755_v50  ;;  %v3571_v22 = vsel %vm13062_vm9, %v12159_v45, %v8835_v37  ;;  %v3570_v19 = vsel %vm13057_vm7, %v3318_v58, %v8834_v28  ;;  %vm13074_vm4 = vmmov %vm13068_vm1 }
 0x2e8   :  { %v3409_v55 = vsel %vm3346_vm2, 0.0, %v2819_v1  ;;  %v12337_v44 = vsel %vm3263_vm10, 0.0, %v2756_v35  ;;  %vm13072_vm2 = vmmov %vm13068_vm1 }
 0x2e9   :  { %v8866_v7 = vpack.i.bf16 %v3409_v55, %v3408_v3 }
 0x2eb   :  { %8867 = vrot.lane.b32.xlu1 %v8866_v7, %s9854_s5 }
 0x2ec   :  { %v8838_v29 = vpop.permute.xlu1 %8837 }
 0x2ed   :  { %v8840_v30 = vunpack.i.h.bf16 %v8838_v29  ;;  %v8839_v5 = vunpack.i.l.bf16 %v8838_v29 }
 0x2ef   :  { %v3592_v63 = vsel %vm3581_vm15, %v3570_v19, %v8839_v5  ;;  %v3593_v17 = vsel %vm3581_vm15, %v3571_v22, %v8840_v30 }
 0x2f0   :  { %v3608_v13 = vpack.c.bf16 %v3593_v17, %v3592_v63  ;;  %v13067_v17 = vld [vmem:[#allocation82_spill] sm:$0xff] }
 0x2f2   :  { %8549 = vmatmul.mubr.msk.bf16.gmra.mrb[20].mxu0 %vm3662_vm5, %v3608_v13  ;;  %v3121_v13 = vshrl.u32 %v13067_v17, 6 }
 0x2f3   :  { %8552 = vmatprep.mubr.msk.bf16.mxu0 %vm9874_vm12, %v12992_v15 }
 0x2fc   :  { %v8843_v33 = vpop.permute.xlu0 %8842 }
 0x2fd   :  { %v8845_v41 = vunpack.i.h.bf16 %v8843_v33  ;;  %v8844_v12 = vunpack.i.l.bf16 %v8843_v33 }
 0x2ff   :  { %v3573_v45 = vsel %vm13063_vm6, %v12195_v18, %v8845_v41  ;;  %v3572_v59 = vsel %vm13064_vm11, %v12191_v8, %v8844_v12 }
 0x304   :  { %v8848_v61 = vpop.permute.xlu1 %8847 }
 0x305   :  { %v8850_v11 = vunpack.i.h.bf16 %v8848_v61  ;;  %v8849_v53 = vunpack.i.l.bf16 %v8848_v61 }
 0x307   :  { %v3594_v21 = vsel %vm3581_vm15, %v3572_v59, %v8849_v53  ;;  %v3595_v31 = vsel %vm3581_vm15, %v3573_v45, %v8850_v11 }
 0x308   :  { %v3609_v20 = vpack.c.bf16 %v3595_v31, %v3594_v21  ;;  %v3122_v21 = vmul.u32 84, %v3121_v13  ;;  %v13069_v31 = vld [vmem:[#allocation83_spill] sm:$0xff] }
 0x30a   :  { %8553 = vmatmul.mubr.msk.bf16.gmra.mrb[24].mxu0 %vm3662_vm5, %v3609_v20  ;;  %v3135_v20 = vshrl.u32 %v13069_v31, 6 }
 0x30b   :  { %8556 = vmatprep.mubr.msk.bf16.mxu0 %vm9874_vm12, %v12992_v15 }
 0x317   :  { %v8853_v6 = vpop.permute.xlu0 %8852 }
 0x318   :  { %v8855_v0 = vunpack.i.h.bf16 %v8853_v6  ;;  %v8854_v60 = vunpack.i.l.bf16 %v8853_v6 }
 0x31a   :  { %v3575_v18 = vsel %vm13065_vm13, %v12213_v10, %v8855_v0  ;;  %v3574_v8 = vsel %vm13066_vm14, %v12204_v47, %v8854_v60  ;;  %vm3347_vm14 = vcmp.eq.s32.totalorder %v12320_v2, 83 }
 0x31f   :  { %v8858_v23 = vpop.permute.xlu1 %8857 }
 0x320   :  { %v8860_v36 = vunpack.i.h.bf16 %v8858_v23  ;;  %v8859_v43 = vunpack.i.l.bf16 %v8858_v23 }
 0x322   :  { %v3596_v4 = vsel %vm3581_vm15, %v3574_v8, %v8859_v43  ;;  %v3597_v56 = vsel %vm3581_vm15, %v3575_v18, %v8860_v36  ;;  %v13071_v36 = vld [vmem:[#allocation79_spill] sm:$0xff]  ;;  %v3136_v18 = vmul.u32 84, %v3135_v20 }
 0x323   :  { %v3610_v25 = vpack.c.bf16 %v3597_v56, %v3596_v4  ;;  %v3123_v43 = vsub.s32 %v13071_v36, %v3122_v21  ;;  %v12426_v21 = vld [vmem:[#allocation11] ss:$0 sm:$0xff]  ;;  %v12428_v20 = vld [vmem:[#allocation13] ss:$0 sm:$0xff] }
 0x325   :  { %8557 = vmatmul.mubr.msk.bf16.gmra.mrb[28].mxu0 %vm3662_vm5, %v3610_v25  ;;  %vm3159_vm3 = vcmp.ne.s32.totalorder %v3123_v43, 0  ;;  %vm3180_vm10 = vcmp.lt.s32.totalorder %v3123_v43, 0  ;;  %v13073_v25 = vld [vmem:[#allocation80_spill] sm:$0xff] }
 0x326   :  { %8560 = vmatprep.mubr.msk.bf16.mxu0 %vm9874_vm12, %v12992_v15  ;;  %vm3201_vm9 = vmand %vm3180_vm10, %vm3159_vm3 }
 0x328   :  { %v1795_v14 = vpop.permute.xlu0 %1794 }
 0x329   :  { %v1854_v47 = vmul.f32 %v10919_v16, %v1795_v14  ;;  %v3137_v14 = vsub.s32 %v13073_v25, %v3136_v18  ;;  %v8920_v25 = vld [vmem:[#allocation14 + $0x40] sm:$0xff]  }
 0x32b   :  { %vm3160_vm7 = vcmp.ne.s32.totalorder %v3137_v14, 0  ;;  %vm3181_vm6 = vcmp.lt.s32.totalorder %v3137_v14, 0 }
 0x32c   :  { %v1805_v42 = vpop.permute.xlu0 %1804  ;;  %vm3202_vm11 = vmand %vm3181_vm6, %vm3160_vm7 }
 0x32d   :  { %v1856_v7 = vmul.f32 %v10919_v16, %v1805_v42  ;;  %v3222_v42 = vadd.s32 84, %v3123_v43 }
 0x330   :  { %v1800_v40 = vpop.permute.xlu1 %1799  ;;  %v2012_v51 = vpop.permute.xlu0 %2011 }
 0x331   :  { %v2068_v10 = vmul.f32 %v10803_v32, %v2012_v51  ;;  %v1855_v30 = vmul.f32 %v10919_v16, %v1800_v40 }
 0x333   :  { %v2110_v48 = vadd.f32 %v2068_v10, %v1854_v47 }
 0x334   :  { %v1810_v27 = vpop.permute.xlu1 %1809  ;;  %v2020_v52 = vpop.permute.xlu0 %2019 }
 0x335   :  { %v2070_v3 = vmul.f32 %v10803_v32, %v2020_v52  ;;  %v1857_v11 = vmul.f32 %v10919_v16, %v1810_v27  ;;  %v3243_v27 = vsel %vm3201_vm9, %v3222_v42, %v3123_v43  ;;  %v3223_v52 = vadd.s32 84, %v3137_v14  ;;  %v8919_v43 = vld [vmem:[#allocation14 + $0x38] sm:$0xff]  }
 0x336   :  { %vm3264_vm13 = vcmp.eq.s32.totalorder %v3243_v27, 0  ;;  %vm13078_vm9 = vcmask 261120  }
 0x337   :  { %v2112_v28 = vadd.f32 %v2070_v3, %v1856_v7  ;;  %v8912_v7 = vld [vmem:[#allocation14] sm:$0xff]   ;;  %vm13079_vm7 = vmmov %vm13078_vm9 }
 0x338   :  { %v2016_v57 = vpop.permute.xlu1 %2015  ;;  %v2307_v1 = vpop.permute.xlu0 %2306  ;;  %4514 = vmatpush1.bf16.msra.mxu0 %v8912_v7 }
 0x339   :  { %v2366_v55 = vmul.f32 %v10928_v26, %v2307_v1  ;;  %v2069_v34 = vmul.f32 %v10803_v32, %v2016_v57  ;;  %4515 = vmatprep.subr.bf16.mxu0 %v12946_v24 }
 0x33b   :  { %v2408_v35 = vadd.f32 %v2366_v55, %v2110_v48  ;;  %v2111_v19 = vadd.f32 %v2069_v34, %v1855_v30  ;;  %v3244_v48 = vsel %vm3202_vm11, %v3223_v52, %v3137_v14 }
 0x33c   :  { %v2024_v39 = vpop.permute.xlu1 %2023  ;;  %v2317_v37 = vpop.permute.xlu0 %2316 }
 0x33d   :  { %v2457_v29 = vmul.f32 %v12239_v9, %v2408_v35  ;;  %v2368_v58 = vmul.f32 %v10928_v26, %v2317_v37  ;;  %v2071_v41 = vmul.f32 %v10803_v32, %v2024_v39 }
 0x33f   :  { %v2506_v5 = vadd.f32 %v12243_v49, %v2457_v29  ;;  %v2410_v22 = vadd.f32 %v2368_v58, %v2112_v28  ;;  %v2113_v6 = vadd.f32 %v2071_v41, %v1857_v11  ;;  %v8913_v28 = vld [vmem:[#allocation14 + $0x8] sm:$0xff]  }
 0x340   :  { %v2312_v63 = vpop.permute.xlu1 %2311  ;;  %4516 = vmatpush1.bf16.msra.mxu0 %v8913_v28 }
 0x341   :  { %v2548_v33 = vmax.f32 %v2506_v5, 0.0  ;;  %v2459_v12 = vmul.f32 %v12239_v9, %v2410_v22  ;;  %v2367_v61 = vmul.f32 %v10928_v26, %v2312_v63  ;;  %4517 = vmatprep.subr.bf16.mxu0 %v12946_v24 }
 0x343   :  { %2591 = vst.msk [vmem:[#allocation2 + $0x130] sm:$0xff] %vm13068_vm1, %v2548_v33  ;;  %v2508_v53 = vadd.f32 %v12243_v49, %v2459_v12  ;;  %v2409_v45 = vadd.f32 %v2367_v61, %v2111_v19  ;;  %vm3348_vm1 = vcmp.eq.s32.totalorder %v3243_v27, 83  ;;  %v8914_v19 = vld [vmem:[#allocation14 + $0x10] sm:$0xff]  }
 0x344   :  { %v2322_v59 = vpop.permute.xlu1 %2321  ;;  %4518 = vmatpush1.bf16.msra.mxu0 %v8914_v19 }
 0x345   :  { %v2550_v0 = vmax.f32 %v2508_v53, 0.0  ;;  %v2458_v60 = vmul.f32 %v12239_v9, %v2409_v45  ;;  %v2369_v32 = vmul.f32 %v10928_v26, %v2322_v59  ;;  %4519 = vmatprep.subr.bf16.mxu0 %v12946_v24  ;;  %v8916_v59 = vld [vmem:[#allocation14 + $0x20] sm:$0xff]  }
 0x347   :  { %2593 = vst.msk [vmem:[#allocation2 + $0x140] sm:$0xff] %vm13070_vm8, %v2550_v0  ;;  %v2507_v23 = vadd.f32 %v12243_v49, %v2458_v60  ;;  %v2411_v16 = vadd.f32 %v2369_v32, %v2113_v6  ;;  %vm13075_vm8 = vcmask 1046528   ;;  %v8918_v6 = vld [vmem:[#allocation14 + $0x30] sm:$0xff]  }
 0x348   :  { %vm13076_vm3 = vmmov %vm13075_vm8 }
 0x349   :  { %v2549_v8 = vmax.f32 %v2507_v23, 0.0  ;;  %v2460_v4 = vmul.f32 %v12239_v9, %v2411_v16  ;;  %vm13077_vm10 = vmmov %vm13076_vm3 }
 0x34b   :  { %2592 = vst.msk [vmem:[#allocation2 + $0x138] sm:$0xff] %vm13072_vm2, %v2549_v8  ;;  %v2509_v56 = vadd.f32 %v12243_v49, %v2460_v4  ;;  %vm3265_vm2 = vcmp.eq.s32.totalorder %v3244_v48, 0 }
 0x34d   :  { %v2551_v26 = vmax.f32 %v2509_v56, 0.0 }
 0x34f   :  { %2594 = vst.msk [vmem:[#allocation2 + $0x148] sm:$0xff] %vm13074_vm4, %v2551_v26  ;;  %vm3349_vm4 = vcmp.eq.s32.totalorder %v3244_v48, 83  ;;  %v13081_v48 = vld [vmem:[#allocation52_spill] sm:$0xff] }
 0x352   :  { %v2633_v40 = vld [vmem:[#allocation2 + $0x130] ss:$2 sm:$0xff]  ;;  %v2675_v51 = vld [vmem:[#allocation2 + $0x131] ss:$2 sm:$0xff] }
 0x353   :  { %v2697_v9 = vmax.f32 %v2633_v40, %v2675_v51 }
 0x355   :  { %v8871_v10 = vpack.i.bf16 %v2697_v9, %v12306_v62  ;;  %v2820_v49 = vrot.slane %v2697_v9, 1  ;;  %v2757_v47 = vrot.slane %v2697_v9, 7  ;;  %v8863_v29 = vpop.permute.xlu0 %8862 }
 0x356   :  { %v2635_v57 = vld [vmem:[#allocation2 + $0x140] ss:$2 sm:$0xff]  ;;  %v2677_v1 = vld [vmem:[#allocation2 + $0x141] ss:$2 sm:$0xff]  ;;  %v8865_v62 = vunpack.i.h.bf16 %v8863_v29 }
 0x357   :  { %8872 = vrot.lane.b32.xlu0 %v8871_v10, %s9872_s3  ;;  %v2698_v3 = vmax.f32 %v2635_v57, %v2677_v1  ;;  %v2758_v55 = vsel %vm338_vm0, %v2755_v50, %v2757_v47  ;;  %v2821_v34 = vsel %vm13075_vm8, %v2818_v38, %v2820_v49  ;;  %v8864_v38 = vunpack.i.l.bf16 %v8863_v29 }
 0x358   :  { %v12399_v35 = vsel %vm3264_vm13, 0.0, %v2758_v55  ;;  %v3410_v58 = vsel %vm3347_vm14, 0.0, %v2821_v34  ;;  %v3577_v41 = vsel %vm13078_vm9, %v12314_v54, %v8865_v62  ;;  %v8915_v54 = vld [vmem:[#allocation14 + $0x18] sm:$0xff]   ;;  %v8922_v55 = vld [vmem:[#allocation14 + $0x50] sm:$0xff]   ;;  %vm13084_vm13 = vmmov %vm13076_vm3 }
 0x359   :  { %v2822_v39 = vrot.slane %v2698_v3, 1  ;;  %v2759_v37 = vrot.slane %v2698_v3, 7  ;;  %v3576_v12 = vsel %vm13079_vm7, %v12218_v46, %v8864_v38  ;;  %4520 = vmatpush1.bf16.msra.mxu0 %v8915_v54  ;;  %v8917_v46 = vld [vmem:[#allocation14 + $0x28] sm:$0xff]   ;;  %v8923_v62 = vld [vmem:[#allocation14 + $0x58] sm:$0xff]   ;;  %vm13086_vm9 = vmmov %vm13079_vm7 }
 0x35a   :  { %4521 = vmatprep.subr.bf16.mxu0 %v12946_v24 }
 0x35b   :  { %3453 = vrot.lane.b32.xlu0 %v2698_v3, %s9872_s3  ;;  %v2823_v50 = vsel %vm13076_vm3, %v2820_v49, %v2822_v39  ;;  %v2760_v2 = vsel %vm338_vm0, %v2757_v47, %v2759_v37  ;;  %v2845_v17 = vsel %vm13077_vm10, %v2822_v39, 0.0  ;;  %v8921_v49 = vld [vmem:[#allocation14 + $0x48] sm:$0xff]   ;;  %v13080_v47 = vld [vmem:[#allocation50_spill] sm:$0xff]  ;;  %v4069_v3 = vshrl.u32 %v13081_v48, 5 }
 0x35c   :  { %v3411_v30 = vsel %vm3348_vm1, 0.0, %v2823_v50  ;;  %v12408_v5 = vsel %vm3265_vm2, 0.0, %v2760_v2  ;;  %v3412_v53 = vsel %vm3349_vm4, 0.0, %v2845_v17  ;;  %v4055_v57 = vshrl.u32 %v13080_v47, 5  ;;  %vm13085_vm4 = vmmov %vm13084_vm13 }
 0x35d   :  { %v8876_v22 = vpack.i.bf16 %v3411_v30, %v3410_v58  ;;  %v8868_v63 = vpop.permute.xlu1 %8867  ;;  %4522 = vmatpush1.bf16.msra.mxu0 %v8916_v59  ;;  %v4070_v30 = vmul.u32 42, %v4069_v3 }
 0x35e   :  { %v8870_v13 = vunpack.i.h.bf16 %v8868_v63  ;;  %v8869_v33 = vunpack.i.l.bf16 %v8868_v63  ;;  %4523 = vmatprep.subr.bf16.mxu0 %v12946_v24  ;;  %v4056_v58 = vmul.u32 42, %v4055_v57 }
 0x35f   :  { %8877 = vrot.lane.b32.xlu1 %v8876_v22, %s9854_s5 }
 0x360   :  { %v3598_v61 = vsel %vm3581_vm15, %v3576_v12, %v8869_v33  ;;  %v3599_v11 = vsel %vm3581_vm15, %v3577_v41, %v8870_v13  ;;  %v13082_v33 = vld [vmem:[#allocation42_spill] sm:$0xff] }
 0x361   :  { %v3611_v45 = vpack.c.bf16 %v3599_v11, %v3598_v61  ;;  %4524 = vmatpush1.bf16.msra.mxu0 %v8917_v46  ;;  %v4057_v41 = vsub.s32 %v13082_v33, %v4056_v58  ;;  %v13083_v61 = vld [vmem:[#allocation44_spill] sm:$0xff] }
 0x362   :  { %4525 = vmatprep.subr.bf16.mxu0 %v12946_v24  ;;  %v4071_v11 = vsub.s32 %v13083_v61, %v4070_v30 }
 0x363   :  { %3537 = vrot.lane.b32.xlu1 %v3412_v53, %s9854_s5  ;;  %8561 = vmatmul.mubr.msk.bf16.gmra.mrb[32].mxu0 %vm3662_vm5, %v3611_v45  ;;  %vm4200_vm6 = vcmp.ne.s32.totalorder %v4057_v41, 0  ;;  %vm4211_vm11 = vcmp.lt.s32.totalorder %v4057_v41, 0 }
 0x364   :  { %8564 = vmatprep.mubr.msk.bf16.mxu0 %vm9874_vm12, %v12992_v15  ;;  %vm4201_vm14 = vcmp.ne.s32.totalorder %v4071_v11, 0  ;;  %vm4212_vm1 = vcmp.lt.s32.totalorder %v4071_v11, 0  ;;  %vm4222_vm8 = vmand %vm4211_vm11, %vm4200_vm6 }
 0x365   :  { %4526 = vmatpush1.bf16.msra.mxu0 %v8918_v6  ;;  %vm4223_vm2 = vmand %vm4212_vm1, %vm4201_vm14 }
 0x366   :  { %4527 = vmatprep.subr.bf16.mxu0 %v12946_v24  ;;  %vm13087_vm6 = vmmov %vm13079_vm7 }
 0x369   :  { %4528 = vmatpush1.bf16.msra.mxu0 %v8919_v43 }
 0x36a   :  { %4529 = vmatprep.subr.bf16.mxu0 %v12946_v24 }
 0x36d   :  { %4530 = vmatpush1.bf16.msra.mxu0 %v8920_v25 }
 0x36e   :  { %4531 = vmatprep.subr.bf16.mxu0 %v12946_v24 }
 0x36f   :  { %v3730_v31 = vpop.f32.mrb[0].mxu0 }
 0x370   :  { %v3823_v0 = vmul.f32 %v12426_v21, %v3730_v31  ;;  %v8530_v60 = vpop.f32.mrb[1].mxu0 }
 0x371   :  { %v3733_v32 = vpop.f32.mrb[2].mxu0  ;;  %4532 = vmatpush1.bf16.msra.mxu0 %v8921_v49  ;;  %v4234_v60 = vadd.s32 42, %v4071_v11 }
 0x372   :  { %v3851_v23 = vadd.f32 %v12428_v20, %v3823_v0  ;;  %v3824_v16 = vmul.f32 %v12426_v21, %v3733_v32  ;;  %v8531_v36 = vpop.f32.mrb[3].mxu0  ;;  %4533 = vmatprep.subr.bf16.mxu0 %v12946_v24  ;;  %v4233_v0 = vadd.s32 42, %v4057_v41 }
 0x373   :  { %v12474_v43 = vsel %vm4223_vm2, %v4234_v60, %v4071_v11 }
 0x374   :  { %v3872_v18 = vmax.f32 %v3851_v23, 0.0  ;;  %v3852_v8 = vadd.f32 %v12428_v20, %v3824_v16  ;;  %v12472_v36 = vsel %vm4222_vm8, %v4233_v0, %v4057_v41  ;;  %vm4300_vm10 = vcmp.eq.s32.totalorder %v12474_v43, 41 }
 0x375   :  { %4534 = vmatpush1.bf16.msra.mxu0 %v8922_v55  ;;  %vm4299_vm3 = vcmp.eq.s32.totalorder %v12472_v36, 41  ;;  %vm4255_vm2 = vcmp.eq.s32.totalorder %v12472_v36, 0 }
 0x376   :  { %3893 = vst.msk [vmem:[#allocation3] sm:$0xff] %vm3581_vm15, %v3872_v18  ;;  %v3873_v4 = vmax.f32 %v3852_v8, 0.0  ;;  %4535 = vmatprep.subr.bf16.mxu0 %v12946_v24 }
 0x377   :  { %v3738_v56 = vpop.f32.mrb[4].mxu0 }
 0x378   :  { %3894 = vst.msk [vmem:[#allocation3 + $0x8] sm:$0xff] %vm3581_vm15, %v3873_v4  ;;  %v3825_v14 = vmul.f32 %v12426_v21, %v3738_v56  ;;  %v8534_v26 = vpop.f32.mrb[5].mxu0 }
 0x379   :  { %v3741_v42 = vpop.f32.mrb[6].mxu0  ;;  %4536 = vmatpush1.bf16.msra.mxu0 %v8923_v62 }
 0x37a   :  { %v3853_v40 = vadd.f32 %v12428_v20, %v3825_v14  ;;  %v3826_v51 = vmul.f32 %v12426_v21, %v3741_v42  ;;  %v8535_v27 = vpop.f32.mrb[7].mxu0 }
 0x37c   :  { %v3874_v52 = vmax.f32 %v3853_v40, 0.0  ;;  %v3854_v9 = vadd.f32 %v12428_v20, %v3826_v51 }
 0x37e   :  { %3895 = vst.msk [vmem:[#allocation3 + $0x10] sm:$0xff] %vm3581_vm15, %v3874_v52  ;;  %v3875_v10 = vmax.f32 %v3854_v9, 0.0 }
 0x37f   :  { %v3746_v1 = vpop.f32.mrb[8].mxu0  ;;  %v3914_v37 = vld [vmem:[#allocation3] ss:$2 sm:$0xff]  ;;  %v3936_v28 = vld [vmem:[#allocation3 + $0x1] ss:$2 sm:$0xff] }
 0x380   :  { %3896 = vst.msk [vmem:[#allocation3 + $0x18] sm:$0xff] %vm3581_vm15, %v3875_v10  ;;  %v3827_v7 = vmul.f32 %v12426_v21, %v3746_v1  ;;  %v8538_v34 = vpop.f32.mrb[9].mxu0  ;;  %v12453_v19 = vmax.f32 %v3914_v37, %v3936_v28 }
 0x381   :  { %v3749_v39 = vpop.f32.mrb[10].mxu0 }
 0x382   :  { %v3855_v29 = vadd.f32 %v12428_v20, %v3827_v7  ;;  %v3828_v50 = vmul.f32 %v12426_v21, %v3749_v39  ;;  %v8539_v2 = vpop.f32.mrb[11].mxu0  ;;  %v4012_v53 = vrot.slane %v12453_v19, 1  ;;  %v3979_v46 = vrot.slane %v12453_v19, 7 }
 0x384   :  { %v3876_v38 = vmax.f32 %v3855_v29, 0.0  ;;  %v3856_v22 = vadd.f32 %v12428_v20, %v3828_v50 }
 0x386   :  { %3897 = vst.msk [vmem:[#allocation3 + $0x20] sm:$0xff] %vm3581_vm15, %v3876_v38  ;;  %v3877_v63 = vmax.f32 %v3856_v22, 0.0 }
 0x387   :  { %v3916_v17 = vld [vmem:[#allocation3 + $0x10] ss:$2 sm:$0xff]  ;;  %v3938_v13 = vld [vmem:[#allocation3 + $0x11] ss:$2 sm:$0xff] }
 0x388   :  { %v3958_v12 = vmax.f32 %v3916_v17, %v3938_v13  ;;  %3898 = vst.msk [vmem:[#allocation3 + $0x28] sm:$0xff] %vm3581_vm15, %v3877_v63 }
 0x38a   :  { %v8881_v45 = vpack.i.bf16 %v3958_v12, %v12453_v19  ;;  %v3980_v54 = vrot.slane %v3958_v12, 7  ;;  %v4013_v59 = vrot.slane %v3958_v12, 1 }
 0x38c   :  { %8882 = vrot.lane.b32.xlu0 %v8881_v45, %s9854_s5  ;;  %v4014_v31 = vsel %vm13084_vm13, %v4012_v53, %v4013_v59  ;;  %v12468_v6 = vsel %vm338_vm0, %v3979_v46, %v3980_v54 }
 0x38d   :  { %v12486_v25 = vsel %vm4299_vm3, 0.0, %v4014_v31  ;;  %vm4256_vm3 = vcmp.eq.s32.totalorder %v12474_v43, 0 }
 0x38e   :  { %v4289_v36 = vsel %vm4256_vm3, 0.0, %v12468_v6  ;;  %v13094_v6 = vld [vmem:[#allocation55_spill] sm:$0xff] }
 0x38f   :  { %v3918_v32 = vld [vmem:[#allocation3 + $0x20] ss:$2 sm:$0xff]  ;;  %v3940_v23 = vld [vmem:[#allocation3 + $0x21] ss:$2 sm:$0xff] }
 0x390   :  { %v12470_v16 = vmax.f32 %v3918_v32, %v3940_v23 }
 0x392   :  { %v4015_v18 = vrot.slane %v12470_v16, 1  ;;  %v3982_v8 = vrot.slane %v12470_v16, 7 }
 0x394   :  { %v4016_v4 = vsel %vm13085_vm4, %v4013_v59, %v4015_v18  ;;  %v12484_v56 = vsel %vm338_vm0, %v3980_v54, %v3982_v8 }
 0x395   :  { %v12488_v14 = vsel %vm4300_vm10, 0.0, %v4016_v4  ;;  %vm13092_vm10 = vmmov %vm13085_vm4 }
 0x396   :  { %v4388_v26 = vpack.c.bf16 %v12488_v14, %v12486_v25  ;;  %v13089_v25 = vld [vmem:[#allocation51_spill] sm:$0xff] }
 0x397   :  { %v4083_v14 = vshrl.u32 %v13089_v25, 5 }
 0x3ad   :  { %v3754_v42 = vpop.f32.mrb[12].mxu0 }
 0x3ae   :  { %v3829_v40 = vmul.f32 %v12426_v21, %v3754_v42  ;;  %v8542_v51 = vpop.f32.mrb[13].mxu0 }
 0x3af   :  { %v3757_v27 = vpop.f32.mrb[14].mxu0 }
 0x3b0   :  { %v3857_v52 = vadd.f32 %v12428_v20, %v3829_v40  ;;  %v3830_v9 = vmul.f32 %v12426_v21, %v3757_v27  ;;  %v8543_v10 = vpop.f32.mrb[15].mxu0 }
 0x3b2   :  { %v3878_v49 = vmax.f32 %v3857_v52, 0.0  ;;  %v3858_v47 = vadd.f32 %v12428_v20, %v3830_v9 }
 0x3b4   :  { %3899 = vst.msk [vmem:[#allocation3 + $0x30] sm:$0xff] %vm3581_vm15, %v3878_v49  ;;  %v3879_v57 = vmax.f32 %v3858_v47, 0.0 }
 0x3b5   :  { %v3762_v1 = vpop.f32.mrb[16].mxu0 }
 0x3b6   :  { %3900 = vst.msk [vmem:[#allocation3 + $0x38] sm:$0xff] %vm3581_vm15, %v3879_v57  ;;  %v3831_v48 = vmul.f32 %v12426_v21, %v3762_v1  ;;  %v8546_v3 = vpop.f32.mrb[17].mxu0 }
 0x3b7   :  { %v3765_v55 = vpop.f32.mrb[18].mxu0 }
 0x3b8   :  { %v3859_v7 = vadd.f32 %v12428_v20, %v3831_v48  ;;  %v3832_v34 = vmul.f32 %v12426_v21, %v3765_v55  ;;  %v8547_v39 = vpop.f32.mrb[19].mxu0 }
 0x3ba   :  { %v3880_v37 = vmax.f32 %v3859_v7, 0.0  ;;  %v3860_v28 = vadd.f32 %v12428_v20, %v3832_v34 }
 0x3bc   :  { %3901 = vst.msk [vmem:[#allocation3 + $0x40] sm:$0xff] %vm3581_vm15, %v3880_v37  ;;  %v3881_v29 = vmax.f32 %v3860_v28, 0.0 }
 0x3bd   :  { %v3920_v50 = vld [vmem:[#allocation3 + $0x30] ss:$2 sm:$0xff]  ;;  %v3942_v2 = vld [vmem:[#allocation3 + $0x31] ss:$2 sm:$0xff] }
 0x3be   :  { %3902 = vst.msk [vmem:[#allocation3 + $0x48] sm:$0xff] %vm3581_vm15, %v3881_v29  ;;  %v12504_v58 = vmax.f32 %v3920_v50, %v3942_v2 }
 0x3c0   :  { %v8886_v30 = vpack.i.bf16 %v12504_v58, %v12470_v16  ;;  %v3984_v62 = vrot.slane %v12504_v58, 7 }
 0x3c2   :  { %8887 = vrot.lane.b32.xlu1 %v8886_v30, %s9854_s5  ;;  %v12511_v38 = vsel %vm338_vm0, %v3982_v8, %v3984_v62 }
 0x3c5   :  { %v3770_v22 = vpop.f32.mrb[20].mxu0  ;;  %v3922_v63 = vld [vmem:[#allocation3 + $0x40] ss:$2 sm:$0xff]  ;;  %v3944_v17 = vld [vmem:[#allocation3 + $0x41] ss:$2 sm:$0xff] }
 0x3c6   :  { %v3833_v13 = vmul.f32 %v12426_v21, %v3770_v22  ;;  %v8550_v33 = vpop.f32.mrb[21].mxu0  ;;  %v12514_v41 = vmax.f32 %v3922_v63, %v3944_v17  ;;  %v13088_v22 = vld [vmem:[#allocation53_spill] sm:$0xff] }
 0x3c7   :  { %v3773_v12 = vpop.f32.mrb[22].mxu0  ;;  %v4097_v63 = vshrl.u32 %v13088_v22, 5 }
 0x3c8   :  { %v3861_v61 = vadd.f32 %v12428_v20, %v3833_v13  ;;  %v3834_v11 = vmul.f32 %v12426_v21, %v3773_v12  ;;  %v8551_v53 = vpop.f32.mrb[23].mxu0  ;;  %v3986_v45 = vrot.slane %v12514_v41, 7  ;;  %v4084_v12 = vmul.u32 42, %v4083_v14  ;;  %v13097_v14 = vld [vmem:[#allocation46_spill] sm:$0xff] }
 0x3c9   :  { %v8873_v59 = vpop.permute.xlu0 %8872 }
 0x3ca   :  { %v3882_v54 = vmax.f32 %v3861_v61, 0.0  ;;  %v3862_v31 = vadd.f32 %v12428_v20, %v3834_v11  ;;  %v12521_v0 = vsel %vm338_vm0, %v3984_v62, %v3986_v45  ;;  %v8875_v32 = vunpack.i.h.bf16 %v8873_v59  ;;  %v13090_v11 = vld [vmem:[#allocation45_spill] sm:$0xff] }
 0x3cb   :  { %v8874_v23 = vunpack.i.l.bf16 %v8873_v59 }
 0x3cc   :  { %3903 = vst.msk [vmem:[#allocation3 + $0x50] sm:$0xff] %vm3581_vm15, %v3882_v54  ;;  %v3883_v60 = vmax.f32 %v3862_v31, 0.0  ;;  %v3579_v40 = vsel %vm13086_vm9, %v12399_v35, %v8875_v32  ;;  %v13091_v54 = vld [vmem:[#allocation43_spill] sm:$0xff]  ;;  %vm13093_vm9 = vmmov %vm13092_vm10 }
 0x3cd   :  { %v3578_v51 = vsel %vm13079_vm7, %v12337_v44, %v8874_v23  ;;  %v3454_v10 = vpop.permute.xlu0 %3453  ;;  %v4085_v59 = vsub.s32 %v13091_v54, %v4084_v12  ;;  %vm13098_vm3 = vmmov %vm13093_vm9 }
 0x3ce   :  { %3904 = vst.msk [vmem:[#allocation3 + $0x58] sm:$0xff] %vm3581_vm15, %v3883_v60  ;;  %v3580_v35 = vsel %vm13087_vm6, %v12408_v5, %v3454_v10 }
 0x3cf   :  { %vm4202_vm13 = vcmp.ne.s32.totalorder %v4085_v59, 0  ;;  %vm4213_vm14 = vcmp.lt.s32.totalorder %v4085_v59, 0 }
 0x3d0   :  { %vm4224_vm8 = vmand %vm4213_vm14, %vm4202_vm13 }
 0x3d1   :  { %v8878_v8 = vpop.permute.xlu1 %8877 }
 0x3d2   :  { %v8880_v4 = vunpack.i.h.bf16 %v8878_v8  ;;  %v8879_v42 = vunpack.i.l.bf16 %v8878_v8  ;;  %v4019_v8 = vrot.slane %v12514_v41, 1 }
 0x3d4   :  { %v3600_v27 = vsel %vm3581_vm15, %v3578_v51, %v8879_v42  ;;  %v3601_v52 = vsel %vm3581_vm15, %v3579_v40, %v8880_v4 }
 0x3d5   :  { %v3612_v9 = vpack.c.bf16 %v3601_v52, %v3600_v27  ;;  %v3538_v49 = vpop.permute.xlu1 %3537  ;;  %v3924_v47 = vld [vmem:[#allocation3 + $0x50] ss:$2 sm:$0xff]  ;;  %v3946_v57 = vld [vmem:[#allocation3 + $0x51] ss:$2 sm:$0xff]  ;;  %v4235_v27 = vadd.s32 42, %v4085_v59  ;;  %v4017_v52 = vrot.slane %v12504_v58, 1 }
 0x3d6   :  { %v12532_v1 = vmax.f32 %v3924_v47, %v3946_v57  ;;  %v3602_v44 = vsel %vm3581_vm15, %v3580_v35, %v3538_v49  ;;  %v4011_v47 = vsel %vm338_vm0, 0.0, %v3979_v46 }
 0x3d7   :  { %8565 = vmatmul.mubr.msk.bf16.gmra.mrb[36].mxu0 %vm3662_vm5, %v3612_v9  ;;  %v3613_v7 = vpack.c.bf16 %v3602_v44, %v3602_v44  ;;  %v4020_v57 = vsel %vm13092_vm10, %v4017_v52, %v4019_v8  ;;  %v4246_v44 = vsel %vm4224_vm8, %v4235_v27, %v4085_v59  ;;  %v4018_v19 = vsel %vm13093_vm9, %v4015_v18, %v4017_v52 }
 0x3d8   :  { %8568 = vmatprep.mubr.msk.bf16.mxu0 %vm9874_vm12, %v12992_v15  ;;  %v8891_v48 = vpack.i.bf16 %v12532_v1, %v12514_v41  ;;  %v3988_v3 = vrot.slane %v12532_v1, 7  ;;  %vm4301_vm7 = vcmp.eq.s32.totalorder %v4246_v44, 41  ;;  %v4288_v46 = vsel %vm4255_vm2, 0.0, %v4011_v47  ;;  %v13100_v41 = vld [vmem:[#allocation59_spill] sm:$0xff] }
 0x3d9   :  { %vm4257_vm8 = vcmp.eq.s32.totalorder %v4246_v44, 0 }
 0x3da   :  { %8892 = vrot.lane.b32.xlu0 %v8891_v48, %s9854_s5  ;;  %v12544_v55 = vsel %vm338_vm0, %v3986_v45, %v3988_v3 }
 0x3dd   :  { %v3778_v34 = vpop.f32.mrb[24].mxu0 }
 0x3de   :  { %v3835_v39 = vmul.f32 %v12426_v21, %v3778_v34  ;;  %v8554_v5 = vpop.f32.mrb[25].mxu0 }
 0x3df   :  { %8569 = vmatmul.mubr.msk.bf16.gmra.mrb[40].mxu0 %vm3662_vm5, %v3613_v7  ;;  %v3781_v37 = vpop.f32.mrb[26].mxu0  ;;  %v4334_v5 = vsel %vm4301_vm7, 0.0, %v4018_v19 }
 0x3e0   :  { %8097 = vmatprep.mubr.msk.bf16.mxu0 %vm3581_vm15, %v4388_v26  ;;  %v3863_v28 = vadd.f32 %v12428_v20, %v3835_v39  ;;  %v3836_v29 = vmul.f32 %v12426_v21, %v3781_v37  ;;  %v8555_v50 = vpop.f32.mrb[27].mxu0  ;;  %v4098_v26 = vmul.u32 42, %v4097_v63  ;;  %v13096_v63 = vld [vmem:[#allocation47_spill] sm:$0xff] }
 0x3e1   :  { %v4125_v50 = vshrl.u32 %v13094_v6, 5 }
 0x3e2   :  { %v3884_v2 = vmax.f32 %v3863_v28, 0.0  ;;  %v3864_v30 = vadd.f32 %v12428_v20, %v3836_v29  ;;  %v4099_v53 = vsub.s32 %v13090_v11, %v4098_v26  ;;  %v4021_v11 = vrot.slane %v12532_v1, 1 }
 0x3e4   :  { %3905 = vst.msk [vmem:[#allocation3 + $0x60] sm:$0xff] %vm3581_vm15, %v3884_v2  ;;  %v3885_v62 = vmax.f32 %v3864_v30, 0.0  ;;  %vm4203_vm5 = vcmp.ne.s32.totalorder %v4099_v53, 0  ;;  %vm4214_vm11 = vcmp.lt.s32.totalorder %v4099_v53, 0  ;;  %v4236_v23 = vadd.s32 42, %v4099_v53  ;;  %v13095_v2 = vld [vmem:[#allocation54_spill] sm:$0xff] }
 0x3e5   :  { %vm4225_vm1 = vmand %vm4214_vm11, %vm4203_vm5  ;;  %v4111_v30 = vshrl.u32 %v13095_v2, 5 }
 0x3e6   :  { %3906 = vst.msk [vmem:[#allocation3 + $0x68] sm:$0xff] %vm3581_vm15, %v3885_v62  ;;  %v4247_v49 = vsel %vm4225_vm1, %v4236_v23, %v4099_v53  ;;  %v4126_v62 = vmul.u32 42, %v4125_v50 }
 0x3e7   :  { %vm4302_vm4 = vcmp.eq.s32.totalorder %v4247_v49, 41  ;;  %v4112_v22 = vmul.u32 42, %v4111_v30  ;;  %vm4258_vm2 = vcmp.eq.s32.totalorder %v4247_v49, 0 }
 0x3e8   :  { %v4335_v43 = vsel %vm4302_vm4, 0.0, %v4020_v57  ;;  %v4127_v25 = vsub.s32 %v13096_v63, %v4126_v62  ;;  %vm13099_vm4 = vmmov %vm13098_vm3  ;;  %v4153_v57 = vshrl.u32 %v13100_v41, 5 }
 0x3e9   :  { %v4390_v37 = vpack.c.bf16 %v4335_v43, %v4334_v5  ;;  %v4113_v26 = vsub.s32 %v13097_v14, %v4112_v22  ;;  %v4022_v23 = vsel %vm13099_vm4, %v4019_v8, %v4021_v11  ;;  %v13102_v43 = vld [vmem:[#allocation49_spill] sm:$0xff] }
 0x3ea   :  { %vm4205_vm6 = vcmp.ne.s32.totalorder %v4127_v25, 0  ;;  %vm4216_vm5 = vcmp.lt.s32.totalorder %v4127_v25, 0  ;;  %v4154_v19 = vmul.u32 42, %v4153_v57 }
 0x3eb   :  { %vm4204_vm11 = vcmp.ne.s32.totalorder %v4113_v26, 0  ;;  %vm4215_vm13 = vcmp.lt.s32.totalorder %v4113_v26, 0  ;;  %vm4227_vm14 = vmand %vm4216_vm5, %vm4205_vm6  ;;  %v4237_v12 = vadd.s32 42, %v4113_v26 }
 0x3ec   :  { %vm4226_vm1 = vmand %vm4215_vm13, %vm4204_vm11 }
 0x3ed   :  { %v3926_v17 = vld [vmem:[#allocation3 + $0x60] ss:$2 sm:$0xff]  ;;  %v3948_v13 = vld [vmem:[#allocation3 + $0x61] ss:$2 sm:$0xff] }
 0x3ee   :  { %v12559_v33 = vmax.f32 %v3926_v17, %v3948_v13  ;;  %v4238_v17 = vadd.s32 42, %v4127_v25 }
 0x3f0   :  { %v3990_v61 = vrot.slane %v12559_v33, 7  ;;  %v4023_v13 = vrot.slane %v12559_v33, 1  ;;  %v12603_v53 = vsel %vm4227_vm14, %v4238_v17, %v4127_v25 }
 0x3f1   :  { %vm4304_vm10 = vcmp.eq.s32.totalorder %v12603_v53, 41 }
 0x3f2   :  { %v12566_v45 = vsel %vm338_vm0, %v3988_v3, %v3990_v61  ;;  %v4024_v54 = vsel %vm13098_vm3, %v4021_v11, %v4023_v13 }
 0x3f8   :  { %v3786_v31 = vpop.f32.mrb[28].mxu0 }
 0x3f9   :  { %v3837_v60 = vmul.f32 %v12426_v21, %v3786_v31  ;;  %v8558_v32 = vpop.f32.mrb[29].mxu0  ;;  %v4248_v31 = vsel %vm4226_vm1, %v4237_v12, %v4113_v26 }
 0x3fa   :  { %v3789_v4 = vpop.f32.mrb[30].mxu0  ;;  %vm4303_vm9 = vcmp.eq.s32.totalorder %v4248_v31, 41  ;;  %vm4259_vm1 = vcmp.eq.s32.totalorder %v4248_v31, 0 }
 0x3fb   :  { %v3865_v42 = vadd.f32 %v12428_v20, %v3837_v60  ;;  %v3838_v40 = vmul.f32 %v12426_v21, %v3789_v4  ;;  %v8559_v51 = vpop.f32.mrb[31].mxu0  ;;  %v4290_v4 = vsel %vm4257_vm8, 0.0, %v12484_v56  ;;  %v4336_v47 = vsel %vm4303_vm9, 0.0, %v4022_v23 }
 0x3fc   :  { %vm4260_vm8 = vcmp.eq.s32.totalorder %v12603_v53, 0  ;;  %v4292_v26 = vsel %vm4259_vm1, 0.0, %v12521_v0 }
 0x3fd   :  { %v3886_v9 = vmax.f32 %v3865_v42, 0.0  ;;  %v3866_v10 = vadd.f32 %v12428_v20, %v3838_v40  ;;  %v4291_v42 = vsel %vm4258_vm2, 0.0, %v12511_v38  ;;  %v4337_v40 = vsel %vm4304_vm10, 0.0, %v4024_v54  ;;  %v13101_v38 = vld [vmem:[#allocation58_spill] sm:$0xff]  ;;  %vm13104_vm2 = vmmov %vm13098_vm3 }
 0x3fe   :  { %v8883_v35 = vpop.permute.xlu0 %8882  ;;  %v4139_v44 = vshrl.u32 %v13101_v38, 5  ;;  %vm13105_vm10 = vmmov %vm13104_vm2  ;;  %v4293_v17 = vsel %vm4260_vm8, 0.0, %v12544_v55  ;;  %v8929_v38 = vld [vmem:[#allocation19 + $0x94] ss:$8 sps:$4 sm:$0xff]  }
 0x3ff   :  { %3907 = vst.msk [vmem:[#allocation3 + $0x70] sm:$0xff] %vm3581_vm15, %v3886_v9  ;;  %v3887_v58 = vmax.f32 %v3866_v10, 0.0  ;;  %v8885_v48 = vunpack.i.h.bf16 %v8883_v35  ;;  %v8884_v3 = vunpack.i.l.bf16 %v8883_v35  ;;  %v4392_v35 = vpack.c.bf16 %v4337_v40, %v4336_v47  ;;  %v13106_v47 = vld [vmem:[#allocation60_spill] sm:$0xff] }
 0x400   :  { %v4167_v41 = vshrl.u32 %v13106_v47, 5  ;;  %v8962_v47 = vld [vmem:[#allocation19 + $0x390] ss:$8 sps:$4 sm:$0xff]  }
 0x401   :  { %3908 = vst.msk [vmem:[#allocation3 + $0x78] sm:$0xff] %vm3581_vm15, %v3887_v58  ;;  %v4376_v7 = vsel %vm3581_vm15, %v4288_v46, %v8884_v3  ;;  %v4377_v34 = vsel %vm3581_vm15, %v4289_v36, %v8885_v48  ;;  %v4140_v36 = vmul.u32 42, %v4139_v44 }
 0x402   :  { %v4387_v39 = vpack.c.bf16 %v4377_v34, %v4376_v7  ;;  %v4155_v7 = vsub.s32 %v13102_v43, %v4154_v19  ;;  %v13103_v34 = vld [vmem:[#allocation48_spill] sm:$0xff]  ;;  %v4168_v19 = vmul.u32 42, %v4167_v41  ;;  %v8966_v41 = vld [vmem:[#allocation19 + $0x3a4] ss:$8 sps:$4 sm:$0xff]  }
 0x404   :  { %4546 = vmatmul.mubr.bf16.vlgmr.msra.gmra.mrb[44].mxu0 %v4387_v39  ;;  %v4141_v39 = vsub.s32 %v13103_v34, %v4140_v36  ;;  %vm4207_vm7 = vcmp.ne.s32.totalorder %v4155_v7, 0  ;;  %vm4218_vm6 = vcmp.lt.s32.totalorder %v4155_v7, 0 }
 0x405   :  { %8098 = vmatprep.mubr.msk.bf16.mxu0 %vm3581_vm15, %v4390_v37  ;;  %vm4229_vm13 = vmand %vm4218_vm6, %vm4207_vm7 }
 0x406   :  { %vm4206_vm5 = vcmp.ne.s32.totalorder %v4141_v39, 0  ;;  %vm4217_vm11 = vcmp.lt.s32.totalorder %v4141_v39, 0 }
 0x407   :  { %vm4228_vm14 = vmand %vm4217_vm11, %vm4206_vm5 }
 0x408   :  { %v3928_v16 = vld [vmem:[#allocation3 + $0x70] ss:$2 sm:$0xff]  ;;  %v3950_v28 = vld [vmem:[#allocation3 + $0x71] ss:$2 sm:$0xff] }
 0x409   :  { %v12592_v18 = vmax.f32 %v3928_v16, %v3950_v28  ;;  %v4240_v16 = vadd.s32 42, %v4155_v7 }
 0x40b   :  { %v8896_v29 = vpack.i.bf16 %v12592_v18, %v12559_v33  ;;  %v4025_v6 = vrot.slane %v12592_v18, 1  ;;  %v4251_v2 = vsel %vm4229_vm13, %v4240_v16, %v4155_v7  ;;  %v8930_v7 = vld [vmem:[#allocation19 + $0xa0] ss:$8 sps:$4 sm:$0xff]  }
 0x40c   :  { %vm4306_vm3 = vcmp.eq.s32.totalorder %v4251_v2, 41  ;;  %vm4262_vm7 = vcmp.eq.s32.totalorder %v4251_v2, 0  ;;  %v13108_v16 = vld [vmem:[#allocation56_spill] sm:$0xff]  ;;  %v13109_v2 = vld [vmem:[#allocation57_spill] sm:$0xff] }
 0x40d   :  { %8897 = vrot.lane.b32.xlu1 %v8896_v29, %s9854_s5  ;;  %v4239_v29 = vadd.s32 42, %v4141_v39  ;;  %v4026_v14 = vsel %vm13105_vm10, %v4023_v13, %v4025_v6 }
 0x40f   :  { %v4250_v22 = vsel %vm4228_vm14, %v4239_v29, %v4141_v39  ;;  %v8935_v39 = vld [vmem:[#allocation19 + $0xb4] ss:$8 sps:$4 sm:$0xff]   ;;  %v4169_v29 = vsub.s32 %v13108_v16, %v4168_v19  ;;  %v8986_v16 = vld [vmem:[#allocation19 + $0x3d0] ss:$8 sps:$4 sm:$0xff]  }
 0x410   :  { %vm4305_vm4 = vcmp.eq.s32.totalorder %v4250_v22, 41  ;;  %vm4261_vm9 = vcmp.eq.s32.totalorder %v4250_v22, 0  ;;  %v8938_v22 = vld [vmem:[#allocation19 + $0xc4] ss:$8 sps:$4 sm:$0xff]  }
 0x411   :  { %v4294_v23 = vsel %vm4261_vm9, 0.0, %v12566_v45  ;;  %vm4208_vm6 = vcmp.ne.s32.totalorder %v4169_v29, 0  ;;  %vm4219_vm5 = vcmp.lt.s32.totalorder %v4169_v29, 0 }
 0x412   :  { %vm4230_vm14 = vmand %vm4219_vm5, %vm4208_vm6  ;;  %vm4044_vm6 = vcmask 1042432  }
 0x434   :  { %v8888_v59 = vpop.permute.xlu1 %8887 }
 0x435   :  { %v8890_v60 = vunpack.i.h.bf16 %v8888_v59  ;;  %v8889_v32 = vunpack.i.l.bf16 %v8888_v59  ;;  %v4338_v59 = vsel %vm4305_vm4, 0.0, %v4026_v14  ;;  %v8941_v14 = vld [vmem:[#allocation19 + $0xd4] ss:$8 sps:$4 sm:$0xff]  }
 0x436   :  { %v3794_v1 = vpop.f32.mrb[32].mxu0 }
 0x437   :  { %v3839_v51 = vmul.f32 %v12426_v21, %v3794_v1  ;;  %v8562_v27 = vpop.f32.mrb[33].mxu0  ;;  %v4378_v52 = vsel %vm3581_vm15, %v4290_v4, %v8889_v32  ;;  %v4379_v9 = vsel %vm3581_vm15, %v4291_v42, %v8890_v60  ;;  %v3992_v60 = vrot.slane %v12592_v18, 7 }
 0x438   :  { %v3797_v10 = vpop.f32.mrb[34].mxu0  ;;  %v4389_v49 = vpack.c.bf16 %v4379_v9, %v4378_v52  ;;  %v8926_v27 = vld [vmem:[#allocation19 + $0x84] ss:$8 sps:$4 sm:$0xff]  }
 0x439   :  { %v3867_v8 = vadd.f32 %v12428_v20, %v3839_v51  ;;  %v3840_v58 = vmul.f32 %v12426_v21, %v3797_v10  ;;  %v8563_v56 = vpop.f32.mrb[35].mxu0  ;;  %v3993_v0 = vsel %vm338_vm0, %v3990_v61, %v3992_v60  ;;  %v8924_v51 = vld [vmem:[#allocation19 + $0x80] ss:$8 sps:$4 sm:$0xff]   ;;  %4775 = vmatprep.subr.bf16.mxu0 %v8926_v27 }
 0x43a   :  { %4554 = vmatmul.mubr.bf16.gmra.mrb[48].mxu0 %v4389_v49  ;;  %v4295_v1 = vsel %vm4262_vm7, 0.0, %v3993_v0 }
 0x43b   :  { %v3888_v48 = vmax.f32 %v3867_v8, 0.0  ;;  %v3868_v3 = vadd.f32 %v12428_v20, %v3840_v58  ;;  %8099 = vmatprep.mubr.msk.bf16.mxu0 %vm3581_vm15, %v4392_v35  ;;  %4776 = vmatpush1.bf16.msra.mxu0 %v8924_v51  ;;  %v13107_v58 = vld [vmem:[#allocation61_spill] sm:$0xff]  ;;  %v8927_v35 = vld [vmem:[#allocation19 + $0x90] ss:$8 sps:$4 sm:$0xff]  }
 0x43c   :  { %v4181_v56 = vshrl.u32 %v13107_v58, 5  ;;  %4777 = vmatprep.subr.bf16.mxu0 %v8929_v38 }
 0x43d   :  { %3909 = vst.msk [vmem:[#allocation3 + $0x80] sm:$0xff] %vm3581_vm15, %v3888_v48  ;;  %v3889_v46 = vmax.f32 %v3868_v3, 0.0  ;;  %v8932_v48 = vld [vmem:[#allocation19 + $0xa4] ss:$8 sps:$4 sm:$0xff]  }
 0x43e   :  { %v4182_v43 = vmul.u32 42, %v4181_v56  ;;  %v12698_v56 = vld [vmem:[#allocation17] ss:$0 sm:$0xff] }
 0x43f   :  { %3910 = vst.msk [vmem:[#allocation3 + $0x88] sm:$0xff] %vm3581_vm15, %v3889_v46  ;;  %4778 = vmatpush1.bf16.msra.mxu0 %v8927_v35 }
 0x440   :  { %4779 = vmatprep.subr.bf16.mxu0 %v8932_v48 }
 0x443   :  { %4780 = vmatpush1.bf16.msra.mxu0 %v8930_v7  ;;  %v8972_v7 = vld [vmem:[#allocation19 + $0x3b4] ss:$8 sps:$4 sm:$0xff]  }
 0x444   :  { %4781 = vmatprep.subr.bf16.mxu0 %v8935_v39  ;;  %v8978_v39 = vld [vmem:[#allocation19 + $0x3c4] ss:$8 sps:$4 sm:$0xff]  }
 0x446   :  { %v3930_v5 = vld [vmem:[#allocation3 + $0x80] ss:$2 sm:$0xff]  ;;  %v3952_v37 = vld [vmem:[#allocation3 + $0x81] ss:$2 sm:$0xff] }
 0x447   :  { %v12627_v28 = vmax.f32 %v3930_v5, %v3952_v37 }
 0x449   :  { %v4027_v50 = vrot.slane %v12627_v28, 1 }
 0x44b   :  { %v4028_v30 = vsel %vm13104_vm2, %v4025_v6, %v4027_v50 }
 0x44c   :  { %v8893_v62 = vpop.permute.xlu0 %8892  ;;  %v4339_v12 = vsel %vm4306_vm3, 0.0, %v4028_v30  ;;  %v4183_v30 = vsub.s32 %v13109_v2, %v4182_v43  ;;  %vm13110_vm3 = vmmov %vm13105_vm10  ;;  %v8996_v2 = vld [vmem:[#allocation19 + $0x3f4] ss:$8 sps:$4 sm:$0xff]  }
 0x44d   :  { %v8895_v63 = vunpack.i.h.bf16 %v8893_v62  ;;  %v8894_v25 = vunpack.i.l.bf16 %v8893_v62  ;;  %v4394_v31 = vpack.c.bf16 %v4339_v12, %v4338_v59  ;;  %v8933_v62 = vld [vmem:[#allocation19 + $0xb0] ss:$8 sps:$4 sm:$0xff]   ;;  %vm13111_vm10 = vmmov %vm13110_vm3 }
 0x44e   :  { %vm4209_vm11 = vcmp.ne.s32.totalorder %v4183_v30, 0  ;;  %vm4220_vm13 = vcmp.lt.s32.totalorder %v4183_v30, 0  ;;  %4782 = vmatpush1.bf16.msra.mxu0 %v8933_v62  ;;  %v4242_v12 = vadd.s32 42, %v4183_v30  ;;  %v9004_v62 = vld [vmem:[#allocation19 + $0x404] ss:$8 sps:$4 sm:$0xff]  }
 0x44f   :  { %v4380_v11 = vsel %vm3581_vm15, %v4292_v26, %v8894_v25  ;;  %v4381_v53 = vsel %vm3581_vm15, %v4293_v17, %v8895_v63  ;;  %4783 = vmatprep.subr.bf16.mxu0 %v8938_v22  ;;  %v4241_v17 = vadd.s32 42, %v4169_v29  ;;  %vm4231_vm1 = vmand %vm4220_vm13, %vm4209_vm11 }
 0x450   :  { %v4391_v54 = vpack.c.bf16 %v4381_v53, %v4380_v11  ;;  %v8939_v53 = vld [vmem:[#allocation19 + $0xd0] ss:$8 sps:$4 sm:$0xff]  }
 0x452   :  { %4562 = vmatmul.mubr.bf16.gmra.mrb[52].mxu0 %v4391_v54  ;;  %v8944_v54 = vld [vmem:[#allocation19 + $0xe4] ss:$8 sps:$4 sm:$0xff]  }
 0x453   :  { %8100 = vmatprep.mubr.msk.bf16.mxu0 %vm3581_vm15, %v4394_v31 }
 0x47f   :  { %v8898_v55 = vpop.permute.xlu1 %8897 }
 0x480   :  { %v8900_v13 = vunpack.i.h.bf16 %v8898_v55  ;;  %v8899_v32 = vunpack.i.l.bf16 %v8898_v55  ;;  %v12673_v55 = vsel %vm4230_vm14, %v4241_v17, %v4169_v29  ;;  %v8990_v29 = vld [vmem:[#allocation19 + $0x3e4] ss:$8 sps:$4 sm:$0xff]  }
 0x481   :  { %vm4307_vm8 = vcmp.eq.s32.totalorder %v12673_v55, 41  ;;  %vm4263_vm5 = vcmp.eq.s32.totalorder %v12673_v55, 0 }
 0x482   :  { %v4382_v4 = vsel %vm3581_vm15, %v4294_v23, %v8899_v32  ;;  %v4383_v42 = vsel %vm3581_vm15, %v4295_v1, %v8900_v13  ;;  %v12675_v13 = vsel %vm4231_vm1, %v4242_v12, %v4183_v30  ;;  %v8998_v30 = vld [vmem:[#allocation19 + $0x3f0] ss:$8 sps:$4 sm:$0xff]  }
 0x483   :  { %v4393_v40 = vpack.c.bf16 %v4383_v42, %v4382_v4  ;;  %vm4308_vm2 = vcmp.eq.s32.totalorder %v12675_v13, 41  ;;  %v8942_v42 = vld [vmem:[#allocation19 + $0xe0] ss:$8 sps:$4 sm:$0xff]   ;;  %vm4264_vm13 = vcmp.eq.s32.totalorder %v12675_v13, 0 }
 0x485   :  { %4570 = vmatmul.mubr.bf16.gmra.mrb[56].mxu0 %v4393_v40  ;;  %v8947_v40 = vld [vmem:[#allocation19 + $0xf4] ss:$8 sps:$4 sm:$0xff]  }
 0x4aa   :  { %v3802_v33 = vpop.f32.mrb[36].mxu0 }
 0x4ab   :  { %v3841_v61 = vmul.f32 %v12426_v21, %v3802_v33  ;;  %v8566_v52 = vpop.f32.mrb[37].mxu0 }
 0x4ac   :  { %v3805_v9 = vpop.f32.mrb[38].mxu0 }
 0x4ad   :  { %v3869_v10 = vadd.f32 %v12428_v20, %v3841_v61  ;;  %v3842_v45 = vmul.f32 %v12426_v21, %v3805_v9  ;;  %v8567_v49 = vpop.f32.mrb[39].mxu0  ;;  %v8950_v9 = vld [vmem:[#allocation19 + $0x4] ss:$8 sps:$4 sm:$0xff]  }
 0x4ae   :  { %v8960_v49 = vld [vmem:[#allocation19 + $0x394] ss:$8 sps:$4 sm:$0xff]  }
 0x4af   :  { %v3890_v57 = vmax.f32 %v3869_v10, 0.0  ;;  %v3870_v8 = vadd.f32 %v12428_v20, %v3842_v45  ;;  %v8954_v10 = vld [vmem:[#allocation19 + $0x384] ss:$8 sps:$4 sm:$0xff]   ;;  %v8956_v45 = vld [vmem:[#allocation19 + $0x380] ss:$8 sps:$4 sm:$0xff]  }
 0x4b0   :  { %5770 = vmatprep.subr.bf16.mxu1 %v8954_v10  ;;  %v3994_v10 = vrot.slane %v12627_v28, 7 }
 0x4b1   :  { %3911 = vst.msk [vmem:[#allocation3 + $0x90] sm:$0xff] %vm3581_vm15, %v3890_v57  ;;  %v3891_v44 = vmax.f32 %v3870_v8, 0.0  ;;  %5771 = vmatpush1.bf16.msra.mxu1 %v8956_v45  ;;  %v8968_v57 = vld [vmem:[#allocation19 + $0x3a0] ss:$8 sps:$4 sm:$0xff]   ;;  %v12696_v8 = vld [vmem:[#allocation16] ss:$0 sm:$0xff] }
 0x4b2   :  { %v3810_v3 = vpop.f32.mrb[40].mxu0  ;;  %5772 = vmatprep.subr.bf16.mxu1 %v8960_v49 }
 0x4b3   :  { %3912 = vst.msk [vmem:[#allocation3 + $0x98] sm:$0xff] %vm3581_vm15, %v3891_v44  ;;  %v3843_v46 = vmul.f32 %v12426_v21, %v3810_v3  ;;  %v8570_v36 = vpop.f32.mrb[41].mxu0 }
 0x4b4   :  { %v3813_v34 = vpop.f32.mrb[42].mxu0 }
 0x4b5   :  { %v3871_v5 = vadd.f32 %v12428_v20, %v3843_v46  ;;  %v8571_v37 = vpop.f32.mrb[43].mxu0  ;;  %v8936_v20 = vld [vmem:[#allocation19 + $0xc0] ss:$8 sps:$4 sm:$0xff]   ;;  %5773 = vmatpush1.bf16.msra.mxu1 %v8962_v47  ;;  %v8974_v34 = vld [vmem:[#allocation19 + $0x3b0] ss:$8 sps:$4 sm:$0xff]  }
 0x4b6   :  { %4784 = vmatpush1.bf16.msra.mxu0 %v8936_v20  ;;  %5774 = vmatprep.subr.bf16.mxu1 %v8966_v41  ;;  %v8984_v37 = vld [vmem:[#allocation19 + $0x3d4] ss:$8 sps:$4 sm:$0xff]  }
 0x4b7   :  { %v3892_v6 = vmax.f32 %v3871_v5, 0.0  ;;  %4785 = vmatprep.subr.bf16.mxu0 %v8941_v14  ;;  %v8980_v5 = vld [vmem:[#allocation19 + $0x3c0] ss:$8 sps:$4 sm:$0xff]  }
 0x4b9   :  { %3913 = vst.msk [vmem:[#allocation3 + $0xa0] sm:$0xff] %vm3581_vm15, %v3892_v6  ;;  %5775 = vmatpush1.bf16.msra.mxu1 %v8968_v57  ;;  %v8992_v6 = vld [vmem:[#allocation19 + $0x3e0] ss:$8 sps:$4 sm:$0xff]   ;;  %v3995_v57 = vsel %vm338_vm0, %v3992_v60, %v3994_v10 }
 0x4ba   :  { %v3932_v21 = vld [vmem:[#allocation3 + $0x90] ss:$2 sm:$0xff]  ;;  %v3954_v63 = vld [vmem:[#allocation3 + $0x91] ss:$2 sm:$0xff]  ;;  %4786 = vmatpush1.bf16.msra.mxu0 %v8939_v53  ;;  %5776 = vmatprep.subr.bf16.mxu1 %v8972_v7 }
 0x4bb   :  { %v12665_v25 = vmax.f32 %v3932_v21, %v3954_v63  ;;  %4787 = vmatprep.subr.bf16.mxu0 %v8944_v54  ;;  %v13112_v54 = vld [vmem:[#allocation65_spill] sm:$0xff] }
 0x4bc   :  { %v8948_v7 = vld [vmem:[#allocation19] ss:$8 sps:$4 sm:$0xff]  }
 0x4bd   :  { %v8901_v26 = vpack.i.bf16 %v12665_v25, %v12627_v28  ;;  %v4029_v11 = vrot.slane %v12665_v25, 1  ;;  %v3996_v4 = vrot.slane %v12665_v25, 7  ;;  %5777 = vmatpush1.bf16.msra.mxu1 %v8974_v34 }
 0x4be   :  { %4788 = vmatpush1.bf16.msra.mxu0 %v8942_v42  ;;  %5778 = vmatprep.subr.bf16.mxu1 %v8978_v39  ;;  %v8953_v39 = vld [vmem:[#allocation19 + $0x14] ss:$8 sps:$4 sm:$0xff]  }
 0x4bf   :  { %8902 = vrot.lane.b32.xlu0 %v8901_v26, %s9854_s5  ;;  %v4030_v1 = vsel %vm13110_vm3, %v4027_v50, %v4029_v11  ;;  %v8945_v50 = vld [vmem:[#allocation19 + $0xf0] ss:$8 sps:$4 sm:$0xff]   ;;  %4789 = vmatprep.subr.bf16.mxu0 %v8947_v40 }
 0x4c0   :  { %v3934_v59 = vld [vmem:[#allocation3 + $0xa0] ss:$2 sm:$0xf]  ;;  %v3956_v31 = vld [vmem:[#allocation3 + $0xa1] ss:$2 sm:$0xf] }
 0x4c1   :  { %v12671_v0 = vmax.f32 %v3934_v59, %v3956_v31  ;;  %v4340_v33 = vsel %vm4307_vm8, 0.0, %v4030_v1  ;;  %5779 = vmatpush1.bf16.msra.mxu1 %v8980_v5  ;;  %v4195_v59 = vshrl.u32 %v13112_v54, 5  ;;  %v8951_v5 = vld [vmem:[#allocation19 + $0x10] ss:$8 sps:$4 sm:$0xff]  }
 0x4c2   :  { %4790 = vmatpush1.bf16.msra.mxu0 %v8945_v50  ;;  %5780 = vmatprep.subr.bf16.mxu1 %v8984_v37  ;;  %v8959_v37 = vld [vmem:[#allocation19 + $0x24] ss:$8 sps:$4 sm:$0xff]  }
 0x4c3   :  { %4363 = vrot.lane.b32.xlu1 %v12671_v0, %s9854_s5  ;;  %v3998_v32 = vrot.slane %v12671_v0, 7  ;;  %v4031_v23 = vrot.slane %v12671_v0, 1  ;;  %4896 = vmatprep.subr.bf16.mxu0 %v8950_v9  ;;  %v4196_v31 = vmul.u32 42, %v4195_v59  ;;  %v8989_v59 = vld [vmem:[#allocation19 + $0x74] ss:$8 sps:$4 sm:$0xff]   ;;  %s9875_s5 = smov [#allocation31]  }
 0x4c4   :  { %s8047_s19 = sshll.u32 %s9875_s5, 4  ;;  %s8048_s19 = int_to_ptr.vmem [resolvable:$true] %s8047_s19 }
 0x4c5   :  { %v4032_v51 = vsel %vm13111_vm10, %v4029_v11, %v4031_v23  ;;  %v12693_v27 = vsel %vm338_vm0, %v3996_v4, %v3998_v32  ;;  %5781 = vmatpush1.bf16.msra.mxu1 %v8986_v16  ;;  %v13113_v32 = vld [vmem:[#allocation62_spill] sm:$0xff]  ;;  %v4045_v28 = vsel %vm4044_vm6, %v4031_v23, 0.0  ;;  %v8965_v16 = vld [vmem:[#allocation19 + $0x34] ss:$8 sps:$4 sm:$0xff]   ;;  %s9809_s3 = scalar_lea.vmem %s8048_s19, 32  ;;  %p9814_p3 = scmp.lt.s32.totalorder %s8048_s19, %s8048_s19 }
 0x4c6   :  { %v4341_v61 = vsel %vm4308_vm2, 0.0, %v4032_v51  ;;  %5782 = vmatprep.subr.bf16.mxu1 %v8990_v29  ;;  %v4197_v1 = vsub.s32 %v13113_v32, %v4196_v31  ;;  %v8963_v29 = vld [vmem:[#allocation19 + $0x30] ss:$8 sps:$4 sm:$0xff]   ;;  %p9810_p2 = scmp.ne.s32.totalorder %s8048_s19, %s9809_s3  ;;  %p9815_p4 = scmp.lt.s32.totalorder %s9809_s3, %s9809_s3 }
 0x4c7   :  { %v4396_v52 = vpack.c.bf16 %v4341_v61, %v4340_v33 }
 0x4c8   :  { %vm4210_vm4 = vcmp.ne.s32.totalorder %v4197_v1, 0  ;;  %vm4221_vm9 = vcmp.lt.s32.totalorder %v4197_v1, 0  ;;  %v4243_v61 = vadd.s32 42, %v4197_v1  ;;  %p9816_p5 = por %p9815_p4, %p9814_p3 }
 0x4c9   :  { %8101 = vmatprep.mubr.msk.bf16.mxu0 %vm3581_vm15, %v4396_v52  ;;  %5783 = vmatpush1.bf16.msra.mxu1 %v8992_v6  ;;  %vm4232_vm7 = vmand %vm4221_vm9, %vm4210_vm4  ;;  %v8971_v6 = vld [vmem:[#allocation19 + $0x44] ss:$8 sps:$4 sm:$0xff]  }
 0x4ca   :  { %5784 = vmatprep.subr.bf16.mxu1 %v8996_v2  ;;  %v4254_v47 = vsel %vm4232_vm7, %v4243_v61, %v4197_v1  ;;  %v8969_v2 = vld [vmem:[#allocation19 + $0x40] ss:$8 sps:$4 sm:$0xff]   ;;  %p9817_p6 = pnand %p9816_p5, %p9810_p2 }
 0x4cb   :  { %vm4309_vm11 = vcmp.eq.s32.totalorder %v4254_v47, 41  ;;  %vm4265_vm14 = vcmp.eq.s32.totalorder %v4254_v47, 0  ;;  %v9002_v47 = vld [vmem:[#allocation19 + $0x400] ss:$8 sps:$4 sm:$0xff]  }
 0x4cc   :  { %v4298_v0 = vsel %vm4265_vm14, 0.0, %v12693_v27  ;;  %v8957_v27 = vld [vmem:[#allocation19 + $0x20] ss:$8 sps:$4 sm:$0xff]  }
 0x4cd   :  { %5785 = vmatpush1.bf16.msra.mxu1 %v8998_v30  ;;  %v8977_v30 = vld [vmem:[#allocation19 + $0x54] ss:$8 sps:$4 sm:$0xff]  }
 0x4ce   :  { %5916 = vmatprep.subr.bf16.mxu1 %v9004_v62 }
 0x4d7   :  { %v4547_v58 = vpop.f32.mrb[44].mxu0 }
 0x4d8   :  { %v4600_v35 = vmul.f32 %v12696_v8, %v4547_v58  ;;  %v4549_v38 = vpop.f32.mrb[45].mxu0  ;;  %v3997_v58 = vsel %vm338_vm0, %v3994_v10, %v3996_v4 }
 0x4d9   :  { %v4550_v44 = vpop.f32.mrb[46].mxu0  ;;  %v4297_v18 = vsel %vm4264_vm13, 0.0, %v3997_v58  ;;  %v9005_v58 = vld [vmem:[#allocation19 + $0x120] ss:$8 sps:$4 sm:$0xff]  }
 0x4da   :  { %v4618_v48 = vadd.f32 %v12698_v56, %v4600_v35  ;;  %v4601_v3 = vmul.f32 %v12696_v8, %v4550_v44  ;;  %v4552_v19 = vpop.f32.mrb[47].mxu0 }
 0x4dc   :  { %v4629_v46 = vmax.f32 %v4618_v48, 0.0  ;;  %v4619_v36 = vadd.f32 %v12698_v56, %v4601_v3  ;;  %v4296_v48 = vsel %vm4263_vm5, 0.0, %v3995_v57  ;;  %v4342_v3 = vsel %vm4309_vm11, 0.0, %v4045_v28  ;;  %v9010_v57 = vld [vmem:[#allocation19 + $0x414] ss:$8 sps:$4 sm:$0xff]  }
 0x4dd   :  { %v4398_v25 = vpack.c.bf16 %v4342_v3, %v4342_v3  ;;  %v9013_v28 = vld [vmem:[#allocation19 + $0x134] ss:$8 sps:$4 sm:$0xff]  }
 0x4de   :  { %4640 = vst [vmem:[#allocation4] sm:$0xff] %v4629_v46  ;;  %v4630_v43 = vmax.f32 %v4619_v36, 0.0  ;;  %v9022_v3 = vld [vmem:[#allocation19 + $0x434] ss:$8 sps:$4 sm:$0xff]  }
 0x4e0   :  { %4641 = vst [vmem:[#allocation4 + $0x8] sm:$0xff] %v4630_v43 }
 0x50d   :  { %v4555_v22 = vpop.f32.mrb[48].mxu0 }
 0x50e   :  { %v4602_v21 = vmul.f32 %v12696_v8, %v4555_v22  ;;  %v4557_v63 = vpop.f32.mrb[49].mxu0  ;;  %v8975_v22 = vld [vmem:[#allocation19 + $0x50] ss:$8 sps:$4 sm:$0xff]  }
 0x50f   :  { %v4558_v20 = vpop.f32.mrb[50].mxu0 }
 0x510   :  { %v4620_v14 = vadd.f32 %v12698_v56, %v4602_v21  ;;  %v4603_v26 = vmul.f32 %v12696_v8, %v4558_v20  ;;  %v4560_v17 = vpop.f32.mrb[51].mxu0  ;;  %v8983_v20 = vld [vmem:[#allocation19 + $0x64] ss:$8 sps:$4 sm:$0xff]  }
 0x512   :  { %v4631_v12 = vmax.f32 %v4620_v14, 0.0  ;;  %v4621_v11 = vadd.f32 %v12698_v56, %v4603_v26 }
 0x514   :  { %4642 = vst [vmem:[#allocation4 + $0x10] sm:$0xff] %v4631_v12  ;;  %v4632_v53 = vmax.f32 %v4621_v11, 0.0  ;;  %v8981_v11 = vld [vmem:[#allocation19 + $0x60] ss:$8 sps:$4 sm:$0xff]  }
 0x516   :  { %4643 = vst [vmem:[#allocation4 + $0x18] sm:$0xff] %v4632_v53 }
 0x525   :  { %v4563_v42 = vpop.f32.mrb[52].mxu0 }
 0x526   :  { %v4604_v40 = vmul.f32 %v12696_v8, %v4563_v42  ;;  %v4565_v51 = vpop.f32.mrb[53].mxu0  ;;  %v8987_v42 = vld [vmem:[#allocation19 + $0x70] ss:$8 sps:$4 sm:$0xff]  }
 0x527   :  { %v4566_v33 = vpop.f32.mrb[54].mxu0  ;;  %v8995_v51 = vld [vmem:[#allocation19 + $0x104] ss:$8 sps:$4 sm:$0xff]  }
 0x528   :  { %v4622_v52 = vadd.f32 %v12698_v56, %v4604_v40  ;;  %v4605_v50 = vmul.f32 %v12696_v8, %v4566_v33  ;;  %v4568_v9 = vpop.f32.mrb[55].mxu0  ;;  %v8993_v33 = vld [vmem:[#allocation19 + $0x100] ss:$8 sps:$4 sm:$0xff]  }
 0x52a   :  { %v4633_v45 = vmax.f32 %v4622_v52, 0.0  ;;  %v4623_v49 = vadd.f32 %v12698_v56, %v4605_v50  ;;  %v9001_v52 = vld [vmem:[#allocation19 + $0x114] ss:$8 sps:$4 sm:$0xff]   ;;  %v8999_v50 = vld [vmem:[#allocation19 + $0x110] ss:$8 sps:$4 sm:$0xff]  }
 0x52c   :  { %4644 = vst [vmem:[#allocation4 + $0x20] sm:$0xff] %v4633_v45  ;;  %v4634_v41 = vmax.f32 %v4623_v49, 0.0  ;;  %v9007_v49 = vld [vmem:[#allocation19 + $0x124] ss:$8 sps:$4 sm:$0xff]  }
 0x52e   :  { %4645 = vst [vmem:[#allocation4 + $0x28] sm:$0xff] %v4634_v41 }
 0x531   :  { %v8903_v35 = vpop.permute.xlu0 %8902 }
 0x532   :  { %v8905_v38 = vunpack.i.h.bf16 %v8903_v35  ;;  %v8904_v44 = vunpack.i.l.bf16 %v8903_v35  ;;  %v9008_v35 = vld [vmem:[#allocation19 + $0x410] ss:$8 sps:$4 sm:$0xff]  }
 0x534   :  { %v4384_v60 = vsel %vm3581_vm15, %v4296_v48, %v8904_v44  ;;  %v4385_v55 = vsel %vm3581_vm15, %v4297_v18, %v8905_v38  ;;  %v9016_v38 = vld [vmem:[#allocation19 + $0x424] ss:$8 sps:$4 sm:$0xff]   ;;  %v9011_v44 = vld [vmem:[#allocation19 + $0x130] ss:$8 sps:$4 sm:$0xff]   ;;  %v9014_v18 = vld [vmem:[#allocation19 + $0x420] ss:$8 sps:$4 sm:$0xff]  }
 0x535   :  { %v4395_v19 = vpack.c.bf16 %v4385_v55, %v4384_v60  ;;  %v4364_v46 = vpop.permute.xlu1 %4363  ;;  %v4673_v4 = vld [vmem:[#allocation4 + $0x2] ss:$42 sm:$0x3]  ;;  %v4675_v36 = vld [vmem:[#allocation4 + $0x3] ss:$42 sm:$0x3] }
 0x536   :  { %v4386_v13 = vsel %vm3581_vm15, %v4298_v0, %v4364_v46  ;;  %v4676_v43 = vmax.f32 %v4673_v4, %v4675_v36  ;;  %v4651_v31 = vld [vmem:[#allocation4] ss:$42 sm:$0x3]  ;;  %v4653_v32 = vld [vmem:[#allocation4 + $0x1] ss:$42 sm:$0x3] }
 0x537   :  { %4578 = vmatmul.mubr.bf16.gmra.mrb[60].mxu0 %v4395_v19  ;;  %v4397_v23 = vpack.c.bf16 %v4386_v13, %v4386_v13  ;;  %v4654_v40 = vmax.f32 %v4651_v31, %v4653_v32  ;;  %v9019_v48 = vld [vmem:[#allocation19 + $0x144] ss:$8 sps:$4 sm:$0xff]   ;;  %v9017_v60 = vld [vmem:[#allocation19 + $0x140] ss:$8 sps:$4 sm:$0xff]   ;;  %v9025_v55 = vld [vmem:[#allocation19 + $0x154] ss:$8 sps:$4 sm:$0xff]  }
 0x538   :  { %8102 = vmatprep.mubr.msk.bf16.mxu0 %vm3581_vm15, %v4398_v25  ;;  %v4677_v34 = vpack.c.bf16 %v4676_v43, %v4676_v43  ;;  %v9020_v19 = vld [vmem:[#allocation19 + $0x430] ss:$8 sps:$4 sm:$0xff]   ;;  %v9028_v25 = vld [vmem:[#allocation19 + $0x444] ss:$8 sps:$4 sm:$0xff]   ;;  %v9026_v13 = vld [vmem:[#allocation19 + $0x440] ss:$8 sps:$4 sm:$0xff]  }
 0x539   :  { %v4655_v61 = vpack.c.bf16 %v4654_v40, %v4654_v40  ;;  %v9023_v46 = vld [vmem:[#allocation19 + $0x150] ss:$8 sps:$4 sm:$0xff]   ;;  %v9031_v0 = vld [vmem:[#allocation19 + $0x164] ss:$8 sps:$4 sm:$0xff]   ;;  %v9029_v4 = vld [vmem:[#allocation19 + $0x160] ss:$8 sps:$4 sm:$0xff]  }
 0x53a   :  { %v9032_v36 = vld [vmem:[#allocation19 + $0x450] ss:$8 sps:$4 sm:$0xff]   ;;  %v9037_v43 = vld [vmem:[#allocation19 + $0x174] ss:$8 sps:$4 sm:$0xff]   ;;  %v9064_v31 = vld [vmem:[#allocation19 + $0x4a4] ss:$8 sps:$4 sm:$0xff]  }
 0x53b   :  { %v9059_v32 = vld [vmem:[#allocation19 + $0x1b0] ss:$8 sps:$4 sm:$0xff]   ;;  %v9070_v40 = vld [vmem:[#allocation19 + $0x4b4] ss:$8 sps:$4 sm:$0xff]  }
 0x53f   :  { %4586 = vmatmul.mubr.bf16.gmra.mrb[64].mxu0 %v4397_v23  ;;  %v9034_v23 = vld [vmem:[#allocation19 + $0x454] ss:$8 sps:$4 sm:$0xff]  }
 0x540   :  { %4807 = vmatprep.mubr.bf16.mxu0 %v12946_v24 }
 0x547   :  { %4808 = vmatmul.mubr.bf16.vlgmr.msra.gmra.mrb[68].mxu0 %v4677_v34  ;;  %v4940_v34 = vld [vmem:[#allocation4 + $0x5] ss:$42 sm:$0x3] }
 0x548   :  { %4897 = vmatpush1.bf16.msra.mxu0 %v8948_v7  ;;  %4928 = vmatprep.mubr.bf16.mxu0 %v12946_v24  ;;  %v4938_v7 = vld [vmem:[#allocation4 + $0x4] ss:$42 sm:$0x3] }
 0x549   :  { %4898 = vmatprep.subr.bf16.mxu0 %v8953_v39  ;;  %v9040_v39 = vld [vmem:[#allocation19 + $0x464] ss:$8 sps:$4 sm:$0xff]  }
 0x54c   :  { %4899 = vmatpush1.bf16.msra.mxu0 %v8951_v5  ;;  %v9035_v5 = vld [vmem:[#allocation19 + $0x170] ss:$8 sps:$4 sm:$0xff]  }
 0x54d   :  { %4900 = vmatprep.subr.bf16.mxu0 %v8959_v37  ;;  %v4941_v37 = vmax.f32 %v4938_v7, %v4940_v34  ;;  %v9106_v7 = vld [vmem:[#allocation19 + $0x514] ss:$8 sps:$4 sm:$0xff]   ;;  %v9101_v34 = vld [vmem:[#allocation19 + $0x220] ss:$8 sps:$4 sm:$0xff]  }
 0x550   :  { %4901 = vmatpush1.bf16.msra.mxu0 %v8957_v27  ;;  %v9043_v27 = vld [vmem:[#allocation19 + $0x184] ss:$8 sps:$4 sm:$0xff]  }
 0x551   :  { %4902 = vmatprep.subr.bf16.mxu0 %v8965_v16  ;;  %v9038_v16 = vld [vmem:[#allocation19 + $0x460] ss:$8 sps:$4 sm:$0xff]  }
 0x554   :  { %4903 = vmatpush1.bf16.msra.mxu0 %v8963_v29  ;;  %v9041_v29 = vld [vmem:[#allocation19 + $0x180] ss:$8 sps:$4 sm:$0xff]  }
 0x555   :  { %4904 = vmatprep.subr.bf16.mxu0 %v8971_v6  ;;  %v9046_v6 = vld [vmem:[#allocation19 + $0x474] ss:$8 sps:$4 sm:$0xff]  }
 0x558   :  { %4905 = vmatpush1.bf16.msra.mxu0 %v8969_v2  ;;  %v4571_v62 = vpop.f32.mrb[56].mxu0 }
 0x559   :  { %v4606_v21 = vmul.f32 %v12696_v8, %v4571_v62  ;;  %v4573_v63 = vpop.f32.mrb[57].mxu0  ;;  %4906 = vmatprep.subr.bf16.mxu0 %v8977_v30  ;;  %v4942_v62 = vpack.c.bf16 %v4941_v37, %v4941_v37  ;;  %v9112_v37 = vld [vmem:[#allocation19 + $0x524] ss:$8 sps:$4 sm:$0xff]  }
 0x55a   :  { %v4574_v14 = vpop.f32.mrb[58].mxu0 }
 0x55b   :  { %v4624_v26 = vadd.f32 %v12698_v56, %v4606_v21  ;;  %v4607_v17 = vmul.f32 %v12696_v8, %v4574_v14  ;;  %v4576_v12 = vpop.f32.mrb[59].mxu0  ;;  %v9044_v21 = vld [vmem:[#allocation19 + $0x470] ss:$8 sps:$4 sm:$0xff]  }
 0x55c   :  { %4907 = vmatpush1.bf16.msra.mxu0 %v8975_v22  ;;  %v9049_v22 = vld [vmem:[#allocation19 + $0x194] ss:$8 sps:$4 sm:$0xff]   ;;  %v9047_v14 = vld [vmem:[#allocation19 + $0x190] ss:$8 sps:$4 sm:$0xff]  }
 0x55d   :  { %v4635_v53 = vmax.f32 %v4624_v26, 0.0  ;;  %v4625_v54 = vadd.f32 %v12698_v56, %v4607_v17  ;;  %4908 = vmatprep.subr.bf16.mxu0 %v8983_v20  ;;  %v9052_v20 = vld [vmem:[#allocation19 + $0x484] ss:$8 sps:$4 sm:$0xff]   ;;  %v9050_v17 = vld [vmem:[#allocation19 + $0x480] ss:$8 sps:$4 sm:$0xff]  }
 0x55e   :  { %v9055_v26 = vld [vmem:[#allocation19 + $0x1a4] ss:$8 sps:$4 sm:$0xff]  }
 0x55f   :  { %4646 = vst [vmem:[#allocation4 + $0x30] sm:$0xff] %v4635_v53  ;;  %v4636_v1 = vmax.f32 %v4625_v54, 0.0  ;;  %v9053_v53 = vld [vmem:[#allocation19 + $0x1a0] ss:$8 sps:$4 sm:$0xff]   ;;  %v9061_v54 = vld [vmem:[#allocation19 + $0x1b4] ss:$8 sps:$4 sm:$0xff]  }
 0x560   :  { %4909 = vmatpush1.bf16.msra.mxu0 %v8981_v11  ;;  %v9058_v11 = vld [vmem:[#allocation19 + $0x494] ss:$8 sps:$4 sm:$0xff]  }
 0x561   :  { %4647 = vst [vmem:[#allocation4 + $0x38] sm:$0xff] %v4636_v1  ;;  %4910 = vmatprep.subr.bf16.mxu0 %v8989_v59  ;;  %v9056_v59 = vld [vmem:[#allocation19 + $0x490] ss:$8 sps:$4 sm:$0xff]   ;;  %v9067_v1 = vld [vmem:[#allocation19 + $0x1c4] ss:$8 sps:$4 sm:$0xff]  }
 0x564   :  { %4911 = vmatpush1.bf16.msra.mxu0 %v8987_v42  ;;  %v9062_v42 = vld [vmem:[#allocation19 + $0x4a0] ss:$8 sps:$4 sm:$0xff]  }
 0x565   :  { %5040 = vmatprep.subr.bf16.mxu0 %v8995_v51  ;;  %v9065_v51 = vld [vmem:[#allocation19 + $0x1c0] ss:$8 sps:$4 sm:$0xff]  }
 0x567   :  { %4929 = vmatmul.mubr.bf16.vlgmr.msra.gmra.mrb[68].mxu0 %v4655_v61  ;;  %v9068_v61 = vld [vmem:[#allocation19 + $0x4b0] ss:$8 sps:$4 sm:$0xff]  }
 0x568   :  { %5041 = vmatpush1.bf16.msra.mxu0 %v8993_v33  ;;  %v5668_v9 = vld [vmem:[#allocation4 + $0xe] ss:$42 sm:$0x3]  ;;  %v5670_v10 = vld [vmem:[#allocation4 + $0xf] ss:$42 sm:$0x3]  ;;  %5072 = vmatprep.mubr.bf16.mxu0 %v12946_v24 }
 0x569   :  { %5042 = vmatprep.subr.bf16.mxu0 %v9001_v52  ;;  %v5671_v45 = vmax.f32 %v5668_v9, %v5670_v10  ;;  %v5814_v2 = vld [vmem:[#allocation4 + $0x10] ss:$42 sm:$0x3]  ;;  %v5816_v30 = vld [vmem:[#allocation4 + $0x11] ss:$42 sm:$0x3] }
 0x56a   :  { %v5817_v63 = vmax.f32 %v5814_v2, %v5816_v30  ;;  %v9073_v33 = vld [vmem:[#allocation19 + $0x1d4] ss:$8 sps:$4 sm:$0xff]   ;;  %v9076_v52 = vld [vmem:[#allocation19 + $0x4c4] ss:$8 sps:$4 sm:$0xff]   ;;  %v9074_v10 = vld [vmem:[#allocation19 + $0x4c0] ss:$8 sps:$4 sm:$0xff]  }
 0x56b   :  { %v5672_v41 = vpack.c.bf16 %v5671_v45, %v5671_v45  ;;  %v9079_v9 = vld [vmem:[#allocation19 + $0x1e4] ss:$8 sps:$4 sm:$0xff]   ;;  %v9082_v45 = vld [vmem:[#allocation19 + $0x4d4] ss:$8 sps:$4 sm:$0xff]   ;;  %v9113_v2 = vld [vmem:[#allocation19 + $0x240] ss:$8 sps:$4 sm:$0xff]  }
 0x56c   :  { %5043 = vmatpush1.bf16.msra.mxu0 %v8999_v50  ;;  %v5818_v12 = vpack.c.bf16 %v5817_v63, %v5817_v63  ;;  %v9071_v50 = vld [vmem:[#allocation19 + $0x1d0] ss:$8 sps:$4 sm:$0xff]   ;;  %v9121_v30 = vld [vmem:[#allocation19 + $0x254] ss:$8 sps:$4 sm:$0xff]   ;;  %v9127_v63 = vld [vmem:[#allocation19 + $0x264] ss:$8 sps:$4 sm:$0xff]  }
 0x56d   :  { %5803 = vmatmul.mubr.bf16.vlgmr.msra.gmra.mrb[0].mxu1 %v5672_v41  ;;  %5044 = vmatprep.subr.bf16.mxu0 %v9007_v49  ;;  %v9077_v49 = vld [vmem:[#allocation19 + $0x1e0] ss:$8 sps:$4 sm:$0xff]   ;;  %v9085_v41 = vld [vmem:[#allocation19 + $0x1f4] ss:$8 sps:$4 sm:$0xff]  }
 0x56e   :  { %5917 = vmatpush1.bf16.msra.mxu1 %v9002_v47  ;;  %5948 = vmatprep.mubr.bf16.mxu1 %v12946_v24  ;;  %v9080_v47 = vld [vmem:[#allocation19 + $0x4d0] ss:$8 sps:$4 sm:$0xff]  }
 0x56f   :  { %5918 = vmatprep.subr.bf16.mxu1 %v9010_v57  ;;  %v5084_v57 = vld [vmem:[#allocation4 + $0x6] ss:$42 sm:$0x3] }
 0x570   :  { %5045 = vmatpush1.bf16.msra.mxu0 %v9005_v58  ;;  %v5086_v58 = vld [vmem:[#allocation4 + $0x7] ss:$42 sm:$0x3] }
 0x571   :  { %5046 = vmatprep.subr.bf16.mxu0 %v9013_v28  ;;  %v9088_v28 = vld [vmem:[#allocation19 + $0x4e4] ss:$8 sps:$4 sm:$0xff]  }
 0x572   :  { %5919 = vmatpush1.bf16.msra.mxu1 %v9008_v35  ;;  %v9083_v35 = vld [vmem:[#allocation19 + $0x1f0] ss:$8 sps:$4 sm:$0xff]  }
 0x573   :  { %5920 = vmatprep.subr.bf16.mxu1 %v9016_v38  ;;  %v5087_v38 = vmax.f32 %v5084_v57, %v5086_v58  ;;  %v9190_v57 = vld [vmem:[#allocation19 + $0x594] ss:$8 sps:$4 sm:$0xff]   ;;  %v9146_v58 = vld [vmem:[#allocation19 + $0x2a0] ss:$8 sps:$4 sm:$0xff]  }
 0x574   :  { %5047 = vmatpush1.bf16.msra.mxu0 %v9011_v44  ;;  %v9091_v44 = vld [vmem:[#allocation19 + $0x204] ss:$8 sps:$4 sm:$0xff]  }
 0x575   :  { %5048 = vmatprep.subr.bf16.mxu0 %v9019_v48  ;;  %v9086_v48 = vld [vmem:[#allocation19 + $0x4e0] ss:$8 sps:$4 sm:$0xff]  }
 0x576   :  { %5921 = vmatpush1.bf16.msra.mxu1 %v9014_v18  ;;  %v9089_v18 = vld [vmem:[#allocation19 + $0x200] ss:$8 sps:$4 sm:$0xff]  }
 0x577   :  { %5922 = vmatprep.subr.bf16.mxu1 %v9022_v3  ;;  %v9094_v3 = vld [vmem:[#allocation19 + $0x4f4] ss:$8 sps:$4 sm:$0xff]  }
 0x578   :  { %5049 = vmatpush1.bf16.msra.mxu0 %v9017_v60  ;;  %v5960_v60 = vld [vmem:[#allocation4 + $0x12] ss:$42 sm:$0x3] }
 0x579   :  { %5050 = vmatprep.subr.bf16.mxu0 %v9025_v55  ;;  %v5962_v55 = vld [vmem:[#allocation4 + $0x13] ss:$42 sm:$0x3] }
 0x57a   :  { %5923 = vmatpush1.bf16.msra.mxu1 %v9020_v19  ;;  %v5088_v19 = vpack.c.bf16 %v5087_v38, %v5087_v38  ;;  %v9196_v38 = vld [vmem:[#allocation19 + $0x5a4] ss:$8 sps:$4 sm:$0xff]  }
 0x57b   :  { %5924 = vmatprep.subr.bf16.mxu1 %v9028_v25  ;;  %v9097_v25 = vld [vmem:[#allocation19 + $0x214] ss:$8 sps:$4 sm:$0xff]  }
 0x57c   :  { %5051 = vmatpush1.bf16.msra.mxu0 %v9023_v46  ;;  %v9092_v46 = vld [vmem:[#allocation19 + $0x4f0] ss:$8 sps:$4 sm:$0xff]  }
 0x57d   :  { %5052 = vmatprep.subr.bf16.mxu0 %v9031_v0  ;;  %v5963_v0 = vmax.f32 %v5960_v60, %v5962_v55  ;;  %v9152_v60 = vld [vmem:[#allocation19 + $0x2c0] ss:$8 sps:$4 sm:$0xff]   ;;  %v9157_v55 = vld [vmem:[#allocation19 + $0x2d4] ss:$8 sps:$4 sm:$0xff]  }
 0x57e   :  { %5925 = vmatpush1.bf16.msra.mxu1 %v9026_v13  ;;  %v9100_v13 = vld [vmem:[#allocation19 + $0x504] ss:$8 sps:$4 sm:$0xff]  }
 0x57f   :  { %5926 = vmatprep.subr.bf16.mxu1 %v9034_v23  ;;  %v9095_v23 = vld [vmem:[#allocation19 + $0x210] ss:$8 sps:$4 sm:$0xff]  }
 0x580   :  { %5053 = vmatpush1.bf16.msra.mxu0 %v9029_v4  ;;  %v9103_v4 = vld [vmem:[#allocation19 + $0x224] ss:$8 sps:$4 sm:$0xff]  }
 0x581   :  { %5054 = vmatprep.subr.bf16.mxu0 %v9037_v43  ;;  %v5964_v43 = vpack.c.bf16 %v5963_v0, %v5963_v0  ;;  %v9160_v0 = vld [vmem:[#allocation19 + $0x2e4] ss:$8 sps:$4 sm:$0xff]  }
 0x582   :  { %5927 = vmatpush1.bf16.msra.mxu1 %v9032_v36  ;;  %v9098_v36 = vld [vmem:[#allocation19 + $0x500] ss:$8 sps:$4 sm:$0xff]  }
 0x583   :  { %5928 = vmatprep.subr.bf16.mxu1 %v9040_v39  ;;  %v9109_v39 = vld [vmem:[#allocation19 + $0x234] ss:$8 sps:$4 sm:$0xff]  }
 0x584   :  { %5055 = vmatpush1.bf16.msra.mxu0 %v9035_v5  ;;  %v9104_v5 = vld [vmem:[#allocation19 + $0x510] ss:$8 sps:$4 sm:$0xff]  }
 0x585   :  { %5186 = vmatprep.subr.bf16.mxu0 %v9043_v27  ;;  %v9107_v27 = vld [vmem:[#allocation19 + $0x230] ss:$8 sps:$4 sm:$0xff]  }
 0x586   :  { %5929 = vmatpush1.bf16.msra.mxu1 %v9038_v16  ;;  %v9115_v16 = vld [vmem:[#allocation19 + $0x244] ss:$8 sps:$4 sm:$0xff]  }
 0x587   :  { %5073 = vmatmul.mubr.bf16.vlgmr.msra.gmra.mrb[68].mxu0 %v4942_v62  ;;  %5930 = vmatprep.subr.bf16.mxu1 %v9046_v6  ;;  %v9118_v6 = vld [vmem:[#allocation19 + $0x534] ss:$8 sps:$4 sm:$0xff]   ;;  %v9116_v62 = vld [vmem:[#allocation19 + $0x530] ss:$8 sps:$4 sm:$0xff]  }
 0x588   :  { %5187 = vmatpush1.bf16.msra.mxu0 %v9041_v29  ;;  %5218 = vmatprep.mubr.bf16.mxu0 %v12946_v24  ;;  %v9110_v29 = vld [vmem:[#allocation19 + $0x520] ss:$8 sps:$4 sm:$0xff]  }
 0x589   :  { %5188 = vmatprep.subr.bf16.mxu0 %v9049_v22  ;;  %v9124_v22 = vld [vmem:[#allocation19 + $0x544] ss:$8 sps:$4 sm:$0xff]  }
 0x58a   :  { %5931 = vmatpush1.bf16.msra.mxu1 %v9044_v21  ;;  %v9119_v21 = vld [vmem:[#allocation19 + $0x250] ss:$8 sps:$4 sm:$0xff]  }
 0x58b   :  { %6062 = vmatprep.subr.bf16.mxu1 %v9052_v20  ;;  %v9122_v20 = vld [vmem:[#allocation19 + $0x540] ss:$8 sps:$4 sm:$0xff]  }
 0x58c   :  { %5189 = vmatpush1.bf16.msra.mxu0 %v9047_v14  ;;  %v9130_v14 = vld [vmem:[#allocation19 + $0x554] ss:$8 sps:$4 sm:$0xff]  }
 0x58d   :  { %5949 = vmatmul.mubr.bf16.vlgmr.msra.gmra.mrb[0].mxu1 %v5818_v12  ;;  %5190 = vmatprep.subr.bf16.mxu0 %v9055_v26  ;;  %v9125_v26 = vld [vmem:[#allocation19 + $0x260] ss:$8 sps:$4 sm:$0xff]   ;;  %v9133_v12 = vld [vmem:[#allocation19 + $0x274] ss:$8 sps:$4 sm:$0xff]  }
 0x58e   :  { %6063 = vmatpush1.bf16.msra.mxu1 %v9050_v17  ;;  %6094 = vmatprep.mubr.bf16.mxu1 %v12946_v24  ;;  %v9128_v17 = vld [vmem:[#allocation19 + $0x550] ss:$8 sps:$4 sm:$0xff]  }
 0x58f   :  { %6064 = vmatprep.subr.bf16.mxu1 %v9058_v11  ;;  %v5230_v11 = vld [vmem:[#allocation4 + $0x8] ss:$42 sm:$0x3] }
 0x590   :  { %5191 = vmatpush1.bf16.msra.mxu0 %v9053_v53  ;;  %v5232_v53 = vld [vmem:[#allocation4 + $0x9] ss:$42 sm:$0x3] }
 0x591   :  { %5192 = vmatprep.subr.bf16.mxu0 %v9061_v54  ;;  %v9136_v54 = vld [vmem:[#allocation19 + $0x564] ss:$8 sps:$4 sm:$0xff]  }
 0x592   :  { %6065 = vmatpush1.bf16.msra.mxu1 %v9056_v59  ;;  %v9131_v59 = vld [vmem:[#allocation19 + $0x270] ss:$8 sps:$4 sm:$0xff]  }
 0x593   :  { %6066 = vmatprep.subr.bf16.mxu1 %v9064_v31  ;;  %v5233_v31 = vmax.f32 %v5230_v11, %v5232_v53  ;;  %v9181_v11 = vld [vmem:[#allocation19 + $0x354] ss:$8 sps:$4 sm:$0xff]   ;;  %v9179_v53 = vld [vmem:[#allocation19 + $0x350] ss:$8 sps:$4 sm:$0xff]  }
 0x594   :  { %5193 = vmatpush1.bf16.msra.mxu0 %v9059_v32  ;;  %v9139_v32 = vld [vmem:[#allocation19 + $0x284] ss:$8 sps:$4 sm:$0xff]  }
 0x595   :  { %5194 = vmatprep.subr.bf16.mxu0 %v9067_v1  ;;  %v9134_v1 = vld [vmem:[#allocation19 + $0x560] ss:$8 sps:$4 sm:$0xff]  }
 0x596   :  { %6067 = vmatpush1.bf16.msra.mxu1 %v9062_v42  ;;  %v9137_v42 = vld [vmem:[#allocation19 + $0x280] ss:$8 sps:$4 sm:$0xff]  }
 0x597   :  { %6068 = vmatprep.subr.bf16.mxu1 %v9070_v40  ;;  %v9142_v40 = vld [vmem:[#allocation19 + $0x574] ss:$8 sps:$4 sm:$0xff]  }
 0x598   :  { %5195 = vmatpush1.bf16.msra.mxu0 %v9065_v51  ;;  %v6106_v51 = vld [vmem:[#allocation4 + $0x14] ss:$42 sm:$0x3] }
 0x599   :  { %5196 = vmatprep.subr.bf16.mxu0 %v9073_v33  ;;  %v6108_v33 = vld [vmem:[#allocation4 + $0x15] ss:$42 sm:$0x3] }
 0x59a   :  { %6069 = vmatpush1.bf16.msra.mxu1 %v9068_v61  ;;  %v5234_v61 = vpack.c.bf16 %v5233_v31, %v5233_v31  ;;  %v9193_v31 = vld [vmem:[#allocation19 + $0x374] ss:$8 sps:$4 sm:$0xff]  }
 0x59b   :  { %6070 = vmatprep.subr.bf16.mxu1 %v9076_v52  ;;  %v9145_v52 = vld [vmem:[#allocation19 + $0x294] ss:$8 sps:$4 sm:$0xff]  }
 0x59c   :  { %5197 = vmatpush1.bf16.msra.mxu0 %v9071_v50  ;;  %v9140_v50 = vld [vmem:[#allocation19 + $0x570] ss:$8 sps:$4 sm:$0xff]  }
 0x59d   :  { %5198 = vmatprep.subr.bf16.mxu0 %v9079_v9  ;;  %v6109_v9 = vmax.f32 %v6106_v51, %v6108_v33 }
 0x59e   :  { %6071 = vmatpush1.bf16.msra.mxu1 %v9074_v10  ;;  %v9184_v10 = vld [vmem:[#allocation19 + $0x584] ss:$8 sps:$4 sm:$0xff]  }
 0x59f   :  { %6072 = vmatprep.subr.bf16.mxu1 %v9082_v45  ;;  %v9143_v45 = vld [vmem:[#allocation19 + $0x290] ss:$8 sps:$4 sm:$0xff]  }
 0x5a0   :  { %5199 = vmatpush1.bf16.msra.mxu0 %v9077_v49  ;;  %v9148_v49 = vld [vmem:[#allocation19 + $0x2a4] ss:$8 sps:$4 sm:$0xff]  }
 0x5a1   :  { %5200 = vmatprep.subr.bf16.mxu0 %v9085_v41  ;;  %v6110_v41 = vpack.c.bf16 %v6109_v9, %v6109_v9 }
 0x5a2   :  { %6073 = vmatpush1.bf16.msra.mxu1 %v9080_v47  ;;  %v9182_v47 = vld [vmem:[#allocation19 + $0x580] ss:$8 sps:$4 sm:$0xff]  }
 0x5a3   :  { %6074 = vmatprep.subr.bf16.mxu1 %v9088_v28  ;;  %v9151_v28 = vld [vmem:[#allocation19 + $0x2b4] ss:$8 sps:$4 sm:$0xff]  }
 0x5a4   :  { %5201 = vmatpush1.bf16.msra.mxu0 %v9083_v35  ;;  %v9188_v35 = vld [vmem:[#allocation19 + $0x590] ss:$8 sps:$4 sm:$0xff]  }
 0x5a5   :  { %5332 = vmatprep.subr.bf16.mxu0 %v9091_v44  ;;  %v9149_v44 = vld [vmem:[#allocation19 + $0x2b0] ss:$8 sps:$4 sm:$0xff]  }
 0x5a6   :  { %6075 = vmatpush1.bf16.msra.mxu1 %v9086_v48  ;;  %v9154_v48 = vld [vmem:[#allocation19 + $0x2c4] ss:$8 sps:$4 sm:$0xff]  }
 0x5a7   :  { %5219 = vmatmul.mubr.bf16.vlgmr.msra.gmra.mrb[68].mxu0 %v5088_v19  ;;  %6076 = vmatprep.subr.bf16.mxu1 %v9094_v3  ;;  %v9199_v3 = vld [vmem:[#allocation19 + $0x5b4] ss:$8 sps:$4 sm:$0xff]   ;;  %v9197_v19 = vld [vmem:[#allocation19 + $0x5b0] ss:$8 sps:$4 sm:$0xff]  }
 0x5a8   :  { %5333 = vmatpush1.bf16.msra.mxu0 %v9089_v18  ;;  %5364 = vmatprep.mubr.bf16.mxu0 %v12946_v24  ;;  %v9194_v18 = vld [vmem:[#allocation19 + $0x5a0] ss:$8 sps:$4 sm:$0xff]  }
 0x5a9   :  { %5334 = vmatprep.subr.bf16.mxu0 %v9097_v25  ;;  %v9202_v25 = vld [vmem:[#allocation19 + $0x5c4] ss:$8 sps:$4 sm:$0xff]  }
 0x5aa   :  { %6077 = vmatpush1.bf16.msra.mxu1 %v9092_v46  ;;  %v9155_v46 = vld [vmem:[#allocation19 + $0x2d0] ss:$8 sps:$4 sm:$0xff]  }
 0x5ab   :  { %6208 = vmatprep.subr.bf16.mxu1 %v9100_v13  ;;  %v9200_v13 = vld [vmem:[#allocation19 + $0x5c0] ss:$8 sps:$4 sm:$0xff]  }
 0x5ac   :  { %5335 = vmatpush1.bf16.msra.mxu0 %v9095_v23  ;;  %v9205_v23 = vld [vmem:[#allocation19 + $0x5d4] ss:$8 sps:$4 sm:$0xff]  }
 0x5ad   :  { %6095 = vmatmul.mubr.bf16.vlgmr.msra.gmra.mrb[0].mxu1 %v5964_v43  ;;  %5336 = vmatprep.subr.bf16.mxu0 %v9103_v4  ;;  %v9158_v4 = vld [vmem:[#allocation19 + $0x2e0] ss:$8 sps:$4 sm:$0xff]  }
 0x5ae   :  { %6209 = vmatpush1.bf16.msra.mxu1 %v9098_v36  ;;  %6240 = vmatprep.mubr.bf16.mxu1 %v12946_v24  ;;  %v9163_v36 = vld [vmem:[#allocation19 + $0x2f4] ss:$8 sps:$4 sm:$0xff]   ;;  %v5376_v43 = vld [vmem:[#allocation4 + $0xa] ss:$42 sm:$0x3] }
 0x5af   :  { %6210 = vmatprep.subr.bf16.mxu1 %v9106_v7  ;;  %v5378_v7 = vld [vmem:[#allocation4 + $0xb] ss:$42 sm:$0x3] }
 0x5b0   :  { %5337 = vmatpush1.bf16.msra.mxu0 %v9101_v34  ;;  %v9203_v34 = vld [vmem:[#allocation19 + $0x5d0] ss:$8 sps:$4 sm:$0xff]  }
 0x5b1   :  { %5338 = vmatprep.subr.bf16.mxu0 %v9109_v39  ;;  %v9208_v39 = vld [vmem:[#allocation19 + $0x5e4] ss:$8 sps:$4 sm:$0xff]  }
 0x5b2   :  { %6211 = vmatpush1.bf16.msra.mxu1 %v9104_v5  ;;  %v9161_v5 = vld [vmem:[#allocation19 + $0x2f0] ss:$8 sps:$4 sm:$0xff]  }
 0x5b3   :  { %6212 = vmatprep.subr.bf16.mxu1 %v9112_v37  ;;  %v5379_v37 = vmax.f32 %v5376_v43, %v5378_v7  ;;  %v9227_v43 = vld [vmem:[#allocation19 + $0x650] ss:$8 sps:$4 sm:$0xff]   ;;  %v9232_v7 = vld [vmem:[#allocation19 + $0x664] ss:$8 sps:$4 sm:$0xff]  }
 0x5b4   :  { %5339 = vmatpush1.bf16.msra.mxu0 %v9107_v27  ;;  %v9166_v27 = vld [vmem:[#allocation19 + $0x304] ss:$8 sps:$4 sm:$0xff]  }
 0x5b5   :  { %5340 = vmatprep.subr.bf16.mxu0 %v9115_v16  ;;  %v9206_v16 = vld [vmem:[#allocation19 + $0x5e0] ss:$8 sps:$4 sm:$0xff]  }
 0x5b6   :  { %6213 = vmatpush1.bf16.msra.mxu1 %v9110_v29  ;;  %v9211_v29 = vld [vmem:[#allocation19 + $0x5f4] ss:$8 sps:$4 sm:$0xff]  }
 0x5b7   :  { %6214 = vmatprep.subr.bf16.mxu1 %v9118_v6  ;;  %v9164_v6 = vld [vmem:[#allocation19 + $0x300] ss:$8 sps:$4 sm:$0xff]  }
 0x5b8   :  { %5341 = vmatpush1.bf16.msra.mxu0 %v9113_v2  ;;  %v5380_v2 = vpack.c.bf16 %v5379_v37, %v5379_v37 }
 0x5b9   :  { %5342 = vmatprep.subr.bf16.mxu0 %v9121_v30  ;;  %v9169_v30 = vld [vmem:[#allocation19 + $0x314] ss:$8 sps:$4 sm:$0xff]  }
 0x5ba   :  { %6215 = vmatpush1.bf16.msra.mxu1 %v9116_v62  ;;  %v9209_v62 = vld [vmem:[#allocation19 + $0x5f0] ss:$8 sps:$4 sm:$0xff]  }
 0x5bb   :  { %6216 = vmatprep.subr.bf16.mxu1 %v9124_v22  ;;  %v9214_v22 = vld [vmem:[#allocation19 + $0x604] ss:$8 sps:$4 sm:$0xff]  }
 0x5bc   :  { %5343 = vmatpush1.bf16.msra.mxu0 %v9119_v21  ;;  %v9167_v21 = vld [vmem:[#allocation19 + $0x310] ss:$8 sps:$4 sm:$0xff]  }
 0x5bd   :  { %5344 = vmatprep.subr.bf16.mxu0 %v9127_v63  ;;  %v9172_v63 = vld [vmem:[#allocation19 + $0x324] ss:$8 sps:$4 sm:$0xff]  }
 0x5be   :  { %6217 = vmatpush1.bf16.msra.mxu1 %v9122_v20  ;;  %v9170_v20 = vld [vmem:[#allocation19 + $0x320] ss:$8 sps:$4 sm:$0xff]  }
 0x5bf   :  { %6218 = vmatprep.subr.bf16.mxu1 %v9130_v14  ;;  %v9175_v14 = vld [vmem:[#allocation19 + $0x334] ss:$8 sps:$4 sm:$0xff]  }
 0x5c0   :  { %5345 = vmatpush1.bf16.msra.mxu0 %v9125_v26  ;;  %v9173_v26 = vld [vmem:[#allocation19 + $0x330] ss:$8 sps:$4 sm:$0xff]  }
 0x5c1   :  { %5346 = vmatprep.subr.bf16.mxu0 %v9133_v12  ;;  %v9176_v12 = vld [vmem:[#allocation19 + $0x340] ss:$8 sps:$4 sm:$0xff]  }
 0x5c2   :  { %6219 = vmatpush1.bf16.msra.mxu1 %v9128_v17  ;;  %v9178_v17 = vld [vmem:[#allocation19 + $0x344] ss:$8 sps:$4 sm:$0xff]  }
 0x5c3   :  { %6220 = vmatprep.subr.bf16.mxu1 %v9136_v54  ;;  %v9187_v54 = vld [vmem:[#allocation19 + $0x364] ss:$8 sps:$4 sm:$0xff]  }
 0x5c4   :  { %5347 = vmatpush1.bf16.msra.mxu0 %v9131_v59  ;;  %v9185_v59 = vld [vmem:[#allocation19 + $0x360] ss:$8 sps:$4 sm:$0xff]  }
 0x5c5   :  { %5478 = vmatprep.subr.bf16.mxu0 %v9139_v32  ;;  %v5522_v32 = vld [vmem:[#allocation4 + $0xc] ss:$42 sm:$0x3] }
 0x5c6   :  { %6221 = vmatpush1.bf16.msra.mxu1 %v9134_v1  ;;  %v5524_v1 = vld [vmem:[#allocation4 + $0xd] ss:$42 sm:$0x3] }
 0x5c7   :  { %5365 = vmatmul.mubr.bf16.vlgmr.msra.gmra.mrb[68].mxu0 %v5234_v61  ;;  %6222 = vmatprep.subr.bf16.mxu1 %v9142_v40  ;;  %v5525_v40 = vmax.f32 %v5522_v32, %v5524_v1  ;;  %v9257_v32 = vld [vmem:[#allocation19 + $0x6f0] ss:$8 sps:$4 sm:$0xff]  }
 0x5c8   :  { %5479 = vmatpush1.bf16.msra.mxu0 %v9137_v42  ;;  %5510 = vmatprep.mubr.bf16.mxu0 %v12946_v24  ;;  %v9191_v42 = vld [vmem:[#allocation19 + $0x370] ss:$8 sps:$4 sm:$0xff]  }
 0x5c9   :  { %5480 = vmatprep.subr.bf16.mxu0 %v9145_v52  ;;  %v5526_v51 = vpack.c.bf16 %v5525_v40, %v5525_v40  ;;  %v9260_v40 = vld [vmem:[#allocation19 + $0x700] ss:$8 sps:$4 sm:$0xff]  }
 0x5ca   :  { %6223 = vmatpush1.bf16.msra.mxu1 %v9140_v50 }
 0x5cb   :  { %6354 = vmatprep.subr.bf16.mxu1 %v9184_v10 }
 0x5cc   :  { %5481 = vmatpush1.bf16.msra.mxu0 %v9143_v45 }
 0x5cd   :  { %6241 = vmatmul.mubr.bf16.vlgmr.msra.gmra.mrb[0].mxu1 %v6110_v41  ;;  %5482 = vmatprep.subr.bf16.mxu0 %v9148_v49 }
 0x5ce   :  { %6355 = vmatpush1.bf16.msra.mxu1 %v9182_v47  ;;  %6386 = vmatprep.mubr.bf16.mxu1 %v12946_v24 }
 0x5cf   :  { %6356 = vmatprep.subr.bf16.mxu1 %v9190_v57 }
 0x5d0   :  { %5483 = vmatpush1.bf16.msra.mxu0 %v9146_v58 }
 0x5d1   :  { %5484 = vmatprep.subr.bf16.mxu0 %v9151_v28 }
 0x5d2   :  { %6357 = vmatpush1.bf16.msra.mxu1 %v9188_v35 }
 0x5d3   :  { %6358 = vmatprep.subr.bf16.mxu1 %v9196_v38 }
 0x5d4   :  { %5485 = vmatpush1.bf16.msra.mxu0 %v9149_v44 }
 0x5d5   :  { %5486 = vmatprep.subr.bf16.mxu0 %v9154_v48 }
 0x5d6   :  { %6359 = vmatpush1.bf16.msra.mxu1 %v9194_v18 }
 0x5d7   :  { %6360 = vmatprep.subr.bf16.mxu1 %v9199_v3 }
 0x5d8   :  { %5487 = vmatpush1.bf16.msra.mxu0 %v9152_v60 }
 0x5d9   :  { %5488 = vmatprep.subr.bf16.mxu0 %v9157_v55  ;;  %v9212_v55 = vld [vmem:[#allocation19 + $0x600] ss:$8 sps:$4 sm:$0xff]  }
 0x5da   :  { %6361 = vmatpush1.bf16.msra.mxu1 %v9197_v19 }
 0x5db   :  { %6362 = vmatprep.subr.bf16.mxu1 %v9202_v25  ;;  %v9217_v25 = vld [vmem:[#allocation19 + $0x614] ss:$8 sps:$4 sm:$0xff]  }
 0x5dc   :  { %5489 = vmatpush1.bf16.msra.mxu0 %v9155_v46  ;;  %v9215_v46 = vld [vmem:[#allocation19 + $0x610] ss:$8 sps:$4 sm:$0xff]  }
 0x5dd   :  { %5490 = vmatprep.subr.bf16.mxu0 %v9160_v0  ;;  %v9218_v0 = vld [vmem:[#allocation19 + $0x620] ss:$8 sps:$4 sm:$0xff]  }
 0x5de   :  { %6363 = vmatpush1.bf16.msra.mxu1 %v9200_v13  ;;  %v9221_v13 = vld [vmem:[#allocation19 + $0x630] ss:$8 sps:$4 sm:$0xff]  }
 0x5df   :  { %6364 = vmatprep.subr.bf16.mxu1 %v9205_v23  ;;  %v9226_v23 = vld [vmem:[#allocation19 + $0x644] ss:$8 sps:$4 sm:$0xff]  }
 0x5e0   :  { %5491 = vmatpush1.bf16.msra.mxu0 %v9158_v4  ;;  %v9224_v4 = vld [vmem:[#allocation19 + $0x640] ss:$8 sps:$4 sm:$0xff]  }
 0x5e1   :  { %5492 = vmatprep.subr.bf16.mxu0 %v9163_v36  ;;  %v9229_v36 = vld [vmem:[#allocation19 + $0x654] ss:$8 sps:$4 sm:$0xff]  }
 0x5e2   :  { %6365 = vmatpush1.bf16.msra.mxu1 %v9203_v34  ;;  %v9230_v34 = vld [vmem:[#allocation19 + $0x660] ss:$8 sps:$4 sm:$0xff]  }
 0x5e3   :  { %6366 = vmatprep.subr.bf16.mxu1 %v9208_v39  ;;  %v9235_v39 = vld [vmem:[#allocation19 + $0x674] ss:$8 sps:$4 sm:$0xff]  }
 0x5e4   :  { %5493 = vmatpush1.bf16.msra.mxu0 %v9161_v5 }
 0x5e5   :  { %5624 = vmatprep.subr.bf16.mxu0 %v9166_v27  ;;  %v9233_v27 = vld [vmem:[#allocation19 + $0x670] ss:$8 sps:$4 sm:$0xff]  }
 0x5e6   :  { %6367 = vmatpush1.bf16.msra.mxu1 %v9206_v16 }
 0x5e7   :  { %5511 = vmatmul.mubr.bf16.vlgmr.msra.gmra.mrb[68].mxu0 %v5380_v2  ;;  %6368 = vmatprep.subr.bf16.mxu1 %v9211_v29  ;;  %v9238_v29 = vld [vmem:[#allocation19 + $0x684] ss:$8 sps:$4 sm:$0xff]  }
 0x5e8   :  { %5625 = vmatpush1.bf16.msra.mxu0 %v9164_v6  ;;  %5656 = vmatprep.mubr.bf16.mxu0 %v12946_v24  ;;  %v9236_v6 = vld [vmem:[#allocation19 + $0x680] ss:$8 sps:$4 sm:$0xff]  }
 0x5e9   :  { %5626 = vmatprep.subr.bf16.mxu0 %v9169_v30  ;;  %v9241_v30 = vld [vmem:[#allocation19 + $0x694] ss:$8 sps:$4 sm:$0xff]  }
 0x5ea   :  { %6369 = vmatpush1.bf16.msra.mxu1 %v9209_v62  ;;  %v9239_v62 = vld [vmem:[#allocation19 + $0x690] ss:$8 sps:$4 sm:$0xff]  }
 0x5eb   :  { %6500 = vmatprep.subr.bf16.mxu1 %v9214_v22  ;;  %v9244_v22 = vld [vmem:[#allocation19 + $0x6a4] ss:$8 sps:$4 sm:$0xff]  }
 0x5ec   :  { %5627 = vmatpush1.bf16.msra.mxu0 %v9167_v21  ;;  %v9242_v21 = vld [vmem:[#allocation19 + $0x6a0] ss:$8 sps:$4 sm:$0xff]  }
 0x5ed   :  { %5628 = vmatprep.subr.bf16.mxu0 %v9172_v63  ;;  %v9247_v63 = vld [vmem:[#allocation19 + $0x6b4] ss:$8 sps:$4 sm:$0xff]  }
 0x5f0   :  { %5629 = vmatpush1.bf16.msra.mxu0 %v9170_v20  ;;  %v9245_v20 = vld [vmem:[#allocation19 + $0x6b0] ss:$8 sps:$4 sm:$0xff]  }
 0x5f1   :  { %5630 = vmatprep.subr.bf16.mxu0 %v9175_v14  ;;  %v9250_v14 = vld [vmem:[#allocation19 + $0x6c4] ss:$8 sps:$4 sm:$0xff]  }
 0x5f4   :  { %5631 = vmatpush1.bf16.msra.mxu0 %v9173_v26  ;;  %v9248_v26 = vld [vmem:[#allocation19 + $0x6c0] ss:$8 sps:$4 sm:$0xff]  }
 0x5f5   :  { %5632 = vmatprep.subr.bf16.mxu0 %v9178_v17  ;;  %v9253_v17 = vld [vmem:[#allocation19 + $0x6d4] ss:$8 sps:$4 sm:$0xff]  }
 0x5f8   :  { %5633 = vmatpush1.bf16.msra.mxu0 %v9176_v12  ;;  %v9251_v12 = vld [vmem:[#allocation19 + $0x6d0] ss:$8 sps:$4 sm:$0xff]  }
 0x5f9   :  { %5634 = vmatprep.subr.bf16.mxu0 %v9181_v11  ;;  %v9256_v11 = vld [vmem:[#allocation19 + $0x6e4] ss:$8 sps:$4 sm:$0xff]  }
 0x5fc   :  { %5635 = vmatpush1.bf16.msra.mxu0 %v9179_v53  ;;  %v9254_v53 = vld [vmem:[#allocation19 + $0x6e0] ss:$8 sps:$4 sm:$0xff]  }
 0x5fd   :  { %5636 = vmatprep.subr.bf16.mxu0 %v9187_v54  ;;  %v9259_v54 = vld [vmem:[#allocation19 + $0x6f4] ss:$8 sps:$4 sm:$0xff]  }
 0x600   :  { %5637 = vmatpush1.bf16.msra.mxu0 %v9185_v59 }
 0x601   :  { %5638 = vmatprep.subr.bf16.mxu0 %v9193_v31 }
 0x604   :  { %5639 = vmatpush1.bf16.msra.mxu0 %v9191_v42  ;;  %v9262_v42 = vld [vmem:[#allocation19 + $0x704] ss:$8 sps:$4 sm:$0xff]  }
 0x607   :  { %5657 = vmatmul.mubr.bf16.vlgmr.msra.gmra.mrb[68].mxu0 %v5526_v51 }
 0x60a   :  { %v4579_v33 = vpop.f32.mrb[60].mxu0 }
 0x60b   :  { %v4608_v61 = vmul.f32 %v12696_v8, %v4579_v33  ;;  %v4581_v52 = vpop.f32.mrb[61].mxu0  ;;  %v9265_v33 = vld [vmem:[#allocation19 + $0x714] ss:$8 sps:$4 sm:$0xff]  }
 0x60c   :  { %v4582_v50 = vpop.f32.mrb[62].mxu0  ;;  %v9268_v52 = vld [vmem:[#allocation19 + $0x724] ss:$8 sps:$4 sm:$0xff]  }
 0x60d   :  { %v4626_v9 = vadd.f32 %v12698_v56, %v4608_v61  ;;  %v4609_v10 = vmul.f32 %v12696_v8, %v4582_v50  ;;  %v4584_v45 = vpop.f32.mrb[63].mxu0  ;;  %v9263_v61 = vld [vmem:[#allocation19 + $0x710] ss:$8 sps:$4 sm:$0xff]   ;;  %v9266_v50 = vld [vmem:[#allocation19 + $0x720] ss:$8 sps:$4 sm:$0xff]  }
 0x60e   :  { %v9274_v45 = vld [vmem:[#allocation19 + $0x744] ss:$8 sps:$4 sm:$0xff]  }
 0x60f   :  { %v4637_v49 = vmax.f32 %v4626_v9, 0.0  ;;  %v4627_v47 = vadd.f32 %v12698_v56, %v4609_v10  ;;  %v9271_v9 = vld [vmem:[#allocation19 + $0x734] ss:$8 sps:$4 sm:$0xff]   ;;  %v9269_v10 = vld [vmem:[#allocation19 + $0x730] ss:$8 sps:$4 sm:$0xff]  }
 0x611   :  { %4648 = vst [vmem:[#allocation4 + $0x40] sm:$0xff] %v4637_v49  ;;  %v4638_v41 = vmax.f32 %v4627_v47, 0.0  ;;  %v9272_v49 = vld [vmem:[#allocation19 + $0x740] ss:$8 sps:$4 sm:$0xff]   ;;  %v9277_v47 = vld [vmem:[#allocation19 + $0x754] ss:$8 sps:$4 sm:$0xff]  }
 0x612   :  { %v4587_v57 = vpop.f32.mrb[64].mxu0 }
 0x613   :  { %4649 = vst [vmem:[#allocation4 + $0x48] sm:$0xff] %v4638_v41  ;;  %v4610_v58 = vmul.f32 %v12696_v8, %v4587_v57  ;;  %v4589_v28 = vpop.f32.mrb[65].mxu0  ;;  %v9220_v8 = vld [vmem:[#allocation19 + $0x624] ss:$8 sps:$4 sm:$0xff]   ;;  %v9275_v41 = vld [vmem:[#allocation19 + $0x750] ss:$8 sps:$4 sm:$0xff]  }
 0x614   :  { %v4590_v35 = vpop.f32.mrb[66].mxu0  ;;  %v9280_v57 = vld [vmem:[#allocation19 + $0x764] ss:$8 sps:$4 sm:$0xff]   ;;  %v9283_v28 = vld [vmem:[#allocation19 + $0x774] ss:$8 sps:$4 sm:$0xff]  }
 0x615   :  { %v4628_v38 = vadd.f32 %v12698_v56, %v4610_v58  ;;  %v4591_v44 = vpop.f32.mrb[67].mxu0  ;;  %v9223_v56 = vld [vmem:[#allocation19 + $0x634] ss:$8 sps:$4 sm:$0xff]   ;;  %v9278_v58 = vld [vmem:[#allocation19 + $0x760] ss:$8 sps:$4 sm:$0xff]  }
 0x616   :  { %v9281_v44 = vld [vmem:[#allocation19 + $0x770] ss:$8 sps:$4 sm:$0xff]  }
 0x617   :  { %v4639_v48 = vmax.f32 %v4628_v38, 0.0 }
 0x618   :  { %v6252_v18 = vld [vmem:[#allocation4 + $0x16] ss:$42 sm:$0x3]  ;;  %v6254_v3 = vld [vmem:[#allocation4 + $0x17] ss:$42 sm:$0x3] }
 0x619   :  { %4650 = vst [vmem:[#allocation4 + $0x50] sm:$0xf] %v4639_v48  ;;  %v6255_v60 = vmax.f32 %v6252_v18, %v6254_v3  ;;  %v6398_v5 = vld [vmem:[#allocation4 + $0x18] ss:$42 sm:$0x3] }
 0x61a   :  { %v6400_v37 = vld [vmem:[#allocation4 + $0x19] ss:$42 sm:$0x3]  ;;  %v6544_v59 = vld [vmem:[#allocation4 + $0x1a] ss:$42 sm:$0x3] }
 0x61b   :  { %v6256_v19 = vpack.c.bf16 %v6255_v60, %v6255_v60  ;;  %v6401_v16 = vmax.f32 %v6398_v5, %v6400_v37  ;;  %v6546_v31 = vld [vmem:[#allocation4 + $0x1b] ss:$42 sm:$0x3]  ;;  %v6690_v35 = vld [vmem:[#allocation4 + $0x1c] ss:$42 sm:$0x3] }
 0x61c   :  { %v6547_v1 = vmax.f32 %v6544_v59, %v6546_v31  ;;  %v6692_v38 = vld [vmem:[#allocation4 + $0x1d] ss:$42 sm:$0x3]  ;;  %v9286_v18 = vld [vmem:[#allocation19 + $0x784] ss:$8 sps:$4 sm:$0xff]  }
 0x61d   :  { %6387 = vmatmul.mubr.bf16.vlgmr.msra.gmra.mrb[0].mxu1 %v6256_v19  ;;  %v6402_v2 = vpack.c.bf16 %v6401_v16, %v6401_v16  ;;  %v6693_v48 = vmax.f32 %v6690_v35, %v6692_v38  ;;  %v9284_v3 = vld [vmem:[#allocation19 + $0x780] ss:$8 sps:$4 sm:$0xff]   ;;  %v9287_v19 = vld [vmem:[#allocation19 + $0x790] ss:$8 sps:$4 sm:$0xff]  }
 0x61e   :  { %6501 = vmatpush1.bf16.msra.mxu1 %v9212_v55  ;;  %6532 = vmatprep.mubr.bf16.mxu1 %v12946_v24  ;;  %v6548_v51 = vpack.c.bf16 %v6547_v1, %v6547_v1  ;;  %v9289_v55 = vld [vmem:[#allocation19 + $0x794] ss:$8 sps:$4 sm:$0xff]   ;;  %v9305_v5 = vld [vmem:[#allocation19 + $0x7f0] ss:$8 sps:$4 sm:$0xff]   ;;  %v9308_v16 = vld [vmem:[#allocation19 + $0x800] ss:$8 sps:$4 sm:$0xff]  }
 0x61f   :  { %6502 = vmatprep.subr.bf16.mxu1 %v9217_v25  ;;  %v6694_v60 = vpack.c.bf16 %v6693_v48, %v6693_v48  ;;  %v9292_v25 = vld [vmem:[#allocation19 + $0x7a4] ss:$8 sps:$4 sm:$0xff]   ;;  %v9329_v59 = vld [vmem:[#allocation19 + $0x870] ss:$8 sps:$4 sm:$0xff]   ;;  %v9332_v1 = vld [vmem:[#allocation19 + $0x880] ss:$8 sps:$4 sm:$0xff]  }
 0x620   :  { %v9436_v35 = vld [vmem:[#allocation23 + $0x60] sm:$0xff]  }
 0x621   :  { %v9344_v38 = vld [vmem:[#allocation19 + $0x8c0] ss:$8 sps:$4 sm:$0xff]  }
 0x622   :  { %6503 = vmatpush1.bf16.msra.mxu1 %v9215_v46  ;;  %v9290_v46 = vld [vmem:[#allocation19 + $0x7a0] ss:$8 sps:$4 sm:$0xff]  }
 0x623   :  { %6504 = vmatprep.subr.bf16.mxu1 %v9220_v8  ;;  %v9295_v8 = vld [vmem:[#allocation19 + $0x7b4] ss:$8 sps:$4 sm:$0xff]   ;;  %v9437_v48 = vld [vmem:[#allocation23 + $0x20] sm:$0xff]  }
 0x626   :  { %6505 = vmatpush1.bf16.msra.mxu1 %v9218_v0  ;;  %v9293_v0 = vld [vmem:[#allocation19 + $0x7b0] ss:$8 sps:$4 sm:$0xff]  }
 0x627   :  { %6506 = vmatprep.subr.bf16.mxu1 %v9223_v56  ;;  %v9298_v56 = vld [vmem:[#allocation19 + $0x7c4] ss:$8 sps:$4 sm:$0xff]  }
 0x62a   :  { %6507 = vmatpush1.bf16.msra.mxu1 %v9221_v13  ;;  %v9296_v13 = vld [vmem:[#allocation19 + $0x7c0] ss:$8 sps:$4 sm:$0xff]  }
 0x62b   :  { %6508 = vmatprep.subr.bf16.mxu1 %v9226_v23  ;;  %v9301_v23 = vld [vmem:[#allocation19 + $0x7d4] ss:$8 sps:$4 sm:$0xff]  }
 0x62e   :  { %6509 = vmatpush1.bf16.msra.mxu1 %v9224_v4  ;;  %v9299_v4 = vld [vmem:[#allocation19 + $0x7d0] ss:$8 sps:$4 sm:$0xff]  }
 0x62f   :  { %6510 = vmatprep.subr.bf16.mxu1 %v9229_v36  ;;  %v9304_v36 = vld [vmem:[#allocation19 + $0x7e4] ss:$8 sps:$4 sm:$0xff]  }
 0x632   :  { %6511 = vmatpush1.bf16.msra.mxu1 %v9227_v43  ;;  %v9302_v43 = vld [vmem:[#allocation19 + $0x7e0] ss:$8 sps:$4 sm:$0xff]  }
 0x633   :  { %6512 = vmatprep.subr.bf16.mxu1 %v9232_v7  ;;  %v9307_v7 = vld [vmem:[#allocation19 + $0x7f4] ss:$8 sps:$4 sm:$0xff]  }
 0x636   :  { %6513 = vmatpush1.bf16.msra.mxu1 %v9230_v34  ;;  %v6836_v34 = vld [vmem:[#allocation4 + $0x1e] ss:$42 sm:$0x3] }
 0x637   :  { %6514 = vmatprep.subr.bf16.mxu1 %v9235_v39  ;;  %v6838_v39 = vld [vmem:[#allocation4 + $0x1f] ss:$42 sm:$0x3] }
 0x638   :  { %v6839_v37 = vmax.f32 %v6836_v34, %v6838_v39  ;;  %v9359_v34 = vld [vmem:[#allocation19 + $0x910] ss:$8 sps:$4 sm:$0xff]   ;;  %v9364_v39 = vld [vmem:[#allocation19 + $0x924] ss:$8 sps:$4 sm:$0xff]  }
 0x63a   :  { %6515 = vmatpush1.bf16.msra.mxu1 %v9233_v27  ;;  %v9310_v27 = vld [vmem:[#allocation19 + $0x804] ss:$8 sps:$4 sm:$0xff]  }
 0x63b   :  { %6646 = vmatprep.subr.bf16.mxu1 %v9238_v29  ;;  %v6840_v29 = vpack.c.bf16 %v6839_v37, %v6839_v37  ;;  %v9367_v37 = vld [vmem:[#allocation19 + $0x934] ss:$8 sps:$4 sm:$0xff]  }
 0x63d   :  { %6533 = vmatmul.mubr.bf16.vlgmr.msra.gmra.mrb[0].mxu1 %v6402_v2  ;;  %v9311_v2 = vld [vmem:[#allocation19 + $0x810] ss:$8 sps:$4 sm:$0xff]  }
 0x63e   :  { %6647 = vmatpush1.bf16.msra.mxu1 %v9236_v6  ;;  %6678 = vmatprep.mubr.bf16.mxu1 %v12946_v24  ;;  %v9313_v6 = vld [vmem:[#allocation19 + $0x814] ss:$8 sps:$4 sm:$0xff]  }
 0x63f   :  { %6648 = vmatprep.subr.bf16.mxu1 %v9241_v30  ;;  %v9316_v30 = vld [vmem:[#allocation19 + $0x824] ss:$8 sps:$4 sm:$0xff]  }
 0x642   :  { %6649 = vmatpush1.bf16.msra.mxu1 %v9239_v62  ;;  %v9314_v62 = vld [vmem:[#allocation19 + $0x820] ss:$8 sps:$4 sm:$0xff]  }
 0x643   :  { %6650 = vmatprep.subr.bf16.mxu1 %v9244_v22  ;;  %v9319_v22 = vld [vmem:[#allocation19 + $0x834] ss:$8 sps:$4 sm:$0xff]  }
 0x646   :  { %6651 = vmatpush1.bf16.msra.mxu1 %v9242_v21  ;;  %v9317_v21 = vld [vmem:[#allocation19 + $0x830] ss:$8 sps:$4 sm:$0xff]  }
 0x647   :  { %6652 = vmatprep.subr.bf16.mxu1 %v9247_v63  ;;  %v9322_v63 = vld [vmem:[#allocation19 + $0x844] ss:$8 sps:$4 sm:$0xff]  }
 0x64a   :  { %6653 = vmatpush1.bf16.msra.mxu1 %v9245_v20  ;;  %v9320_v20 = vld [vmem:[#allocation19 + $0x840] ss:$8 sps:$4 sm:$0xff]  }
 0x64b   :  { %6654 = vmatprep.subr.bf16.mxu1 %v9250_v14  ;;  %v9325_v14 = vld [vmem:[#allocation19 + $0x854] ss:$8 sps:$4 sm:$0xff]  }
 0x64e   :  { %6655 = vmatpush1.bf16.msra.mxu1 %v9248_v26  ;;  %v9323_v26 = vld [vmem:[#allocation19 + $0x850] ss:$8 sps:$4 sm:$0xff]  }
 0x64f   :  { %6656 = vmatprep.subr.bf16.mxu1 %v9253_v17  ;;  %v9328_v17 = vld [vmem:[#allocation19 + $0x864] ss:$8 sps:$4 sm:$0xff]  }
 0x652   :  { %6657 = vmatpush1.bf16.msra.mxu1 %v9251_v12  ;;  %v9326_v12 = vld [vmem:[#allocation19 + $0x860] ss:$8 sps:$4 sm:$0xff]  }
 0x653   :  { %6658 = vmatprep.subr.bf16.mxu1 %v9256_v11  ;;  %v9331_v11 = vld [vmem:[#allocation19 + $0x874] ss:$8 sps:$4 sm:$0xff]  }
 0x656   :  { %6659 = vmatpush1.bf16.msra.mxu1 %v9254_v53  ;;  %v6982_v53 = vld [vmem:[#allocation4 + $0x20] ss:$42 sm:$0x3] }
 0x657   :  { %6660 = vmatprep.subr.bf16.mxu1 %v9259_v54  ;;  %v6984_v54 = vld [vmem:[#allocation4 + $0x21] ss:$42 sm:$0x3] }
 0x658   :  { %v6985_v31 = vmax.f32 %v6982_v53, %v6984_v54  ;;  %v9383_v53 = vld [vmem:[#allocation19 + $0x990] ss:$8 sps:$4 sm:$0xff]   ;;  %v9388_v54 = vld [vmem:[#allocation19 + $0x9a4] ss:$8 sps:$4 sm:$0xff]  }
 0x65a   :  { %6661 = vmatpush1.bf16.msra.mxu1 %v9257_v32  ;;  %v9334_v32 = vld [vmem:[#allocation19 + $0x884] ss:$8 sps:$4 sm:$0xff]  }
 0x65b   :  { %6792 = vmatprep.subr.bf16.mxu1 %v9262_v42  ;;  %v6986_v42 = vpack.c.bf16 %v6985_v31, %v6985_v31  ;;  %v9391_v31 = vld [vmem:[#allocation19 + $0x9b4] ss:$8 sps:$4 sm:$0xff]  }
 0x65d   :  { %6679 = vmatmul.mubr.bf16.vlgmr.msra.gmra.mrb[0].mxu1 %v6548_v51  ;;  %v9428_v51 = vld [vmem:[#allocation23 + $0x40] sm:$0xff]  }
 0x65e   :  { %6793 = vmatpush1.bf16.msra.mxu1 %v9260_v40  ;;  %6824 = vmatprep.mubr.bf16.mxu1 %v12946_v24  ;;  %v9337_v40 = vld [vmem:[#allocation19 + $0x894] ss:$8 sps:$4 sm:$0xff]  }
 0x65f   :  { %6794 = vmatprep.subr.bf16.mxu1 %v9265_v33  ;;  %v9429_v33 = vld [vmem:[#allocation23] sm:$0xff]   ;;  %8485 = vmatprep.subr.bf16.mxu0 %v9428_v51  ;;  %v9395_v51 = vld [vmem:[#allocation19 + $0x9d0] ss:$8 sps:$4 sm:$0xff]  }
 0x660   :  { %8486 = vmatpush3.bf16.msra.mxu0 %v9429_v33  ;;  %v9400_v33 = vld [vmem:[#allocation19 + $0x9e4] ss:$8 sps:$4 sm:$0xff]  }
 0x662   :  { %6795 = vmatpush1.bf16.msra.mxu1 %v9263_v61  ;;  %v9430_v61 = vld [vmem:[#allocation23 + $0x48] sm:$0xff]  }
 0x663   :  { %6796 = vmatprep.subr.bf16.mxu1 %v9268_v52  ;;  %v9335_v52 = vld [vmem:[#allocation19 + $0x890] ss:$8 sps:$4 sm:$0xff]   ;;  %8487 = vmatprep.subr.bf16.mxu0 %v9430_v61  ;;  %v9398_v61 = vld [vmem:[#allocation19 + $0x9e0] ss:$8 sps:$4 sm:$0xff]  }
 0x666   :  { %6797 = vmatpush1.bf16.msra.mxu1 %v9266_v50  ;;  %v9340_v50 = vld [vmem:[#allocation19 + $0x8a4] ss:$8 sps:$4 sm:$0xff]  }
 0x667   :  { %6798 = vmatprep.subr.bf16.mxu1 %v9271_v9  ;;  %v9431_v9 = vld [vmem:[#allocation23 + $0x8] sm:$0xff]  }
 0x668   :  { %8488 = vmatpush3.bf16.msra.mxu0 %v9431_v9  ;;  %v7422_v9 = vld [vmem:[#allocation4 + $0x27] ss:$42 sm:$0x3] }
 0x66a   :  { %6799 = vmatpush1.bf16.msra.mxu1 %v9269_v10  ;;  %v9432_v10 = vld [vmem:[#allocation23 + $0x50] sm:$0xff]  }
 0x66b   :  { %6800 = vmatprep.subr.bf16.mxu1 %v9274_v45  ;;  %v9338_v45 = vld [vmem:[#allocation19 + $0x8a0] ss:$8 sps:$4 sm:$0xff]   ;;  %8489 = vmatprep.subr.bf16.mxu0 %v9432_v10  ;;  %v9401_v10 = vld [vmem:[#allocation19 + $0x9f0] ss:$8 sps:$4 sm:$0xff]  }
 0x66e   :  { %6801 = vmatpush1.bf16.msra.mxu1 %v9272_v49  ;;  %v9343_v49 = vld [vmem:[#allocation19 + $0x8b4] ss:$8 sps:$4 sm:$0xff]  }
 0x66f   :  { %6802 = vmatprep.subr.bf16.mxu1 %v9277_v47  ;;  %v9433_v47 = vld [vmem:[#allocation23 + $0x10] sm:$0xff]  }
 0x670   :  { %8490 = vmatpush3.bf16.msra.mxu0 %v9433_v47  ;;  %v9404_v47 = vld [vmem:[#allocation19 + $0xa00] ss:$8 sps:$4 sm:$0xff]  }
 0x672   :  { %6803 = vmatpush1.bf16.msra.mxu1 %v9275_v41  ;;  %v9434_v41 = vld [vmem:[#allocation23 + $0x58] sm:$0xff]  }
 0x673   :  { %6804 = vmatprep.subr.bf16.mxu1 %v9280_v57  ;;  %v9341_v57 = vld [vmem:[#allocation19 + $0x8b0] ss:$8 sps:$4 sm:$0xff]   ;;  %8491 = vmatprep.subr.bf16.mxu0 %v9434_v41 }
 0x676   :  { %6805 = vmatpush1.bf16.msra.mxu1 %v9278_v58  ;;  %v9346_v58 = vld [vmem:[#allocation19 + $0x8c4] ss:$8 sps:$4 sm:$0xff]  }
 0x677   :  { %6806 = vmatprep.subr.bf16.mxu1 %v9283_v28  ;;  %v9435_v28 = vld [vmem:[#allocation23 + $0x18] sm:$0xff]  }
 0x678   :  { %8492 = vmatpush3.bf16.msra.mxu0 %v9435_v28  ;;  %v9412_v28 = vld [vmem:[#allocation19 + $0xa24] ss:$8 sps:$4 sm:$0xff]  }
 0x679   :  { %8493 = vmatprep.subr.bf16.mxu0 %v9436_v35  ;;  %v9410_v35 = vld [vmem:[#allocation19 + $0xa20] ss:$8 sps:$4 sm:$0xff]  }
 0x67a   :  { %6807 = vmatpush1.bf16.msra.mxu1 %v9281_v44  ;;  %v9349_v44 = vld [vmem:[#allocation19 + $0x8d4] ss:$8 sps:$4 sm:$0xff]  }
 0x67b   :  { %6938 = vmatprep.subr.bf16.mxu1 %v9286_v18  ;;  %v9347_v18 = vld [vmem:[#allocation19 + $0x8d0] ss:$8 sps:$4 sm:$0xff]  }
 0x67c   :  { %8494 = vmatpush3.bf16.msra.mxu0 %v9437_v48  ;;  %v9418_v48 = vld [vmem:[#allocation19 + $0xa44] ss:$8 sps:$4 sm:$0xff]  }
 0x67d   :  { %6825 = vmatmul.mubr.bf16.vlgmr.msra.gmra.mrb[0].mxu1 %v6694_v60  ;;  %v9350_v60 = vld [vmem:[#allocation19 + $0x8e0] ss:$8 sps:$4 sm:$0xff]  }
 0x67e   :  { %6939 = vmatpush1.bf16.msra.mxu1 %v9284_v3  ;;  %6970 = vmatprep.mubr.bf16.mxu1 %v12946_v24  ;;  %v9352_v3 = vld [vmem:[#allocation19 + $0x8e4] ss:$8 sps:$4 sm:$0xff]  }
 0x67f   :  { %6940 = vmatprep.subr.bf16.mxu1 %v9289_v55  ;;  %v9355_v55 = vld [vmem:[#allocation19 + $0x8f4] ss:$8 sps:$4 sm:$0xff]  }
 0x682   :  { %6941 = vmatpush1.bf16.msra.mxu1 %v9287_v19  ;;  %v7128_v19 = vld [vmem:[#allocation4 + $0x22] ss:$42 sm:$0x3] }
 0x683   :  { %6942 = vmatprep.subr.bf16.mxu1 %v9292_v25  ;;  %v7130_v25 = vld [vmem:[#allocation4 + $0x23] ss:$42 sm:$0x3] }
 0x686   :  { %6943 = vmatpush1.bf16.msra.mxu1 %v9290_v46  ;;  %v9353_v46 = vld [vmem:[#allocation19 + $0x8f0] ss:$8 sps:$4 sm:$0xff]  }
 0x687   :  { %6944 = vmatprep.subr.bf16.mxu1 %v9295_v8  ;;  %v7131_v8 = vmax.f32 %v7128_v19, %v7130_v25  ;;  %v9427_v19 = vld [vmem:[#allocation19 + $0xa74] ss:$8 sps:$4 sm:$0xff]   ;;  %v7566_v25 = vld [vmem:[#allocation4 + $0x28] ss:$42 sm:$0x3] }
 0x68a   :  { %6945 = vmatpush1.bf16.msra.mxu1 %v9293_v0  ;;  %v9358_v0 = vld [vmem:[#allocation19 + $0x904] ss:$8 sps:$4 sm:$0xff]  }
 0x68b   :  { %6946 = vmatprep.subr.bf16.mxu1 %v9298_v56 }
 0x68e   :  { %6947 = vmatpush1.bf16.msra.mxu1 %v9296_v13  ;;  %v9356_v13 = vld [vmem:[#allocation19 + $0x900] ss:$8 sps:$4 sm:$0xff]  }
 0x68f   :  { %6948 = vmatprep.subr.bf16.mxu1 %v9301_v23 }
 0x692   :  { %6949 = vmatpush1.bf16.msra.mxu1 %v9299_v4  ;;  %v7132_v4 = vpack.c.bf16 %v7131_v8, %v7131_v8  ;;  %v9425_v8 = vld [vmem:[#allocation19 + $0xa70] ss:$8 sps:$4 sm:$0xff]  }
 0x693   :  { %6950 = vmatprep.subr.bf16.mxu1 %v9304_v36  ;;  %v9361_v36 = vld [vmem:[#allocation19 + $0x914] ss:$8 sps:$4 sm:$0xff]  }
 0x696   :  { %6951 = vmatpush1.bf16.msra.mxu1 %v9302_v43 }
 0x697   :  { %6952 = vmatprep.subr.bf16.mxu1 %v9307_v7 }
 0x69a   :  { %6953 = vmatpush1.bf16.msra.mxu1 %v9305_v5  ;;  %v9362_v5 = vld [vmem:[#allocation19 + $0x920] ss:$8 sps:$4 sm:$0xff]  }
 0x69b   :  { %7084 = vmatprep.subr.bf16.mxu1 %v9310_v27  ;;  %v9365_v27 = vld [vmem:[#allocation19 + $0x930] ss:$8 sps:$4 sm:$0xff]  }
 0x69d   :  { %6971 = vmatmul.mubr.bf16.vlgmr.msra.gmra.mrb[0].mxu1 %v6840_v29  ;;  %v9368_v29 = vld [vmem:[#allocation19 + $0x940] ss:$8 sps:$4 sm:$0xff]  }
 0x69e   :  { %7085 = vmatpush1.bf16.msra.mxu1 %v9308_v16  ;;  %7116 = vmatprep.mubr.bf16.mxu1 %v12946_v24  ;;  %v9370_v16 = vld [vmem:[#allocation19 + $0x944] ss:$8 sps:$4 sm:$0xff]  }
 0x69f   :  { %7086 = vmatprep.subr.bf16.mxu1 %v9313_v6  ;;  %v9373_v6 = vld [vmem:[#allocation19 + $0x954] ss:$8 sps:$4 sm:$0xff]  }
 0x6a2   :  { %7087 = vmatpush1.bf16.msra.mxu1 %v9311_v2  ;;  %v9371_v2 = vld [vmem:[#allocation19 + $0x950] ss:$8 sps:$4 sm:$0xff]  }
 0x6a3   :  { %7088 = vmatprep.subr.bf16.mxu1 %v9316_v30  ;;  %v9376_v30 = vld [vmem:[#allocation19 + $0x964] ss:$8 sps:$4 sm:$0xff]  }
 0x6a6   :  { %7089 = vmatpush1.bf16.msra.mxu1 %v9314_v62  ;;  %v9374_v62 = vld [vmem:[#allocation19 + $0x960] ss:$8 sps:$4 sm:$0xff]  }
 0x6a7   :  { %7090 = vmatprep.subr.bf16.mxu1 %v9319_v22  ;;  %v9379_v22 = vld [vmem:[#allocation19 + $0x974] ss:$8 sps:$4 sm:$0xff]  }
 0x6aa   :  { %7091 = vmatpush1.bf16.msra.mxu1 %v9317_v21  ;;  %v7274_v21 = vld [vmem:[#allocation4 + $0x24] ss:$42 sm:$0x3] }
 0x6ab   :  { %7092 = vmatprep.subr.bf16.mxu1 %v9322_v63  ;;  %v7276_v63 = vld [vmem:[#allocation4 + $0x25] ss:$42 sm:$0x3] }
 0x6ae   :  { %7093 = vmatpush1.bf16.msra.mxu1 %v9320_v20  ;;  %v9377_v20 = vld [vmem:[#allocation19 + $0x970] ss:$8 sps:$4 sm:$0xff]  }
 0x6af   :  { %7094 = vmatprep.subr.bf16.mxu1 %v9325_v14  ;;  %v7277_v14 = vmax.f32 %v7274_v21, %v7276_v63 }
 0x6b2   :  { %7095 = vmatpush1.bf16.msra.mxu1 %v9323_v26  ;;  %v9382_v26 = vld [vmem:[#allocation19 + $0x984] ss:$8 sps:$4 sm:$0xff]  }
 0x6b3   :  { %7096 = vmatprep.subr.bf16.mxu1 %v9328_v17  ;;  %v9380_v17 = vld [vmem:[#allocation19 + $0x980] ss:$8 sps:$4 sm:$0xff]  }
 0x6b6   :  { %7097 = vmatpush1.bf16.msra.mxu1 %v9326_v12  ;;  %v7278_v12 = vpack.c.bf16 %v7277_v14, %v7277_v14 }
 0x6b7   :  { %7098 = vmatprep.subr.bf16.mxu1 %v9331_v11  ;;  %v9385_v11 = vld [vmem:[#allocation19 + $0x994] ss:$8 sps:$4 sm:$0xff]  }
 0x6ba   :  { %7099 = vmatpush1.bf16.msra.mxu1 %v9329_v59  ;;  %v9386_v59 = vld [vmem:[#allocation19 + $0x9a0] ss:$8 sps:$4 sm:$0xff]  }
 0x6bb   :  { %7230 = vmatprep.subr.bf16.mxu1 %v9334_v32  ;;  %v9389_v32 = vld [vmem:[#allocation19 + $0x9b0] ss:$8 sps:$4 sm:$0xff]  }
 0x6bd   :  { %7117 = vmatmul.mubr.bf16.vlgmr.msra.gmra.mrb[0].mxu1 %v6986_v42  ;;  %v9392_v42 = vld [vmem:[#allocation19 + $0x9c0] ss:$8 sps:$4 sm:$0xff]  }
 0x6be   :  { %7231 = vmatpush1.bf16.msra.mxu1 %v9332_v1  ;;  %7262 = vmatprep.mubr.bf16.mxu1 %v12946_v24  ;;  %v9394_v1 = vld [vmem:[#allocation19 + $0x9c4] ss:$8 sps:$4 sm:$0xff]  }
 0x6bf   :  { %7232 = vmatprep.subr.bf16.mxu1 %v9337_v40  ;;  %v9397_v40 = vld [vmem:[#allocation19 + $0x9d4] ss:$8 sps:$4 sm:$0xff]  }
 0x6c2   :  { %7233 = vmatpush1.bf16.msra.mxu1 %v9335_v52  ;;  %v9403_v52 = vld [vmem:[#allocation19 + $0x9f4] ss:$8 sps:$4 sm:$0xff]  }
 0x6c3   :  { %7234 = vmatprep.subr.bf16.mxu1 %v9340_v50  ;;  %v7420_v50 = vld [vmem:[#allocation4 + $0x26] ss:$42 sm:$0x3] }
 0x6c6   :  { %7235 = vmatpush1.bf16.msra.mxu1 %v9338_v45  ;;  %v7423_v45 = vmax.f32 %v7420_v50, %v7422_v9  ;;  %v8457_v50 = vld [vmem:[#allocation25] ss:$0 sm:$0xff] }
 0x6c7   :  { %7236 = vmatprep.subr.bf16.mxu1 %v9343_v49  ;;  %v9406_v49 = vld [vmem:[#allocation19 + $0xa04] ss:$8 sps:$4 sm:$0xff]  }
 0x6c8   :  { %v7424_v41 = vpack.c.bf16 %v7423_v45, %v7423_v45  ;;  %v8458_v45 = vld [vmem:[#allocation26] ss:$0 sm:$0xff] }
 0x6ca   :  { %7237 = vmatpush1.bf16.msra.mxu1 %v9341_v57  ;;  %v9409_v57 = vld [vmem:[#allocation19 + $0xa14] ss:$8 sps:$4 sm:$0xff]  }
 0x6cb   :  { %7238 = vmatprep.subr.bf16.mxu1 %v9346_v58  ;;  %v9407_v58 = vld [vmem:[#allocation19 + $0xa10] ss:$8 sps:$4 sm:$0xff]  }
 0x6ce   :  { %7239 = vmatpush1.bf16.msra.mxu1 %v9344_v38  ;;  %v9415_v38 = vld [vmem:[#allocation19 + $0xa34] ss:$8 sps:$4 sm:$0xff]  }
 0x6cf   :  { %7240 = vmatprep.subr.bf16.mxu1 %v9349_v44  ;;  %v9413_v44 = vld [vmem:[#allocation19 + $0xa30] ss:$8 sps:$4 sm:$0xff]  }
 0x6d2   :  { %7241 = vmatpush1.bf16.msra.mxu1 %v9347_v18  ;;  %v9416_v18 = vld [vmem:[#allocation19 + $0xa40] ss:$8 sps:$4 sm:$0xff]  }
 0x6d3   :  { %7242 = vmatprep.subr.bf16.mxu1 %v9352_v3  ;;  %v9421_v3 = vld [vmem:[#allocation19 + $0xa54] ss:$8 sps:$4 sm:$0xff]  }
 0x6d6   :  { %7243 = vmatpush1.bf16.msra.mxu1 %v9350_v60  ;;  %v9419_v60 = vld [vmem:[#allocation19 + $0xa50] ss:$8 sps:$4 sm:$0xff]  }
 0x6d7   :  { %7244 = vmatprep.subr.bf16.mxu1 %v9355_v55  ;;  %v9424_v55 = vld [vmem:[#allocation19 + $0xa64] ss:$8 sps:$4 sm:$0xff]  }
 0x6da   :  { %v12757_v56 = vpop.f32.mrb[68].mxu0  ;;  %7245 = vmatpush1.bf16.msra.mxu1 %v9353_v46  ;;  %v7568_v46 = vld [vmem:[#allocation4 + $0x29] ss:$42 sm:$0x3] }
 0x6db   :  { %v12759_v23 = vpop.f32.mrb[69].mxu0  ;;  %7376 = vmatprep.subr.bf16.mxu1 %v9358_v0  ;;  %v7569_v0 = vmax.f32 %v7566_v25, %v7568_v46 }
 0x6dc   :  { %v5662_v43 = vpop.f32.mrb[70].mxu0 }
 0x6dd   :  { %v5663_v7 = vpop.f32.mrb[71].mxu0  ;;  %7263 = vmatmul.mubr.bf16.vlgmr.msra.gmra.mrb[0].mxu1 %v7132_v4  ;;  %v9438_v4 = vld [vmem:[#allocation23 + $0x68] sm:$0xff]   ;;  %v9440_v43 = vld [vmem:[#allocation23 + $0x70] sm:$0xff]  }
 0x6de   :  { %7377 = vmatpush1.bf16.msra.mxu1 %v9356_v13  ;;  %7408 = vmatprep.mubr.bf16.mxu1 %v12946_v24  ;;  %v7570_v13 = vpack.c.bf16 %v7569_v0, %v7569_v0  ;;  %v9441_v7 = vld [vmem:[#allocation23 + $0x30] sm:$0xff]  }
 0x6df   :  { %7378 = vmatprep.subr.bf16.mxu1 %v9361_v36  ;;  %v9439_v36 = vld [vmem:[#allocation23 + $0x28] sm:$0xff]   ;;  %8495 = vmatprep.subr.bf16.mxu0 %v9438_v4 }
 0x6e0   :  { %8496 = vmatpush3.bf16.msra.mxu0 %v9439_v36 }
 0x6e1   :  { %8497 = vmatprep.subr.bf16.mxu0 %v9440_v43 }
 0x6e2   :  { %7379 = vmatpush1.bf16.msra.mxu1 %v9359_v34  ;;  %v9442_v34 = vld [vmem:[#allocation23 + $0x78] sm:$0xff]  }
 0x6e3   :  { %7380 = vmatprep.subr.bf16.mxu1 %v9364_v39  ;;  %v9443_v39 = vld [vmem:[#allocation23 + $0x38] sm:$0xff]  }
 0x6e4   :  { %8498 = vmatpush3.bf16.msra.mxu0 %v9441_v7 }
 0x6e5   :  { %8499 = vmatprep.subr.bf16.mxu0 %v9442_v34 }
 0x6e6   :  { %7381 = vmatpush1.bf16.msra.mxu1 %v9362_v5  ;;  %v7711_v5 = vld [vmem:[#allocation20] sm:$0x3] }
 0x6e7   :  { %7382 = vmatprep.subr.bf16.mxu1 %v9367_v37  ;;  %v7725_v37 = vld [vmem:[#allocation22] sm:$0x3] }
 0x6e8   :  { %8500 = vmatpush3.bf16.msra.mxu0 %v9443_v39 }
 0x6e9   :  { %8572 = vmatprep.subr.bf16.mxu0 %v12992_v15 }
 0x6ea   :  { %7383 = vmatpush1.bf16.msra.mxu1 %v9365_v27  ;;  %v13114_v27 = vld [vmem:[#allocation85_spill] sm:$0xff] }
 0x6eb   :  { %7384 = vmatprep.subr.bf16.mxu1 %v9370_v16  ;;  %v7716_v16 = vrot.slane %v7711_v5, %v13114_v27 }
 0x6ee   :  { %7385 = vmatpush1.bf16.msra.mxu1 %v9368_v29 }
 0x6ef   :  { %7386 = vmatprep.subr.bf16.mxu1 %v9373_v6  ;;  %v13115_v6 = vld [vmem:[#allocation84_spill] sm:$0xff] }
 0x6f0   :  { %v7734_v63 = vrot.slane %v7725_v37, %v13115_v6 }
 0x6f2   :  { %7387 = vmatpush1.bf16.msra.mxu1 %v9371_v2  ;;  %v7720_v2 = vrot.slane %v7711_v5, %v13115_v6 }
 0x6f3   :  { %7388 = vmatprep.subr.bf16.mxu1 %v9376_v30 }
 0x6f6   :  { %7389 = vmatpush1.bf16.msra.mxu1 %v9374_v62  ;;  %v7730_v62 = vrot.slane %v7725_v37, %v13114_v27 }
 0x6f7   :  { %7390 = vmatprep.subr.bf16.mxu1 %v9379_v22 }
 0x6fa   :  { %7391 = vmatpush1.bf16.msra.mxu1 %v9377_v20 }
 0x6fb   :  { %7522 = vmatprep.subr.bf16.mxu1 %v9382_v26 }
 0x6fd   :  { %7409 = vmatmul.mubr.bf16.vlgmr.msra.gmra.mrb[0].mxu1 %v7278_v12 }
 0x6fe   :  { %7523 = vmatpush1.bf16.msra.mxu1 %v9380_v17  ;;  %7554 = vmatprep.mubr.bf16.mxu1 %v12946_v24 }
 0x6ff   :  { %7524 = vmatprep.subr.bf16.mxu1 %v9385_v11 }
 0x702   :  { %7525 = vmatpush1.bf16.msra.mxu1 %v9383_v53 }
 0x703   :  { %7526 = vmatprep.subr.bf16.mxu1 %v9388_v54 }
 0x706   :  { %7527 = vmatpush1.bf16.msra.mxu1 %v9386_v59 }
 0x707   :  { %7528 = vmatprep.subr.bf16.mxu1 %v9391_v31  ;;  %v9444_v31 = vld [vmem:[#allocation28] sm:$0xff]  }
 0x70a   :  { %7529 = vmatpush1.bf16.msra.mxu1 %v9389_v32 }
 0x70b   :  { %7530 = vmatprep.subr.bf16.mxu1 %v9394_v1  ;;  %v9447_v1 = vld [vmem:[#allocation28 + $0x18] sm:$0xff]  }
 0x70e   :  { %7531 = vmatpush1.bf16.msra.mxu1 %v9392_v42  ;;  %v9448_v42 = vld [vmem:[#allocation28 + $0x20] sm:$0xff]  }
 0x70f   :  { %7532 = vmatprep.subr.bf16.mxu1 %v9397_v40  ;;  %v9449_v40 = vld [vmem:[#allocation28 + $0x28] sm:$0xff]  }
 0x712   :  { %7533 = vmatpush1.bf16.msra.mxu1 %v9395_v51  ;;  %v9450_v51 = vld [vmem:[#allocation28 + $0x30] sm:$0xff]  }
 0x713   :  { %7534 = vmatprep.subr.bf16.mxu1 %v9400_v33  ;;  %v9451_v33 = vld [vmem:[#allocation28 + $0x38] sm:$0xff]  }
 0x716   :  { %7535 = vmatpush1.bf16.msra.mxu1 %v9398_v61 }
 0x717   :  { %7536 = vmatprep.subr.bf16.mxu1 %v9403_v52 }
 0x71a   :  { %7537 = vmatpush1.bf16.msra.mxu1 %v9401_v10 }
 0x71b   :  { %7668 = vmatprep.subr.bf16.mxu1 %v9406_v49 }
 0x71d   :  { %7555 = vmatmul.mubr.bf16.vlgmr.msra.gmra.mrb[0].mxu1 %v7424_v41 }
 0x71e   :  { %7669 = vmatpush1.bf16.msra.mxu1 %v9404_v47  ;;  %7700 = vmatprep.mubr.bf16.mxu1 %v12946_v24  ;;  %v9422_v24 = vld [vmem:[#allocation19 + $0xa60] ss:$8 sps:$4 sm:$0xff]  }
 0x71f   :  { %7670 = vmatprep.subr.bf16.mxu1 %v9409_v57 }
 0x722   :  { %7671 = vmatpush1.bf16.msra.mxu1 %v9407_v58 }
 0x723   :  { %7672 = vmatprep.subr.bf16.mxu1 %v9412_v28  ;;  %v8459_v28 = vld [vmem:[#allocation29] ss:$0 sm:$0xff] }
 0x726   :  { %7673 = vmatpush1.bf16.msra.mxu1 %v9410_v35 }
 0x727   :  { %7674 = vmatprep.subr.bf16.mxu1 %v9415_v38 }
 0x72a   :  { %7675 = vmatpush1.bf16.msra.mxu1 %v9413_v44 }
 0x72b   :  { %7676 = vmatprep.subr.bf16.mxu1 %v9418_v48 }
 0x72e   :  { %7677 = vmatpush1.bf16.msra.mxu1 %v9416_v18 }
 0x72f   :  { %7678 = vmatprep.subr.bf16.mxu1 %v9421_v3 }
 0x732   :  { %7679 = vmatpush1.bf16.msra.mxu1 %v9419_v60 }
 0x733   :  { %7680 = vmatprep.subr.bf16.mxu1 %v9424_v55 }
 0x736   :  { %7681 = vmatpush1.bf16.msra.mxu1 %v9422_v24 }
 0x737   :  { %7682 = vmatprep.subr.bf16.mxu1 %v9427_v19 }
 0x73a   :  { %7683 = vmatpush1.bf16.msra.mxu1 %v9425_v8 }
 0x73d   :  { %7701 = vmatmul.mubr.bf16.vlgmr.msra.gmra.mrb[0].mxu1 %v7570_v13 }
 0x810   :  { %v7702_v29 = vpop.f32.mrb[0].mxu1 }
 0x811   :  { %v8592_v30 = vadd.f32 %v7702_v29, %v12757_v56  ;;  %v7704_v22 = vpop.f32.mrb[1].mxu1  ;;  %v9445_v56 = vld [vmem:[#allocation28 + $0x8] sm:$0xff]  }
 0x812   :  { %v8593_v21 = vadd.f32 %v7704_v22, %v12759_v23  ;;  %v7706_v20 = vpop.f32.mrb[2].mxu1  ;;  %v9446_v23 = vld [vmem:[#allocation28 + $0x10] sm:$0xff]  }
 0x813   :  { %v7723_v14 = vmul.f32 %v8592_v30, %v7716_v16  ;;  %v7707_v26 = vpop.f32.mrb[3].mxu1 }
 0x814   :  { %v7724_v17 = vmul.f32 %v8593_v21, %v7720_v2 }
 0x815   :  { %v7737_v12 = vadd.f32 %v7730_v62, %v7723_v14 }
 0x816   :  { %v7738_v11 = vadd.f32 %v7734_v63, %v7724_v17 }
 0x817   :  { %v7739_v53 = vmax.f32 %v7737_v12, 0.0 }
 0x818   :  { %v7740_v54 = vmax.f32 %v7738_v11, 0.0 }
 0x819   :  { %v7741_v32 = vpack.c.bf16 %v7739_v53, %v7739_v53 }
 0x81a   :  { %v7742_v59 = vpack.c.bf16 %v7740_v54, %v7740_v54 }
 0x81c   :  { %7903 = vmatprep.mubr.bf16.mxu0 %v7742_v59 }
 0x81d   :  { %7904 = vmatmul.mubr.bf16.vlgmr.msra.gmra.mrb[72].mxu0 %v7741_v32 }
 0x81e   :  { %8573 = vmatpush3.bf16.msra.mxu0 %v9444_v31  ;;  %8588 = vmatprep.mubr.msk.bf16.mxu0 %vm9874_vm12, %v12992_v15 }
 0x81f   :  { %8574 = vmatprep.subr.bf16.mxu0 %v12992_v15 }
 0x822   :  { %8575 = vmatpush3.bf16.msra.mxu0 %v9445_v56 }
 0x823   :  { %8576 = vmatprep.subr.bf16.mxu0 %v12992_v15 }
 0x826   :  { %8577 = vmatpush3.bf16.msra.mxu0 %v9446_v23 }
 0x827   :  { %8578 = vmatprep.subr.bf16.mxu0 %v12992_v15 }
 0x82a   :  { %8579 = vmatpush3.bf16.msra.mxu0 %v9447_v1 }
 0x82b   :  { %8580 = vmatprep.subr.bf16.mxu0 %v12992_v15 }
 0x82e   :  { %8581 = vmatpush3.bf16.msra.mxu0 %v9448_v42 }
 0x82f   :  { %8582 = vmatprep.subr.bf16.mxu0 %v12992_v15 }
 0x832   :  { %8583 = vmatpush3.bf16.msra.mxu0 %v9449_v40 }
 0x833   :  { %8584 = vmatprep.subr.bf16.mxu0 %v12992_v15 }
 0x836   :  { %8585 = vmatpush3.bf16.msra.mxu0 %v9450_v51 }
 0x837   :  { %8586 = vmatprep.subr.bf16.mxu0 %v12992_v15 }
 0x83a   :  { %8587 = vmatpush3.bf16.msra.mxu0 %v9451_v33 }
 0x8f0   :  { %v8501_v61 = vpop.f32.mrb[72].mxu0 }
 0x8f1   :  { %v8502_v52 = vpop.f32.mrb[73].mxu0 }
 0x8f2   :  { %v8503_v9 = vadd.f32 %v8502_v52, %v8501_v61  ;;  %v8504_v10 = vpop.f32.mrb[74].mxu0 }
 0x8f3   :  { %v8505_v49 = vpop.f32.mrb[75].mxu0 }
 0x8f4   :  { %v7918_v47 = vmul.f32 %v8503_v9, %v8457_v50 }
 0x8f6   :  { %v7926_v41 = vadd.f32 %v8458_v45, %v7918_v47 }
 0x8f8   :  { %v7927_v57 = vmax.f32 %v7926_v41, 0.0 }
 0x8fa   :  { %v7928_v58 = vpack.c.bf16 %v7927_v57, %v7927_v57 }
 0x8fc   :  { %8589 = vmatmul.mubr.bf16.vlgmr.msra.gmra.mrb[76].mxu0 %v7928_v58 }
 0x9cf   :  { %v8034_v35 = vpop.f32.mrb[76].mxu0 }
 0x9d0   :  { %v8035_v38 = vadd.f32 %v8459_v28, %v8034_v35  ;;  %v8590_v44 = vpop.f32.mrb[77].mxu0 }
 0x9d1   :  { %v8037_v15 = vpop.f32.mrb[78].mxu0 }
 0x9d2   :  { %8040 = vst [vmem:[#allocation31] sm:$0x3] %v8035_v38  ;;  %v8591_v48 = vpop.f32.mrb[79].mxu0 }
 0x9d3   :  { %9820 = shalt.err (!%p9817_p6)
}
 0x9d4   :  { %s9821_s27 = scalar_lea.hbm %s12810_s18, 32 }
 0x9d5   :  { %p9822_p7 = scmp.ne.s32.totalorder %s12810_s18, %s9821_s27  ;;  %p9825_p8 = scmp.lt.u32.totalorder %s9821_s27, %s12810_s18 }
 0x9d7   :  { %p9827_p9 = pnand %p9825_p8, %p9822_p7 }
 0x9d9   :  { %9830 = shalt.err (!%p9827_p9)
}
 0x9da   :  { %8050 = dma.vmem_to_hbm [thread:$0]  %s8048_s19, 32, %s12810_s18, [#allocation7]  }
 0x9db   :  { %9849 = dma.done.wait [#allocation7], 32  }
 0x9dc   :  { %9850 = vsyncadd [#allocation7], 4294967264 }
 0x9dd   :  { %8054 = vsyncpa [#allocation6], 1 }
 0x9de   :  { %8055 = vsyncpa [#allocation9], 1 }
 0x9df   :  { %8056 = vsyncpa [#allocation12], 1 }
 0x9e0   :  { %8057 = vsyncpa [#allocation15], 1 }
 0x9e1   :  { %8058 = vsyncpa [#allocation18], 1 }
 0x9e2   :  { %8059 = vsyncpa [#allocation21], 1 }
 0x9e3   :  { %8060 = vsyncpa [#allocation24], 1 }
 0x9e4   :  { %8061 = vsyncpa [#allocation27], 1 }
 0x9e5   :  { %8062 = vsyncpa [#allocation30], 1 }
 0x9e6   :  { %8063 = vsyncpa [#allocation7], 1 }

</bundles_post_ra>
